<compile_context>
chip_gen: v5e
topology: v5e:2x2
jax: 0.10.0
libtpu: 0.0.40
codegen_flags: <defaults>
</compile_context>

<pallas_src>
import functools

import numpy as np
import jax
import jax.numpy as jnp
from jax import lax
from jax.experimental import pallas as pl
from jax.experimental.pallas import tpu as pltpu

BN_EPS = 1e-5
BN_SCALE = float(1.0 / np.sqrt(1.0 + BN_EPS))


# --------------------------------------------------------------------------
# Pallas kernel: fused DoubleConv for one image (NHWC)
# --------------------------------------------------------------------------
def _double_conv_kernel(x_ref, w1_ref, s1_ref, t1_ref, w2_ref, s2_ref, t2_ref,
                        o_ref, mid_ref, *, H, W, Cin, Cmid, Cout):
    # ---- conv1: implicit im2col (built in VMEM, never in HBM) + MXU GEMM ----
    cols = []
    for dh in range(3):
        for dw in range(3):
            cols.append(x_ref[0, dh:dh + H, dw:dw + W, :].reshape(H * W, Cin))
    patches = jnp.concatenate(cols, axis=1)                  # (H*W, 9*Cin) bf16
    y1 = jnp.dot(patches, w1_ref[...], preferred_element_type=jnp.float32)
    y1 = jnp.maximum(y1 * s1_ref[...] + t1_ref[...], 0.0)    # fused BN/bias/ReLU

    # Stage the intermediate activation in VMEM with a 1-pixel zero halo so the
    # second conv reads shifted windows directly (no HBM round trip).
    mid_ref[...] = jnp.zeros_like(mid_ref)
    mid_ref[1:1 + H, 1:1 + W, :] = y1.reshape(H, W, Cmid).astype(mid_ref.dtype)

    # ---- conv2: same structure, reading from the VMEM-resident intermediate --
    cols2 = []
    for dh in range(3):
        for dw in range(3):
            cols2.append(mid_ref[dh:dh + H, dw:dw + W, :].reshape(H * W, Cmid))
    patches2 = jnp.concatenate(cols2, axis=1)                # (H*W, 9*Cmid) bf16
    y2 = jnp.dot(patches2, w2_ref[...], preferred_element_type=jnp.float32)
    y2 = jnp.maximum(y2 * s2_ref[...] + t2_ref[...], 0.0)
    o_ref[...] = y2.reshape(1, H, W, Cout).astype(o_ref.dtype)


# --------------------------------------------------------------------------
# Wrapper
# --------------------------------------------------------------------------
def _fold_weight(w):
    """OIHW conv weight -> (KH*KW*Cin, Cout) GEMM matrix matching patch order."""
    cout, cin, kh, kw = w.shape
    return jnp.transpose(w, (2, 3, 1, 0)).reshape(kh * kw * cin, cout)


def double_conv(x_nchw, w1, b1, w2, b2):
    """PyTorch-semantics DoubleConv forward. x: (N, Cin, H, W) f32, weights OIHW."""
    N, Cin, H, W = x_nchw.shape
    Cmid = w1.shape[0]
    Cout = w2.shape[0]
    assert w1.shape == (Cmid, Cin, 3, 3) and w2.shape == (Cout, Cmid, 3, 3)

    # NHWC once at the boundary; 1-pixel spatial zero pad for the padding=1 convs.
    x = jnp.transpose(x_nchw, (0, 2, 3, 1))
    x_pad = jnp.pad(x, ((0, 0), (1, 1), (1, 1), (0, 0))).astype(jnp.bfloat16)

    w1m = _fold_weight(w1).astype(jnp.bfloat16)               # (9*Cin,  Cmid)
    w2m = _fold_weight(w2).astype(jnp.bfloat16)               # (9*Cmid, Cout)

    # BN (inference identity stats) + conv bias folded into per-channel scale/shift.
    s1 = jnp.full((1, Cmid), BN_SCALE, jnp.float32)
    t1 = (b1.astype(jnp.float32) * BN_SCALE).reshape(1, Cmid)
    s2 = jnp.full((1, Cout), BN_SCALE, jnp.float32)
    t2 = (b2.astype(jnp.float32) * BN_SCALE).reshape(1, Cout)

    kernel = functools.partial(_double_conv_kernel,
                               H=H, W=W, Cin=Cin, Cmid=Cmid, Cout=Cout)
    flops = 2 * N * H * W * 9 * (Cin * Cmid + Cmid * Cout)
    bytes_accessed = (x_pad.size * 2 + w1m.size * 2 + w2m.size * 2
                      + (s1.size + t1.size + s2.size + t2.size) * 4
                      + N * H * W * Cout * 4)

    out = pl.pallas_call(
        kernel,
        out_shape=jax.ShapeDtypeStruct((N, H, W, Cout), jnp.float32),
        grid_spec=pltpu.PrefetchScalarGridSpec(
            num_scalar_prefetch=0,
            grid=(N,),
            in_specs=[
                pl.BlockSpec((1, H + 2, W + 2, Cin), lambda n: (n, 0, 0, 0)),
                pl.BlockSpec((9 * Cin, Cmid), lambda n: (0, 0)),
                pl.BlockSpec((1, Cmid), lambda n: (0, 0)),
                pl.BlockSpec((1, Cmid), lambda n: (0, 0)),
                pl.BlockSpec((9 * Cmid, Cout), lambda n: (0, 0)),
                pl.BlockSpec((1, Cout), lambda n: (0, 0)),
                pl.BlockSpec((1, Cout), lambda n: (0, 0)),
            ],
            out_specs=pl.BlockSpec((1, H, W, Cout), lambda n: (n, 0, 0, 0)),
            scratch_shapes=[pltpu.VMEM((H + 2, W + 2, Cmid), jnp.bfloat16)],
        ),
        compiler_params=pltpu.CompilerParams(
            dimension_semantics=("parallel",)),
        cost_estimate=pl.CostEstimate(flops=flops, transcendentals=0,
                                      bytes_accessed=bytes_accessed),
    )(x_pad, w1m, s1, t1, w2m, s2, t2)

    return jnp.transpose(out, (0, 3, 1, 2))   # back to NCHW (PyTorch layout)


# --------------------------------------------------------------------------
# Pure-JAX reference (f32) for a correctness check
# --------------------------------------------------------------------------
def _conv_bn_relu_ref(x, w, b):
    y = lax.conv_general_dilated(
        x, w, window_strides=(1, 1), padding=((1, 1), (1, 1)),
        dimension_numbers=('NCHW', 'OIHW', 'NCHW'),
        precision=lax.Precision.HIGHEST)
    y = (y + b[None, :, None, None]) * BN_SCALE
    return jnp.maximum(y, 0.0)


def double_conv_ref(x, w1, b1, w2, b2):
    return _conv_bn_relu_ref(_conv_bn_relu_ref(x, w1, b1), w2, b2)


if __name__ == "__main__":
    key = jax.random.PRNGKey(0)
    kx, k1, kb1, k2, kb2 = jax.random.split(key, 5)
    N, Cin, H, W = 2, 4, 16, 16
    Cout = 32                                   # DoubleConv(in_channel=4, out_channel=32)

    x = jax.random.normal(kx, (N, Cin, H, W), jnp.float32)
    w1 = jax.random.normal(k1, (Cout, Cin, 3, 3), jnp.float32) * 0.1
    b1 = jax.random.normal(kb1, (Cout,), jnp.float32) * 0.1
    w2 = jax.random.normal(k2, (Cout, Cout, 3, 3), jnp.float32) * 0.1
    b2 = jax.random.normal(kb2, (Cout,), jnp.float32) * 0.1

    fwd = jax.jit(double_conv)
    out = jax.block_until_ready(fwd(x, w1, b1, w2, b2))
    assert out.shape == (N, Cout, H, W), out.shape
    assert bool(jnp.all(jnp.isfinite(out)))

    ref = jax.block_until_ready(double_conv_ref(x, w1, b1, w2, b2))
    # bf16 MXU operands (f32 accumulation) -> allow small numeric drift vs f32 ref.
    np.testing.assert_allclose(np.asarray(out), np.asarray(ref),
                               rtol=1e-1, atol=1e-1)
    print("KERNEL_OK")
</pallas_src>

<mosaic_0001>
module attributes {stable_mosaic.version = 11 : i64} {
  func.func @_double_conv_kernel(%arg0: i32, %arg1: memref<1x18x18x4xbf16, #tpu.memory_space<vmem>>, %arg2: memref<36x32xbf16, #tpu.memory_space<vmem>>, %arg3: memref<1x32xf32, #tpu.memory_space<vmem>>, %arg4: memref<1x32xf32, #tpu.memory_space<vmem>>, %arg5: memref<288x32xbf16, #tpu.memory_space<vmem>>, %arg6: memref<1x32xf32, #tpu.memory_space<vmem>>, %arg7: memref<1x32xf32, #tpu.memory_space<vmem>>, %arg8: memref<1x16x16x32xf32, #tpu.memory_space<vmem>>, %arg9: memref<18x18x32xbf16, #tpu.memory_space<vmem>>) attributes {dimension_semantics = [#tpu.dimension_semantics<parallel>], iteration_bounds = array<i64: 2>, scalar_prefetch = 0 : i64, scratch_operands = 1 : i64, tpu.core_type = #tpu.core_type<tc>, window_params = [{transform_indices = @transform_0, window_bounds = array<i64: 1, 18, 18, 4>}, {pipeline_mode = #tpu.pipeline_mode<synchronous>, transform_indices = @transform_1, window_bounds = array<i64: 36, 32>}, {pipeline_mode = #tpu.pipeline_mode<synchronous>, transform_indices = @transform_2, window_bounds = array<i64: 1, 32>}, {pipeline_mode = #tpu.pipeline_mode<synchronous>, transform_indices = @transform_3, window_bounds = array<i64: 1, 32>}, {pipeline_mode = #tpu.pipeline_mode<synchronous>, transform_indices = @transform_4, window_bounds = array<i64: 288, 32>}, {pipeline_mode = #tpu.pipeline_mode<synchronous>, transform_indices = @transform_5, window_bounds = array<i64: 1, 32>}, {pipeline_mode = #tpu.pipeline_mode<synchronous>, transform_indices = @transform_6, window_bounds = array<i64: 1, 32>}, {transform_indices = @transform_7, window_bounds = array<i64: 1, 16, 16, 32>}]} {
    %c0 = arith.constant 0 : index
    %c0_0 = arith.constant 0 : index
    %c0_1 = arith.constant 0 : index
    %c0_2 = arith.constant 0 : index
    %0 = vector.load %arg1[%c0, %c0_0, %c0_1, %c0_2] : memref<1x18x18x4xbf16, #tpu.memory_space<vmem>>, vector<1x16x16x4xbf16>
    %1 = vector.shape_cast %0 : vector<1x16x16x4xbf16> to vector<16x16x4xbf16>
    %2 = vector.shape_cast %1 : vector<16x16x4xbf16> to vector<256x4xbf16>
    %c0_3 = arith.constant 0 : index
    %c0_4 = arith.constant 0 : index
    %c1 = arith.constant 1 : index
    %c0_5 = arith.constant 0 : index
    %3 = vector.load %arg1[%c0_3, %c0_4, %c1, %c0_5] : memref<1x18x18x4xbf16, #tpu.memory_space<vmem>>, vector<1x16x16x4xbf16>
    %4 = vector.shape_cast %3 : vector<1x16x16x4xbf16> to vector<16x16x4xbf16>
    %5 = vector.shape_cast %4 : vector<16x16x4xbf16> to vector<256x4xbf16>
    %c0_6 = arith.constant 0 : index
    %c0_7 = arith.constant 0 : index
    %c2 = arith.constant 2 : index
    %c0_8 = arith.constant 0 : index
    %6 = vector.load %arg1[%c0_6, %c0_7, %c2, %c0_8] : memref<1x18x18x4xbf16, #tpu.memory_space<vmem>>, vector<1x16x16x4xbf16>
    %7 = vector.shape_cast %6 : vector<1x16x16x4xbf16> to vector<16x16x4xbf16>
    %8 = vector.shape_cast %7 : vector<16x16x4xbf16> to vector<256x4xbf16>
    %c0_9 = arith.constant 0 : index
    %c1_10 = arith.constant 1 : index
    %c0_11 = arith.constant 0 : index
    %c0_12 = arith.constant 0 : index
    %9 = vector.load %arg1[%c0_9, %c1_10, %c0_11, %c0_12] : memref<1x18x18x4xbf16, #tpu.memory_space<vmem>>, vector<1x16x16x4xbf16>
    %10 = vector.shape_cast %9 : vector<1x16x16x4xbf16> to vector<16x16x4xbf16>
    %11 = vector.shape_cast %10 : vector<16x16x4xbf16> to vector<256x4xbf16>
    %c0_13 = arith.constant 0 : index
    %c1_14 = arith.constant 1 : index
    %c1_15 = arith.constant 1 : index
    %c0_16 = arith.constant 0 : index
    %12 = vector.load %arg1[%c0_13, %c1_14, %c1_15, %c0_16] : memref<1x18x18x4xbf16, #tpu.memory_space<vmem>>, vector<1x16x16x4xbf16>
    %13 = vector.shape_cast %12 : vector<1x16x16x4xbf16> to vector<16x16x4xbf16>
    %14 = vector.shape_cast %13 : vector<16x16x4xbf16> to vector<256x4xbf16>
    %c0_17 = arith.constant 0 : index
    %c1_18 = arith.constant 1 : index
    %c2_19 = arith.constant 2 : index
    %c0_20 = arith.constant 0 : index
    %15 = vector.load %arg1[%c0_17, %c1_18, %c2_19, %c0_20] : memref<1x18x18x4xbf16, #tpu.memory_space<vmem>>, vector<1x16x16x4xbf16>
    %16 = vector.shape_cast %15 : vector<1x16x16x4xbf16> to vector<16x16x4xbf16>
    %17 = vector.shape_cast %16 : vector<16x16x4xbf16> to vector<256x4xbf16>
    %c0_21 = arith.constant 0 : index
    %c2_22 = arith.constant 2 : index
    %c0_23 = arith.constant 0 : index
    %c0_24 = arith.constant 0 : index
    %18 = vector.load %arg1[%c0_21, %c2_22, %c0_23, %c0_24] : memref<1x18x18x4xbf16, #tpu.memory_space<vmem>>, vector<1x16x16x4xbf16>
    %19 = vector.shape_cast %18 : vector<1x16x16x4xbf16> to vector<16x16x4xbf16>
    %20 = vector.shape_cast %19 : vector<16x16x4xbf16> to vector<256x4xbf16>
    %c0_25 = arith.constant 0 : index
    %c2_26 = arith.constant 2 : index
    %c1_27 = arith.constant 1 : index
    %c0_28 = arith.constant 0 : index
    %21 = vector.load %arg1[%c0_25, %c2_26, %c1_27, %c0_28] : memref<1x18x18x4xbf16, #tpu.memory_space<vmem>>, vector<1x16x16x4xbf16>
    %22 = vector.shape_cast %21 : vector<1x16x16x4xbf16> to vector<16x16x4xbf16>
    %23 = vector.shape_cast %22 : vector<16x16x4xbf16> to vector<256x4xbf16>
    %c0_29 = arith.constant 0 : index
    %c2_30 = arith.constant 2 : index
    %c2_31 = arith.constant 2 : index
    %c0_32 = arith.constant 0 : index
    %24 = vector.load %arg1[%c0_29, %c2_30, %c2_31, %c0_32] : memref<1x18x18x4xbf16, #tpu.memory_space<vmem>>, vector<1x16x16x4xbf16>
    %25 = vector.shape_cast %24 : vector<1x16x16x4xbf16> to vector<16x16x4xbf16>
    %26 = vector.shape_cast %25 : vector<16x16x4xbf16> to vector<256x4xbf16>
    %27 = tpu.concatenate %2, %5, %8, %11, %14, %17, %20, %23, %26 in 1 : vector<256x4xbf16>, vector<256x4xbf16>, vector<256x4xbf16>, vector<256x4xbf16>, vector<256x4xbf16>, vector<256x4xbf16>, vector<256x4xbf16>, vector<256x4xbf16>, vector<256x4xbf16> -> vector<256x36xbf16>
    %c0_33 = arith.constant 0 : index
    %c0_34 = arith.constant 0 : index
    %28 = vector.load %arg2[%c0_33, %c0_34] : memref<36x32xbf16, #tpu.memory_space<vmem>>, vector<36x32xbf16>
    %cst = arith.constant dense<0.000000e+00> : vector<256x32xf32>
    %29 = tpu.matmul %27, %28, %cst {dimension_numbers = #tpu.dot_dimension_numbers<[1], [0], [0], [1], [0, 0, 1, 1], [], []>} : vector<256x36xbf16>, vector<36x32xbf16>, vector<256x32xf32> -> vector<256x32xf32>
    %c0_35 = arith.constant 0 : index
    %c0_36 = arith.constant 0 : index
    %30 = vector.load %arg3[%c0_35, %c0_36] : memref<1x32xf32, #tpu.memory_space<vmem>>, vector<1x32xf32>
    %31 = vector.broadcast %30 : vector<1x32xf32> to vector<256x32xf32>
    %32 = arith.mulf %29, %31 : vector<256x32xf32>
    %c0_37 = arith.constant 0 : index
    %c0_38 = arith.constant 0 : index
    %33 = vector.load %arg4[%c0_37, %c0_38] : memref<1x32xf32, #tpu.memory_space<vmem>>, vector<1x32xf32>
    %34 = vector.broadcast %33 : vector<1x32xf32> to vector<256x32xf32>
    %35 = arith.addf %32, %34 : vector<256x32xf32>
    %cst_39 = arith.constant 0.000000e+00 : f32
    %36 = vector.broadcast %cst_39 : f32 to vector<256x32xf32>
    %37 = arith.maximumf %35, %36 : vector<256x32xf32>
    %cst_40 = arith.constant 0.000000e+00 : bf16
    %38 = vector.broadcast %cst_40 : bf16 to vector<18x18x32xbf16>
    %c0_41 = arith.constant 0 : index
    %c0_42 = arith.constant 0 : index
    %c0_43 = arith.constant 0 : index
    %39 = vector.load %arg9[%c0_41, %c0_42, %c0_43] : memref<18x18x32xbf16, #tpu.memory_space<vmem>>, vector<18x18x32xbf16>
    tpu.vector_store %arg9[%c0_41, %c0_42, %c0_43], %38 {strides = array<i32>} : memref<18x18x32xbf16, #tpu.memory_space<vmem>>, vector<18x18x32xbf16>,
    %40 = vector.shape_cast %37 : vector<256x32xf32> to vector<16x16x32xf32>
    %41 = arith.truncf %40 : vector<16x16x32xf32> to vector<16x16x32xbf16>
    %c1_44 = arith.constant 1 : index
    %c1_45 = arith.constant 1 : index
    %c0_46 = arith.constant 0 : index
    %42 = vector.load %arg9[%c1_44, %c1_45, %c0_46] : memref<18x18x32xbf16, #tpu.memory_space<vmem>>, vector<16x16x32xbf16>
    tpu.vector_store %arg9[%c1_44, %c1_45, %c0_46], %41 {strides = array<i32>} : memref<18x18x32xbf16, #tpu.memory_space<vmem>>, vector<16x16x32xbf16>,
    %c0_47 = arith.constant 0 : index
    %c0_48 = arith.constant 0 : index
    %c0_49 = arith.constant 0 : index
    %43 = vector.load %arg9[%c0_47, %c0_48, %c0_49] : memref<18x18x32xbf16, #tpu.memory_space<vmem>>, vector<16x16x32xbf16>
    %44 = vector.shape_cast %43 : vector<16x16x32xbf16> to vector<256x32xbf16>
    %c0_50 = arith.constant 0 : index
    %c1_51 = arith.constant 1 : index
    %c0_52 = arith.constant 0 : index
    %45 = vector.load %arg9[%c0_50, %c1_51, %c0_52] : memref<18x18x32xbf16, #tpu.memory_space<vmem>>, vector<16x16x32xbf16>
    %46 = vector.shape_cast %45 : vector<16x16x32xbf16> to vector<256x32xbf16>
    %c0_53 = arith.constant 0 : index
    %c2_54 = arith.constant 2 : index
    %c0_55 = arith.constant 0 : index
    %47 = vector.load %arg9[%c0_53, %c2_54, %c0_55] : memref<18x18x32xbf16, #tpu.memory_space<vmem>>, vector<16x16x32xbf16>
    %48 = vector.shape_cast %47 : vector<16x16x32xbf16> to vector<256x32xbf16>
    %c1_56 = arith.constant 1 : index
    %c0_57 = arith.constant 0 : index
    %c0_58 = arith.constant 0 : index
    %49 = vector.load %arg9[%c1_56, %c0_57, %c0_58] : memref<18x18x32xbf16, #tpu.memory_space<vmem>>, vector<16x16x32xbf16>
    %50 = vector.shape_cast %49 : vector<16x16x32xbf16> to vector<256x32xbf16>
    %c1_59 = arith.constant 1 : index
    %c1_60 = arith.constant 1 : index
    %c0_61 = arith.constant 0 : index
    %51 = vector.load %arg9[%c1_59, %c1_60, %c0_61] : memref<18x18x32xbf16, #tpu.memory_space<vmem>>, vector<16x16x32xbf16>
    %52 = vector.shape_cast %51 : vector<16x16x32xbf16> to vector<256x32xbf16>
    %c1_62 = arith.constant 1 : index
    %c2_63 = arith.constant 2 : index
    %c0_64 = arith.constant 0 : index
    %53 = vector.load %arg9[%c1_62, %c2_63, %c0_64] : memref<18x18x32xbf16, #tpu.memory_space<vmem>>, vector<16x16x32xbf16>
    %54 = vector.shape_cast %53 : vector<16x16x32xbf16> to vector<256x32xbf16>
    %c2_65 = arith.constant 2 : index
    %c0_66 = arith.constant 0 : index
    %c0_67 = arith.constant 0 : index
    %55 = vector.load %arg9[%c2_65, %c0_66, %c0_67] : memref<18x18x32xbf16, #tpu.memory_space<vmem>>, vector<16x16x32xbf16>
    %56 = vector.shape_cast %55 : vector<16x16x32xbf16> to vector<256x32xbf16>
    %c2_68 = arith.constant 2 : index
    %c1_69 = arith.constant 1 : index
    %c0_70 = arith.constant 0 : index
    %57 = vector.load %arg9[%c2_68, %c1_69, %c0_70] : memref<18x18x32xbf16, #tpu.memory_space<vmem>>, vector<16x16x32xbf16>
    %58 = vector.shape_cast %57 : vector<16x16x32xbf16> to vector<256x32xbf16>
    %c2_71 = arith.constant 2 : index
    %c2_72 = arith.constant 2 : index
    %c0_73 = arith.constant 0 : index
    %59 = vector.load %arg9[%c2_71, %c2_72, %c0_73] : memref<18x18x32xbf16, #tpu.memory_space<vmem>>, vector<16x16x32xbf16>
    %60 = vector.shape_cast %59 : vector<16x16x32xbf16> to vector<256x32xbf16>
    %61 = tpu.concatenate %44, %46, %48, %50, %52, %54, %56, %58, %60 in 1 : vector<256x32xbf16>, vector<256x32xbf16>, vector<256x32xbf16>, vector<256x32xbf16>, vector<256x32xbf16>, vector<256x32xbf16>, vector<256x32xbf16>, vector<256x32xbf16>, vector<256x32xbf16> -> vector<256x288xbf16>
    %c0_74 = arith.constant 0 : index
    %c0_75 = arith.constant 0 : index
    %62 = vector.load %arg5[%c0_74, %c0_75] : memref<288x32xbf16, #tpu.memory_space<vmem>>, vector<288x32xbf16>
    %cst_76 = arith.constant dense<0.000000e+00> : vector<256x32xf32>
    %63 = tpu.matmul %61, %62, %cst_76 {dimension_numbers = #tpu.dot_dimension_numbers<[1], [0], [0], [1], [0, 0, 1, 1], [], []>} : vector<256x288xbf16>, vector<288x32xbf16>, vector<256x32xf32> -> vector<256x32xf32>
    %c0_77 = arith.constant 0 : index
    %c0_78 = arith.constant 0 : index
    %64 = vector.load %arg6[%c0_77, %c0_78] : memref<1x32xf32, #tpu.memory_space<vmem>>, vector<1x32xf32>
    %65 = vector.broadcast %64 : vector<1x32xf32> to vector<256x32xf32>
    %66 = arith.mulf %63, %65 : vector<256x32xf32>
    %c0_79 = arith.constant 0 : index
    %c0_80 = arith.constant 0 : index
    %67 = vector.load %arg7[%c0_79, %c0_80] : memref<1x32xf32, #tpu.memory_space<vmem>>, vector<1x32xf32>
    %68 = vector.broadcast %67 : vector<1x32xf32> to vector<256x32xf32>
    %69 = arith.addf %66, %68 : vector<256x32xf32>
    %cst_81 = arith.constant 0.000000e+00 : f32
    %70 = vector.broadcast %cst_81 : f32 to vector<256x32xf32>
    %71 = arith.maximumf %69, %70 : vector<256x32xf32>
    %72 = vector.shape_cast %71 : vector<256x32xf32> to vector<1x16x16x32xf32>
    %c0_82 = arith.constant 0 : index
    %c0_83 = arith.constant 0 : index
    %c0_84 = arith.constant 0 : index
    %c0_85 = arith.constant 0 : index
    %73 = vector.load %arg8[%c0_82, %c0_83, %c0_84, %c0_85] : memref<1x16x16x32xf32, #tpu.memory_space<vmem>>, vector<1x16x16x32xf32>
    tpu.vector_store %arg8[%c0_82, %c0_83, %c0_84, %c0_85], %72 {strides = array<i32>} : memref<1x16x16x32xf32, #tpu.memory_space<vmem>>, vector<1x16x16x32xf32>,
    return
  }
  func.func @transform_0(%arg0: i32) -> (i32, i32, i32, i32) {
    %c0_i32 = arith.constant 0 : i32
    %c0_i32_0 = arith.constant 0 : i32
    %c0_i32_1 = arith.constant 0 : i32
    %c0_i32_2 = arith.constant 0 : i32
    return %arg0, %c0_i32, %c0_i32_0, %c0_i32_1 : i32, i32, i32, i32
  }
  func.func @transform_1(%arg0: i32) -> (i32, i32) {
    %c0_i32 = arith.constant 0 : i32
    %c0_i32_0 = arith.constant 0 : i32
    %c0_i32_1 = arith.constant 0 : i32
    return %c0_i32, %c0_i32_0 : i32, i32
  }
  func.func @transform_2(%arg0: i32) -> (i32, i32) {
    %c0_i32 = arith.constant 0 : i32
    %c0_i32_0 = arith.constant 0 : i32
    %c0_i32_1 = arith.constant 0 : i32
    return %c0_i32, %c0_i32_0 : i32, i32
  }
  func.func @transform_3(%arg0: i32) -> (i32, i32) {
    %c0_i32 = arith.constant 0 : i32
    %c0_i32_0 = arith.constant 0 : i32
    %c0_i32_1 = arith.constant 0 : i32
    return %c0_i32, %c0_i32_0 : i32, i32
  }
  func.func @transform_4(%arg0: i32) -> (i32, i32) {
    %c0_i32 = arith.constant 0 : i32
    %c0_i32_0 = arith.constant 0 : i32
    %c0_i32_1 = arith.constant 0 : i32
    return %c0_i32, %c0_i32_0 : i32, i32
  }
  func.func @transform_5(%arg0: i32) -> (i32, i32) {
    %c0_i32 = arith.constant 0 : i32
    %c0_i32_0 = arith.constant 0 : i32
    %c0_i32_1 = arith.constant 0 : i32
    return %c0_i32, %c0_i32_0 : i32, i32
  }
  func.func @transform_6(%arg0: i32) -> (i32, i32) {
    %c0_i32 = arith.constant 0 : i32
    %c0_i32_0 = arith.constant 0 : i32
    %c0_i32_1 = arith.constant 0 : i32
    return %c0_i32, %c0_i32_0 : i32, i32
  }
  func.func @transform_7(%arg0: i32) -> (i32, i32, i32, i32) {
    %c0_i32 = arith.constant 0 : i32
    %c0_i32_0 = arith.constant 0 : i32
    %c0_i32_1 = arith.constant 0 : i32
    %c0_i32_2 = arith.constant 0 : i32
    return %arg0, %c0_i32, %c0_i32_0, %c0_i32_1 : i32, i32, i32, i32
  }
}

</mosaic_0001>

<bundles_post_ra>
// kernel: double_conv.1
= control target key start
LH: loop header
LB: loop body
LE: loop exit
PB: predicated region body
PF: predicated region fallthrough
CT: control target
= control target key end

     0   :  { %12 = vsyncpa [#allocation4], 0  ;;  %s11597_s0 = inlined_call_operand.vmem [shape: bf16[2,18,18,4], index: 0, kind: input, shape index: {}]   ;;  %s11598_s1 = inlined_call_operand.vmem [shape: bf16[36,32], index: 1, kind: input, shape index: {}]   ;;  %s11599_s2 = inlined_call_operand.vmem [shape: f32[1,32], index: 2, kind: input, shape index: {}, may-alias: {2,5}]   ;;  %s11600_s3 = inlined_call_operand.vmem [shape: f32[1,32], index: 3, kind: input, shape index: {}]   ;;  %s11601_s4 = inlined_call_operand.vmem [shape: bf16[288,32], index: 4, kind: input, shape index: {}]   ;;  %s11602_s5 = inlined_call_operand.vmem [shape: f32[1,32], index: 5, kind: input, shape index: {}, may-alias: {2,5}]   ;;  %s11603_s6 = inlined_call_operand.vmem [shape: f32[1,32], index: 6, kind: input, shape index: {}]   ;;  %s11604_s7 = inlined_call_operand.hbm [shape: f32[2,16,16,32], index: 7, kind: output, shape index: {}]  }
   0x1   :  { %14 = vsyncpa [#allocation4 + $0x1], 0  ;;  %s8392_s24 = smov 0   ;;  %s8394_s25 = smov 0  }
   0x2   :  { %s8396_s26 = smov 0   ;;  %s8398_s27 = smov 0  }
   0x3 LB: > { %s8413_s28 = sadd.s32 4294967295, %s8338_s27   ;;  %s7333_s29 = sadd.s32 4294967294, %s8338_s27   ;;  %s8338_s27 = sphi %s8398_s27, %s11657_s27   ;;  %s8334_s26 = sphi %s8396_s26, %s11656_s26   ;;  %s8330_s25 = sphi %s8394_s25, %s11655_s25   ;;  %s8326_s24 = sphi %s8392_s24, %s11654_s24  }
   0x4   : > { %s8417_s30 = sadd.s32 1, %s8338_s27   ;;  %s179_s8 = sadd.s32 1, %s8334_s26 }
   0x5   : > { %s176_s9 = ssub.s32 %s8338_s27, %s8417_s30  ;;  %p189_p0 = scmp.ne.s32.totalorder %s8334_s26, %s8330_s25 }
   0x6   : > { %p177_p1 = scmp.eq.s32.totalorder %s176_s9, 0  ;;  %p190_p2 = scmp.eq.s32.totalorder %s8413_s28, 1 }
   0x7   : > { %p195_p3 = scmp.ne.s32.totalorder %s8330_s25, %s8326_s24  ;;  %p196_p4 = scmp.eq.s32.totalorder %s7333_s29, 1 }
   0x8   : > { %s8428_s10 = scalar_select %p177_p1, %s8334_s26, %s179_s8  }
   0x9   : > { %p8430_p5 = por %p190_p2, %p189_p0  ;;  %p8434_p6 = por %p196_p4, %p195_p3 }
   0xa   : > { %p7336_p7 = scmp.ge.s32.totalorder %s8338_s27, 1  ;;  %p240_p8 = scmp.lt.s32.totalorder %s8338_s27, 3 }
   0xc   : > { %p241_p9 = pnand %p7336_p7, %p240_p8 }
   0xd   : > { %p272_p10 = scmp.lt.s32.totalorder (!%p241_p9), %s8413_s28, 1  ;;  %s8340_s18 = smov (!%p241_p9), 24  }
   0xe   : > { %244 = sbr.rel (%p241_p9) target bundleno = 1099 (0x44b), region = 48  ;;  %s8341_s19 = smov (!%p241_p9), 12  }
   0xf   : > { %s8342_s20 = smov (!%p241_p9), 20   ;;  %s8343_s21 = smov (!%p241_p9), 8  }
  0x10   : > { %s8344_s22 = smov (!%p241_p9), 16   ;;  %s8345_s23 = smov (!%p241_p9), 4  }
  0x11   : > { %s8346_s29 = smov (!%p241_p9), 28   ;;  %s8347_s8 = smov (!%p241_p9), 32  }
  0x12   : > { %s8349_s16 = smov (!%p241_p9), 96   ;;  %s8350_s9 = smov (!%p241_p9), 64  }
  0x13   : > { %s273_s13 = scalar_select %p272_p10, %s8413_s28, 1  ;;  %vm777_vm0 = vcmask 1042432   ;;  %vm778_vm1 = vcmask 1046532   ;;  %vm326_vm2 = vsmask.f32 3328  ;;  %vm11605_vm6 = vcmask 31744  }
  0x14   : > { %vm327_vm3 = vsmask.f32 7440  ;;  %vm8450_vm4 = vmor %vm777_vm0, %vm778_vm1  ;;  %vm2895_vm7 = vcmask 64512   ;;  %vm2928_vm8 = vcmask 97280   ;;  %vm2961_vm9 = vcmask 130048  }
  0x15   : > { %s8181_s14 = smul.u32 216, %s273_s13  ;;  %vm8473_vm5 = vmor %vm326_vm2, %vm327_vm3  ;;  %vm3179_vm10 = vcmask 1041408   ;;  %vm2994_vm11 = vcmask 162816   ;;  %vm3027_vm12 = vcmask 195584   ;;  %vm3060_vm13 = vcmask 228352  }
  0x16   : > { %vm3093_vm14 = vcmask 261120   ;;  %vm3146_vm15 = vcmask 293888   ;;  %vm3376_vm0 = vcmask 257024   ;;  %vm3789_vm1 = vsmask.f32 7938 }
  0x17   : > { %s8445_s17 = scalar_lea.vmem %s11597_s0, %s8181_s14  ;;  %vm9418_vm2 = vmand %vm3376_vm0, %vm3789_vm1  ;;  %vm3464_vm3 = vsmask.f32 256  ;;  %vm3379_vm1 = vcmask 253952  }
  0x18   : > { %v8096_v0 = vld [vmem:[%s8445_s17 + $0x18] sm:$0xff]  ;;  %v8080_v1 = vld [vmem:[%s8445_s17 + $0xc] sm:$0xff]  ;;  %v7387_v4 = vld [vmem:[%s8445_s17 + $0x14] sm:$0x1] }
  0x19   : > { %v7356_v2 = vld [vmem:[%s8445_s17 + $0x10] sm:$0xf]  ;;  %v7403_v5 = vld [vmem:[%s8445_s17 + $0xc] sm:$0xe]  ;;  %2654 = vrot.lane.b32.xlu1 %v8096_v0, %s8340_s18  ;;  %2398 = vrot.lane.b32.xlu2 %v8080_v1, %s8341_s19  ;;  %v961_v8 = vshll.u32 %v7387_v4, 16  ;;  %v1394_v10 = vrot.slane %v7387_v4, 5 }
  0x1a   : > { %v1391_v6 = vrot.slane %v7356_v2, 5  ;;  %v955_v7 = vshrl.u32 %v7356_v2, 16  ;;  %v7419_v9 = vrot.slane %v7403_v5, 9  ;;  %v279_v11 = vld [vmem:[%s8445_s17 + $0x4] sm:$0xf]  ;;  %v951_v12 = vshll.u32 %v7356_v2, 16 }
  0x1b   : > { %v310_v14 = vld [vmem:[%s8445_s17 + $0x8] sm:$0x1]  ;;  %v713_v15 = vld [vmem:[%s8445_s17] sm:$0xe]  ;;  %v782_v16 = vrot.slane %v279_v11, 5  ;;  %v963_v34 = vrot.slane %v961_v8, 5 }
  0x1c   : > { %v1393_v13 = vrot.slane %v1391_v6, 4  ;;  %v1392_v17 = vsel %vm8450_vm4, %v7419_v9, %v1391_v6  ;;  %v7339_v18 = vrot.slane %v713_v15, 9  ;;  %v785_v19 = vrot.slane %v310_v14, 5  ;;  %v7355_v20 = vld [vmem:[%s8445_s17 + $0xc] sm:$0xf] }
  0x1d   : > { %v953_v21 = vrot.slane %v951_v12, 5  ;;  %v2510_v23 = vunpack.c.l.b16 %v1392_v17  ;;  %v784_v24 = vrot.slane %v782_v16, 4  ;;  %v942_v25 = vshrl.u32 %v7355_v20, 16  ;;  %v278_v30 = vld [vmem:[%s8445_s17] sm:$0xf] }
  0x1e   : > { %v1395_v22 = vsel %vm8450_vm4, %v1393_v13, %v1394_v10  ;;  %v783_v27 = vsel %vm8450_vm4, %v7339_v18, %v782_v16  ;;  %v945_v28 = vshll.u32 %v7355_v20, 16  ;;  %v957_v29 = vrot.slane %v955_v7, 4  ;;  %v282_v44 = vld [vmem:[%s8445_s17 + $0x18] sm:$0xf]  ;;  %v8480_v53 = vld [vmem:[%s8445_s17 + $0x1c] sm:$0xf] }
  0x1f   : > { %v2511_v26 = vunpack.c.l.b16 %v1395_v22  ;;  %v786_v31 = vsel %vm8450_vm4, %v784_v24, %v785_v19  ;;  %v2254_v32 = vunpack.c.l.b16 %v783_v27  ;;  %v944_v33 = vrot.slane %v942_v25, 4  ;;  %v8486_v61 = vld [vmem:[%s8445_s17 + $0x20] sm:$0x1]  ;;  %v7435_v63 = vld [vmem:[%s8445_s17 + $0x18] sm:$0xf] }
  0x20   : > { %v2255_v36 = vunpack.c.l.b16 %v786_v31  ;;  %v947_v37 = vrot.slane %v945_v28, 5  ;;  %v958_v38 = vor.u32 %v957_v29, %v953_v21  ;;  %v330_v40 = vshrl.u32 %v278_v30, 16  ;;  %v8495_v12 = vld [vmem:[%s8445_s17 + $0x1c] sm:$0xf]  ;;  %v8502_v18 = vld [vmem:[%s8445_s17 + $0x20] sm:$0x1] }
  0x21   : > { %v2542_v35 = vpack.c.b16 %v2511_v26, %v2510_v23  ;;  %v333_v41 = vshll.u32 %v278_v30, 16  ;;  %v339_v42 = vshll.u32 %v279_v11, 16  ;;  %v343_v43 = vshrl.u32 %v279_v11, 16  ;;  %v280_v23 = vld [vmem:[%s8445_s17 + $0xc] sm:$0xf] }
  0x22   : > { %v2286_v45 = vpack.c.b16 %v2255_v36, %v2254_v32  ;;  %v948_v46 = vor.u32 %v947_v37, %v944_v33  ;;  %v959_v47 = vrot.slane %v958_v38, 4  ;;  %v349_v48 = vshll.u32 %v310_v14, 16  ;;  %v281_v32 = vld [vmem:[%s8445_s17 + $0x10] sm:$0xf]  ;;  %v311_v36 = vld [vmem:[%s8445_s17 + $0x14] sm:$0x1] }
  0x23   : > { %2558 = vrot.lane.b32.xlu0 %v2542_v35, %s8342_s20  ;;  %v332_v49 = vrot.slane %v330_v40, 4  ;;  %v335_v50 = vrot.slane %v333_v41, 5  ;;  %v341_v51 = vrot.slane %v339_v42, 5  ;;  %v345_v52 = vrot.slane %v343_v43, 4  ;;  %v714_v43 = vld [vmem:[%s8445_s17 + $0xc] sm:$0xe] }
  0x24   : > { %2302 = vrot.lane.b32.xlu1 %v2286_v45, %s8343_s21  ;;  %v949_v54 = vrot.slane %v948_v46, 4  ;;  %v964_v55 = vsel %vm8473_vm5, %v959_v47, %v963_v34  ;;  %v351_v56 = vrot.slane %v349_v48, 5  ;;  %v378_v57 = vshrl.u32 %v282_v44, 16 }
  0x25   : > { %v2431_v58 = vunpack.c.l.b16 %v964_v55  ;;  %v336_v59 = vor.u32 %v335_v50, %v332_v49  ;;  %v346_v60 = vor.u32 %v345_v52, %v341_v51  ;;  %v381_v62 = vshll.u32 %v282_v44, 16 }
  0x26   : > { %v954_v0 = vsel %vm8473_vm5, %v949_v54, %v953_v21  ;;  %v380_v1 = vrot.slane %v378_v57, 4  ;;  %v387_v2 = vshll.u32 %v8480_v53, 16  ;;  %v391_v4 = vshrl.u32 %v8480_v53, 16  ;;  %v7483_v57 = vld [vmem:[%s8445_s17 + $0x18] sm:$0xe] }
  0x27   : > { %v2430_v5 = vunpack.c.l.b16 %v954_v0  ;;  %v337_v6 = vrot.slane %v336_v59, 4  ;;  %v347_v7 = vrot.slane %v346_v60, 4  ;;  %v383_v8 = vrot.slane %v381_v62, 5 }
  0x28   : > { %v389_v9 = vrot.slane %v387_v2, 5  ;;  %v393_v10 = vrot.slane %v391_v4, 4  ;;  %v397_v11 = vshll.u32 %v8486_v61, 16  ;;  %v1551_v13 = vshrl.u32 %v7435_v63, 16 }
  0x29   : > { %v2462_v14 = vpack.c.b16 %v2431_v58, %v2430_v5  ;;  %v342_v15 = vsel %vm8473_vm5, %v337_v6, %v341_v51  ;;  %v352_v16 = vsel %vm8473_vm5, %v347_v7, %v351_v56  ;;  %v384_v17 = vor.u32 %v383_v8, %v380_v1  ;;  %v7404_v8 = vld [vmem:[%s8445_s17 + $0x18] sm:$0xe] }
  0x2a   : > { %v2174_v19 = vunpack.c.l.b16 %v342_v15  ;;  %v2175_v20 = vunpack.c.l.b16 %v352_v16  ;;  %v394_v21 = vor.u32 %v393_v10, %v389_v9  ;;  %v399_v22 = vrot.slane %v397_v11, 5 }
  0x2b   : > { %2478 = vrot.lane.b32.xlu2 %v2462_v14, %s8344_s22  ;;  %v385_v24 = vrot.slane %v384_v17, 4  ;;  %v1553_v25 = vrot.slane %v1551_v13, 4  ;;  %v1554_v26 = vshll.u32 %v7435_v63, 16  ;;  %v1560_v27 = vshll.u32 %v8495_v12, 16 }
  0x2c   : > { %v2206_v28 = vpack.c.b16 %v2175_v20, %v2174_v19  ;;  %v395_v29 = vrot.slane %v394_v21, 4  ;;  %v1564_v30 = vshrl.u32 %v8495_v12, 16  ;;  %v1570_v31 = vshll.u32 %v8502_v18, 16  ;;  %v7358_v19 = vld [vmem:[%s8445_s17 + $0x1c] sm:$0xf] }
  0x2d   : > { %v390_v33 = vsel %vm8473_vm5, %v385_v24, %v389_v9  ;;  %v1556_v34 = vrot.slane %v1554_v26, 5  ;;  %v1562_v35 = vrot.slane %v1560_v27, 5  ;;  %v354_v37 = vshrl.u32 %v280_v23, 16 }
  0x2e   : > { %2222 = vrot.lane.b32.xlu0 %v2206_v28, %s8345_s23  ;;  %v400_v38 = vsel %vm8473_vm5, %v395_v29, %v399_v22  ;;  %v2178_v40 = vunpack.c.l.b16 %v390_v33  ;;  %v1566_v41 = vrot.slane %v1564_v30, 4  ;;  %v1572_v42 = vrot.slane %v1570_v31, 5 }
  0x2f   : > { %v2179_v44 = vunpack.c.l.b16 %v400_v38  ;;  %v1557_v45 = vor.u32 %v1556_v34, %v1553_v25  ;;  %v356_v46 = vrot.slane %v354_v37, 4  ;;  %v357_v47 = vshll.u32 %v280_v23, 16  ;;  %v7388_v23 = vld [vmem:[%s8445_s17 + $0x20] sm:$0x1]  ;;  %v7357_v25 = vld [vmem:[%s8445_s17 + $0x18] sm:$0xf] }
  0x30   : > { %v1567_v48 = vor.u32 %v1566_v41, %v1562_v35  ;;  %v363_v49 = vshll.u32 %v281_v32, 16  ;;  %v367_v50 = vshrl.u32 %v281_v32, 16  ;;  %v373_v51 = vshll.u32 %v311_v36, 16  ;;  %v715_v41 = vld [vmem:[%s8445_s17 + $0x18] sm:$0xe] }
  0x31   : > { %v2208_v52 = vpack.c.b16 %v2179_v44, %v2178_v40  ;;  %v1558_v54 = vrot.slane %v1557_v45, 4  ;;  %v359_v55 = vrot.slane %v357_v47, 5  ;;  %v7340_v56 = vrot.slane %v714_v43, 9 }
  0x32   : > { %v1568_v58 = vrot.slane %v1567_v48, 4  ;;  %v365_v59 = vrot.slane %v363_v49, 5  ;;  %v369_v60 = vrot.slane %v367_v50, 4  ;;  %v375_v62 = vrot.slane %v373_v51, 5  ;;  %v7484_v51 = vld [vmem:[%s8445_s17 + $0x24] sm:$0xe] }
  0x33   : > { %2226 = vrot.lane.b32.xlu1 %v2208_v52, %s8345_s23  ;;  %v1563_v63 = vsel %vm8473_vm5, %v1558_v54, %v1562_v35  ;;  %v360_v0 = vor.u32 %v359_v55, %v356_v46  ;;  %v789_v1 = vrot.slane %v281_v32, 5  ;;  %v792_v2 = vrot.slane %v311_v36, 5  ;;  %v8081_v46 = vld [vmem:[%s8445_s17 + $0x18] sm:$0xff] }
  0x34   : > { %v1573_v4 = vsel %vm8473_vm5, %v1568_v58, %v1572_v42  ;;  %v2686_v5 = vunpack.c.l.b16 %v1563_v63  ;;  %v370_v6 = vor.u32 %v369_v60, %v365_v59  ;;  %v7499_v7 = vrot.slane %v7483_v57, 9  ;;  %v7438_v57 = vld [vmem:[%s8445_s17 + $0x28] sm:$0xf]  ;;  %v7468_v58 = vld [vmem:[%s8445_s17 + $0x2c] sm:$0x1] }
  0x35   : > { %v2687_v9 = vunpack.c.l.b16 %v1573_v4  ;;  %v361_v10 = vrot.slane %v360_v0, 4  ;;  %v790_v11 = vsel %vm8450_vm4, %v7340_v56, %v789_v1  ;;  %v791_v13 = vrot.slane %v789_v1, 4  ;;  %v7437_v0 = vld [vmem:[%s8445_s17 + $0x24] sm:$0xf] }
  0x36   : > { %v371_v14 = vrot.slane %v370_v6, 4  ;;  %v2256_v15 = vunpack.c.l.b16 %v790_v11  ;;  %v2000_v16 = vrot.slane %v8495_v12, 5  ;;  %v2003_v17 = vrot.slane %v8502_v18, 5 }
  0x37   : > { %v2718_v20 = vpack.c.b16 %v2687_v9, %v2686_v5  ;;  %v366_v21 = vsel %vm8473_vm5, %v361_v10, %v365_v59  ;;  %v793_v22 = vsel %vm8450_vm4, %v791_v13, %v792_v2  ;;  %v7420_v24 = vrot.slane %v7404_v8, 9 }
  0x38   : > { %v376_v26 = vsel %vm8473_vm5, %v371_v14, %v375_v62  ;;  %v2176_v27 = vunpack.c.l.b16 %v366_v21  ;;  %v2257_v28 = vunpack.c.l.b16 %v793_v22  ;;  %v2001_v12 = vsel %vm8450_vm4, %v7499_v7, %v2000_v16  ;;  %v8097_v22 = vld [vmem:[%s8445_s17 + $0x24] sm:$0xff] }
  0x39   : > { %2734 = vrot.lane.b32.xlu2 %v2718_v20, %s8346_s29  ;;  %v2177_v18 = vunpack.c.l.b16 %v376_v26  ;;  %v2002_v29 = vrot.slane %v2000_v16, 4  ;;  %v2766_v30 = vunpack.c.l.b16 %v2001_v12  ;;  %v1398_v31 = vrot.slane %v7358_v19, 5 }
  0x3a   : > { %v2287_v32 = vpack.c.b16 %v2257_v28, %v2256_v15  ;;  %v1401_v33 = vrot.slane %v7388_v23, 5  ;;  %v966_v34 = vshrl.u32 %v7357_v25, 16  ;;  %v969_v35 = vshll.u32 %v7357_v25, 16 }
  0x3b   : > { %v2207_v36 = vpack.c.b16 %v2177_v18, %v2176_v27  ;;  %v2004_v37 = vsel %vm8450_vm4, %v2002_v29, %v2003_v17  ;;  %v1399_v38 = vsel %vm8450_vm4, %v7420_v24, %v1398_v31  ;;  %v1400_v40 = vrot.slane %v1398_v31, 4  ;;  %v7405_v27 = vld [vmem:[%s8445_s17 + $0x24] sm:$0xe] }
  0x3c   : > { %2304 = vrot.lane.b32.xlu1 %v2287_v32, %s8343_s21  ;;  %v2767_v42 = vunpack.c.l.b16 %v2004_v37  ;;  %v2512_v43 = vunpack.c.l.b16 %v1399_v38  ;;  %v968_v44 = vrot.slane %v966_v34, 4  ;;  %v971_v45 = vrot.slane %v969_v35, 5  ;;  %v7359_v35 = vld [vmem:[%s8445_s17 + $0x24] sm:$0xf]  ;;  %v7389_v38 = vld [vmem:[%s8445_s17 + $0x2c] sm:$0x1] }
  0x3d   : > { %2224 = vrot.lane.b32.xlu0 %v2207_v36, %s8345_s23  ;;  %v1402_v47 = vsel %vm8450_vm4, %v1400_v40, %v1401_v33  ;;  %v975_v48 = vshll.u32 %v7358_v19, 16  ;;  %v979_v49 = vshrl.u32 %v7358_v19, 16  ;;  %v985_v50 = vshll.u32 %v7388_v23, 16 }
  0x3e   : > { %v2798_v52 = vpack.c.b16 %v2767_v42, %v2766_v30  ;;  %v2513_v54 = vunpack.c.l.b16 %v1402_v47  ;;  %v972_v55 = vor.u32 %v971_v45, %v968_v44  ;;  %v7341_v56 = vrot.slane %v715_v41, 9  ;;  %v7360_v30 = vld [vmem:[%s8445_s17 + $0x28] sm:$0xf] }
  0x3f   : > { %v977_v59 = vrot.slane %v975_v48, 5  ;;  %v981_v60 = vrot.slane %v979_v49, 4  ;;  %v987_v62 = vrot.slane %v985_v50, 5  ;;  %v796_v63 = vrot.slane %v8480_v53, 5 }
  0x40   : > { %v2543_v1 = vpack.c.b16 %v2513_v54, %v2512_v43  ;;  %v973_v2 = vrot.slane %v972_v55, 4  ;;  %v799_v4 = vrot.slane %v8486_v61, 5  ;;  %v7500_v5 = vrot.slane %v7484_v51, 9 }
  0x41   : > { %2400 = vrot.lane.b32.xlu2 %v8081_v46, %s8341_s19  ;;  %v982_v6 = vor.u32 %v981_v60, %v977_v59  ;;  %v797_v7 = vsel %vm8450_vm4, %v7341_v56, %v796_v63  ;;  %v798_v8 = vrot.slane %v796_v63, 4  ;;  %v2007_v9 = vrot.slane %v7438_v57, 5 }
  0x42   : > { %v978_v10 = vsel %vm8473_vm5, %v973_v2, %v977_v59  ;;  %v2258_v11 = vunpack.c.l.b16 %v797_v7  ;;  %v2010_v53 = vrot.slane %v7468_v58, 5  ;;  %v1575_v13 = vshrl.u32 %v7437_v0, 16  ;;  %v7485_v59 = vld [vmem:[%s8445_s17 + $0x30] sm:$0xe] }
  0x43   : > { %v983_v14 = vrot.slane %v982_v6, 4  ;;  %v2432_v15 = vunpack.c.l.b16 %v978_v10  ;;  %v800_v61 = vsel %vm8450_vm4, %v798_v8, %v799_v4  ;;  %v2008_v16 = vsel %vm8450_vm4, %v7500_v5, %v2007_v9  ;;  %v7440_v6 = vld [vmem:[%s8445_s17 + $0x34] sm:$0xf]  ;;  %v7439_v7 = vld [vmem:[%s8445_s17 + $0x30] sm:$0xf] }
  0x44   : > { %2560 = vrot.lane.b32.xlu1 %v2543_v1, %s8342_s20  ;;  %v2259_v17 = vunpack.c.l.b16 %v800_v61  ;;  %v2009_v19 = vrot.slane %v2007_v9, 4  ;;  %v2768_v20 = vunpack.c.l.b16 %v2008_v16  ;;  %v1577_v21 = vrot.slane %v1575_v13, 4  ;;  %v7469_v9 = vld [vmem:[%s8445_s17 + $0x38] sm:$0x1] }
  0x45   : > { %2814 = vrot.lane.b32.xlu0 %v2798_v52, %s8347_s8  ;;  %v988_v23 = vsel %vm8473_vm5, %v983_v14, %v987_v62  ;;  %v1578_v24 = vshll.u32 %v7437_v0, 16  ;;  %v1584_v25 = vshll.u32 %v7438_v57, 16  ;;  %v1588_v26 = vshrl.u32 %v7438_v57, 16 }
  0x46   : > { %v2433_v28 = vunpack.c.l.b16 %v988_v23  ;;  %v2288_v12 = vpack.c.b16 %v2259_v17, %v2258_v11  ;;  %v2011_v18 = vsel %vm8450_vm4, %v2009_v19, %v2010_v53  ;;  %v1594_v29 = vshll.u32 %v7468_v58, 16 }
  0x47   : > { %v2769_v31 = vunpack.c.l.b16 %v2011_v18  ;;  %v1580_v32 = vrot.slane %v1578_v24, 5  ;;  %v1586_v33 = vrot.slane %v1584_v25, 5  ;;  %v1590_v34 = vrot.slane %v1588_v26, 4  ;;  %v716_v24 = vld [vmem:[%s8445_s17 + $0x24] sm:$0xe] }
  0x48   : > { %v2463_v36 = vpack.c.b16 %v2433_v28, %v2432_v15  ;;  %v1596_v37 = vrot.slane %v1594_v29, 5  ;;  %v7421_v40 = vrot.slane %v7405_v27, 9  ;;  %v1405_v41 = vrot.slane %v7360_v30, 5 }
  0x49   : > { %2656 = vrot.lane.b32.xlu2 %v8097_v22, %s8340_s18  ;;  %v2799_v42 = vpack.c.b16 %v2769_v31, %v2768_v20  ;;  %v1581_v43 = vor.u32 %v1580_v32, %v1577_v21  ;;  %v1591_v44 = vor.u32 %v1590_v34, %v1586_v33  ;;  %v1408_v45 = vrot.slane %v7389_v38, 5  ;;  %v313_v32 = vld [vmem:[%s8445_s17 + $0x2c] sm:$0x1] }
  0x4a   : > { %v1406_v46 = vsel %vm8450_vm4, %v7421_v40, %v1405_v41  ;;  %v1407_v47 = vrot.slane %v1405_v41, 4  ;;  %v990_v48 = vshrl.u32 %v7359_v35, 16  ;;  %v993_v49 = vshll.u32 %v7359_v35, 16 }
  0x4b   : > { %v1582_v50 = vrot.slane %v1581_v43, 4  ;;  %v1592_v51 = vrot.slane %v1591_v44, 4  ;;  %v2514_v52 = vunpack.c.l.b16 %v1406_v46  ;;  %v999_v54 = vshll.u32 %v7360_v30, 16 }
  0x4c   : > { %2816 = vrot.lane.b32.xlu1 %v2799_v42, %s8347_s8  ;;  %v1409_v55 = vsel %vm8450_vm4, %v1407_v47, %v1408_v45  ;;  %v992_v56 = vrot.slane %v990_v48, 4  ;;  %v995_v57 = vrot.slane %v993_v49, 5  ;;  %v1003_v58 = vshrl.u32 %v7360_v30, 16 }
  0x4d   : > { %2480 = vrot.lane.b32.xlu0 %v2463_v36, %s8344_s22  ;;  %v1587_v60 = vsel %vm8473_vm5, %v1582_v50, %v1586_v33  ;;  %v1597_v62 = vsel %vm8473_vm5, %v1592_v51, %v1596_v37  ;;  %v2515_v63 = vunpack.c.l.b16 %v1409_v55  ;;  %v1001_v0 = vrot.slane %v999_v54, 5  ;;  %v284_v33 = vld [vmem:[%s8445_s17 + $0x24] sm:$0xf] }
  0x4e   : > { %v2688_v1 = vunpack.c.l.b16 %v1587_v60  ;;  %v2689_v2 = vunpack.c.l.b16 %v1597_v62  ;;  %v996_v4 = vor.u32 %v995_v57, %v992_v56  ;;  %v1005_v5 = vrot.slane %v1003_v58, 4  ;;  %v8082_v51 = vld [vmem:[%s8445_s17 + $0x24] sm:$0xff]  ;;  %v7406_v57 = vld [vmem:[%s8445_s17 + $0x30] sm:$0xe] }
  0x4f   : > { %v1009_v8 = vshll.u32 %v7389_v38, 16  ;;  %v7501_v10 = vrot.slane %v7485_v59, 9  ;;  %v2014_v11 = vrot.slane %v7440_v6, 5  ;;  %v2017_v15 = vrot.slane %v7469_v9, 5 }
  0x50   : > { %v2719_v53 = vpack.c.b16 %v2689_v2, %v2688_v1  ;;  %v997_v13 = vrot.slane %v996_v4, 4  ;;  %v1006_v14 = vor.u32 %v1005_v5, %v1001_v0  ;;  %v1599_v19 = vshrl.u32 %v7439_v7, 16  ;;  %v7390_v5 = vld [vmem:[%s8445_s17 + $0x38] sm:$0x1] }
  0x51   : > { %2306 = vrot.lane.b32.xlu2 %v2288_v12, %s8343_s21  ;;  %v1011_v61 = vrot.slane %v1009_v8, 5  ;;  %v2015_v16 = vsel %vm8450_vm4, %v7501_v10, %v2014_v11  ;;  %v2016_v17 = vrot.slane %v2014_v11, 4  ;;  %v2544_v20 = vpack.c.b16 %v2515_v63, %v2514_v52  ;;  %v285_v12 = vld [vmem:[%s8445_s17 + $0x28] sm:$0xf]  ;;  %v7362_v63 = vld [vmem:[%s8445_s17 + $0x34] sm:$0xf] }
  0x52   : > { %v1002_v21 = vsel %vm8473_vm5, %v997_v13, %v1001_v0  ;;  %v1007_v22 = vrot.slane %v1006_v14, 4  ;;  %v1602_v23 = vshll.u32 %v7439_v7, 16  ;;  %v1601_v27 = vrot.slane %v1599_v19, 4 }
  0x53   : > { %v2434_v25 = vunpack.c.l.b16 %v1002_v21  ;;  %v2018_v26 = vsel %vm8450_vm4, %v2016_v17, %v2017_v15  ;;  %v1608_v28 = vshll.u32 %v7440_v6, 16  ;;  %v2770_v29 = vunpack.c.l.b16 %v2015_v16 }
  0x54   : > { %v1012_v18 = vsel %vm8473_vm5, %v1007_v22, %v1011_v61  ;;  %v1604_v30 = vrot.slane %v1602_v23, 5  ;;  %v1612_v31 = vshrl.u32 %v7440_v6, 16  ;;  %v1618_v36 = vshll.u32 %v7469_v9, 16  ;;  %v7361_v6 = vld [vmem:[%s8445_s17 + $0x30] sm:$0xf] }
  0x55   : > { %2736 = vrot.lane.b32.xlu0 %v2719_v53, %s8346_s29  ;;  %v2435_v34 = vunpack.c.l.b16 %v1012_v18  ;;  %v1610_v35 = vrot.slane %v1608_v28, 5  ;;  %v7342_v37 = vrot.slane %v716_v24, 9  ;;  %v2771_v38 = vunpack.c.l.b16 %v2018_v26 }
  0x56   : > { %v1605_v40 = vor.u32 %v1604_v30, %v1601_v27  ;;  %v1614_v41 = vrot.slane %v1612_v31, 4  ;;  %v803_v42 = vrot.slane %v285_v12, 5  ;;  %v1620_v44 = vrot.slane %v1618_v36, 5  ;;  %v8098_v27 = vld [vmem:[%s8445_s17 + $0x30] sm:$0xff] }
  0x57   : > { %v2464_v43 = vpack.c.b16 %v2435_v34, %v2434_v25  ;;  %v806_v45 = vrot.slane %v313_v32, 5  ;;  %v402_v46 = vshrl.u32 %v284_v33, 16  ;;  %v405_v55 = vshll.u32 %v284_v33, 16  ;;  %v286_v30 = vld [vmem:[%s8445_s17 + $0x30] sm:$0xf] }
  0x58   : > { %v1606_v47 = vrot.slane %v1605_v40, 4  ;;  %v1615_v48 = vor.u32 %v1614_v41, %v1610_v35  ;;  %v804_v49 = vsel %vm8450_vm4, %v7342_v37, %v803_v42  ;;  %v805_v50 = vrot.slane %v803_v42, 4 }
  0x59   : > { %2562 = vrot.lane.b32.xlu2 %v2544_v20, %s8342_s20  ;;  %2482 = vrot.lane.b32.xlu1 %v2464_v43, %s8344_s22  ;;  %v2260_v52 = vunpack.c.l.b16 %v804_v49  ;;  %v404_v54 = vrot.slane %v402_v46, 4  ;;  %v411_v56 = vshll.u32 %v285_v12, 16  ;;  %v415_v62 = vshrl.u32 %v285_v12, 16  ;;  %v8637_v43 = vld [vmem:[%s8445_s17 + $0x38] sm:$0x1] }
  0x5a   : > { %v1611_v58 = vsel %vm8473_vm5, %v1606_v47, %v1610_v35  ;;  %v1616_v59 = vrot.slane %v1615_v48, 4  ;;  %v807_v60 = vsel %vm8450_vm4, %v805_v50, %v806_v45  ;;  %v407_v2 = vrot.slane %v405_v55, 5  ;;  %v8634_v35 = vld [vmem:[%s8445_s17 + $0x34] sm:$0xf]  ;;  %v7486_v46 = vld [vmem:[%s8445_s17 + $0x3c] sm:$0xe] }
  0x5b   : > { %v2690_v0 = vunpack.c.l.b16 %v1611_v58  ;;  %v2261_v1 = vunpack.c.l.b16 %v807_v60  ;;  %v413_v4 = vrot.slane %v411_v56, 5  ;;  %v417_v8 = vrot.slane %v415_v62, 4  ;;  %v8083_v47 = vld [vmem:[%s8445_s17 + $0x30] sm:$0xff]  ;;  %v7470_v58 = vld [vmem:[%s8445_s17 + $0x44] sm:$0x1] }
  0x5c   : > { %v1621_v7 = vsel %vm8473_vm5, %v1616_v59, %v1620_v44  ;;  %v421_v9 = vshll.u32 %v313_v32, 16  ;;  %v7422_v10 = vrot.slane %v7406_v57, 9  ;;  %v2800_v11 = vpack.c.b16 %v2771_v38, %v2770_v29 }
  0x5d   : > { %2402 = vrot.lane.b32.xlu0 %v8082_v51, %s8341_s19  ;;  %v2691_v53 = vunpack.c.l.b16 %v1621_v7  ;;  %v408_v13 = vor.u32 %v407_v2, %v404_v54  ;;  %v1412_v14 = vrot.slane %v7362_v63, 5  ;;  %v418_v15 = vor.u32 %v417_v8, %v413_v4 }
  0x5e   : > { %v423_v61 = vrot.slane %v421_v9, 5  ;;  %v1415_v16 = vrot.slane %v7390_v5, 5  ;;  %v1014_v17 = vshrl.u32 %v7361_v6, 16  ;;  %v2289_v23 = vpack.c.b16 %v2261_v1, %v2260_v52  ;;  %v7442_v52 = vld [vmem:[%s8445_s17 + $0x40] sm:$0xf] }
  0x5f   : > { %v2720_v19 = vpack.c.b16 %v2691_v53, %v2690_v0  ;;  %v409_v20 = vrot.slane %v408_v13, 4  ;;  %v1413_v21 = vsel %vm8450_vm4, %v7422_v10, %v1412_v14  ;;  %v1414_v22 = vrot.slane %v1412_v14, 4 }
  0x60   : > { %v419_v24 = vrot.slane %v418_v15, 4  ;;  %v1016_v25 = vrot.slane %v1014_v17, 4  ;;  %v1017_v26 = vshll.u32 %v7361_v6, 16  ;;  %v1023_v18 = vshll.u32 %v7362_v63, 16 }
  0x61   : > { %2818 = vrot.lane.b32.xlu2 %v2800_v11, %s8347_s8  ;;  %2738 = vrot.lane.b32.xlu1 %v2720_v19, %s8346_s29  ;;  %v414_v28 = vsel %vm8473_vm5, %v409_v20, %v413_v4  ;;  %v1416_v12 = vsel %vm8450_vm4, %v1414_v22, %v1415_v16  ;;  %v1027_v29 = vshrl.u32 %v7362_v63, 16  ;;  %v2516_v33 = vunpack.c.l.b16 %v1413_v21  ;;  %v7363_v22 = vld [vmem:[%s8445_s17 + $0x3c] sm:$0xf] }
  0x62   : > { %v424_v31 = vsel %vm8473_vm5, %v419_v24, %v423_v61  ;;  %v2180_v32 = vunpack.c.l.b16 %v414_v28  ;;  %v1019_v34 = vrot.slane %v1017_v26, 5  ;;  %v1025_v37 = vrot.slane %v1023_v18, 5  ;;  %v8664_v28 = vld [vmem:[%s8445_s17 + $0x40] sm:$0xf] }
  0x63   : > { %v2181_v36 = vunpack.c.l.b16 %v424_v31  ;;  %v1029_v38 = vrot.slane %v1027_v29, 4  ;;  %v1033_v40 = vshll.u32 %v7390_v5, 16  ;;  %v2517_v41 = vunpack.c.l.b16 %v1416_v12  ;;  %v7441_v5 = vld [vmem:[%s8445_s17 + $0x3c] sm:$0xf] }
  0x64   : > { %v1020_v42 = vor.u32 %v1019_v34, %v1016_v25  ;;  %v426_v44 = vshrl.u32 %v286_v30, 16  ;;  %v429_v45 = vshll.u32 %v286_v30, 16  ;;  %v435_v51 = vshll.u32 %v8634_v35, 16  ;;  %v8669_v34 = vld [vmem:[%s8445_s17 + $0x44] sm:$0x1] }
  0x65   : > { %2658 = vrot.lane.b32.xlu0 %v8098_v27, %s8340_s18  ;;  %v2209_v48 = vpack.c.b16 %v2181_v36, %v2180_v32  ;;  %v1030_v49 = vor.u32 %v1029_v38, %v1025_v37  ;;  %v1035_v50 = vrot.slane %v1033_v40, 5  ;;  %v439_v57 = vshrl.u32 %v8634_v35, 16 }
  0x66   : > { %v1021_v54 = vrot.slane %v1020_v42, 4  ;;  %v428_v55 = vrot.slane %v426_v44, 4  ;;  %v431_v56 = vrot.slane %v429_v45, 5  ;;  %v437_v60 = vrot.slane %v435_v51, 5  ;;  %v717_v42 = vld [vmem:[%s8445_s17 + $0x30] sm:$0xe] }
  0x67   : > { %v1031_v59 = vrot.slane %v1030_v49, 4  ;;  %v445_v62 = vshll.u32 %v8637_v43, 16  ;;  %v7502_v63 = vrot.slane %v7486_v46, 9  ;;  %v441_v2 = vrot.slane %v439_v57, 4 }
  0x68   : > { %v1026_v0 = vsel %vm8473_vm5, %v1021_v54, %v1025_v37  ;;  %v432_v1 = vor.u32 %v431_v56, %v428_v55  ;;  %v2021_v4 = vrot.slane %v7442_v52, 5  ;;  %v2024_v9 = vrot.slane %v7470_v58, 5 }
  0x69   : > { %2404 = vrot.lane.b32.xlu2 %v8083_v47, %s8341_s19  ;;  %2308 = vrot.lane.b32.xlu1 %v2289_v23, %s8343_s21  ;;  %v1036_v6 = vsel %vm8473_vm5, %v1031_v59, %v1035_v50  ;;  %v2436_v7 = vunpack.c.l.b16 %v1026_v0  ;;  %v447_v8 = vrot.slane %v445_v62, 5  ;;  %v442_v53 = vor.u32 %v441_v2, %v437_v60  ;;  %v8099_v23 = vld [vmem:[%s8445_s17 + $0x3c] sm:$0xff]  ;;  %v7443_v62 = vld [vmem:[%s8445_s17 + $0x48] sm:$0xf] }
  0x6a   : > { %v2437_v10 = vunpack.c.l.b16 %v1036_v6  ;;  %v433_v11 = vrot.slane %v432_v1, 4  ;;  %v2022_v13 = vsel %vm8450_vm4, %v7502_v63, %v2021_v4  ;;  %v2545_v14 = vpack.c.b16 %v2517_v41, %v2516_v33 }
  0x6b   : > { %v2023_v15 = vrot.slane %v2021_v4, 4  ;;  %v1623_v61 = vshrl.u32 %v7441_v5, 16  ;;  %v1626_v16 = vshll.u32 %v7441_v5, 16  ;;  %v443_v19 = vrot.slane %v442_v53, 4  ;;  %v8686_v4 = vld [vmem:[%s8445_s17 + $0x4c] sm:$0xf] }
  0x6c   : > { %v438_v17 = vsel %vm8473_vm5, %v433_v11, %v437_v60  ;;  %v2772_v20 = vunpack.c.l.b16 %v2022_v13  ;;  %v1632_v21 = vshll.u32 %v7442_v52, 16  ;;  %v2465_v24 = vpack.c.b16 %v2437_v10, %v2436_v7 }
  0x6d   : > { %2228 = vrot.lane.b32.xlu0 %v2209_v48, %s8345_s23  ;;  %v2025_v25 = vsel %vm8450_vm4, %v2023_v15, %v2024_v9  ;;  %v1625_v26 = vrot.slane %v1623_v61, 4  ;;  %v1628_v27 = vrot.slane %v1626_v16, 5  ;;  %v448_v12 = vsel %vm8473_vm5, %v443_v19, %v447_v8  ;;  %v7407_v61 = vld [vmem:[%s8445_s17 + $0x3c] sm:$0xe] }
  0x6e   : > { %v2773_v18 = vunpack.c.l.b16 %v2025_v25  ;;  %v1634_v29 = vrot.slane %v1632_v21, 5  ;;  %v1636_v30 = vshrl.u32 %v7442_v52, 16  ;;  %v2182_v31 = vunpack.c.l.b16 %v438_v17  ;;  %v718_v21 = vld [vmem:[%s8445_s17 + $0x3c] sm:$0xe] }
  0x6f   : > { %v1629_v32 = vor.u32 %v1628_v27, %v1625_v26  ;;  %v1642_v33 = vshll.u32 %v7470_v58, 16  ;;  %v1038_v36 = vshrl.u32 %v7363_v22, 16  ;;  %v2183_v37 = vunpack.c.l.b16 %v448_v12 }
  0x70   : > { %v1638_v38 = vrot.slane %v1636_v30, 4  ;;  %v1041_v40 = vshll.u32 %v7363_v22, 16  ;;  %v1047_v41 = vshll.u32 %v8664_v28, 16  ;;  %v2801_v44 = vpack.c.b16 %v2773_v18, %v2772_v20 }
  0x71   : > { %2660 = vrot.lane.b32.xlu2 %v8099_v23, %s8340_s18  ;;  %2564 = vrot.lane.b32.xlu1 %v2545_v14, %s8342_s20  ;;  %v1630_v45 = vrot.slane %v1629_v32, 4  ;;  %v1644_v46 = vrot.slane %v1642_v33, 5  ;;  %v1040_v47 = vrot.slane %v1038_v36, 4  ;;  %v1051_v51 = vshrl.u32 %v8664_v28, 16  ;;  %v8695_v14 = vld [vmem:[%s8445_s17 + $0x50] sm:$0x1] }
  0x72   : > { %v1639_v48 = vor.u32 %v1638_v38, %v1634_v29  ;;  %v1043_v49 = vrot.slane %v1041_v40, 5  ;;  %v1049_v50 = vrot.slane %v1047_v41, 5  ;;  %v1057_v54 = vshll.u32 %v8669_v34, 16  ;;  %v289_v32 = vld [vmem:[%s8445_s17 + $0x40] sm:$0xf] }
  0x73   : > { %v1635_v52 = vsel %vm8473_vm5, %v1630_v45, %v1634_v29  ;;  %v7343_v55 = vrot.slane %v717_v42, 9  ;;  %v810_v56 = vrot.slane %v8634_v35, 5  ;;  %v2210_v57 = vpack.c.b16 %v2183_v37, %v2182_v31  ;;  %v8084_v37 = vld [vmem:[%s8445_s17 + $0x3c] sm:$0xff]  ;;  %v315_v41 = vld [vmem:[%s8445_s17 + $0x44] sm:$0x1] }
  0x74   : > { %v1640_v58 = vrot.slane %v1639_v48, 4  ;;  %v1044_v59 = vor.u32 %v1043_v49, %v1040_v47  ;;  %v1053_v60 = vrot.slane %v1051_v51, 4  ;;  %v2692_v63 = vunpack.c.l.b16 %v1635_v52  ;;  %v288_v48 = vld [vmem:[%s8445_s17 + $0x3c] sm:$0xf] }
  0x75   : > { %2484 = vrot.lane.b32.xlu0 %v2465_v24, %s8344_s22  ;;  %v811_v0 = vsel %vm8450_vm4, %v7343_v55, %v810_v56  ;;  %v812_v1 = vrot.slane %v810_v56, 4  ;;  %v813_v2 = vrot.slane %v8637_v43, 5  ;;  %v1059_v7 = vrot.slane %v1057_v54, 5 }
  0x76   : > { %v1645_v35 = vsel %vm8473_vm5, %v1640_v58, %v1644_v46  ;;  %v1045_v5 = vrot.slane %v1044_v59, 4  ;;  %v1054_v6 = vor.u32 %v1053_v60, %v1049_v50  ;;  %v1647_v10 = vshrl.u32 %v7443_v62, 16 }
  0x77   : > { %v2693_v8 = vunpack.c.l.b16 %v1645_v35  ;;  %v814_v9 = vsel %vm8450_vm4, %v812_v1, %v813_v2  ;;  %v1650_v11 = vshll.u32 %v7443_v62, 16  ;;  %v2262_v43 = vunpack.c.l.b16 %v811_v0  ;;  %v7487_v2 = vld [vmem:[%s8445_s17 + $0x48] sm:$0xe] }
  0x78   : > { %v1050_v53 = vsel %vm8473_vm5, %v1045_v5, %v1049_v50  ;;  %v1055_v13 = vrot.slane %v1054_v6, 4  ;;  %v1656_v15 = vshll.u32 %v8686_v4, 16  ;;  %v1649_v19 = vrot.slane %v1647_v10, 4 }
  0x79   : > { %2230 = vrot.lane.b32.xlu2 %v2210_v57, %s8345_s23  ;;  %2820 = vrot.lane.b32.xlu1 %v2801_v44, %s8347_s8  ;;  %v2721_v16 = vpack.c.b16 %v2693_v8, %v2692_v63  ;;  %v2438_v17 = vunpack.c.l.b16 %v1050_v53  ;;  %v1652_v20 = vrot.slane %v1650_v11, 5  ;;  %v2263_v23 = vunpack.c.l.b16 %v814_v9  ;;  %v7408_v8 = vld [vmem:[%s8445_s17 + $0x48] sm:$0xe] }
  0x7a   : > { %v1060_v22 = vsel %vm8473_vm5, %v1055_v13, %v1059_v7  ;;  %v1658_v24 = vrot.slane %v1656_v15, 5  ;;  %v1660_v25 = vshrl.u32 %v8686_v4, 16  ;;  %v1666_v12 = vshll.u32 %v8695_v14, 16 }
  0x7b   : > { %v2439_v26 = vunpack.c.l.b16 %v1060_v22  ;;  %v1653_v27 = vor.u32 %v1652_v20, %v1649_v19  ;;  %v7423_v18 = vrot.slane %v7407_v61, 9  ;;  %v1419_v30 = vrot.slane %v8664_v28, 5  ;;  %v8715_v28 = vpop.permute.xlu2 %2398  ;;  %v7366_v22 = vld [vmem:[%s8445_s17 + $0x4c] sm:$0xf] }
  0x7c   : > { %v1662_v29 = vrot.slane %v1660_v25, 4  ;;  %v1422_v31 = vrot.slane %v8669_v34, 5  ;;  %v7344_v33 = vrot.slane %v718_v21, 9  ;;  %v1668_v40 = vrot.slane %v1666_v12, 5 }
  0x7d   : > { %2740 = vrot.lane.b32.xlu0 %v2721_v16, %s8346_s29  ;;  %v2466_v36 = vpack.c.b16 %v2439_v26, %v2438_v17  ;;  %v1654_v38 = vrot.slane %v1653_v27, 4  ;;  %v817_v42 = vrot.slane %v289_v32, 5  ;;  %v1420_v45 = vsel %vm8450_vm4, %v7423_v18, %v1419_v30  ;;  %v7365_v17 = vld [vmem:[%s8445_s17 + $0x48] sm:$0xf]  ;;  %v7392_v27 = vld [vmem:[%s8445_s17 + $0x50] sm:$0x1] }
  0x7e   : > { %v1663_v44 = vor.u32 %v1662_v29, %v1658_v24  ;;  %v1421_v46 = vrot.slane %v1419_v30, 4  ;;  %v820_v47 = vrot.slane %v315_v41, 5  ;;  %v2290_v34 = vpack.c.b16 %v2263_v23, %v2262_v43  ;;  %v8100_v43 = vld [vmem:[%s8445_s17 + $0x48] sm:$0xff] }
  0x7f   : > { %v1659_v49 = vsel %vm8473_vm5, %v1654_v38, %v1658_v24  ;;  %v818_v50 = vsel %vm8450_vm4, %v7344_v33, %v817_v42  ;;  %v819_v51 = vrot.slane %v817_v42, 4  ;;  %v2518_v56 = vunpack.c.l.b16 %v1420_v45  ;;  %v7488_v42 = vld [vmem:[%s8445_s17 + $0x54] sm:$0xe] }
  0x80   : > { %v1664_v52 = vrot.slane %v1663_v44, 4  ;;  %v2694_v54 = vunpack.c.l.b16 %v1659_v49  ;;  %v1423_v55 = vsel %vm8450_vm4, %v1421_v46, %v1422_v31  ;;  %v450_v59 = vshrl.u32 %v288_v48, 16 }
  0x81   : > { %2486 = vrot.lane.b32.xlu2 %v2466_v36, %s8344_s22  ;;  %2406 = vrot.lane.b32.xlu1 %v8084_v37, %s8341_s19  ;;  %v2519_v57 = vunpack.c.l.b16 %v1423_v55  ;;  %v821_v58 = vsel %vm8450_vm4, %v819_v51, %v820_v47  ;;  %v453_v60 = vshll.u32 %v288_v48, 16  ;;  %v2264_v63 = vunpack.c.l.b16 %v818_v50  ;;  %v7445_v51 = vld [vmem:[%s8445_s17 + $0x54] sm:$0xf] }
  0x82   : > { %v1669_v62 = vsel %vm8473_vm5, %v1664_v52, %v1668_v40  ;;  %v459_v0 = vshll.u32 %v289_v32, 16  ;;  %v463_v1 = vshrl.u32 %v289_v32, 16  ;;  %v2265_v5 = vunpack.c.l.b16 %v821_v58 }
  0x83   : > { %v2695_v35 = vunpack.c.l.b16 %v1669_v62  ;;  %v452_v6 = vrot.slane %v450_v59, 4  ;;  %v455_v7 = vrot.slane %v453_v60, 5  ;;  %v2546_v9 = vpack.c.b16 %v2519_v57, %v2518_v56  ;;  %v7446_v56 = vld [vmem:[%s8445_s17 + $0x58] sm:$0xf]  ;;  %v7472_v62 = vld [vmem:[%s8445_s17 + $0x5c] sm:$0x1] }
  0x84   : > { %v461_v10 = vrot.slane %v459_v0, 5  ;;  %v465_v11 = vrot.slane %v463_v1, 4  ;;  %v469_v53 = vshll.u32 %v315_v41, 16  ;;  %v7503_v61 = vrot.slane %v7487_v2, 9 }
  0x85   : > { %2310 = vrot.lane.b32.xlu0 %v2290_v34, %s8343_s21  ;;  %v2722_v13 = vpack.c.b16 %v2695_v35, %v2694_v54  ;;  %v456_v15 = vor.u32 %v455_v7, %v452_v6  ;;  %v2028_v16 = vrot.slane %v8686_v4, 5  ;;  %v2031_v21 = vrot.slane %v8695_v14, 5  ;;  %v8742_v4 = vpop.permute.xlu2 %2478 }
  0x86   : > { %v466_v19 = vor.u32 %v465_v11, %v461_v10  ;;  %v471_v20 = vrot.slane %v469_v53, 5  ;;  %v7424_v23 = vrot.slane %v7408_v8, 9  ;;  %v1426_v12 = vrot.slane %v7366_v22, 5 }
  0x87   : > { %v457_v24 = vrot.slane %v456_v15, 4  ;;  %v2029_v25 = vsel %vm8450_vm4, %v7503_v61, %v2028_v16  ;;  %v2030_v26 = vrot.slane %v2028_v16, 4  ;;  %v1429_v30 = vrot.slane %v7392_v27, 5 }
  0x88   : > { %v467_v18 = vrot.slane %v466_v19, 4  ;;  %v2774_v29 = vunpack.c.l.b16 %v2029_v25  ;;  %v1062_v31 = vshrl.u32 %v7365_v17, 16  ;;  %v1427_v33 = vsel %vm8450_vm4, %v7424_v23, %v1426_v12 }
  0x89   : > { %2742 = vrot.lane.b32.xlu2 %v2722_v13, %s8346_s29  ;;  %2662 = vrot.lane.b32.xlu1 %v8100_v43, %s8340_s18  ;;  %v462_v14 = vsel %vm8473_vm5, %v457_v24, %v461_v10  ;;  %v2032_v32 = vsel %vm8450_vm4, %v2030_v26, %v2031_v21  ;;  %v1428_v36 = vrot.slane %v1426_v12, 4  ;;  %v2291_v37 = vpack.c.b16 %v2265_v5, %v2264_v63  ;;  %v719_v12 = vld [vmem:[%s8445_s17 + $0x48] sm:$0xe] }
  0x8a   : > { %v472_v38 = vsel %vm8473_vm5, %v467_v18, %v471_v20  ;;  %v2184_v40 = vunpack.c.l.b16 %v462_v14  ;;  %v2775_v41 = vunpack.c.l.b16 %v2032_v32  ;;  %v1064_v46 = vrot.slane %v1062_v31, 4  ;;  %v316_v31 = vld [vmem:[%s8445_s17 + $0x50] sm:$0x1]  ;;  %v290_v14 = vld [vmem:[%s8445_s17 + $0x48] sm:$0xf] }
  0x8b   : > { %v2185_v44 = vunpack.c.l.b16 %v472_v38  ;;  %v1430_v45 = vsel %vm8450_vm4, %v1428_v36, %v1429_v30  ;;  %v1065_v47 = vshll.u32 %v7365_v17, 16  ;;  %v2520_v34 = vunpack.c.l.b16 %v1427_v33 }
  0x8c   : > { %v2802_v48 = vpack.c.b16 %v2775_v41, %v2774_v29  ;;  %v1071_v49 = vshll.u32 %v7366_v22, 16  ;;  %v1075_v50 = vshrl.u32 %v7366_v22, 16  ;;  %v1081_v55 = vshll.u32 %v7392_v27, 16  ;;  %v291_v27 = vld [vmem:[%s8445_s17 + $0x4c] sm:$0xf] }
  0x8d   : > { %2566 = vrot.lane.b32.xlu0 %v2546_v9, %s8342_s20  ;;  %v2211_v52 = vpack.c.b16 %v2185_v44, %v2184_v40  ;;  %v1067_v54 = vrot.slane %v1065_v47, 5  ;;  %v7504_v57 = vrot.slane %v7488_v42, 9  ;;  %v2521_v58 = vunpack.c.l.b16 %v1430_v45  ;;  %v8763_v9 = vpop.permute.xlu1 %2654  ;;  %v8085_v47 = vld [vmem:[%s8445_s17 + $0x48] sm:$0xff] }
  0x8e   : > { %v1073_v59 = vrot.slane %v1071_v49, 5  ;;  %v1077_v60 = vrot.slane %v1075_v50, 4  ;;  %v2035_v63 = vrot.slane %v7446_v56, 5  ;;  %v1083_v1 = vrot.slane %v1081_v55, 5 }
  0x8f   : > { %v1068_v0 = vor.u32 %v1067_v54, %v1064_v46  ;;  %v2038_v2 = vrot.slane %v7472_v62, 5  ;;  %v1671_v35 = vshrl.u32 %v7445_v51, 16  ;;  %v1674_v8 = vshll.u32 %v7445_v51, 16  ;;  %v3130_v51 = vld [vmem:[%s11598_s1 + $0x10] sm:$0x3] }
  0x90   : > { %v1078_v5 = vor.u32 %v1077_v60, %v1073_v59  ;;  %v2036_v6 = vsel %vm8450_vm4, %v7504_v57, %v2035_v63  ;;  %v2037_v7 = vrot.slane %v2035_v63, 4  ;;  %v1680_v13 = vshll.u32 %v7446_v56, 16 }
  0x91   : > { %2312 = vrot.lane.b32.xlu2 %v2291_v37, %s8343_s21  ;;  %2232 = vrot.lane.b32.xlu1 %v2211_v52, %s8345_s23  ;;  %v1069_v10 = vrot.slane %v1068_v0, 4  ;;  %v2776_v11 = vunpack.c.l.b16 %v2036_v6  ;;  %v1673_v53 = vrot.slane %v1671_v35, 4  ;;  %v1676_v61 = vrot.slane %v1674_v8, 5  ;;  %v7409_v0 = vld [vmem:[%s8445_s17 + $0x54] sm:$0xe] }
  0x92   : > { %v1079_v43 = vrot.slane %v1078_v5, 4  ;;  %v2039_v15 = vsel %vm8450_vm4, %v2037_v7, %v2038_v2  ;;  %v1684_v16 = vshrl.u32 %v7446_v56, 16  ;;  %v1682_v21 = vrot.slane %v1680_v13, 5  ;;  %v8798_v6 = vld [vmem:[%s8445_s17 + $0x58] sm:$0xf] }
  0x93   : > { %v8767_v17 = vpop.permute.xlu2 %2734  ;;  %v1074_v19 = vsel %vm8473_vm5, %v1069_v10, %v1073_v59  ;;  %v2777_v20 = vunpack.c.l.b16 %v2039_v15  ;;  %v1690_v22 = vshll.u32 %v7472_v62, 16  ;;  %v1677_v25 = vor.u32 %v1676_v61, %v1673_v53  ;;  %v8801_v7 = vld [vmem:[%s8445_s17 + $0x5c] sm:$0x1]  ;;  %v8064_v10 = vld [vmem:[%s8445_s17] sm:$0xff]  ;;  %v7367_v13 = vld [vmem:[%s8445_s17 + $0x54] sm:$0xf] }
  0x94   : > { %v1084_v23 = vsel %vm8473_vm5, %v1079_v43, %v1083_v1  ;;  %v2440_v24 = vunpack.c.l.b16 %v1074_v19  ;;  %v1686_v26 = vrot.slane %v1684_v16, 4  ;;  %v2547_v18 = vpack.c.b16 %v2521_v58, %v2520_v34 }
  0x95   : > { %2822 = vrot.lane.b32.xlu0 %v2802_v48, %s8347_s8  ;;  %v2441_v29 = vunpack.c.l.b16 %v1084_v23  ;;  %v2803_v30 = vpack.c.b16 %v2777_v20, %v2776_v11  ;;  %v8778_v32 = vpop.permute.xlu0 %2558  ;;  %v1678_v33 = vrot.slane %v1677_v25, 4  ;;  %v1692_v37 = vrot.slane %v1690_v22, 5 }
  0x96   : > { %v1687_v36 = vor.u32 %v1686_v26, %v1682_v21  ;;  %v7345_v40 = vrot.slane %v719_v12, 9  ;;  %v824_v41 = vrot.slane %v291_v27, 5  ;;  %v827_v45 = vrot.slane %v316_v31, 5  ;;  %v2303_v58 = vpop.permute.xlu1 %2302  ;;  %v8101_v12 = vld [vmem:[%s8445_s17 + $0x54] sm:$0xff] }
  0x97   : > { %v2467_v38 = vpack.c.b16 %v2441_v29, %v2440_v24  ;;  %v1683_v42 = vsel %vm8473_vm5, %v1678_v33, %v1682_v21  ;;  %v474_v46 = vshrl.u32 %v290_v14, 16  ;;  %v477_v50 = vshll.u32 %v290_v14, 16 }
  0x98   : > { %v1688_v44 = vrot.slane %v1687_v36, 4  ;;  %v2696_v48 = vunpack.c.l.b16 %v1683_v42  ;;  %v825_v34 = vsel %vm8450_vm4, %v7345_v40, %v824_v41  ;;  %v826_v49 = vrot.slane %v824_v41, 4  ;;  %v8066_v36 = vld [vmem:[%s8445_s17 + $0x18] sm:$0xff]  ;;  %v8113_v40 = vld [vmem:[%s11598_s1 + $0x8] sm:$0xff] }
  0x99   : > { %2568 = vrot.lane.b32.xlu2 %v2547_v18, %s8342_s20  ;;  %2488 = vrot.lane.b32.xlu1 %v2467_v38, %s8344_s22  ;;  %v2266_v54 = vunpack.c.l.b16 %v825_v34  ;;  %v476_v55 = vrot.slane %v474_v46, 4  ;;  %v483_v56 = vshll.u32 %v291_v27, 16  ;;  %v479_v62 = vrot.slane %v477_v50, 5  ;;  %v8086_v34 = vld [vmem:[%s8445_s17 + $0x54] sm:$0xff] }
  0x9a   : > { %v1693_v52 = vsel %vm8473_vm5, %v1688_v44, %v1692_v37  ;;  %v828_v60 = vsel %vm8450_vm4, %v826_v49, %v827_v45  ;;  %v487_v63 = vshrl.u32 %v291_v27, 16  ;;  %v493_v35 = vshll.u32 %v316_v31, 16 }
  0x9b   : > { %v8792_v57 = vpop.permute.xlu2 %2400  ;;  %v2697_v59 = vunpack.c.l.b16 %v1693_v52  ;;  %v2267_v1 = vunpack.c.l.b16 %v828_v60  ;;  %v485_v2 = vrot.slane %v483_v56, 5  ;;  %v3140_v5 = vunpack.c.l.b16 %v3130_v51 }
  0x9c   : > { %v480_v11 = vor.u32 %v479_v62, %v476_v55  ;;  %v489_v53 = vrot.slane %v487_v63, 4  ;;  %v495_v15 = vrot.slane %v493_v35, 5  ;;  %v7425_v16 = vrot.slane %v7409_v0, 9  ;;  %v8112_v62 = vld [vmem:[%s11598_s1] sm:$0xff] }
  0x9d   : > { %2408 = vrot.lane.b32.xlu0 %v8085_v47, %s8341_s19  ;;  %v2723_v8 = vpack.c.b16 %v2697_v59, %v2696_v48  ;;  %v8806_v43 = vpack.c.b16 %v2267_v1, %v2266_v54  ;;  %v3143_v61 = vpack.c.b16 %v3140_v5, %v3140_v5  ;;  %v1433_v21 = vrot.slane %v8798_v6, 5  ;;  %v292_v47 = vld [vmem:[%s8445_s17 + $0x54] sm:$0xf]  ;;  %v7489_v1 = vld [vmem:[%s8445_s17 + $0x60] sm:$0xe] }
  0x9e   : > { %v481_v19 = vrot.slane %v480_v11, 4  ;;  %v490_v20 = vor.u32 %v489_v53, %v485_v2  ;;  %v1436_v22 = vrot.slane %v8801_v7, 5  ;;  %v1086_v25 = vshrl.u32 %v7367_v13, 16 }
  0x9f   : > { %v3181_v24 = vsel %vm3179_vm10, %v3143_v61, 0  ;;  %v1089_v26 = vshll.u32 %v7367_v13, 16  ;;  %v1095_v27 = vshll.u32 %v8798_v6, 16  ;;  %v1434_v14 = vsel %vm8450_vm4, %v7425_v16, %v1433_v21  ;;  %v8856_v13 = vld [vmem:[%s8445_s17 + $0x68] sm:$0x1] }
  0xa0   : > { %v2223_v23 = vpop.permute.xlu0 %2222  ;;  %v486_v29 = vsel %vm8473_vm5, %v481_v19, %v485_v2  ;;  %v491_v31 = vrot.slane %v490_v20, 4  ;;  %3188 = vmatpush.bf16.msra.mxu0 %v3181_v24  ;;  %v2522_v38 = vunpack.c.l.b16 %v1434_v14  ;;  %v1088_v45 = vrot.slane %v1086_v25, 4  ;;  %v8102_v14 = vld [vmem:[%s8445_s17 + $0x60] sm:$0xff] }
  0xa1   : > { %2824 = vrot.lane.b32.xlu2 %v2803_v30, %s8347_s8  ;;  %2744 = vrot.lane.b32.xlu1 %v2723_v8, %s8346_s29  ;;  %v2849_v18 = vsel %vm11605_vm6, %v8064_v10, %v2223_v23  ;;  %v2186_v37 = vunpack.c.l.b16 %v486_v29  ;;  %v1435_v30 = vrot.slane %v1433_v21, 4  ;;  %v1091_v46 = vrot.slane %v1089_v26, 5 }
  0xa2   : > { %v2897_v33 = vsel %vm2895_vm7, %v2849_v18, %v2303_v58  ;;  %v496_v44 = vsel %vm8473_vm5, %v491_v31, %v495_v15  ;;  %v1097_v51 = vrot.slane %v1095_v27, 5  ;;  %v1099_v55 = vshrl.u32 %v8798_v6, 16  ;;  %v8840_v58 = vld [vmem:[%s8445_s17 + $0x58] sm:$0xf]  ;;  %v8065_v18 = vld [vmem:[%s8445_s17 + $0xc] sm:$0xff] }
  0xa3   : > { %v8824_v41 = vpop.permute.xlu2 %2656  ;;  %v2930_v42 = vsel %vm2928_vm8, %v2897_v33, %v8715_v28  ;;  %v2187_v49 = vunpack.c.l.b16 %v496_v44  ;;  %v1437_v50 = vsel %vm8450_vm4, %v1435_v30, %v1436_v22  ;;  %v1092_v54 = vor.u32 %v1091_v46, %v1088_v45 }
  0xa4   : > { %v2963_v48 = vsel %vm2961_vm9, %v2930_v42, %v8742_v4  ;;  %v2523_v52 = vunpack.c.l.b16 %v1437_v50  ;;  %v1105_v56 = vshll.u32 %v8801_v7, 16  ;;  %v8843_v4 = vld [vmem:[%s8445_s17 + $0x5c] sm:$0x1]  ;;  %3189 = vmatpush.bf16.msra.mxu0 %v8113_v40  ;;  %v498_v63 = vshrl.u32 %v292_v47, 16  ;;  %v8851_v7 = vld [vmem:[%s8445_s17 + $0x64] sm:$0xf] }
  0xa5   : > { %2664 = vrot.lane.b32.xlu0 %v8101_v12, %s8340_s18  ;;  %v2227_v28 = vpop.permute.xlu1 %2226  ;;  %v2212_v60 = vpack.c.b16 %v2187_v49, %v2186_v37  ;;  %v501_v0 = vshll.u32 %v292_v47, 16  ;;  %v1093_v35 = vrot.slane %v1092_v54, 4  ;;  %v1101_v5 = vrot.slane %v1099_v55, 4  ;;  %v7447_v49 = vld [vmem:[%s8445_s17 + $0x60] sm:$0xf] }
  0xa6   : > { %v2855_v59 = vsel %vm11605_vm6, %v8066_v36, %v2227_v28  ;;  %v2548_v2 = vpack.c.b16 %v2523_v52, %v2522_v38  ;;  %v1107_v6 = vrot.slane %v1105_v56, 5  ;;  %v500_v8 = vrot.slane %v498_v63, 4  ;;  %v7369_v55 = vld [vmem:[%s8445_s17 + $0x60] sm:$0xf] }
  0xa7   : > { %v503_v10 = vrot.slane %v501_v0, 5  ;;  %v507_v11 = vshll.u32 %v8840_v58, 16  ;;  %v511_v53 = vshrl.u32 %v8840_v58, 16  ;;  %v1098_v15 = vsel %vm8473_vm5, %v1093_v35, %v1097_v51  ;;  %v8899_v35 = vld [vmem:[%s8445_s17 + $0x64] sm:$0xf] }
  0xa8   : > { %v1102_v61 = vor.u32 %v1101_v5, %v1097_v51  ;;  %v517_v16 = vshll.u32 %v8843_v4, 16  ;;  %v7505_v19 = vrot.slane %v7489_v1, 9  ;;  %v2442_v20 = vunpack.c.l.b16 %v1098_v15  ;;  %3190 = vmatpush.bf16.msra.mxu0 %v8112_v62 }
  0xa9   : > { %2410 = vrot.lane.b32.xlu2 %v8086_v34, %s8341_s19  ;;  %2314 = vrot.lane.b32.xlu1 %v8806_v43, %s8343_s21  ;;  %v504_v21 = vor.u32 %v503_v10, %v500_v8  ;;  %v509_v22 = vrot.slane %v507_v11, 5  ;;  %v513_v23 = vrot.slane %v511_v53, 4  ;;  %v2042_v27 = vrot.slane %v8851_v7, 5 }
  0xaa   : > { %v1103_v25 = vrot.slane %v1102_v61, 4  ;;  %v519_v26 = vrot.slane %v517_v16, 5  ;;  %v2045_v43 = vrot.slane %v8856_v13, 5  ;;  %v2996_v30 = vsel %vm2994_vm11, %v2963_v48, %v8778_v32  ;;  %v720_v61 = vld [vmem:[%s8445_s17 + $0x54] sm:$0xe] }
  0xab   : > { %v2307_v24 = vpop.permute.xlu2 %2306  ;;  %v505_v29 = vrot.slane %v504_v21, 4  ;;  %v514_v31 = vor.u32 %v513_v23, %v509_v22  ;;  %v2043_v36 = vsel %vm8450_vm4, %v7505_v19, %v2042_v27  ;;  %v2044_v37 = vrot.slane %v2042_v27, 4 }
  0xac   : > { %v8867_v12 = vsel %vm2895_vm7, %v2855_v59, %v2307_v24  ;;  %v1108_v33 = vsel %vm8473_vm5, %v1103_v25, %v1107_v6  ;;  %v2778_v45 = vunpack.c.l.b16 %v2043_v36  ;;  %v3029_v54 = vsel %vm3027_vm12, %v2996_v30, %v8763_v9  ;;  %v7449_v25 = vld [vmem:[%s8445_s17 + $0x6c] sm:$0xf] }
  0xad   : > { %2234 = vrot.lane.b32.xlu0 %v2212_v60, %s8345_s23  ;;  %v2443_v40 = vunpack.c.l.b16 %v1108_v33  ;;  %v510_v42 = vsel %vm8473_vm5, %v505_v29, %v509_v22  ;;  %v515_v44 = vrot.slane %v514_v31, 4  ;;  %v2046_v34 = vsel %vm8450_vm4, %v2044_v37, %v2045_v43 }
  0xae   : > { %v2305_v38 = vpop.permute.xlu1 %2304  ;;  %v2188_v47 = vunpack.c.l.b16 %v510_v42  ;;  %v2779_v48 = vunpack.c.l.b16 %v2046_v34  ;;  %v3062_v59 = vsel %vm3060_vm13, %v3029_v54, %v8767_v17  ;;  %v1695_v60 = vshrl.u32 %v7447_v49, 16  ;;  %v8905_v17 = vld [vmem:[%s8445_s17 + $0x68] sm:$0x1] }
  0xaf   : > { %v2225_v46 = vpop.permute.xlu0 %2224  ;;  %v2468_v51 = vpack.c.b16 %v2443_v40, %v2442_v20  ;;  %v520_v32 = vsel %vm8473_vm5, %v515_v44, %v519_v26  ;;  %v1698_v0 = vshll.u32 %v7447_v49, 16  ;;  %v1704_v1 = vshll.u32 %v8851_v7, 16 }
  0xb0   : > { %v2852_v50 = vsel %vm11605_vm6, %v8065_v18, %v2225_v46  ;;  %v2189_v52 = vunpack.c.l.b16 %v520_v32  ;;  %v2804_v56 = vpack.c.b16 %v2779_v48, %v2778_v45  ;;  %v1697_v9 = vrot.slane %v1695_v60, 4 }
  0xb1   : > { %v2899_v28 = vsel %vm2895_vm7, %v2852_v50, %v2305_v38  ;;  %2666 = vrot.lane.b32.xlu2 %v8102_v14, %s8340_s18  ;;  %2570 = vrot.lane.b32.xlu1 %v2548_v2, %s8342_s20  ;;  %v1708_v2 = vshrl.u32 %v8851_v7, 16  ;;  %v1714_v5 = vshll.u32 %v8856_v13, 16  ;;  %v1110_v8 = vshrl.u32 %v7369_v55, 16  ;;  %v8928_v50 = vld [vmem:[%s8445_s17 + $0x70] sm:$0xf] }
  0xb2   : > { %v2213_v63 = vpack.c.b16 %v2189_v52, %v2188_v47  ;;  %v2932_v6 = vsel %vm2928_vm8, %v2899_v28, %v8792_v57  ;;  %v1700_v10 = vrot.slane %v1698_v0, 5  ;;  %v1706_v11 = vrot.slane %v1704_v1, 5  ;;  %v8934_v28 = vld [vmem:[%s8445_s17 + $0x74] sm:$0x1] }
  0xb3   : > { %v8894_v62 = vpop.permute.xlu2 %2562  ;;  %v1710_v53 = vrot.slane %v1708_v2, 4  ;;  %v1113_v15 = vshll.u32 %v7369_v55, 16  ;;  %v1716_v7 = vrot.slane %v1714_v5, 5  ;;  %v1112_v16 = vrot.slane %v1110_v8, 4 }
  0xb4   : > { %v1119_v19 = vshll.u32 %v8899_v35, 16  ;;  %v1123_v13 = vshrl.u32 %v8899_v35, 16  ;;  %v1701_v57 = vor.u32 %v1700_v10, %v1697_v9  ;;  %v1129_v24 = vshll.u32 %v8905_v17, 16 }
  0xb5   : > { %2490 = vrot.lane.b32.xlu0 %v2468_v51, %s8344_s22  ;;  %v1711_v22 = vor.u32 %v1710_v53, %v1706_v11  ;;  %v1115_v23 = vrot.slane %v1113_v15, 5  ;;  %v7346_v18 = vrot.slane %v720_v61, 9  ;;  %v831_v37 = vrot.slane %v8840_v58, 5  ;;  %v8087_v51 = vld [vmem:[%s8445_s17 + $0x60] sm:$0xff] }
  0xb6   : > { %v2561_v21 = vpop.permute.xlu1 %2560  ;;  %v1121_v27 = vrot.slane %v1119_v19, 5  ;;  %v1125_v43 = vrot.slane %v1123_v13, 4  ;;  %v1702_v29 = vrot.slane %v1701_v57, 4  ;;  %v1131_v33 = vrot.slane %v1129_v24, 5  ;;  %v721_v19 = vld [vmem:[%s8445_s17 + $0x60] sm:$0xe] }
  0xb7   : > { %v2815_v20 = vpop.permute.xlu0 %2814  ;;  %v1712_v31 = vrot.slane %v1711_v22, 4  ;;  %v1116_v14 = vor.u32 %v1115_v23, %v1112_v16  ;;  %v834_v30 = vrot.slane %v8843_v4, 5  ;;  %v1719_v38 = vshrl.u32 %v7449_v25, 16  ;;  %v295_v22 = vld [vmem:[%s8445_s17 + $0x64] sm:$0xf] }
  0xb8   : > { %v3095_v26 = vsel %vm3093_vm14, %v3062_v59, %v2815_v20  ;;  %v1126_v36 = vor.u32 %v1125_v43, %v1121_v27  ;;  %v1707_v42 = vsel %vm8473_vm5, %v1702_v29, %v1706_v11  ;;  %v1722_v46 = vshll.u32 %v7449_v25, 16  ;;  %v7410_v11 = vld [vmem:[%s8445_s17 + $0x60] sm:$0xe]  ;;  %v318_v43 = vld [vmem:[%s8445_s17 + $0x68] sm:$0x1] }
  0xb9   : > { %2236 = vrot.lane.b32.xlu2 %v2213_v63, %s8345_s23  ;;  %2826 = vrot.lane.b32.xlu1 %v2804_v56, %s8347_s8  ;;  %v1717_v44 = vsel %vm8473_vm5, %v1712_v31, %v1716_v7  ;;  %v1117_v45 = vrot.slane %v1116_v14, 4  ;;  %v2698_v47 = vunpack.c.l.b16 %v1707_v42  ;;  %v832_v58 = vsel %vm8450_vm4, %v7346_v18, %v831_v37  ;;  %v294_v23 = vld [vmem:[%s8445_s17 + $0x60] sm:$0xf] }
  0xba   : > { %7715 = vmatmul.msk.bf16.vlgmr.msra.gmra.mxu0 %vm3146_vm15, %v3095_v26  ;;  %v2699_v34 = vunpack.c.l.b16 %v1717_v44  ;;  %v1127_v49 = vrot.slane %v1126_v36, 4  ;;  %v833_v32 = vrot.slane %v831_v37, 4  ;;  %v2268_v48 = vunpack.c.l.b16 %v832_v58  ;;  %v8103_v36 = vld [vmem:[%s8445_s17 + $0x6c] sm:$0xff] }
  0xbb   : > { %v8919_v40 = vpop.permute.xlu2 %2818  ;;  %v1122_v4 = vsel %vm8473_vm5, %v1117_v45, %v1121_v27  ;;  %v1721_v52 = vrot.slane %v1719_v38, 4  ;;  %v1724_v59 = vrot.slane %v1722_v46, 5  ;;  %v1728_v1 = vshll.u32 %v8928_v50, 16 }
  0xbc   : > { %v2724_v54 = vpack.c.b16 %v2699_v34, %v2698_v47  ;;  %v1132_v55 = vsel %vm8473_vm5, %v1127_v49, %v1131_v33  ;;  %v2444_v56 = vunpack.c.l.b16 %v1122_v4  ;;  %v835_v0 = vsel %vm8450_vm4, %v833_v32, %v834_v30  ;;  %v7490_v32 = vld [vmem:[%s8445_s17 + $0x6c] sm:$0xe] }
  0xbd   : > { %v2445_v63 = vunpack.c.l.b16 %v1132_v55  ;;  %v1732_v2 = vshrl.u32 %v8928_v50, 16  ;;  %v2269_v5 = vunpack.c.l.b16 %v835_v0  ;;  %v1725_v8 = vor.u32 %v1724_v59, %v1721_v52  ;;  %v7411_v0 = vld [vmem:[%s8445_s17 + $0x6c] sm:$0xe] }
  0xbe   : > { %2746 = vrot.lane.b32.xlu0 %v2724_v54, %s8346_s29  ;;  %v1738_v10 = vshll.u32 %v8934_v28, 16  ;;  %v2817_v61 = vpop.permute.xlu1 %2816  ;;  %v1730_v7 = vrot.slane %v1728_v1, 5  ;;  %v7426_v25 = vrot.slane %v7410_v11, 9  ;;  %v1440_v26 = vrot.slane %v8899_v35, 5 }
  0xbf   : > { %v2481_v60 = vpop.permute.xlu0 %2480  ;;  %v2469_v15 = vpack.c.b16 %v2445_v63, %v2444_v56  ;;  %v1734_v16 = vrot.slane %v1732_v2, 4  ;;  %v2293_v13 = vpack.c.b16 %v2269_v5, %v2268_v48  ;;  %v1726_v20 = vrot.slane %v1725_v8, 4 }
  0xc0   : > { %v2965_v9 = vsel %vm2961_vm9, %v2932_v6, %v2481_v60  ;;  %v1740_v57 = vrot.slane %v1738_v10, 5  ;;  %v1443_v27 = vrot.slane %v8905_v17, 5  ;;  %v838_v29 = vrot.slane %v295_v22, 5 }
  0xc1   : > { %v2998_v53 = vsel %vm2994_vm11, %v2965_v9, %v2561_v21  ;;  %2412 = vrot.lane.b32.xlu1 %v8087_v51, %s8341_s19  ;;  %2492 = vrot.lane.b32.xlu2 %v2469_v15, %s8344_s22  ;;  %v1735_v24 = vor.u32 %v1734_v16, %v1730_v7  ;;  %v1731_v18 = vsel %vm8473_vm5, %v1726_v20, %v1730_v7  ;;  %v841_v31 = vrot.slane %v318_v43, 5  ;;  %v7372_v7 = vld [vmem:[%s8445_s17 + $0x70] sm:$0xf] }
  0xc2   : > { %v3031_v6 = vsel %vm3027_vm12, %v2998_v53, %v8824_v41  ;;  %v7347_v41 = vrot.slane %v721_v19, 9  ;;  %v2700_v33 = vunpack.c.l.b16 %v1731_v18  ;;  %v1441_v37 = vsel %vm8450_vm4, %v7426_v25, %v1440_v26 }
  0xc3   : > { %v8954_v21 = vpop.permute.xlu2 %2404  ;;  %v1736_v14 = vrot.slane %v1735_v24, 4  ;;  %v1442_v30 = vrot.slane %v1440_v26, 4  ;;  %v2524_v38 = vunpack.c.l.b16 %v1441_v37  ;;  %v840_v17 = vrot.slane %v838_v29, 4 }
  0xc4   : > { %v839_v35 = vsel %vm8450_vm4, %v7347_v41, %v838_v29  ;;  %v522_v42 = vshrl.u32 %v294_v23, 16  ;;  %v525_v34 = vshll.u32 %v294_v23, 16  ;;  %v531_v60 = vshll.u32 %v295_v22, 16 }
  0xc5   : > { %v1741_v45 = vsel %vm8473_vm5, %v1736_v14, %v1740_v57  ;;  %v1444_v46 = vsel %vm8450_vm4, %v1442_v30, %v1443_v27  ;;  %v2270_v47 = vunpack.c.l.b16 %v839_v35  ;;  %v842_v51 = vsel %vm8450_vm4, %v840_v17, %v841_v31  ;;  %v8068_v31 = vld [vmem:[%s8445_s17 + $0x30] sm:$0xff] }
  0xc6   : > { %2316 = vrot.lane.b32.xlu0 %v2293_v13, %s8343_s21  ;;  %v2701_v58 = vunpack.c.l.b16 %v1741_v45  ;;  %v2525_v4 = vunpack.c.l.b16 %v1444_v46  ;;  %v2271_v52 = vunpack.c.l.b16 %v842_v51  ;;  %v524_v54 = vrot.slane %v522_v42, 4  ;;  %v7395_v13 = vld [vmem:[%s8445_s17 + $0x74] sm:$0x1] }
  0xc7   : > { %v2737_v44 = vpop.permute.xlu0 %2736  ;;  %v527_v55 = vrot.slane %v525_v34, 5  ;;  %v535_v63 = vshrl.u32 %v295_v22, 16  ;;  %v541_v8 = vshll.u32 %v318_v43, 16  ;;  %v7506_v10 = vrot.slane %v7490_v32, 9  ;;  %v7371_v43 = vld [vmem:[%s8445_s17 + $0x6c] sm:$0xf] }
  0xc8   : > { %v3064_v49 = vsel %vm3060_vm13, %v3031_v6, %v2737_v44  ;;  %v2725_v56 = vpack.c.b16 %v2701_v58, %v2700_v33  ;;  %v2549_v59 = vpack.c.b16 %v2525_v4, %v2524_v38  ;;  %v2294_v9 = vpack.c.b16 %v2271_v52, %v2270_v47 }
  0xc9   : > { %2668 = vrot.lane.b32.xlu1 %v8103_v36, %s8340_s18  ;;  %v3097_v48 = vsel %vm3093_vm14, %v3064_v49, %v2817_v61  ;;  %v528_v5 = vor.u32 %v527_v55, %v524_v54  ;;  %v533_v11 = vrot.slane %v531_v60, 5  ;;  %v537_v53 = vrot.slane %v535_v63, 4  ;;  %v7491_v49 = vld [vmem:[%s8445_s17 + $0x78] sm:$0xe] }
  0xca   : > { %7716 = vmatmul.msk.bf16.gmra.mxu0 %vm3146_vm15, %v3097_v48  ;;  %2748 = vrot.lane.b32.xlu2 %v2725_v56, %s8346_s29  ;;  %v2049_v15 = vrot.slane %v8928_v50, 5  ;;  %v2052_v61 = vrot.slane %v8934_v28, 5  ;;  %v543_v19 = vrot.slane %v541_v8, 5  ;;  %v7427_v6 = vrot.slane %v7411_v0, 9  ;;  %v7451_v48 = vld [vmem:[%s8445_s17 + $0x78] sm:$0xf] }
  0xcb   : > { %v8979_v1 = vpop.permute.xlu2 %2660  ;;  %v2483_v2 = vpop.permute.xlu1 %2482  ;;  %v529_v16 = vrot.slane %v528_v5, 4  ;;  %v1447_v20 = vrot.slane %v7372_v7, 5  ;;  %v538_v57 = vor.u32 %v537_v53, %v533_v11  ;;  %v1450_v24 = vrot.slane %v7395_v13, 5 }
  0xcc   : > { %v2050_v22 = vsel %vm8450_vm4, %v7506_v10, %v2049_v15  ;;  %v2051_v23 = vrot.slane %v2049_v15, 4  ;;  %v1134_v17 = vshrl.u32 %v7371_v43, 16  ;;  %v1137_v47 = vshll.u32 %v7371_v43, 16  ;;  %v297_v43 = vld [vmem:[%s8445_s17 + $0x70] sm:$0xf] }
  0xcd   : > { %v534_v50 = vsel %vm8473_vm5, %v529_v16, %v533_v11  ;;  %v2780_v26 = vunpack.c.l.b16 %v2050_v22  ;;  %v1448_v28 = vsel %vm8450_vm4, %v7427_v6, %v1447_v20  ;;  %v1449_v27 = vrot.slane %v1447_v20, 4  ;;  %v8088_v22 = vld [vmem:[%s8445_s17 + $0x6c] sm:$0xff] }
  0xce   : > { %2572 = vrot.lane.b32.xlu0 %v2549_v59, %s8342_s20  ;;  %v539_v41 = vrot.slane %v538_v57, 4  ;;  %v2190_v29 = vunpack.c.l.b16 %v534_v50  ;;  %v2053_v14 = vsel %vm8450_vm4, %v2051_v23, %v2052_v61  ;;  %v2526_v30 = vunpack.c.l.b16 %v1448_v28  ;;  %v7475_v59 = vld [vmem:[%s8445_s17 + $0x80] sm:$0x1] }
  0xcf   : > { %v2403_v25 = vpop.permute.xlu0 %2402  ;;  %v2781_v36 = vunpack.c.l.b16 %v2053_v14  ;;  %v1451_v37 = vsel %vm8450_vm4, %v1449_v27, %v1450_v24  ;;  %v1143_v34 = vshll.u32 %v7372_v7, 16  ;;  %v1136_v51 = vrot.slane %v1134_v17, 4 }
  0xd0   : > { %v2934_v18 = vsel %vm2928_vm8, %v8867_v12, %v2403_v25  ;;  %v544_v38 = vsel %vm8473_vm5, %v539_v41, %v543_v19  ;;  %v2527_v35 = vunpack.c.l.b16 %v1451_v37  ;;  %v1147_v32 = vshrl.u32 %v7372_v7, 16 }
  0xd1   : > { %v2967_v33 = vsel %vm2961_vm9, %v2934_v18, %v2483_v2  ;;  %v2191_v42 = vunpack.c.l.b16 %v544_v38  ;;  %v2805_v46 = vpack.c.b16 %v2781_v36, %v2780_v26  ;;  %v1139_v54 = vrot.slane %v1137_v47, 5  ;;  %v722_v18 = vld [vmem:[%s8445_s17 + $0x6c] sm:$0xe] }
  0xd2   : > { %v3000_v12 = vsel %vm2994_vm11, %v2967_v33, %v8894_v62  ;;  %2318 = vrot.lane.b32.xlu2 %v2294_v9, %s8343_s21  ;;  %v2550_v4 = vpack.c.b16 %v2527_v35, %v2526_v30  ;;  %v7452_v62 = vld [vmem:[%s8445_s17 + $0x7c] sm:$0xf]  ;;  %v1145_v55 = vrot.slane %v1143_v34, 5  ;;  %v1153_v56 = vshll.u32 %v7395_v13, 16  ;;  %v319_v33 = vld [vmem:[%s8445_s17 + $0x74] sm:$0x1] }
  0xd3   : > { %v2231_v44 = vpop.permute.xlu2 %2230  ;;  %v2739_v45 = vpop.permute.xlu1 %2738  ;;  %v2214_v52 = vpack.c.b16 %v2191_v42, %v2190_v29  ;;  %v1149_v60 = vrot.slane %v1147_v32, 4  ;;  %v7507_v63 = vrot.slane %v7491_v49, 9  ;;  %v2056_v0 = vrot.slane %v7452_v62, 5  ;;  %v8067_v29 = vld [vmem:[%s8445_s17 + $0x24] sm:$0xff]  ;;  %v296_v36 = vld [vmem:[%s8445_s17 + $0x6c] sm:$0xf] }
  0xd4   : > { %v9009_v58 = vsel %vm11605_vm6, %v8068_v31, %v2231_v44  ;;  %v2059_v2 = vrot.slane %v7475_v59, 5  ;;  %v1140_v5 = vor.u32 %v1139_v54, %v1136_v51  ;;  %v1155_v8 = vrot.slane %v1153_v56, 5  ;;  %v7412_v56 = vld [vmem:[%s8445_s17 + $0x78] sm:$0xe] }
  0xd5   : > { %2238 = vrot.lane.b32.xlu1 %v2214_v52, %s8345_s23  ;;  %v1743_v10 = vshrl.u32 %v7451_v48, 16  ;;  %v1746_v11 = vshll.u32 %v7451_v48, 16  ;;  %v1150_v15 = vor.u32 %v1149_v60, %v1145_v55  ;;  %v2057_v61 = vsel %vm8450_vm4, %v7507_v63, %v2056_v0 }
  0xd6   : > { %2828 = vrot.lane.b32.xlu0 %v2805_v46, %s8347_s8  ;;  %v2058_v7 = vrot.slane %v2056_v0, 4  ;;  %v1141_v16 = vrot.slane %v1140_v5, 4  ;;  %v2782_v13 = vunpack.c.l.b16 %v2057_v61  ;;  %v1752_v28 = vshll.u32 %v7452_v62, 16  ;;  %v8104_v61 = vld [vmem:[%s8445_s17 + $0x78] sm:$0xff] }
  0xd7   : > { %v2659_v9 = vpop.permute.xlu0 %2658  ;;  %v1745_v6 = vrot.slane %v1743_v10, 4  ;;  %v1151_v20 = vrot.slane %v1150_v15, 4  ;;  %v1748_v24 = vrot.slane %v1746_v11, 5  ;;  %v1756_v27 = vshrl.u32 %v7452_v62, 16  ;;  %v7396_v15 = vld [vmem:[%s8445_s17 + $0x80] sm:$0x1] }
  0xd8   : > { %v3033_v53 = vsel %vm3027_vm12, %v3000_v12, %v2659_v9  ;;  %v2060_v23 = vsel %vm8450_vm4, %v2058_v7, %v2059_v2  ;;  %v1146_v25 = vsel %vm8473_vm5, %v1141_v16, %v1145_v55  ;;  %v1762_v14 = vshll.u32 %v7475_v59, 16  ;;  %v7374_v2 = vld [vmem:[%s8445_s17 + $0x7c] sm:$0xf] }
  0xd9   : > { %v3066_v19 = vsel %vm3060_vm13, %v3033_v53, %v2739_v45  ;;  %v2783_v26 = vunpack.c.l.b16 %v2060_v23  ;;  %v2446_v41 = vunpack.c.l.b16 %v1146_v25  ;;  %v1749_v31 = vor.u32 %v1748_v24, %v1745_v6 }
  0xda   : > { %v3099_v57 = vsel %vm3093_vm14, %v3066_v19, %v8919_v40  ;;  %2574 = vrot.lane.b32.xlu2 %v2550_v4, %s8342_s20  ;;  %v1156_v40 = vsel %vm8473_vm5, %v1151_v20, %v1155_v8  ;;  %v1754_v38 = vrot.slane %v1752_v28, 5  ;;  %v1758_v12 = vrot.slane %v1756_v27, 4 }
  0xdb   : > { %v2309_v50 = vpop.permute.xlu1 %2308  ;;  %7717 = vmatmul.msk.bf16.gmra.mxu0 %vm3146_vm15, %v3099_v57  ;;  %v2447_v37 = vunpack.c.l.b16 %v1156_v40  ;;  %v2806_v30 = vpack.c.b16 %v2783_v26, %v2782_v13  ;;  %v1750_v35 = vrot.slane %v1749_v31, 4  ;;  %v1764_v17 = vrot.slane %v1762_v14, 5  ;;  %v9050_v9 = vpop.permute.xlu2 %2486  ;;  %v7373_v13 = vld [vmem:[%s8445_s17 + $0x78] sm:$0xf] }
  0xdc   : > { %v7348_v42 = vrot.slane %v722_v18, 9  ;;  %v845_v44 = vrot.slane %v297_v43, 5  ;;  %v1759_v47 = vor.u32 %v1758_v12, %v1754_v38  ;;  %v848_v34 = vrot.slane %v319_v33, 5 }
  0xdd   : > { %v2470_v45 = vpack.c.b16 %v2447_v37, %v2446_v41  ;;  %v546_v49 = vshrl.u32 %v296_v36, 16  ;;  %v1755_v51 = vsel %vm8473_vm5, %v1750_v35, %v1754_v38  ;;  %v549_v0 = vshll.u32 %v296_v36, 16  ;;  %v8089_v41 = vld [vmem:[%s8445_s17 + $0x78] sm:$0xff] }
  0xde   : > { %2414 = vrot.lane.b32.xlu0 %v8088_v22, %s8341_s19  ;;  %v846_v32 = vsel %vm8450_vm4, %v7348_v42, %v845_v44  ;;  %v847_v62 = vrot.slane %v845_v44, 4  ;;  %v1760_v52 = vrot.slane %v1759_v47, 4  ;;  %v2702_v54 = vunpack.c.l.b16 %v1755_v51  ;;  %v298_v42 = vld [vmem:[%s8445_s17 + $0x78] sm:$0xf] }
  0xdf   : > { %v2229_v46 = vpop.permute.xlu0 %2228  ;;  %2494 = vrot.lane.b32.xlu1 %v2470_v45, %s8344_s22  ;;  %v2272_v55 = vunpack.c.l.b16 %v846_v32  ;;  %v548_v63 = vrot.slane %v546_v49, 4  ;;  %v555_v11 = vshll.u32 %v297_v43, 16  ;;  %v559_v53 = vshrl.u32 %v297_v43, 16  ;;  %v9077_v49 = vld [vmem:[%s8445_s17 + $0x7c] sm:$0xf] }
  0xe0   : > { %v2858_v4 = vsel %vm11605_vm6, %v8067_v29, %v2229_v46  ;;  %v849_v60 = vsel %vm8450_vm4, %v847_v62, %v848_v34  ;;  %v1765_v5 = vsel %vm8473_vm5, %v1760_v52, %v1764_v17  ;;  %v551_v7 = vrot.slane %v549_v0, 5 }
  0xe1   : > { %v2903_v48 = vsel %vm2895_vm7, %v2858_v4, %v2309_v50  ;;  %v2273_v10 = vunpack.c.l.b16 %v849_v60  ;;  %v565_v16 = vshll.u32 %v319_v33, 16  ;;  %v7428_v19 = vrot.slane %v7412_v56, 9 }
  0xe2   : > { %v2936_v59 = vsel %vm2928_vm8, %v2903_v48, %v8954_v21  ;;  %2830 = vrot.lane.b32.xlu2 %v2806_v30, %s8347_s8  ;;  %v2703_v21 = vunpack.c.l.b16 %v1765_v5  ;;  %v557_v20 = vrot.slane %v555_v11, 5  ;;  %v561_v57 = vrot.slane %v559_v53, 4 }
  0xe3   : > { %v2565_v8 = vpop.permute.xlu1 %2564  ;;  %v9058_v6 = vpack.c.b16 %v2273_v10, %v2272_v55  ;;  %v1454_v22 = vrot.slane %v7374_v2, 5  ;;  %v552_v24 = vor.u32 %v551_v7, %v548_v63  ;;  %v567_v25 = vrot.slane %v565_v16, 5  ;;  %v9082_v62 = vpop.permute.xlu2 %2742 }
  0xe4   : > { %v2726_v23 = vpack.c.b16 %v2703_v21, %v2702_v54  ;;  %v1457_v50 = vrot.slane %v7396_v15, 5  ;;  %v562_v28 = vor.u32 %v561_v57, %v557_v20  ;;  %v1158_v18 = vshrl.u32 %v7373_v13, 16  ;;  %v9085_v54 = vld [vmem:[%s8445_s17 + $0x80] sm:$0x1]  ;;  %v7492_v21 = vld [vmem:[%s8445_s17 + $0x84] sm:$0xe] }
  0xe5   : > { %v1455_v27 = vsel %vm8450_vm4, %v7428_v19, %v1454_v22  ;;  %v1456_v43 = vrot.slane %v1454_v22, 4  ;;  %v553_v29 = vrot.slane %v552_v24, 4  ;;  %v1161_v14 = vshll.u32 %v7373_v13, 16  ;;  %v7476_v13 = vld [vmem:[%s8445_s17 + $0x8c] sm:$0x1] }
  0xe6   : > { %2670 = vrot.lane.b32.xlu0 %v8104_v61, %s8340_s18  ;;  %v2528_v31 = vunpack.c.l.b16 %v1455_v27  ;;  %v563_v36 = vrot.slane %v562_v28, 4  ;;  %v1160_v30 = vrot.slane %v1158_v18, 4  ;;  %v1167_v47 = vshll.u32 %v7374_v2, 16 }
  0xe7   : > { %v2485_v26 = vpop.permute.xlu0 %2484  ;;  %2750 = vrot.lane.b32.xlu1 %v2726_v23, %s8346_s29  ;;  %v1458_v37 = vsel %vm8450_vm4, %v1456_v43, %v1457_v50  ;;  %v558_v38 = vsel %vm8473_vm5, %v553_v29, %v557_v20  ;;  %v1163_v17 = vrot.slane %v1161_v14, 5  ;;  %v1171_v34 = vshrl.u32 %v7374_v2, 16  ;;  %v9089_v2 = vld [vmem:[%s8445_s17 + $0x88] sm:$0xf]  ;;  %v7453_v20 = vld [vmem:[%s8445_s17 + $0x84] sm:$0xf] }
  0xe8   : > { %v2969_v40 = vsel %vm2961_vm9, %v2936_v59, %v2485_v26  ;;  %v2529_v35 = vunpack.c.l.b16 %v1458_v37  ;;  %v568_v45 = vsel %vm8473_vm5, %v563_v36, %v567_v25  ;;  %v2192_v46 = vunpack.c.l.b16 %v558_v38  ;;  %v7375_v38 = vld [vmem:[%s8445_s17 + $0x84] sm:$0xf] }
  0xe9   : > { %v3002_v33 = vsel %vm2994_vm11, %v2969_v40, %v2565_v8  ;;  %v2193_v4 = vunpack.c.l.b16 %v568_v45  ;;  %v1177_v32 = vshll.u32 %v7396_v15, 16  ;;  %v1169_v48 = vrot.slane %v1167_v47, 5  ;;  %v8105_v8 = vld [vmem:[%s8445_s17 + $0x84] sm:$0xff] }
  0xea   : > { %v3035_v12 = vsel %vm3027_vm12, %v3002_v33, %v8979_v1  ;;  %2416 = vrot.lane.b32.xlu2 %v8089_v41, %s8341_s19  ;;  %v9080_v51 = vpack.c.b16 %v2529_v35, %v2528_v31  ;;  %v1164_v1 = vor.u32 %v1163_v17, %v1160_v30  ;;  %v1173_v52 = vrot.slane %v1171_v34, 4 }
  0xeb   : > { %v2821_v44 = vpop.permute.xlu1 %2820  ;;  %v570_v55 = vshrl.u32 %v298_v42, 16  ;;  %v573_v56 = vshll.u32 %v298_v42, 16  ;;  %v2215_v59 = vpack.c.b16 %v2193_v4, %v2192_v46  ;;  %v1179_v63 = vrot.slane %v1177_v32, 5 }
  0xec   : > { %v1165_v60 = vrot.slane %v1164_v1, 4  ;;  %v579_v0 = vshll.u32 %v9077_v49, 16  ;;  %v1174_v10 = vor.u32 %v1173_v52, %v1169_v48  ;;  %v583_v15 = vshrl.u32 %v9077_v49, 16 }
  0xed   : > { %v572_v11 = vrot.slane %v570_v55, 4  ;;  %v575_v53 = vrot.slane %v573_v56, 5  ;;  %v589_v19 = vshll.u32 %v9085_v54, 16  ;;  %v7508_v26 = vrot.slane %v7492_v21, 9 }
  0xee   : > { %2240 = vrot.lane.b32.xlu0 %v2215_v59, %s8345_s23  ;;  %v1170_v7 = vsel %vm8473_vm5, %v1165_v60, %v1169_v48  ;;  %v581_v16 = vrot.slane %v579_v0, 5  ;;  %v1175_v22 = vrot.slane %v1174_v10, 4  ;;  %v585_v25 = vrot.slane %v583_v15, 4  ;;  %v9132_v0 = vld [vmem:[%s8445_s17 + $0x8c] sm:$0x1] }
  0xef   : > { %v2741_v5 = vpop.permute.xlu0 %2740  ;;  %2320 = vrot.lane.b32.xlu1 %v9058_v6, %s8343_s21  ;;  %v2448_v23 = vunpack.c.l.b16 %v1170_v7  ;;  %v576_v24 = vor.u32 %v575_v53, %v572_v11  ;;  %v591_v50 = vrot.slane %v589_v19, 5  ;;  %v2063_v28 = vrot.slane %v9089_v2, 5  ;;  %v723_v10 = vld [vmem:[%s8445_s17 + $0x78] sm:$0xe] }
  0xf0   : > { %v3068_v61 = vsel %vm3060_vm13, %v3035_v12, %v2741_v5  ;;  %v1180_v43 = vsel %vm8473_vm5, %v1175_v22, %v1179_v63  ;;  %v2066_v40 = vrot.slane %v7476_v13, 5  ;;  %v1767_v6 = vshrl.u32 %v7453_v20, 16  ;;  %v9129_v63 = vld [vmem:[%s8445_s17 + $0x88] sm:$0xf] }
  0xf1   : > { %v3101_v57 = vsel %vm3093_vm14, %v3068_v61, %v2821_v44  ;;  %v577_v18 = vrot.slane %v576_v24, 4  ;;  %v2449_v41 = vunpack.c.l.b16 %v1180_v43  ;;  %v586_v29 = vor.u32 %v585_v25, %v581_v16  ;;  %v9116_v44 = vpop.permute.xlu2 %2312 }
  0xf2   : > { %7718 = vmatmul.msk.bf16.gmra.mxu0 %vm3146_vm15, %v3101_v57  ;;  %2672 = vrot.lane.b32.xlu2 %v8105_v8, %s8340_s18  ;;  %v2064_v31 = vsel %vm8450_vm4, %v7508_v26, %v2063_v28  ;;  %v2065_v14 = vrot.slane %v2063_v28, 4  ;;  %v1769_v37 = vrot.slane %v1767_v6, 4  ;;  %v1770_v30 = vshll.u32 %v7453_v20, 16 }
  0xf3   : > { %v2407_v27 = vpop.permute.xlu1 %2406  ;;  %v582_v33 = vsel %vm8473_vm5, %v577_v18, %v581_v16  ;;  %v2784_v36 = vunpack.c.l.b16 %v2064_v31  ;;  %v2471_v12 = vpack.c.b16 %v2449_v41, %v2448_v23  ;;  %v587_v35 = vrot.slane %v586_v29, 4  ;;  %v7455_v18 = vld [vmem:[%s8445_s17 + $0x90] sm:$0xf]  ;;  %v9152_v29 = vld [vmem:[%s8445_s17 + $0x94] sm:$0xf] }
  0xf4   : > { %v2194_v17 = vunpack.c.l.b16 %v582_v33  ;;  %v2067_v42 = vsel %vm8450_vm4, %v2065_v14, %v2066_v40  ;;  %v1772_v47 = vrot.slane %v1770_v30, 5  ;;  %v1776_v34 = vshll.u32 %v9089_v2, 16 }
  0xf5   : > { %v2785_v46 = vunpack.c.l.b16 %v2067_v42  ;;  %v1780_v4 = vshrl.u32 %v9089_v2, 16  ;;  %v592_v32 = vsel %vm8473_vm5, %v587_v35, %v591_v50  ;;  %v1786_v48 = vshll.u32 %v7476_v13, 16 }
  0xf6   : > { %2496 = vrot.lane.b32.xlu0 %v2471_v12, %s8344_s22  ;;  %v1182_v52 = vshrl.u32 %v7375_v38, 16  ;;  %v2195_v56 = vunpack.c.l.b16 %v592_v32  ;;  %v1773_v60 = vor.u32 %v1772_v47, %v1769_v37  ;;  %v1778_v2 = vrot.slane %v1776_v34, 5  ;;  %v8069_v37 = vld [vmem:[%s8445_s17 + $0x3c] sm:$0xff]  ;;  %v7413_v34 = vld [vmem:[%s8445_s17 + $0x84] sm:$0xe] }
  0xf7   : > { %v2311_v45 = vpop.permute.xlu0 %2310  ;;  %2576 = vrot.lane.b32.xlu1 %v9080_v51, %s8342_s20  ;;  %v2807_v59 = vpack.c.b16 %v2785_v46, %v2784_v36  ;;  %v1782_v5 = vrot.slane %v1780_v4, 4  ;;  %v1185_v21 = vshll.u32 %v7375_v38, 16  ;;  %v1191_v7 = vshll.u32 %v9129_v63, 16  ;;  %v9164_v46 = vld [vmem:[%s8445_s17 + $0x98] sm:$0x1] }
  0xf8   : > { %v2905_v1 = vsel %vm2895_vm7, %v9009_v58, %v2311_v45  ;;  %v1788_v58 = vrot.slane %v1786_v48, 5  ;;  %v2216_v11 = vpack.c.b16 %v2195_v56, %v2194_v17  ;;  %v1774_v15 = vrot.slane %v1773_v60, 4 }
  0xf9   : > { %v2938_v55 = vsel %vm2928_vm8, %v2905_v1, %v2407_v27  ;;  %v1184_v51 = vrot.slane %v1182_v52, 4  ;;  %v1783_v61 = vor.u32 %v1782_v5, %v1778_v2  ;;  %v1195_v16 = vshrl.u32 %v9129_v63, 16  ;;  %v9154_v31 = vpop.permute.xlu2 %2568 }
  0xfa   : > { %v2971_v8 = vsel %vm2961_vm9, %v2938_v55, %v9050_v9  ;;  %v1201_v19 = vshll.u32 %v9132_v0, 16  ;;  %2242 = vrot.lane.b32.xlu2 %v2216_v11, %s8345_s23  ;;  %v1779_v13 = vsel %vm8473_vm5, %v1774_v15, %v1778_v2  ;;  %v1187_v9 = vrot.slane %v1185_v21, 5  ;;  %v8090_v55 = vld [vmem:[%s8445_s17 + $0x84] sm:$0xff] }
  0xfb   : > { %v2663_v53 = vpop.permute.xlu1 %2662  ;;  %v7349_v20 = vrot.slane %v723_v10, 9  ;;  %v852_v57 = vrot.slane %v9077_v49, 5  ;;  %v1784_v22 = vrot.slane %v1783_v61, 4  ;;  %v2704_v23 = vunpack.c.l.b16 %v1779_v13  ;;  %v724_v10 = vld [vmem:[%s8445_s17 + $0x84] sm:$0xe] }
  0xfc   : > { %v1193_v24 = vrot.slane %v1191_v7, 5  ;;  %v1197_v25 = vrot.slane %v1195_v16, 4  ;;  %v1188_v26 = vor.u32 %v1187_v9, %v1184_v51  ;;  %v1203_v28 = vrot.slane %v1201_v19, 5  ;;  %v301_v13 = vld [vmem:[%s8445_s17 + $0x88] sm:$0xf] }
  0xfd   : > { %v853_v27 = vsel %vm8450_vm4, %v7349_v20, %v852_v57  ;;  %v854_v43 = vrot.slane %v852_v57, 4  ;;  %v1789_v40 = vsel %vm8473_vm5, %v1784_v22, %v1788_v58  ;;  %v855_v49 = vrot.slane %v9085_v54, 5  ;;  %v300_v9 = vld [vmem:[%s8445_s17 + $0x84] sm:$0xf]  ;;  %v321_v22 = vld [vmem:[%s8445_s17 + $0x8c] sm:$0x1] }
  0xfe   : > { %v1198_v41 = vor.u32 %v1197_v25, %v1193_v24  ;;  %v2705_v14 = vunpack.c.l.b16 %v1789_v40  ;;  %v1189_v36 = vrot.slane %v1188_v26, 4  ;;  %v1791_v12 = vshrl.u32 %v7455_v18, 16 }
  0xff   : > { %v2567_v50 = vpop.permute.xlu0 %2566  ;;  %2832 = vrot.lane.b32.xlu1 %v2807_v59, %s8347_s8  ;;  %v856_v38 = vsel %vm8450_vm4, %v854_v43, %v855_v49  ;;  %v1794_v54 = vshll.u32 %v7455_v18, 16  ;;  %v2274_v45 = vunpack.c.l.b16 %v853_v27  ;;  %v1800_v47 = vshll.u32 %v9152_v29, 16 }
 0x100   : > { %v3004_v6 = vsel %vm2994_vm11, %v2971_v8, %v2567_v50  ;;  %v1199_v30 = vrot.slane %v1198_v41, 4  ;;  %v2727_v35 = vpack.c.b16 %v2705_v14, %v2704_v23  ;;  %v1194_v17 = vsel %vm8473_vm5, %v1189_v36, %v1193_v24 }
 0x101   : > { %v3037_v33 = vsel %vm3027_vm12, %v3004_v6, %v2663_v53  ;;  %v2450_v1 = vunpack.c.l.b16 %v1194_v17  ;;  %v2275_v32 = vunpack.c.l.b16 %v856_v38  ;;  %v1793_v48 = vrot.slane %v1791_v12, 4  ;;  %v9191_v50 = vpop.permute.xlu2 %2824 }
 0x102   : > { %v1204_v4 = vsel %vm8473_vm5, %v1199_v30, %v1203_v28  ;;  %2752 = vrot.lane.b32.xlu0 %v2727_v35, %s8346_s29  ;;  %v1796_v59 = vrot.slane %v1794_v54, 5  ;;  %v1802_v60 = vrot.slane %v1800_v47, 5  ;;  %v1804_v2 = vshrl.u32 %v9152_v29, 16 }
 0x103   : > { %v2233_v42 = vpop.permute.xlu1 %2232  ;;  %v2451_v52 = vunpack.c.l.b16 %v1204_v4  ;;  %v1810_v5 = vshll.u32 %v9164_v46, 16  ;;  %v3070_v58 = vsel %vm3060_vm13, %v3037_v33, %v9082_v62  ;;  %v7429_v8 = vrot.slane %v7413_v34, 9  ;;  %v7493_v34 = vld [vmem:[%s8445_s17 + $0x90] sm:$0xe] }
 0x104   : > { %v2864_v56 = vsel %vm11605_vm6, %v8069_v37, %v2233_v42  ;;  %v1797_v15 = vor.u32 %v1796_v59, %v1793_v48  ;;  %v1461_v51 = vrot.slane %v9129_v63, 5  ;;  %v1464_v21 = vrot.slane %v9132_v0, 5 }
 0x105   : > { %v2472_v11 = vpack.c.b16 %v2451_v52, %v2450_v1  ;;  %v2296_v61 = vpack.c.b16 %v2275_v32, %v2274_v45  ;;  %v1806_v7 = vrot.slane %v1804_v2, 4  ;;  %v1812_v16 = vrot.slane %v1810_v5, 5  ;;  %v7414_v52 = vld [vmem:[%s8445_s17 + $0x90] sm:$0xe] }
 0x106   : > { %v1798_v62 = vrot.slane %v1797_v15, 4  ;;  %v1462_v20 = vsel %vm8450_vm4, %v7429_v8, %v1461_v51  ;;  %v1463_v57 = vrot.slane %v1461_v51, 4  ;;  %v7350_v63 = vrot.slane %v724_v10, 9  ;;  %v7378_v51 = vld [vmem:[%s8445_s17 + $0x94] sm:$0xf] }
 0x107   : > { %v2823_v53 = vpop.permute.xlu0 %2822  ;;  %2498 = vrot.lane.b32.xlu2 %v2472_v11, %s8344_s22  ;;  %2418 = vrot.lane.b32.xlu1 %v8090_v55, %s8341_s19  ;;  %v1807_v23 = vor.u32 %v1806_v7, %v1802_v60  ;;  %v2907_v0 = vsel %vm2895_vm7, %v2864_v56, %v9116_v44  ;;  %v859_v24 = vrot.slane %v301_v13, 5  ;;  %v862_v25 = vrot.slane %v321_v22, 5  ;;  %v8106_v44 = vld [vmem:[%s8445_s17 + $0x90] sm:$0xff] }
 0x108   : > { %v3103_v19 = vsel %vm3093_vm14, %v3070_v58, %v2823_v53  ;;  %v1803_v26 = vsel %vm8473_vm5, %v1798_v62, %v1802_v60  ;;  %v1465_v27 = vsel %vm8450_vm4, %v1463_v57, %v1464_v21  ;;  %v594_v43 = vshrl.u32 %v300_v9, 16 }
 0x109   : > { %7719 = vmatmul.msk.bf16.gmra.mxu0 %vm3146_vm15, %v3103_v19  ;;  %v597_v18 = vshll.u32 %v300_v9, 16  ;;  %v1808_v40 = vrot.slane %v1807_v23, 4  ;;  %v2706_v6 = vunpack.c.l.b16 %v1803_v26  ;;  %v2530_v41 = vunpack.c.l.b16 %v1462_v20  ;;  %v9222_v9 = vpop.permute.xlu2 %2410 }
 0x10a   : > { %v860_v49 = vsel %vm8450_vm4, %v7350_v63, %v859_v24  ;;  %2322 = vrot.lane.b32.xlu0 %v2296_v61, %s8343_s21  ;;  %v2531_v14 = vunpack.c.l.b16 %v1465_v27  ;;  %v861_v33 = vrot.slane %v859_v24, 4  ;;  %v596_v36 = vrot.slane %v594_v43, 4  ;;  %v7377_v61 = vld [vmem:[%s8445_s17 + $0x90] sm:$0xf] }
 0x10b   : > { %v2489_v28 = vpop.permute.xlu1 %2488  ;;  %v599_v37 = vrot.slane %v597_v18, 5  ;;  %v1813_v30 = vsel %vm8473_vm5, %v1808_v40, %v1812_v16  ;;  %v2276_v38 = vunpack.c.l.b16 %v860_v49  ;;  %v603_v12 = vshll.u32 %v301_v13, 16 }
 0x10c   : > { %v607_v54 = vshrl.u32 %v301_v13, 16  ;;  %v2707_v35 = vunpack.c.l.b16 %v1813_v30  ;;  %v863_v42 = vsel %vm8450_vm4, %v861_v33, %v862_v25  ;;  %v613_v47 = vshll.u32 %v321_v22, 16  ;;  %v7398_v13 = vld [vmem:[%s8445_s17 + $0x98] sm:$0x1] }
 0x10d   : > { %v600_v45 = vor.u32 %v599_v37, %v596_v36  ;;  %v2277_v1 = vunpack.c.l.b16 %v863_v42  ;;  %v605_v32 = vrot.slane %v603_v12, 5  ;;  %v2552_v56 = vpack.c.b16 %v2531_v14, %v2530_v41 }
 0x10e   : > { %v609_v48 = vrot.slane %v607_v54, 4  ;;  %v2728_v55 = vpack.c.b16 %v2707_v35, %v2706_v6  ;;  %v615_v5 = vrot.slane %v613_v47, 5  ;;  %v7509_v58 = vrot.slane %v7493_v34, 9  ;;  %v7494_v6 = vld [vmem:[%s8445_s17 + $0x9c] sm:$0xe] }
 0x10f   : > { %v2409_v17 = vpop.permute.xlu0 %2408  ;;  %2674 = vrot.lane.b32.xlu1 %v8106_v44, %s8340_s18  ;;  %v601_v60 = vrot.slane %v600_v45, 4  ;;  %v2070_v8 = vrot.slane %v9152_v29, 5  ;;  %v2297_v10 = vpack.c.b16 %v2277_v1, %v2276_v38  ;;  %v2073_v15 = vrot.slane %v9164_v46, 5  ;;  %v7458_v38 = vld [vmem:[%s8445_s17 + $0xa0] sm:$0xf] }
 0x110   : > { %v2940_v4 = vsel %vm2928_vm8, %v2907_v0, %v2409_v17  ;;  %v610_v2 = vor.u32 %v609_v48, %v605_v32  ;;  %2754 = vrot.lane.b32.xlu2 %v2728_v55, %s8346_s29  ;;  %v7430_v21 = vrot.slane %v7414_v52, 9  ;;  %v1468_v46 = vrot.slane %v7378_v51, 5  ;;  %v7457_v45 = vld [vmem:[%s8445_s17 + $0x9c] sm:$0xf]  ;;  %v7478_v48 = vld [vmem:[%s8445_s17 + $0xa4] sm:$0x1] }
 0x111   : > { %v2973_v59 = vsel %vm2961_vm9, %v2940_v4, %v2489_v28  ;;  %v606_v11 = vsel %vm8473_vm5, %v601_v60, %v605_v32  ;;  %v2071_v19 = vsel %vm8450_vm4, %v7509_v58, %v2070_v8  ;;  %v2072_v62 = vrot.slane %v2070_v8, 4  ;;  %v8070_v32 = vld [vmem:[%s8445_s17 + $0x48] sm:$0xff] }
 0x112   : > { %v611_v7 = vrot.slane %v610_v2, 4  ;;  %v2196_v16 = vunpack.c.l.b16 %v606_v11  ;;  %v3006_v29 = vsel %vm2994_vm11, %v2973_v59, %v9154_v31  ;;  %2578 = vrot.lane.b32.xlu0 %v2552_v56, %s8342_s20  ;;  %v2786_v20 = vunpack.c.l.b16 %v2071_v19  ;;  %v725_v19 = vld [vmem:[%s8445_s17 + $0x90] sm:$0xe] }
 0x113   : > { %v2745_v53 = vpop.permute.xlu1 %2744  ;;  %v1471_v57 = vrot.slane %v7398_v13, 5  ;;  %v1206_v63 = vshrl.u32 %v7377_v61, 16  ;;  %v1209_v23 = vshll.u32 %v7377_v61, 16  ;;  %v1215_v0 = vshll.u32 %v7378_v51, 16 }
 0x114   : > { %v616_v22 = vsel %vm8473_vm5, %v611_v7, %v615_v5  ;;  %v2074_v31 = vsel %vm8450_vm4, %v2072_v62, %v2073_v15  ;;  %v1469_v26 = vsel %vm8450_vm4, %v7430_v21, %v1468_v46  ;;  %v1470_v28 = vrot.slane %v1468_v46, 4 }
 0x115   : > { %v2197_v24 = vunpack.c.l.b16 %v616_v22  ;;  %v2787_v27 = vunpack.c.l.b16 %v2074_v31  ;;  %v2532_v18 = vunpack.c.l.b16 %v1469_v26  ;;  %v1208_v40 = vrot.slane %v1206_v63, 4 }
 0x116   : > { %v1472_v49 = vsel %vm8450_vm4, %v1470_v28, %v1471_v57  ;;  %v1211_v44 = vrot.slane %v1209_v23, 5  ;;  %v1217_v14 = vrot.slane %v1215_v0, 5  ;;  %v1219_v37 = vshrl.u32 %v7378_v51, 16  ;;  %v9260_v57 = vld [vmem:[%s8445_s17 + $0x98] sm:$0x1] }
 0x117   : > { %v2665_v25 = vpop.permute.xlu0 %2664  ;;  %v2217_v41 = vpack.c.b16 %v2197_v24, %v2196_v16  ;;  %v2808_v33 = vpack.c.b16 %v2787_v27, %v2786_v20  ;;  %v2533_v36 = vunpack.c.l.b16 %v1472_v49  ;;  %v1225_v30 = vshll.u32 %v7398_v13, 16  ;;  %v303_v16 = vld [vmem:[%s8445_s17 + $0x94] sm:$0xf]  ;;  %v302_v24 = vld [vmem:[%s8445_s17 + $0x90] sm:$0xf] }
 0x118   : > { %v3039_v43 = vsel %vm3027_vm12, %v3006_v29, %v2665_v25  ;;  %2324 = vrot.lane.b32.xlu2 %v2297_v10, %s8343_s21  ;;  %v1212_v12 = vor.u32 %v1211_v44, %v1208_v40  ;;  %v7510_v17 = vrot.slane %v7494_v6, 9  ;;  %v2077_v42 = vrot.slane %v7458_v38, 5  ;;  %v8091_v29 = vld [vmem:[%s8445_s17 + $0x90] sm:$0xff] }
 0x119   : > { %2244 = vrot.lane.b32.xlu1 %v2217_v41, %s8345_s23  ;;  %v3072_v35 = vsel %vm3060_vm13, %v3039_v43, %v2745_v53  ;;  %v2553_v47 = vpack.c.b16 %v2533_v36, %v2532_v18  ;;  %v1221_v34 = vrot.slane %v1219_v37, 4  ;;  %v1227_v4 = vrot.slane %v1225_v30, 5  ;;  %v8071_v30 = vld [vmem:[%s8445_s17 + $0x54] sm:$0xff] }
 0x11a   : > { %v3105_v1 = vsel %vm3093_vm14, %v3072_v35, %v9191_v50  ;;  %2834 = vrot.lane.b32.xlu0 %v2808_v33, %s8347_s8  ;;  %v1213_v52 = vrot.slane %v1212_v12, 4  ;;  %v2078_v55 = vsel %vm8450_vm4, %v7510_v17, %v2077_v42  ;;  %v2079_v56 = vrot.slane %v2077_v42, 4  ;;  %v9248_v50 = vpop.permute.xlu2 %2666 }
 0x11b   : > { %v2315_v54 = vpop.permute.xlu1 %2314  ;;  %7720 = vmatmul.msk.bf16.gmra.mxu0 %vm3146_vm15, %v3105_v1  ;;  %v2080_v59 = vrot.slane %v7478_v48, 5  ;;  %v1222_v60 = vor.u32 %v1221_v34, %v1217_v14  ;;  %v2788_v2 = vunpack.c.l.b16 %v2078_v55  ;;  %v1815_v5 = vshrl.u32 %v7457_v45, 16 }
 0x11c   : > { %v1818_v58 = vshll.u32 %v7457_v45, 16  ;;  %v1218_v8 = vsel %vm8473_vm5, %v1213_v52, %v1217_v14  ;;  %v1824_v53 = vshll.u32 %v7458_v38, 16  ;;  %v1828_v15 = vshrl.u32 %v7458_v38, 16 }
 0x11d   : > { %v2081_v11 = vsel %vm8450_vm4, %v2079_v56, %v2080_v59  ;;  %v1223_v51 = vrot.slane %v1222_v60, 4  ;;  %v2452_v21 = vunpack.c.l.b16 %v1218_v8  ;;  %v1817_v62 = vrot.slane %v1815_v5, 4  ;;  %v7380_v59 = vld [vmem:[%s8445_s17 + $0xa0] sm:$0xf]  ;;  %v7399_v60 = vld [vmem:[%s8445_s17 + $0xa4] sm:$0x1] }
 0x11e   : > { %v2789_v7 = vunpack.c.l.b16 %v2081_v11  ;;  %v1820_v20 = vrot.slane %v1818_v58, 5  ;;  %v1826_v46 = vrot.slane %v1824_v53, 5  ;;  %v1830_v23 = vrot.slane %v1828_v15, 4  ;;  %v7379_v8 = vld [vmem:[%s8445_s17 + $0x9c] sm:$0xf] }
 0x11f   : > { %v2235_v10 = vpop.permute.xlu0 %2234  ;;  %v1228_v22 = vsel %vm8473_vm5, %v1223_v51, %v1227_v4  ;;  %v1834_v0 = vshll.u32 %v7478_v48, 16  ;;  %v7351_v28 = vrot.slane %v725_v19, 9  ;;  %v866_v40 = vrot.slane %v303_v16, 5  ;;  %v7415_v4 = vld [vmem:[%s8445_s17 + $0x9c] sm:$0xe] }
 0x120   : > { %v2867_v61 = vsel %vm11605_vm6, %v8070_v32, %v2235_v10  ;;  %v2809_v63 = vpack.c.b16 %v2789_v7, %v2788_v2  ;;  %2580 = vrot.lane.b32.xlu2 %v2553_v47, %s8342_s20  ;;  %v2453_v31 = vunpack.c.l.b16 %v1228_v22  ;;  %v1821_v25 = vor.u32 %v1820_v20, %v1817_v62  ;;  %v8107_v48 = vld [vmem:[%s8445_s17 + $0x9c] sm:$0xff] }
 0x121   : > { %v2909_v13 = vsel %vm2895_vm7, %v2867_v61, %v2315_v54  ;;  %v1831_v27 = vor.u32 %v1830_v23, %v1826_v46  ;;  %v1836_v43 = vrot.slane %v1834_v0, 5  ;;  %v869_v6 = vrot.slane %v9260_v57, 5 }
 0x122   : > { %v2942_v26 = vsel %vm2928_vm8, %v2909_v13, %v9222_v9  ;;  %v2473_v41 = vpack.c.b16 %v2453_v31, %v2452_v21  ;;  %2420 = vrot.lane.b32.xlu0 %v8091_v29, %s8341_s19  ;;  %v1822_v49 = vrot.slane %v1821_v25, 4  ;;  %v618_v44 = vshrl.u32 %v302_v24, 16  ;;  %v2237_v1 = vpop.permute.xlu2 %2236 }
 0x123   : > { %v2571_v18 = vpop.permute.xlu1 %2570  ;;  %v621_v14 = vshll.u32 %v302_v24, 16  ;;  %v1832_v33 = vrot.slane %v1831_v27, 4  ;;  %v867_v36 = vsel %vm8450_vm4, %v7351_v28, %v866_v40  ;;  %v868_v9 = vrot.slane %v866_v40, 4  ;;  %v9309_v40 = vld [vmem:[%s8445_s17 + $0xa0] sm:$0xf] }
 0x124   : > { %v627_v37 = vshll.u32 %v303_v16, 16  ;;  %2500 = vrot.lane.b32.xlu1 %v2473_v41, %s8344_s22  ;;  %v1827_v38 = vsel %vm8473_vm5, %v1822_v49, %v1826_v46  ;;  %v2278_v54 = vunpack.c.l.b16 %v867_v36  ;;  %v620_v35 = vrot.slane %v618_v44, 4  ;;  %v9318_v36 = vld [vmem:[%s8445_s17 + $0xa4] sm:$0x1] }
 0x125   : > { %v623_v17 = vrot.slane %v621_v14, 5  ;;  %v1837_v42 = vsel %vm8473_vm5, %v1832_v33, %v1836_v43  ;;  %v2708_v45 = vunpack.c.l.b16 %v1827_v38  ;;  %v870_v34 = vsel %vm8450_vm4, %v868_v9, %v869_v6 }
 0x126   : > { %v2709_v32 = vunpack.c.l.b16 %v1837_v42  ;;  %v2279_v55 = vunpack.c.l.b16 %v870_v34  ;;  %v629_v2 = vrot.slane %v627_v37, 5  ;;  %v631_v5 = vshrl.u32 %v303_v16, 16 }
 0x127   : > { %v2491_v12 = vpop.permute.xlu0 %2490  ;;  %v624_v56 = vor.u32 %v623_v17, %v620_v35  ;;  %v637_v58 = vshll.u32 %v9260_v57, 16  ;;  %v9289_v10 = vsel %vm11605_vm6, %v8071_v30, %v2237_v1  ;;  %v7431_v15 = vrot.slane %v7415_v4, 9  ;;  %v9332_v35 = vld [vmem:[%s8445_s17 + $0xac] sm:$0xf]  ;;  %v7495_v4 = vld [vmem:[%s8445_s17 + $0xa8] sm:$0xe] }
 0x128   : > { %v2975_v47 = vsel %vm2961_vm9, %v2942_v26, %v2491_v12  ;;  %2836 = vrot.lane.b32.xlu2 %v2809_v63, %s8347_s8  ;;  %v2729_v11 = vpack.c.b16 %v2709_v32, %v2708_v45  ;;  %v633_v51 = vrot.slane %v631_v5, 4  ;;  %v1475_v61 = vrot.slane %v7380_v59, 5  ;;  %v9338_v45 = vld [vmem:[%s11600_s3] ss:$0 sm:$0xff] }
 0x129   : > { %v3008_v52 = vsel %vm2994_vm11, %v2975_v47, %v2571_v18  ;;  %v625_v53 = vrot.slane %v624_v56, 4  ;;  %v1478_v7 = vrot.slane %v7399_v60, 5  ;;  %v2298_v16 = vpack.c.b16 %v2279_v55, %v2278_v54  ;;  %v304_v18 = vld [vmem:[%s8445_s17 + $0x9c] sm:$0xf]  ;;  %v9327_v54 = vld [vmem:[%s11599_s2] ss:$0 sm:$0xff] }
 0x12a   : > { %v3041_v21 = vsel %vm3027_vm12, %v3008_v52, %v9248_v50  ;;  %2676 = vrot.lane.b32.xlu0 %v8107_v48, %s8340_s18  ;;  %v1230_v19 = vshrl.u32 %v7379_v8, 16  ;;  %v1233_v29 = vshll.u32 %v7379_v8, 16  ;;  %v1239_v13 = vshll.u32 %v7380_v59, 16  ;;  %v8092_v50 = vld [vmem:[%s8445_s17 + $0x9c] sm:$0xff]  ;;  %v9320_v9 = vpop.permute.xlu2 %2492  ;;  %v9351_v55 = vld [vmem:[%s8445_s17 + $0xb0] sm:$0x1] }
 0x12b   : > { %v2827_v62 = vpop.permute.xlu1 %2826  ;;  %v630_v20 = vsel %vm8473_vm5, %v625_v53, %v629_v2  ;;  %v634_v46 = vor.u32 %v633_v51, %v629_v2  ;;  %v639_v57 = vrot.slane %v637_v58, 5  ;;  %v1477_v22 = vrot.slane %v1475_v61, 4  ;;  %v8108_v56 = vld [vmem:[%s8445_s17 + $0xa8] sm:$0xff] }
 0x12c   : > { %2756 = vrot.lane.b32.xlu1 %v2729_v11, %s8346_s29  ;;  %v9301_v63 = vsel %vm8450_vm4, %v7431_v15, %v1475_v61  ;;  %v1232_v23 = vrot.slane %v1230_v19, 4  ;;  %v1235_v0 = vrot.slane %v1233_v29, 5  ;;  %v1241_v24 = vrot.slane %v1239_v13, 5 }
 0x12d   : > { %v635_v31 = vrot.slane %v634_v46, 4  ;;  %v9305_v25 = vsel %vm8450_vm4, %v1477_v22, %v1478_v7  ;;  %v1243_v26 = vshrl.u32 %v7380_v59, 16  ;;  %v1249_v28 = vshll.u32 %v7399_v60, 16 }
 0x12e   : > { %v2198_v27 = vunpack.c.l.b16 %v630_v20  ;;  %v1236_v43 = vor.u32 %v1235_v0, %v1232_v23  ;;  %v2534_v49 = vunpack.c.l.b16 %v9301_v63  ;;  %v2535_v44 = vunpack.c.l.b16 %v9305_v25  ;;  %v7459_v63 = vld [vmem:[%s8445_s17 + $0xa8] sm:$0xf] }
 0x12f   : > { %v640_v6 = vsel %vm8473_vm5, %v635_v31, %v639_v57  ;;  %v1245_v14 = vrot.slane %v1243_v26, 4  ;;  %v8348_v33 = vmov 0   ;;  %v1251_v12 = vrot.slane %v1249_v28, 5 }
 0x130   : > { %v2747_v41 = vpop.permute.xlu0 %2746  ;;  %3381 = vst.msk [vmem:[#allocation2 + $0xc] sm:$0xf] %vm3376_vm0, %v8348_v33  ;;  %2422 = vrot.lane.b32.xlu2 %v8092_v50, %s8341_s19  ;;  %v2199_v37 = vunpack.c.l.b16 %v640_v6  ;;  %v1237_v38 = vrot.slane %v1236_v43, 4  ;;  %v642_v47 = vshrl.u32 %v304_v18, 16  ;;  %v645_v34 = vshll.u32 %v304_v18, 16 }
 0x131   : > { %v3074_v30 = vsel %vm3060_vm13, %v3041_v21, %v2747_v41  ;;  %3377 = vst.msk [vmem:[#allocation2] sm:$0xf] %vm3376_vm0, %v8348_v33  ;;  %v1246_v42 = vor.u32 %v1245_v14, %v1241_v24  ;;  %v651_v48 = vshll.u32 %v9309_v40, 16  ;;  %v655_v52 = vshrl.u32 %v9309_v40, 16 }
 0x132   : > { %v3107_v17 = vsel %vm3093_vm14, %v3074_v30, %v2827_v62  ;;  %3378 = vst.msk [vmem:[#allocation2 + $0x4] sm:$0xf] %vm3376_vm0, %v8348_v33  ;;  %v2218_v1 = vpack.c.b16 %v2199_v37, %v2198_v27  ;;  %v1242_v32 = vsel %vm8473_vm5, %v1237_v38, %v1241_v24  ;;  %v644_v2 = vrot.slane %v642_v47, 4  ;;  %v9387_v27 = vpop.permute.xlu2 %2748 }
 0x133   : > { %7721 = vmatmul.msk.bf16.gmra.mxu0 %vm3146_vm15, %v3107_v17  ;;  %3382 = vst.msk [vmem:[#allocation2 + $0x10] sm:$0xf] %vm3376_vm0, %v8348_v33  ;;  %v1247_v59 = vrot.slane %v1246_v42, 4  ;;  %v2454_v60 = vunpack.c.l.b16 %v1242_v32  ;;  %v647_v5 = vrot.slane %v645_v34, 5  ;;  %v653_v8 = vrot.slane %v651_v48, 5  ;;  %v2413_v51 = vpop.permute.xlu1 %2412 }
 0x134   : > { %3384 = vst.msk [vmem:[#allocation2 + $0x18] sm:$0xf] %vm3376_vm0, %v8348_v33  ;;  %2326 = vrot.lane.b32.xlu1 %v2298_v16, %s8343_s21  ;;  %2246 = vrot.lane.b32.xlu0 %v2218_v1, %s8345_s23  ;;  %v657_v11 = vrot.slane %v655_v52, 4  ;;  %v661_v53 = vshll.u32 %v9318_v36, 16  ;;  %v7511_v15 = vrot.slane %v7495_v4, 9  ;;  %v2084_v16 = vrot.slane %v9332_v35, 5 }
 0x135   : > { %3385 = vst.msk [vmem:[#allocation2 + $0x1c] sm:$0xf] %vm3376_vm0, %v8348_v33  ;;  %v1252_v21 = vsel %vm8473_vm5, %v1247_v59, %v1251_v12  ;;  %v648_v7 = vor.u32 %v647_v5, %v644_v2  ;;  %v2087_v62 = vrot.slane %v9351_v55, 5  ;;  %v2554_v23 = vpack.c.b16 %v2535_v44, %v2534_v49  ;;  %v7381_v48 = vld [vmem:[%s8445_s17 + $0xa8] sm:$0xf] }
 0x136   : > { %3387 = vst.msk [vmem:[#allocation2 + $0x24] sm:$0xf] %vm3376_vm0, %v8348_v33  ;;  %v2455_v19 = vunpack.c.l.b16 %v1252_v21  ;;  %v658_v29 = vor.u32 %v657_v11, %v653_v8  ;;  %v663_v13 = vrot.slane %v661_v53, 5  ;;  %v2085_v22 = vsel %vm8450_vm4, %v7511_v15, %v2084_v16  ;;  %v9414_v2 = vld [vmem:[%s8445_s17 + $0xac] sm:$0xf] }
 0x137   : > { %v3192_v58 = vpop.f32.mrf.mxu0  ;;  %3388 = vst.msk [vmem:[#allocation2 + $0x28] sm:$0xf] %vm3376_vm0, %v8348_v33  ;;  %v649_v57 = vrot.slane %v648_v7, 4  ;;  %v2086_v50 = vrot.slane %v2084_v16, 4  ;;  %v2790_v6 = vunpack.c.l.b16 %v2085_v22  ;;  %v1839_v41 = vshrl.u32 %v7459_v63, 16 }
 0x138   : > { %v3276_v61 = vmul.f32 %v9327_v54, %v3192_v58  ;;  %3390 = vst.msk [vmem:[#allocation2 + $0x30] sm:$0xf] %vm3376_vm0, %v8348_v33  ;;  %v2317_v46 = vpop.permute.xlu0 %2316  ;;  %2678 = vrot.lane.b32.xlu2 %v8108_v56, %s8340_s18  ;;  %v2474_v0 = vpack.c.b16 %v2455_v19, %v2454_v60  ;;  %v659_v24 = vrot.slane %v658_v29, 4  ;;  %v1842_v44 = vshll.u32 %v7459_v63, 16  ;;  %v3791_v58 = vld [vmem:[#allocation2 + $0xc] sm:$0xf] }
 0x139   : > { %3391 = vst.msk [vmem:[#allocation2 + $0x34] sm:$0xf] %vm3376_vm0, %v8348_v33  ;;  %v2911_v25 = vsel %vm2895_vm7, %v9289_v10, %v2317_v46  ;;  %v654_v26 = vsel %vm8473_vm5, %v649_v57, %v653_v8  ;;  %v2088_v28 = vsel %vm8450_vm4, %v2086_v50, %v2087_v62  ;;  %v1848_v14 = vshll.u32 %v9332_v35, 16  ;;  %v9433_v16 = vld [vmem:[%s8445_s17 + $0xb0] sm:$0x1] }
 0x13a   : > { %v3312_v20 = vadd.f32 %v9338_v45, %v3276_v61  ;;  %3393 = vst.msk [vmem:[#allocation2 + $0x3c] sm:$0xf] %vm3376_vm0, %v8348_v33  ;;  %v664_v43 = vsel %vm8473_vm5, %v659_v24, %v663_v13  ;;  %v2200_v18 = vunpack.c.l.b16 %v654_v26  ;;  %v2791_v37 = vunpack.c.l.b16 %v2088_v28  ;;  %v726_v22 = vld [vmem:[%s8445_s17 + $0x9c] sm:$0xe]  ;;  %v9446_v50 = vpop.permute.xlu2 %2318 }
 0x13b   : > { %3394 = vst.msk [vmem:[#allocation2 + $0x40] sm:$0xf] %vm3376_vm0, %v8348_v33  ;;  %v2201_v10 = vunpack.c.l.b16 %v664_v43  ;;  %v1841_v30 = vrot.slane %v1839_v41, 4  ;;  %v1852_v38 = vshrl.u32 %v9332_v35, 16  ;;  %v1858_v12 = vshll.u32 %v9351_v55, 16  ;;  %v2669_v56 = vpop.permute.xlu1 %2668 }
 0x13c   : > { %v3344_v31 = vmax.f32 %v3312_v20, 0.0  ;;  %3396 = vst.msk [vmem:[#allocation2 + $0x48] sm:$0xf] %vm3376_vm0, %v8348_v33  ;;  %2582 = vrot.lane.b32.xlu1 %v2554_v23, %s8342_s20  ;;  %2502 = vrot.lane.b32.xlu0 %v2474_v0, %s8344_s22  ;;  %v1844_v34 = vrot.slane %v1842_v44, 5  ;;  %v2944_v4 = vsel %vm2928_vm8, %v2911_v25, %v2413_v51  ;;  %v1850_v1 = vrot.slane %v1848_v14, 5 }
 0x13d   : > { %3397 = vst.msk [vmem:[#allocation2 + $0x4c] sm:$0xf] %vm3376_vm0, %v8348_v33  ;;  %v2219_v47 = vpack.c.b16 %v2201_v10, %v2200_v18  ;;  %v1854_v32 = vrot.slane %v1852_v38, 4  ;;  %v2810_v8 = vpack.c.b16 %v2791_v37, %v2790_v6  ;;  %v1860_v53 = vrot.slane %v1858_v12, 5  ;;  %v8093_v12 = vld [vmem:[%s8445_s17 + $0xa8] sm:$0xff] }
 0x13e   : > { %v3432_v49 = vpack.c.bf16 %v3344_v31, %v3344_v31  ;;  %3399 = vst.msk [vmem:[#allocation2 + $0x54] sm:$0xf] %vm3376_vm0, %v8348_v33  ;;  %v1845_v59 = vor.u32 %v1844_v34, %v1841_v30  ;;  %vm3465_vm10 = vsmask.f32 4368  ;;  %v2977_v7 = vsel %vm2961_vm9, %v2944_v4, %v9320_v9  ;;  %v9452_v31 = vld [vmem:[%s8445_s17 + $0xb4] sm:$0xf] }
 0x13f   : > { %v3194_v17 = vpop.f32.mrf.mxu0  ;;  %3400 = vst.msk [vmem:[#allocation2 + $0x58] sm:$0xf] %vm3376_vm0, %v8348_v33  ;;  %v1855_v11 = vor.u32 %v1854_v32, %v1850_v1  ;;  %v1254_v62 = vshrl.u32 %v7381_v48, 16  ;;  %v1257_v46 = vshll.u32 %v7381_v48, 16  ;;  %v1263_v57 = vshll.u32 %v9414_v2, 16 }
 0x140   : > { %v3468_v42 = vshrl.u32 %v3432_v49, 16  ;;  %v3277_v35 = vmul.f32 %v9327_v54, %v3194_v17  ;;  %v3471_v55 = vshll.u32 %v3432_v49, 16  ;;  %3402 = vst.msk [vmem:[#allocation2 + $0x60] sm:$0xf] %vm3376_vm0, %v8348_v33  ;;  %v2573_v60 = vpop.permute.xlu0 %2572  ;;  %2248 = vrot.lane.b32.xlu2 %v2219_v47, %s8345_s23  ;;  %v1846_v61 = vrot.slane %v1845_v59, 4  ;;  %v8072_v49 = vld [vmem:[%s8445_s17 + $0x60] sm:$0xff] }
 0x141   : > { %3403 = vst.msk [vmem:[#allocation2 + $0x64] sm:$0xf] %vm3376_vm0, %v8348_v33  ;;  %v1856_v19 = vrot.slane %v1855_v11, 4  ;;  %v3010_v13 = vsel %vm2994_vm11, %v2977_v7, %v2573_v60  ;;  %v1256_v24 = vrot.slane %v1254_v62, 4  ;;  %v1259_v26 = vrot.slane %v1257_v46, 5 }
 0x142   : > { %v9409_v52 = vrot.slane %v3468_v42, 7  ;;  %v3313_v15 = vadd.f32 %v9338_v45, %v3277_v35  ;;  %3405 = vst.msk [vmem:[#allocation2 + $0x6c] sm:$0xf] %vm3376_vm0, %v8348_v33  ;;  %v1851_v9 = vsel %vm8473_vm5, %v1846_v61, %v1850_v1  ;;  %v1265_v28 = vrot.slane %v1263_v57, 5  ;;  %v9489_v60 = vld [vmem:[%s8445_s17 + $0xb8] sm:$0xf]  ;;  %v9516_v46 = vpop.permute.xlu2 %2574 }
 0x143   : > { %3406 = vst.msk [vmem:[#allocation2 + $0x70] sm:$0xf] %vm3376_vm0, %v8348_v33  ;;  %v1861_v63 = vsel %vm8473_vm5, %v1856_v19, %v1860_v53  ;;  %v2710_v23 = vunpack.c.l.b16 %v1851_v9  ;;  %v1267_v43 = vshrl.u32 %v9414_v2, 16  ;;  %v9460_v6 = vsel %vm3027_vm12, %v3010_v13, %v2669_v56 }
 0x144   : > { %v3473_v51 = vor.u32 %v3471_v55, %v9409_v52  ;;  %v3474_v21 = vrot.slane %v9409_v52, 4  ;;  %v3345_v29 = vmax.f32 %v3313_v15, 0.0  ;;  %3408 = vst.msk [vmem:[#allocation2 + $0x78] sm:$0xf] %vm3376_vm0, %v8348_v33  ;;  %2838 = vrot.lane.b32.xlu1 %v2810_v8, %s8347_s8  ;;  %v2711_v25 = vunpack.c.l.b16 %v1861_v63  ;;  %v9497_v15 = vld [vmem:[%s8445_s17 + $0xbc] sm:$0x1] }
 0x145   : > { %3409 = vst.msk [vmem:[#allocation2 + $0x7c] sm:$0xf] %vm3376_vm0, %v8348_v33  ;;  %v1273_v41 = vshll.u32 %v9433_v16, 16  ;;  %v7352_v10 = vrot.slane %v726_v22, 9  ;;  %v1260_v30 = vor.u32 %v1259_v26, %v1256_v24  ;;  %v1269_v38 = vrot.slane %v1267_v43, 4 }
 0x146   : > { %v3792_v20 = vsel %vm9418_vm2, %v3473_v51, %v3791_v58  ;;  %v3433_v0 = vpack.c.bf16 %v3345_v29, %v3345_v29  ;;  %3411 = vst.msk [vmem:[#allocation2 + $0x84] sm:$0xf] %vm3376_vm0, %v8348_v33  ;;  %v2730_v14 = vpack.c.b16 %v2711_v25, %v2710_v23  ;;  %v873_v34 = vrot.slane %v9309_v40, 5  ;;  %v7416_v26 = vld [vmem:[%s8445_s17 + $0xa8] sm:$0xe] }
 0x147   : > { %3793 = vst [vmem:[#allocation2 + $0xc] sm:$0xf] %v3792_v20  ;;  %v3197_v44 = vpop.f32.mrf.mxu0  ;;  %v1275_v47 = vrot.slane %v1273_v41, 5  ;;  %v876_v4 = vrot.slane %v9318_v36, 5  ;;  %v1261_v1 = vrot.slane %v1260_v30, 4  ;;  %v1270_v32 = vor.u32 %v1269_v38, %v1265_v28  ;;  %v2239_v35 = vpop.permute.xlu1 %2238  ;;  %v8109_v41 = vld [vmem:[%s8445_s17 + $0xb4] sm:$0xff] }
 0x148   : > { %v3476_v18 = vshrl.u32 %v3433_v0, 16  ;;  %3412 = vst.msk [vmem:[#allocation2 + $0x88] sm:$0xf] %vm3376_vm0, %v8348_v33  ;;  %v3479_v37 = vshll.u32 %v3433_v0, 16  ;;  %v9467_v17 = vpop.permute.xlu0 %2828  ;;  %2758 = vrot.lane.b32.xlu0 %v2730_v14, %s8346_s29  ;;  %v3278_v48 = vmul.f32 %v9327_v54, %v3197_v44  ;;  %v1863_v55 = vshrl.u32 %v9452_v31, 16 }
 0x149   : > { %3414 = vst.msk [vmem:[#allocation2 + $0x90] sm:$0xf] %vm3376_vm0, %v8348_v33  ;;  %v9484_v36 = vsel %vm11605_vm6, %v8072_v49, %v2239_v35  ;;  %v874_v56 = vsel %vm8450_vm4, %v7352_v10, %v873_v34  ;;  %v875_v59 = vrot.slane %v873_v34, 4  ;;  %v1266_v58 = vsel %vm8473_vm5, %v1261_v1, %v1265_v28  ;;  %vm9503_vm6 = vmor %vm3464_vm3, %vm3465_vm10 }
 0x14a   : > { %v9471_v42 = vrot.slane %v3476_v18, 7  ;;  %3415 = vst.msk [vmem:[#allocation2 + $0x94] sm:$0xf] %vm3376_vm0, %v8348_v33  ;;  %v1271_v8 = vrot.slane %v1270_v32, 4  ;;  %v2280_v11 = vunpack.c.l.b16 %v874_v56  ;;  %v3314_v53 = vadd.f32 %v9338_v45, %v3278_v48  ;;  %v727_v56 = vld [vmem:[%s8445_s17 + $0xa8] sm:$0xe]  ;;  %vm9593_vm10 = vmand %vm3379_vm1, %vm3464_vm3 }
 0x14b   : > { %3417 = vst.msk [vmem:[#allocation2 + $0x9c] sm:$0xf] %vm3376_vm0, %v8348_v33  ;;  %v2456_v7 = vunpack.c.l.b16 %v1266_v58  ;;  %v877_v19 = vsel %vm8450_vm4, %v875_v59, %v876_v4  ;;  %v1865_v29 = vrot.slane %v1863_v55, 4  ;;  %v1866_v9 = vshll.u32 %v9452_v31, 16  ;;  %v9554_v4 = vld [vmem:[#allocation2 + $0x18] sm:$0xf] }
 0x14c   : > { %v3481_v40 = vor.u32 %v3479_v37, %v9471_v42  ;;  %3418 = vst.msk [vmem:[#allocation2 + $0xa0] sm:$0xf] %vm3376_vm0, %v8348_v33  ;;  %v3483_v61 = vrot.slane %v9471_v42, 4  ;;  %2424 = vrot.lane.b32.xlu1 %v8093_v12, %s8341_s19  ;;  %v1276_v13 = vsel %vm8473_vm5, %v1271_v8, %v1275_v47  ;;  %v2281_v62 = vunpack.c.l.b16 %v877_v19 }
 0x14d   : > { %3420 = vst.msk [vmem:[#allocation2 + $0xa8] sm:$0xf] %vm3376_vm0, %v8348_v33  ;;  %v3346_v20 = vmax.f32 %v3314_v53, 0.0  ;;  %v2457_v57 = vunpack.c.l.b16 %v1276_v13  ;;  %v1872_v22 = vshll.u32 %v9489_v60, 16  ;;  %v1876_v63 = vshrl.u32 %v9489_v60, 16 }
 0x14e   : > { %3421 = vst.msk [vmem:[#allocation2 + $0xac] sm:$0xf] %vm3376_vm0, %v8348_v33  ;;  %v1882_v23 = vshll.u32 %v9497_v15, 16  ;;  %v3482_v0 = vsel %vm9503_vm6, %v3474_v21, %v3481_v40  ;;  %v2299_v24 = vpack.c.b16 %v2281_v62, %v2280_v11  ;;  %v1868_v25 = vrot.slane %v1866_v9, 5  ;;  %v307_v11 = vld [vmem:[%s8445_s17 + $0xac] sm:$0xf] }
 0x14f   : > { %3423 = vst.msk [vmem:[#allocation2 + $0xb4] sm:$0xf] %vm3376_vm0, %v8348_v33  ;;  %v3434_v31 = vpack.c.bf16 %v3346_v20, %v3346_v20  ;;  %v2475_v28 = vpack.c.b16 %v2457_v57, %v2456_v7  ;;  %v1874_v43 = vrot.slane %v1872_v22, 5  ;;  %v1878_v18 = vrot.slane %v1876_v63, 4  ;;  %v3199_v10 = vpop.f32.mrf.mxu0  ;;  %v306_v53 = vld [vmem:[%s8445_s17 + $0xa8] sm:$0xf]  ;;  %v9587_v20 = vpop.permute.xlu2 %2830 }
 0x150   : > { %3424 = vst.msk [vmem:[#allocation2 + $0xb8] sm:$0xf] %vm3376_vm0, %v8348_v33  ;;  %v3076_v49 = vsel %vm3060_vm13, %v9460_v6, %v9387_v27  ;;  %2328 = vrot.lane.b32.xlu0 %v2299_v24, %s8343_s21  ;;  %v1869_v21 = vor.u32 %v1868_v25, %v1865_v29  ;;  %v1884_v44 = vrot.slane %v1882_v23, 5  ;;  %v2415_v37 = vpop.permute.xlu0 %2414  ;;  %v7432_v27 = vrot.slane %v7416_v26, 9  ;;  %v324_v62 = vld [vmem:[%s8445_s17 + $0xb0] sm:$0x1] }
 0x151   : > { %3426 = vst.msk [vmem:[#allocation2 + $0xc0] sm:$0xf] %vm3376_vm0, %v8348_v33  ;;  %v3485_v52 = vshrl.u32 %v3434_v31, 16  ;;  %v3109_v14 = vsel %vm3093_vm14, %v3076_v49, %v9467_v17  ;;  %2504 = vrot.lane.b32.xlu2 %v2475_v28, %s8344_s22  ;;  %v1879_v30 = vor.u32 %v1878_v18, %v1874_v43  ;;  %v1482_v6 = vrot.slane %v9414_v2, 5 }
 0x152   : > { %3427 = vst.msk [vmem:[#allocation2 + $0xc4] sm:$0xf] %vm3376_vm0, %v8348_v33  ;;  %7722 = vmatmul.msk.bf16.gmra.mxu0 %vm3146_vm15, %v3109_v14  ;;  %v1485_v38 = vrot.slane %v9433_v16, 5  ;;  %v3488_v17 = vshll.u32 %v3434_v31, 16  ;;  %v1870_v47 = vrot.slane %v1869_v21, 4  ;;  %v3279_v34 = vmul.f32 %v9327_v54, %v3199_v10 }
 0x153   : > { %3429 = vst.msk [vmem:[#allocation2 + $0xcc] sm:$0xf] %vm3376_vm0, %v8348_v33  ;;  %v9549_v12 = vrot.slane %v3485_v52, 7  ;;  %v1880_v1 = vrot.slane %v1879_v30, 4  ;;  %v1483_v2 = vsel %vm8450_vm4, %v7432_v27, %v1482_v6  ;;  %v1484_v16 = vrot.slane %v1482_v6, 4 }
 0x154   : > { %3430 = vst.msk [vmem:[#allocation2 + $0xd0] sm:$0xf] %vm3376_vm0, %v8348_v33  ;;  %2680 = vrot.lane.b32.xlu1 %v8109_v41, %s8340_s18  ;;  %v2913_v32 = vsel %vm2895_vm7, %v9484_v36, %v9446_v50  ;;  %v1875_v48 = vsel %vm8473_vm5, %v1870_v47, %v1874_v43  ;;  %v2536_v55 = vunpack.c.l.b16 %v1483_v2  ;;  %v2495_v36 = vpop.permute.xlu1 %2494  ;;  %v3315_v8 = vadd.f32 %v9338_v45, %v3279_v34 }
 0x155   : > { %3383 = vst.msk [vmem:[#allocation2 + $0x14] sm:$0x1] %vm3379_vm1, %v8348_v33  ;;  %v9564_v35 = vor.u32 %v3488_v17, %v9549_v12  ;;  %v2946_v40 = vsel %vm2928_vm8, %v2913_v32, %v2415_v37  ;;  %v1885_v59 = vsel %vm8473_vm5, %v1880_v1, %v1884_v44  ;;  %v2712_v50 = vunpack.c.l.b16 %v1875_v48 }
 0x156   : > { %3794 = vst.msk [vmem:[#allocation2 + $0x10] sm:$0xf] %vm3376_vm0, %v3482_v0  ;;  %v1486_v58 = vsel %vm8450_vm4, %v1484_v16, %v1485_v38  ;;  %v3491_v7 = vrot.slane %v9549_v12, 4  ;;  %v2713_v29 = vunpack.c.l.b16 %v1885_v59  ;;  %v3347_v9 = vmax.f32 %v3315_v8, 0.0  ;;  %v7496_v38 = vld [vmem:[%s8445_s17 + $0xb4] sm:$0xe] }
 0x157   : > { %3380 = vst.msk [vmem:[#allocation2 + $0x8] sm:$0x1] %vm3379_vm1, %v8348_v33  ;;  %v3801_v19 = vsel %vm9418_vm2, %v9564_v35, %v9554_v4  ;;  %v2537_v13 = vunpack.c.l.b16 %v1486_v58  ;;  %v7353_v57 = vrot.slane %v727_v56, 9  ;;  %v880_v22 = vrot.slane %v307_v11, 5  ;;  %v7417_v59 = vld [vmem:[%s8445_s17 + $0xb4] sm:$0xe] }
 0x158   : > { %3386 = vst.msk [vmem:[#allocation2 + $0x20] sm:$0x1] %vm3379_vm1, %v8348_v33  ;;  %v883_v63 = vrot.slane %v324_v62, 5  ;;  %v2731_v0 = vpack.c.b16 %v2713_v29, %v2712_v50  ;;  %v666_v31 = vshrl.u32 %v306_v53, 16  ;;  %v669_v25 = vshll.u32 %v306_v53, 16  ;;  %v2671_v44 = vpop.permute.xlu0 %2670  ;;  %v3202_v14 = vpop.f32.mrf.mxu0 }
 0x159   : > { %3389 = vst.msk [vmem:[#allocation2 + $0x2c] sm:$0x1] %vm3379_vm1, %v8348_v33  ;;  %v2555_v24 = vpack.c.b16 %v2537_v13, %v2536_v55  ;;  %v3435_v26 = vpack.c.bf16 %v3347_v9, %v3347_v9  ;;  %v881_v28 = vsel %vm8450_vm4, %v7353_v57, %v880_v22  ;;  %v882_v43 = vrot.slane %v880_v22, 4  ;;  %v7383_v9 = vld [vmem:[%s8445_s17 + $0xb4] sm:$0xf] }
 0x15a   : > { %3392 = vst.msk [vmem:[#allocation2 + $0x38] sm:$0x1] %vm3379_vm1, %v8348_v33  ;;  %v675_v18 = vshll.u32 %v307_v11, 16  ;;  %2760 = vrot.lane.b32.xlu2 %v2731_v0, %s8346_s29  ;;  %v2979_v49 = vsel %vm2961_vm9, %v2946_v40, %v2495_v36  ;;  %v2282_v10 = vunpack.c.l.b16 %v881_v28  ;;  %v668_v52 = vrot.slane %v666_v31, 4  ;;  %v7384_v0 = vld [vmem:[%s8445_s17 + $0xb8] sm:$0xf] }
 0x15b   : > { %3395 = vst.msk [vmem:[#allocation2 + $0x44] sm:$0x1] %vm3379_vm1, %v8348_v33  ;;  %2584 = vrot.lane.b32.xlu0 %v2555_v24, %s8342_s20  ;;  %v671_v21 = vrot.slane %v669_v25, 5  ;;  %v3493_v30 = vshrl.u32 %v3435_v26, 16  ;;  %v3496_v27 = vshll.u32 %v3435_v26, 16  ;;  %v884_v6 = vsel %vm8450_vm4, %v882_v43, %v883_v63 }
 0x15c   : > { %v3797_v41 = vld [vmem:[#allocation2 + $0x14] sm:$0x1]  ;;  %3398 = vst.msk [vmem:[#allocation2 + $0x50] sm:$0x1] %vm3379_vm1, %v8348_v33  ;;  %v2283_v17 = vunpack.c.l.b16 %v884_v6  ;;  %v677_v34 = vrot.slane %v675_v18, 5  ;;  %v679_v1 = vshrl.u32 %v307_v11, 16  ;;  %v3012_v16 = vsel %vm2994_vm11, %v2979_v49, %v9516_v46  ;;  %v9627_v8 = vpop.permute.xlu1 %2750 }
 0x15d   : > { %v3798_v37 = vsel %vm9593_vm10, %v3483_v61, %v3797_v41  ;;  %3401 = vst.msk [vmem:[#allocation2 + $0x5c] sm:$0x1] %vm3379_vm1, %v8348_v33  ;;  %v672_v47 = vor.u32 %v671_v21, %v668_v52  ;;  %v3495_v42 = vrot.slane %v3493_v30, 7  ;;  %v685_v2 = vshll.u32 %v324_v62, 16  ;;  %v8179_v11 = vld [vmem:[%s11601_s4 + $0x88] sm:$0xff] }
 0x15e   : > { %3799 = vst [vmem:[#allocation2 + $0x14] sm:$0x1] %v3798_v37  ;;  %v3280_v32 = vmul.f32 %v9327_v54, %v3202_v14  ;;  %v2300_v48 = vpack.c.b16 %v2283_v17, %v2282_v10  ;;  %v681_v40 = vrot.slane %v679_v1, 4  ;;  %v7512_v56 = vrot.slane %v7496_v38, 9  ;;  %7036 = vmatpush.bf16.msra.mxu3 %v8179_v11 }
 0x15f   : > { %3404 = vst.msk [vmem:[#allocation2 + $0x68] sm:$0x1] %vm3379_vm1, %v8348_v33  ;;  %v3804_v61 = vld [vmem:[#allocation2 + $0x20] sm:$0x1]  ;;  %v673_v55 = vrot.slane %v672_v47, 4  ;;  %v3498_v50 = vor.u32 %v3496_v27, %v3495_v42  ;;  %v3500_v36 = vrot.slane %v3495_v42, 4  ;;  %v3045_v62 = vsel %vm3027_vm12, %v3012_v16, %v2671_v44 }
 0x160   : > { %3407 = vst.msk [vmem:[#allocation2 + $0x74] sm:$0x1] %vm3379_vm1, %v8348_v33  ;;  %v687_v58 = vrot.slane %v685_v2, 5  ;;  %v2091_v46 = vrot.slane %v9489_v60, 5  ;;  %v682_v29 = vor.u32 %v681_v40, %v677_v34  ;;  %v2094_v13 = vrot.slane %v9497_v15, 5  ;;  %v9642_v60 = vpop.permute.xlu2 %2416  ;;  %v2241_v21 = vpop.permute.xlu0 %2240  ;;  %v8178_v47 = vld [vmem:[%s11601_s4 + $0x80] sm:$0xff] }
 0x161   : > { %3410 = vst.msk [vmem:[#allocation2 + $0x80] sm:$0x1] %vm3379_vm1, %v8348_v33  ;;  %v678_v53 = vsel %vm8473_vm5, %v673_v55, %v677_v34  ;;  %v3499_v57 = vsel %vm9503_vm6, %v3491_v7, %v3498_v50  ;;  %v3805_v22 = vsel %vm9593_vm10, %v3500_v36, %v3804_v61  ;;  %v3316_v25 = vadd.f32 %v9338_v45, %v3280_v32  ;;  %v7401_v7 = vld [vmem:[%s8445_s17 + $0xbc] sm:$0x1]  ;;  %v8073_v61 = vld [vmem:[%s8445_s17 + $0x6c] sm:$0xff]  ;;  %v3204_v55 = vpop.f32.mrf.mxu0 }
 0x162   : > { %3413 = vst.msk [vmem:[#allocation2 + $0x8c] sm:$0x1] %vm3379_vm1, %v8348_v33  ;;  %v2202_v63 = vunpack.c.l.b16 %v678_v53  ;;  %v2092_v15 = vsel %vm8450_vm4, %v7512_v56, %v2091_v46  ;;  %2330 = vrot.lane.b32.xlu2 %v2300_v48, %s8343_s21  ;;  %v683_v24 = vrot.slane %v682_v29, 4  ;;  %v2093_v31 = vrot.slane %v2091_v46, 4  ;;  %7037 = vmatpush.bf16.msra.mxu3 %v8178_v47  ;;  %v7497_v46 = vld [vmem:[%s8445_s17 + $0xc0] sm:$0xe] }
 0x163   : > { %3416 = vst.msk [vmem:[#allocation2 + $0x98] sm:$0x1] %vm3379_vm1, %v8348_v33  ;;  %v2792_v12 = vunpack.c.l.b16 %v2092_v15  ;;  %v7433_v26 = vrot.slane %v7417_v59, 9  ;;  %v1489_v28 = vrot.slane %v7384_v0, 5  ;;  %v1492_v43 = vrot.slane %v7401_v7, 5 }
 0x164   : > { %3419 = vst.msk [vmem:[#allocation2 + $0xa4] sm:$0x1] %vm3379_vm1, %v8348_v33  ;;  %v1278_v18 = vshrl.u32 %v7383_v9, 16  ;;  %v688_v41 = vsel %vm8473_vm5, %v683_v24, %v687_v58  ;;  %v2095_v49 = vsel %vm8450_vm4, %v2093_v31, %v2094_v13  ;;  %v3348_v10 = vmax.f32 %v3316_v25, 0.0  ;;  %v2321_v40 = vpop.permute.xlu1 %2320  ;;  %v3807_v53 = vld [vmem:[#allocation2 + $0x24] sm:$0xf] }
 0x165   : > { %3422 = vst.msk [vmem:[#allocation2 + $0xb0] sm:$0x1] %vm3379_vm1, %v8348_v33  ;;  %v1281_v52 = vshll.u32 %v7383_v9, 16  ;;  %v2203_v44 = vunpack.c.l.b16 %v688_v41  ;;  %v2793_v14 = vunpack.c.l.b16 %v2095_v49  ;;  %v1490_v37 = vsel %vm8450_vm4, %v7433_v26, %v1489_v28  ;;  %v8094_v24 = vld [vmem:[%s8445_s17 + $0xb4] sm:$0xff] }
 0x166   : > { %3425 = vst.msk [vmem:[#allocation2 + $0xbc] sm:$0x1] %vm3379_vm1, %v8348_v33  ;;  %v1491_v30 = vrot.slane %v1489_v28, 4  ;;  %v3436_v27 = vpack.c.bf16 %v3348_v10, %v3348_v10  ;;  %v2538_v6 = vunpack.c.l.b16 %v1490_v37  ;;  %v1280_v38 = vrot.slane %v1278_v18, 4 }
 0x167   : > { %3428 = vst.msk [vmem:[#allocation2 + $0xc8] sm:$0x1] %vm3379_vm1, %v8348_v33  ;;  %v1283_v17 = vrot.slane %v1281_v52, 5  ;;  %v2220_v34 = vpack.c.b16 %v2203_v44, %v2202_v63  ;;  %v2811_v1 = vpack.c.b16 %v2793_v14, %v2792_v12  ;;  %v1291_v35 = vshrl.u32 %v7384_v0, 16  ;;  %v7464_v63 = vld [vmem:[%s8445_s17 + $0xc4] sm:$0xf] }
 0x168   : > { %3431 = vst.msk [vmem:[#allocation2 + $0xd4] sm:$0x1] %vm3379_vm1, %v8348_v33  ;;  %v1493_v42 = vsel %vm8450_vm4, %v1491_v30, %v1492_v43  ;;  %v1287_v33 = vshll.u32 %v7384_v0, 16  ;;  %v3502_v2 = vshrl.u32 %v3436_v27, 16  ;;  %v3505_v16 = vshll.u32 %v3436_v27, 16  ;;  %v9693_v11 = vpop.permute.xlu2 %2672  ;;  %v2497_v18 = vpop.permute.xlu0 %2496 }
 0x169   : > { %3802 = vst [vmem:[#allocation2 + $0x18] sm:$0xf] %v3801_v19  ;;  %v2539_v32 = vunpack.c.l.b16 %v1493_v42  ;;  %v1284_v48 = vor.u32 %v1283_v17, %v1280_v38  ;;  %2250 = vrot.lane.b32.xlu1 %v2220_v34, %s8345_s23  ;;  %2840 = vrot.lane.b32.xlu0 %v2811_v1, %s8347_s8  ;;  %v1297_v19 = vshll.u32 %v7401_v7, 16  ;;  %v3078_v56 = vsel %vm3060_vm13, %v3045_v62, %v9627_v8  ;;  %v7463_v62 = vld [vmem:[%s8445_s17 + $0xc0] sm:$0xf]  ;;  %v8074_v17 = vld [vmem:[%s8445_s17 + $0x78] sm:$0xff] }
 0x16a   : > { %3803 = vst.msk [vmem:[#allocation2 + $0x1c] sm:$0xf] %vm3376_vm0, %v3499_v57  ;;  %v1289_v4 = vrot.slane %v1287_v33, 5  ;;  %v9688_v59 = vrot.slane %v3502_v2, 7  ;;  %v3111_v58 = vsel %vm3093_vm14, %v3078_v56, %v9587_v20  ;;  %v1293_v29 = vrot.slane %v1291_v35, 4 }
 0x16b   : > { %3806 = vst [vmem:[#allocation2 + $0x20] sm:$0x1] %v3805_v22  ;;  %v2556_v50 = vpack.c.b16 %v2539_v32, %v2538_v6  ;;  %v1285_v36 = vrot.slane %v1284_v48, 4  ;;  %7723 = vmatmul.msk.bf16.gmra.mxu0 %vm3146_vm15, %v3111_v58  ;;  %vm11619_vm3 = vcmask 31744   ;;  %v3281_v8 = vmul.f32 %v9327_v54, %v3204_v55  ;;  %v7481_v12 = vld [vmem:[%s8445_s17 + $0xc8] sm:$0x1] }
 0x16c   : > { %v2876_v13 = vsel %vm11619_vm3, %v8073_v61, %v2241_v21  ;;  %v3507_v9 = vor.u32 %v3505_v16, %v9688_v59  ;;  %v1299_v57 = vrot.slane %v1297_v19, 5  ;;  %v1294_v15 = vor.u32 %v1293_v29, %v1289_v4  ;;  %v2577_v32 = vpop.permute.xlu1 %2576  ;;  %v9720_v19 = vld [vmem:[#allocation2 + $0x10] sm:$0xf]  ;;  %vm11620_vm1 = vmmov %vm11619_vm3 }
 0x16d   : > { %2586 = vrot.lane.b32.xlu2 %v2556_v50, %s8342_s20  ;;  %v1290_v20 = vsel %vm8473_vm5, %v1285_v36, %v1289_v4  ;;  %v2915_v22 = vsel %vm2895_vm7, %v2876_v13, %v2321_v40  ;;  %v3317_v31 = vadd.f32 %v9338_v45, %v3281_v8  ;;  %v7513_v25 = vrot.slane %v7497_v46, 9  ;;  %v4945_v40 = vld [vmem:[#allocation2 + $0xc] sm:$0xe]  ;;  %v3811_v36 = vld [vmem:[#allocation2 + $0x2c] sm:$0x1]  ;;  %vm11621_vm3 = vmmov %vm11620_vm1 }
 0x16e   : > { %v2458_v0 = vunpack.c.l.b16 %v1290_v20  ;;  %v3808_v7 = vsel %vm9418_vm2, %v3507_v9, %v3807_v53  ;;  %v2098_v26 = vrot.slane %v7464_v63, 5  ;;  %v2101_v28 = vrot.slane %v7481_v12, 5  ;;  %v8110_v53 = vld [vmem:[%s8445_s17 + $0xc0] sm:$0xff]  ;;  %v9729_v9 = vld [vmem:[#allocation2 + $0x14] sm:$0x1] }
 0x16f   : > { %v1887_v43 = vshrl.u32 %v7463_v62, 16  ;;  %3809 = vst [vmem:[#allocation2 + $0x24] sm:$0xf] %v3808_v7  ;;  %v1295_v41 = vrot.slane %v1294_v15, 4  ;;  %v3349_v49 = vmax.f32 %v3317_v31, 0.0  ;;  %v1890_v10 = vshll.u32 %v7463_v62, 16  ;;  %v3207_v15 = vpop.f32.mrf.mxu0 }
 0x170   : > { %v1896_v52 = vshll.u32 %v7464_v63, 16  ;;  %v2099_v21 = vsel %vm8450_vm4, %v7513_v25, %v2098_v26  ;;  %v2100_v44 = vrot.slane %v2098_v26, 4  ;;  %v1900_v37 = vshrl.u32 %v7464_v63, 16  ;;  %v2243_v56 = vpop.permute.xlu2 %2242  ;;  %v5554_v25 = vld [vmem:[#allocation2 + $0x18] sm:$0xe] }
 0x171   : > { %v1889_v14 = vrot.slane %v1887_v43, 4  ;;  %v1300_v30 = vsel %vm8473_vm5, %v1295_v41, %v1299_v57  ;;  %2426 = vrot.lane.b32.xlu0 %v8094_v24, %s8341_s19  ;;  %v3437_v27 = vpack.c.bf16 %v3349_v49, %v3349_v49  ;;  %v2794_v6 = vunpack.c.l.b16 %v2099_v21  ;;  %v9738_v7 = vld [vmem:[#allocation2 + $0x4] sm:$0xf]  ;;  %v9740_v26 = vld [vmem:[#allocation2 + $0x8] sm:$0x1] }
 0x172   : > { %v1892_v38 = vrot.slane %v1890_v10, 5  ;;  %v2459_v47 = vunpack.c.l.b16 %v1300_v30  ;;  %v2102_v34 = vsel %vm8450_vm4, %v2100_v44, %v2101_v28  ;;  %v1898_v1 = vrot.slane %v1896_v52, 5  ;;  %v5123_v49 = vld [vmem:[#allocation2 + $0x1c] sm:$0xf]  ;;  %v9748_v10 = vld [vmem:[#allocation2 + $0x20] sm:$0x1] }
 0x173   : > { %v1902_v42 = vrot.slane %v1900_v37, 4  ;;  %v3510_v33 = vshrl.u32 %v3437_v27, 16  ;;  %v3513_v61 = vshll.u32 %v3437_v27, 16  ;;  %v2795_v2 = vunpack.c.l.b16 %v2102_v34  ;;  %v4337_v37 = vld [vmem:[#allocation2] sm:$0xe] }
 0x174   : > { %v1893_v16 = vor.u32 %v1892_v38, %v1889_v14  ;;  %v2476_v48 = vpack.c.b16 %v2459_v47, %v2458_v0  ;;  %v1906_v4 = vshll.u32 %v7481_v12, 16  ;;  %v2948_v35 = vsel %vm2928_vm8, %v2915_v22, %v9642_v60  ;;  %v2753_v12 = vpop.permute.xlu0 %2752 }
 0x175   : > { %v1903_v55 = vor.u32 %v1902_v42, %v1898_v1  ;;  %v3512_v50 = vrot.slane %v3510_v33, 7  ;;  %v2812_v58 = vpack.c.b16 %v2795_v2, %v2794_v6  ;;  %v2981_v29 = vsel %vm2961_vm9, %v2948_v35, %v2497_v18  ;;  %v8130_v42 = vld [vmem:[#allocation2 + $0xc] sm:$0xff] }
 0x176   : > { %v1894_v46 = vrot.slane %v1893_v16, 4  ;;  %v9725_v13 = vsel %vm11620_vm1, %v8074_v17, %v2243_v56  ;;  %v3508_v8 = vrot.slane %v9688_v59, 4  ;;  %2506 = vrot.lane.b32.xlu1 %v2476_v48, %s8344_s22  ;;  %v1908_v60 = vrot.slane %v1906_v4, 5  ;;  %v5122_v16 = vld [vmem:[#allocation2 + $0x18] sm:$0xf] }
 0x177   : > { %v1904_v62 = vrot.slane %v1903_v55, 4  ;;  %v3515_v20 = vor.u32 %v3513_v61, %v3512_v50  ;;  %v3517_v57 = vrot.slane %v3512_v50, 4  ;;  %2842 = vrot.lane.b32.xlu2 %v2812_v58, %s8347_s8  ;;  %v3014_v63 = vsel %vm2994_vm11, %v2981_v29, %v2577_v32 }
 0x178   : > { %v1899_v22 = vsel %vm8473_vm5, %v1894_v46, %v1898_v1  ;;  %v7747_v24 = vrot.slane %v4945_v40, 9  ;;  %v5011_v31 = vrot.slane %v9720_v19, 5  ;;  %v5014_v41 = vrot.slane %v9729_v9, 5 }
 0x179   : > { %v1909_v0 = vsel %vm8473_vm5, %v1904_v62, %v1908_v60  ;;  %v2714_v59 = vunpack.c.l.b16 %v1899_v22  ;;  %v3516_v28 = vsel %vm9503_vm6, %v3508_v8, %v3515_v20  ;;  %v3812_v43 = vsel %vm9593_vm10, %v3517_v57, %v3811_v36  ;;  %2682 = vrot.lane.b32.xlu0 %v8110_v53, %s8340_s18  ;;  %v3905_v60 = vld [vmem:[#allocation2] sm:$0xf]  ;;  %v8146_v20 = vld [vmem:[#allocation2 + $0x18] sm:$0xff] }
 0x17a   : > { %v2715_v18 = vunpack.c.l.b16 %v1909_v0  ;;  %3810 = vst.msk [vmem:[#allocation2 + $0x28] sm:$0xf] %vm3376_vm0, %v3516_v28  ;;  %v5012_v52 = vsel %vm8450_vm4, %v7747_v24, %v5011_v31  ;;  %v5013_v21 = vrot.slane %v5011_v31, 4  ;;  %v3282_v44 = vmul.f32 %v9327_v54, %v3207_v15  ;;  %v2833_v54 = vpop.permute.xlu1 %2832 }
 0x17b   : > { %v3047_v14 = vsel %vm3027_vm12, %v3014_v63, %v9693_v11  ;;  %3813 = vst [vmem:[#allocation2 + $0x2c] sm:$0x1] %v3812_v43  ;;  %v6098_v27 = vunpack.c.l.b16 %v5012_v52  ;;  %v7763_v38 = vrot.slane %v5554_v25, 9  ;;  %v5620_v34 = vrot.slane %v5123_v49, 5 }
 0x17c   : > { %v2732_v30 = vpack.c.b16 %v2715_v18, %v2714_v59  ;;  %v3080_v6 = vsel %vm3060_vm13, %v3047_v14, %v2753_v12  ;;  %v5015_v17 = vsel %vm8450_vm4, %v5013_v21, %v5014_v41  ;;  %v3318_v47 = vadd.f32 %v9338_v45, %v3282_v44  ;;  %v3814_v18 = vld [vmem:[#allocation2 + $0x30] sm:$0xf]  ;;  %v3209_v14 = vpop.f32.mrf.mxu0 }
 0x17d   : > { %v5623_v1 = vrot.slane %v9748_v10, 5  ;;  %v6099_v33 = vunpack.c.l.b16 %v5015_v17  ;;  %v7731_v61 = vrot.slane %v4337_v37, 9  ;;  %v4403_v11 = vrot.slane %v9738_v7, 5 }
 0x17e   : > { %v4406_v2 = vrot.slane %v9740_v26, 5  ;;  %2762 = vrot.lane.b32.xlu1 %v2732_v30, %s8346_s29  ;;  %v3350_v32 = vmax.f32 %v3318_v47, 0.0  ;;  %v5621_v48 = vsel %vm8450_vm4, %v7763_v38, %v5620_v34  ;;  %v5622_v55 = vrot.slane %v5620_v34, 4 }
 0x17f   : > { %v3113_v45 = vsel %vm3093_vm14, %v3080_v6, %v2833_v54  ;;  %6018 = vrot.lane.b32.xlu2 %v8130_v42, %s8349_s16  ;;  %v6130_v4 = vpack.c.b16 %v6099_v33, %v6098_v27  ;;  %v6354_v35 = vunpack.c.l.b16 %v5621_v48  ;;  %v4404_v40 = vsel %vm8450_vm4, %v7731_v61, %v4403_v11  ;;  %v2323_v27 = vpop.permute.xlu0 %2322  ;;  %v9791_v54 = vld [vmem:[%s11599_s2] ss:$0 sm:$0xff]  ;;  %v728_v61 = vld [vmem:[%s8445_s17 + $0xb4] sm:$0xe] }
 0x180   : > { %v4405_v56 = vrot.slane %v4403_v11, 4  ;;  %7724 = vmatmul.msk.bf16.gmra.mxu0 %vm3146_vm15, %v3113_v45  ;;  %v3438_v50 = vpack.c.bf16 %v3350_v32, %v3350_v32  ;;  %v5624_v36 = vsel %vm8450_vm4, %v5622_v55, %v5623_v1  ;;  %v5874_v58 = vunpack.c.l.b16 %v4404_v40  ;;  %v9807_v40 = vld [vmem:[%s8445_s17 + $0xbc] sm:$0x1] }
 0x181   : > { %v5171_v46 = vshrl.u32 %v5122_v16, 16  ;;  %6146 = vrot.lane.b32.xlu0 %v6130_v4, %s8347_s8  ;;  %v6355_v53 = vunpack.c.l.b16 %v5624_v36  ;;  %v5174_v8 = vshll.u32 %v5122_v16, 16  ;;  %v5180_v62 = vshll.u32 %v5123_v49, 16  ;;  %v9803_v4 = vld [vmem:[%s11600_s3] ss:$0 sm:$0xff] }
 0x182   : > { %v4407_v29 = vsel %vm8450_vm4, %v4405_v56, %v4406_v2  ;;  %v3519_v57 = vshrl.u32 %v3438_v50, 16  ;;  %v3522_v22 = vshll.u32 %v3438_v50, 16  ;;  %v5184_v31 = vshrl.u32 %v5123_v49, 16  ;;  %v2419_v32 = vpop.permute.xlu1 %2418  ;;  %v308_v56 = vld [vmem:[%s8445_s17 + $0xb4] sm:$0xf]  ;;  %v2499_v50 = vpop.permute.xlu2 %2498 }
 0x183   : > { %v5875_v63 = vunpack.c.l.b16 %v4407_v29  ;;  %v5173_v15 = vrot.slane %v5171_v46, 4  ;;  %v6386_v0 = vpack.c.b16 %v6355_v53, %v6354_v35  ;;  %v5176_v59 = vrot.slane %v5174_v8, 5 }
 0x184   : > { %v5182_v24 = vrot.slane %v5180_v62, 5  ;;  %v9776_v12 = vrot.slane %v3519_v57, 7  ;;  %v5190_v28 = vshll.u32 %v9748_v10, 16  ;;  %v3954_v43 = vshrl.u32 %v3905_v60, 16 }
 0x185   : > { %v5906_v25 = vpack.c.b16 %v5875_v63, %v5874_v58  ;;  %8043 = vmatmul.msk.bf16.vlgmr.msra.gmra.mxu3 %vm3093_vm14, %v6386_v0  ;;  %v5177_v41 = vor.u32 %v5176_v59, %v5173_v15  ;;  %v5186_v52 = vrot.slane %v5184_v31, 4  ;;  %v3957_v21 = vshll.u32 %v3905_v60, 16 }
 0x186   : > { %v3963_v44 = vshll.u32 %v9738_v7, 16  ;;  %6242 = vrot.lane.b32.xlu1 %v8146_v20, %s8350_s9  ;;  %v3524_v49 = vor.u32 %v3522_v22, %v9776_v12  ;;  %v3525_v37 = vrot.slane %v9776_v12, 4  ;;  %v5192_v30 = vrot.slane %v5190_v28, 5 }
 0x187   : > { %v3956_v10 = vrot.slane %v3954_v43, 4  ;;  %v5178_v6 = vrot.slane %v5177_v41, 4  ;;  %v5187_v38 = vor.u32 %v5186_v52, %v5182_v24  ;;  %v3959_v17 = vrot.slane %v3957_v21, 5 }
 0x188   : > { %v3965_v47 = vrot.slane %v3963_v44, 5  ;;  %v3815_v34 = vsel %vm9418_vm2, %v3524_v49, %v3814_v18  ;;  %v3967_v1 = vshrl.u32 %v9738_v7, 16  ;;  %v3973_v42 = vshll.u32 %v9740_v26, 16  ;;  %v309_v26 = vld [vmem:[%s8445_s17 + $0xb8] sm:$0xf] }
 0x189   : > { %v3283_v33 = vmul.f32 %v9791_v54, %v3209_v14  ;;  %3816 = vst [vmem:[#allocation2 + $0x30] sm:$0xf] %v3815_v34  ;;  %v5183_v11 = vsel %vm8473_vm5, %v5178_v6, %v5182_v24  ;;  %v5188_v2 = vrot.slane %v5187_v38, 4  ;;  %v3960_v16 = vor.u32 %v3959_v17, %v3956_v10  ;;  %v3818_v44 = vld [vmem:[#allocation2 + $0x38] sm:$0x1]  ;;  %v2579_v17 = vpop.permute.xlu0 %2578 }
 0x18a   : > { %v2917_v7 = vsel %vm2895_vm7, %v9725_v13, %v2323_v27  ;;  %v6274_v48 = vunpack.c.l.b16 %v5183_v11  ;;  %v3969_v55 = vrot.slane %v3967_v1, 4  ;;  %v3975_v45 = vrot.slane %v3973_v42, 5  ;;  %v8095_v1 = vld [vmem:[%s8445_s17 + $0xc0] sm:$0xff] }
 0x18b   : > { %v3319_v35 = vadd.f32 %v9803_v4, %v3283_v33  ;;  %v5193_v36 = vsel %vm8473_vm5, %v5188_v2, %v5192_v30  ;;  %v3961_v13 = vrot.slane %v3960_v16, 4  ;;  %v2950_v58 = vsel %vm2928_vm8, %v2917_v7, %v2419_v32  ;;  %v5555_v11 = vld [vmem:[#allocation2 + $0x24] sm:$0xe] }
 0x18c   : > { %v7354_v46 = vrot.slane %v728_v61, 9  ;;  %v6275_v53 = vunpack.c.l.b16 %v5193_v36  ;;  %v3970_v29 = vor.u32 %v3969_v55, %v3965_v47  ;;  %v887_v62 = vrot.slane %v309_v26, 5  ;;  %v9830_v55 = vld [vmem:[%s8445_s17 + $0xc8] sm:$0x1] }
 0x18d   : > { %v3351_v8 = vmax.f32 %v3319_v35, 0.0  ;;  %v3966_v60 = vsel %vm8473_vm5, %v3961_v13, %v3965_v47  ;;  %v890_v20 = vrot.slane %v9807_v40, 5  ;;  %v690_v57 = vshrl.u32 %v308_v56, 16  ;;  %v7418_v47 = vld [vmem:[%s8445_s17 + $0xc0] sm:$0xe] }
 0x18e   : > { %v693_v22 = vshll.u32 %v308_v56, 16  ;;  %5922 = vrot.lane.b32.xlu1 %v5906_v25, %s8350_s9  ;;  %v6306_v63 = vpack.c.b16 %v6275_v53, %v6274_v48  ;;  %v3971_v15 = vrot.slane %v3970_v29, 4  ;;  %v5794_v0 = vunpack.c.l.b16 %v3966_v60  ;;  %v7386_v48 = vld [vmem:[%s8445_s17 + $0xc4] sm:$0xf]  ;;  %v9838_v56 = vld [vmem:[#allocation2 + $0x28] sm:$0xf] }
 0x18f   : > { %v3439_v59 = vpack.c.bf16 %v3351_v8, %v3351_v8  ;;  %v888_v24 = vsel %vm8450_vm4, %v7354_v46, %v887_v62  ;;  %v889_v31 = vrot.slane %v887_v62, 4  ;;  %v692_v28 = vrot.slane %v690_v57, 4  ;;  %v7385_v29 = vld [vmem:[%s8445_s17 + $0xc0] sm:$0xf] }
 0x190   : > { %v695_v43 = vrot.slane %v693_v22, 5  ;;  %6322 = vrot.lane.b32.xlu2 %v6306_v63, %s8349_s16  ;;  %v3976_v18 = vsel %vm8473_vm5, %v3971_v15, %v3975_v45  ;;  %v2284_v25 = vunpack.c.l.b16 %v888_v24  ;;  %v699_v30 = vshll.u32 %v309_v26, 16 }
 0x191   : > { %v3527_v41 = vshrl.u32 %v3439_v59, 16  ;;  %v3530_v52 = vshll.u32 %v3439_v59, 16  ;;  %v5795_v21 = vunpack.c.l.b16 %v3976_v18  ;;  %v891_v14 = vsel %vm8450_vm4, %v889_v31, %v890_v20 }
 0x192   : > { %v696_v49 = vor.u32 %v695_v43, %v692_v28  ;;  %v2285_v27 = vunpack.c.l.b16 %v891_v14  ;;  %v703_v6 = vshrl.u32 %v309_v26, 16  ;;  %v709_v38 = vshll.u32 %v9807_v40, 16  ;;  %v9832_v26 = vpop.permute.xlu2 %2754 }
 0x193   : > { %v3529_v10 = vrot.slane %v3527_v41, 7  ;;  %v5826_v34 = vpack.c.b16 %v5795_v21, %v5794_v0  ;;  %v701_v33 = vrot.slane %v699_v30, 5  ;;  %v2983_v61 = vsel %vm2961_vm9, %v2950_v58, %v2499_v50  ;;  %v9840_v50 = vld [vmem:[#allocation2 + $0x2c] sm:$0x1]  ;;  %v2675_v58 = vpop.permute.xlu1 %2674  ;;  %v3212_v21 = vpop.f32.mrf.mxu0 }
 0x194   : > { %v697_v42 = vrot.slane %v696_v49, 4  ;;  %v2301_v7 = vpack.c.b16 %v2285_v27, %v2284_v25  ;;  %v705_v32 = vrot.slane %v703_v6, 4  ;;  %v3016_v35 = vsel %vm2994_vm11, %v2983_v61, %v2579_v17  ;;  %v8111_v49 = vld [vmem:[%s8445_s17 + $0xcc] sm:$0xff] }
 0x195   : > { %v3532_v2 = vor.u32 %v3530_v52, %v3529_v10  ;;  %v3534_v16 = vrot.slane %v3529_v10, 4  ;;  %5842 = vrot.lane.b32.xlu0 %v5826_v34, %s8347_s8  ;;  %v7434_v40 = vrot.slane %v7418_v47, 9  ;;  %v711_v53 = vrot.slane %v709_v38, 5  ;;  %v7498_v27 = vld [vmem:[%s8445_s17 + $0xcc] sm:$0xe] }
 0x196   : > { %v702_v45 = vsel %vm8473_vm5, %v697_v42, %v701_v33  ;;  %2332 = vrot.lane.b32.xlu1 %v2301_v7, %s8343_s21  ;;  %v706_v46 = vor.u32 %v705_v32, %v701_v33  ;;  %v3049_v62 = vsel %vm3027_vm12, %v3016_v35, %v2675_v58  ;;  %v1496_v60 = vrot.slane %v7386_v48, 5  ;;  %v9870_v34 = vld [vmem:[%s8445_s17 + $0xd0] sm:$0xf]  ;;  %v8075_v7 = vld [vmem:[%s8445_s17 + $0x84] sm:$0xff]  ;;  %v2835_v35 = vpop.permute.xlu0 %2834 }
 0x197   : > { %v3533_v36 = vsel %vm9503_vm6, %v3525_v37, %v3532_v2  ;;  %v3819_v13 = vsel %vm9593_vm10, %v3534_v16, %v3818_v44  ;;  %v2204_v8 = vunpack.c.l.b16 %v702_v45  ;;  %v1499_v12 = vrot.slane %v9830_v55, 5 }
 0x198   : > { %3817 = vst.msk [vmem:[#allocation2 + $0x34] sm:$0xf] %vm3376_vm0, %v3533_v36  ;;  %2428 = vrot.lane.b32.xlu2 %v8095_v1, %s8341_s19  ;;  %v707_v37 = vrot.slane %v706_v46, 4  ;;  %v7764_v20 = vrot.slane %v5555_v11, 9  ;;  %v5627_v57 = vrot.slane %v9838_v56, 5  ;;  %v5630_v22 = vrot.slane %v9840_v50, 5 }
 0x199   : > { %3820 = vst [vmem:[#allocation2 + $0x38] sm:$0x1] %v3819_v13  ;;  %v1497_v63 = vsel %vm8450_vm4, %v7434_v40, %v1496_v60  ;;  %v1498_v15 = vrot.slane %v1496_v60, 4  ;;  %v1302_v0 = vshrl.u32 %v7385_v29, 16  ;;  %v1305_v59 = vshll.u32 %v7385_v29, 16 }
 0x19a   : > { %v712_v24 = vsel %vm8473_vm5, %v707_v37, %v711_v53  ;;  %v2540_v31 = vunpack.c.l.b16 %v1497_v63  ;;  %v5628_v28 = vsel %vm8450_vm4, %v7764_v20, %v5627_v57  ;;  %v5629_v43 = vrot.slane %v5627_v57, 4  ;;  %v9873_v1 = vld [vmem:[%s8445_s17 + $0xd4] sm:$0x1]  ;;  %v9876_v2 = vpop.permute.xlu2 %2324  ;;  %v4516_v53 = vld [vmem:[#allocation2 + $0x1c] sm:$0xf] }
 0x19b   : > { %v2205_v18 = vunpack.c.l.b16 %v712_v24  ;;  %v1500_v41 = vsel %vm8450_vm4, %v1498_v15, %v1499_v12  ;;  %v6356_v52 = vunpack.c.l.b16 %v5628_v28  ;;  %v1304_v25 = vrot.slane %v1302_v0, 4  ;;  %v2245_v29 = vpop.permute.xlu1 %2244  ;;  %v4946_v20 = vld [vmem:[#allocation2 + $0x18] sm:$0xe]  ;;  %v7465_v57 = vld [vmem:[%s8445_s17 + $0xcc] sm:$0xf] }
 0x19c   : > { %v2541_v44 = vunpack.c.l.b16 %v1500_v41  ;;  %v5631_v14 = vsel %vm8450_vm4, %v5629_v43, %v5630_v22  ;;  %v1307_v30 = vrot.slane %v1305_v59, 5  ;;  %v1311_v10 = vshll.u32 %v7386_v48, 16  ;;  %v4546_v59 = vld [vmem:[#allocation2 + $0x20] sm:$0x1] }
 0x19d   : > { %v2221_v6 = vpack.c.b16 %v2205_v18, %v2204_v8  ;;  %v6357_v38 = vunpack.c.l.b16 %v5631_v14  ;;  %v1315_v17 = vshrl.u32 %v7386_v48, 16  ;;  %v1321_v47 = vshll.u32 %v9830_v55, 16  ;;  %v3214_v14 = vpop.f32.mrf.mxu0 }
 0x19e   : > { %v2557_v42 = vpack.c.b16 %v2541_v44, %v2540_v31  ;;  %v1308_v33 = vor.u32 %v1307_v30, %v1304_v25  ;;  %v1313_v61 = vrot.slane %v1311_v10, 5  ;;  %v3284_v11 = vmul.f32 %v9791_v54, %v3212_v21 }
 0x19f   : > { %2252 = vrot.lane.b32.xlu0 %v2221_v6, %s8345_s23  ;;  %v6387_v16 = vpack.c.b16 %v6357_v38, %v6356_v52  ;;  %v1317_v32 = vrot.slane %v1315_v17, 4  ;;  %v7514_v45 = vrot.slane %v7498_v27, 9  ;;  %v2105_v40 = vrot.slane %v9870_v34, 5 }
 0x1a0   : > { %2588 = vrot.lane.b32.xlu1 %v2557_v42, %s8342_s20  ;;  %2684 = vrot.lane.b32.xlu2 %v8111_v49, %s8340_s18  ;;  %v1309_v48 = vrot.slane %v1308_v33, 4  ;;  %v3320_v55 = vadd.f32 %v9803_v4, %v3284_v11  ;;  %v2108_v36 = vrot.slane %v9873_v1, 5  ;;  %v1323_v58 = vrot.slane %v1321_v47, 5  ;;  %v3821_v33 = vld [vmem:[#allocation2 + $0x3c] sm:$0xf] }
 0x1a1   : > { %8044 = vmatmul.msk.bf16.gmra.mxu3 %vm3093_vm14, %v6387_v16  ;;  %v1318_v13 = vor.u32 %v1317_v32, %v1313_v61  ;;  %v3082_v46 = vsel %vm3060_vm13, %v3049_v62, %v9832_v26  ;;  %v2106_v12 = vsel %vm8450_vm4, %v7514_v45, %v2105_v40  ;;  %v2107_v37 = vrot.slane %v2105_v40, 4 }
 0x1a2   : > { %v1314_v8 = vsel %vm8473_vm5, %v1309_v48, %v1313_v61  ;;  %v3352_v60 = vmax.f32 %v3320_v55, 0.0  ;;  %v2882_v22 = vsel %vm11621_vm3, %v8075_v7, %v2245_v29  ;;  %v2796_v15 = vunpack.c.l.b16 %v2106_v12  ;;  %v9905_v42 = vpop.permute.xlu2 %2580  ;;  %vm11622_vm3 = vmmov %vm11620_vm1 }
 0x1a3   : > { %v1319_v63 = vrot.slane %v1318_v13, 4  ;;  %v3115_v0 = vsel %vm3093_vm14, %v3082_v46, %v2835_v35  ;;  %v2460_v26 = vunpack.c.l.b16 %v1314_v8  ;;  %v2109_v24 = vsel %vm8450_vm4, %v2107_v37, %v2108_v36  ;;  %v5124_v35 = vld [vmem:[#allocation2 + $0x24] sm:$0xf]  ;;  %v2421_v46 = vpop.permute.xlu0 %2420 }
 0x1a4   : > { %v3440_v62 = vpack.c.bf16 %v3352_v60, %v3352_v60  ;;  %7725 = vmatmul.msk.bf16.gmra.mxu0 %vm3146_vm15, %v3115_v0  ;;  %v5018_v31 = vrot.slane %v4516_v53, 5  ;;  %v2797_v43 = vunpack.c.l.b16 %v2109_v24  ;;  %v7748_v18 = vrot.slane %v4946_v20, 9  ;;  %v2501_v0 = vpop.permute.xlu1 %2500 }
 0x1a5   : > { %v1324_v28 = vsel %vm8473_vm5, %v1319_v63, %v1323_v58  ;;  %v1911_v41 = vshrl.u32 %v7465_v57, 16  ;;  %v5021_v44 = vrot.slane %v4546_v59, 5  ;;  %v1914_v17 = vshll.u32 %v7465_v57, 16 }
 0x1a6   : > { %v2461_v52 = vunpack.c.l.b16 %v1324_v28  ;;  %v3536_v25 = vshrl.u32 %v3440_v62, 16  ;;  %v3539_v21 = vshll.u32 %v3440_v62, 16  ;;  %v2813_v49 = vpack.c.b16 %v2797_v43, %v2796_v15  ;;  %v3907_v43 = vld [vmem:[#allocation2 + $0xc] sm:$0xf] }
 0x1a7   : > { %v5019_v30 = vsel %vm8450_vm4, %v7748_v18, %v5018_v31  ;;  %v5020_v10 = vrot.slane %v5018_v31, 4  ;;  %v1913_v27 = vrot.slane %v1911_v41, 4  ;;  %v1920_v47 = vshll.u32 %v9870_v34, 16 }
 0x1a8   : > { %v2477_v6 = vpack.c.b16 %v2461_v52, %v2460_v26  ;;  %v9902_v38 = vrot.slane %v3536_v25, 7  ;;  %2844 = vrot.lane.b32.xlu1 %v2813_v49, %s8347_s8  ;;  %v1924_v11 = vshrl.u32 %v9870_v34, 16  ;;  %v1930_v16 = vshll.u32 %v9873_v1, 16 }
 0x1a9   : > { %v5022_v61 = vsel %vm8450_vm4, %v5020_v10, %v5021_v44  ;;  %v3285_v7 = vmul.f32 %v9791_v54, %v3214_v14  ;;  %v6100_v45 = vunpack.c.l.b16 %v5019_v30  ;;  %v1916_v55 = vrot.slane %v1914_v17, 5  ;;  %v3825_v17 = vld [vmem:[#allocation2 + $0x44] sm:$0x1] }
 0x1aa   : > { %2508 = vrot.lane.b32.xlu0 %v2477_v6, %s8344_s22  ;;  %v3541_v32 = vor.u32 %v3539_v21, %v9902_v38  ;;  %v6101_v48 = vunpack.c.l.b16 %v5022_v61  ;;  %v3542_v40 = vrot.slane %v9902_v38, 4  ;;  %v1922_v36 = vrot.slane %v1920_v47, 5  ;;  %v9931_v21 = vld [vmem:[#allocation2 + $0x10] sm:$0xf]  ;;  %v9933_v30 = vpop.permute.xlu2 %2836 }
 0x1ab   : > { %v1926_v13 = vrot.slane %v1924_v11, 4  ;;  %v3321_v58 = vadd.f32 %v9803_v4, %v3285_v7  ;;  %v1917_v53 = vor.u32 %v1916_v55, %v1913_v27  ;;  %v1932_v29 = vrot.slane %v1930_v16, 5  ;;  %v9936_v7 = vld [vmem:[#allocation2 + $0x14] sm:$0x1] }
 0x1ac   : > { %v3822_v34 = vsel %vm9418_vm2, %v3541_v32, %v3821_v33  ;;  %v6131_v1 = vpack.c.b16 %v6101_v48, %v6100_v45  ;;  %v2919_v12 = vsel %vm2895_vm7, %v2882_v22, %v9876_v2  ;;  %v5195_v37 = vshrl.u32 %v5124_v35, 16 }
 0x1ad   : > { %3823 = vst [vmem:[#allocation2 + $0x3c] sm:$0xf] %v3822_v34  ;;  %v1927_v8 = vor.u32 %v1926_v13, %v1922_v36  ;;  %v3353_v60 = vmax.f32 %v3321_v58, 0.0  ;;  %v1918_v20 = vrot.slane %v1917_v53, 4  ;;  %v2952_v57 = vsel %vm2928_vm8, %v2919_v12, %v2421_v46  ;;  %v2677_v13 = vpop.permute.xlu0 %2676  ;;  %v3217_v58 = vpop.f32.mrf.mxu0  ;;  %v9946_v53 = vld [vmem:[#allocation2 + $0x34] sm:$0xf] }
 0x1ae   : > { %6148 = vrot.lane.b32.xlu2 %v6131_v1, %s8347_s8  ;;  %v5198_v63 = vshll.u32 %v5124_v35, 16  ;;  %v5204_v15 = vshll.u32 %v9838_v56, 16  ;;  %v5197_v62 = vrot.slane %v5195_v37, 4  ;;  %v5208_v24 = vshrl.u32 %v9838_v56, 16 }
 0x1af   : > { %v1928_v59 = vrot.slane %v1927_v8, 4  ;;  %v3441_v26 = vpack.c.bf16 %v3353_v60, %v3353_v60  ;;  %v1923_v31 = vsel %vm8473_vm5, %v1918_v20, %v1922_v36  ;;  %v5214_v22 = vshll.u32 %v9840_v50, 16 }
 0x1b0   : > { %v5200_v28 = vrot.slane %v5198_v63, 5  ;;  %v5206_v2 = vrot.slane %v5204_v15, 5  ;;  %v2716_v41 = vunpack.c.l.b16 %v1923_v31  ;;  %v2985_v25 = vsel %vm2961_vm9, %v2952_v57, %v2501_v0  ;;  %v2757_v57 = vpop.permute.xlu1 %2756  ;;  %v9955_v0 = vld [vmem:[#allocation2 + $0x38] sm:$0x1] }
 0x1b1   : > { %v1933_v18 = vsel %vm8473_vm5, %v1928_v59, %v1932_v29  ;;  %v3544_v52 = vshrl.u32 %v3441_v26, 16  ;;  %v3547_v14 = vshll.u32 %v3441_v26, 16  ;;  %v5210_v49 = vrot.slane %v5208_v24, 4  ;;  %v5556_v29 = vld [vmem:[#allocation2 + $0x30] sm:$0xe] }
 0x1b2   : > { %v2717_v44 = vunpack.c.l.b16 %v1933_v18  ;;  %v5201_v56 = vor.u32 %v5200_v28, %v5197_v62  ;;  %v5216_v27 = vrot.slane %v5214_v22, 5  ;;  %v3978_v6 = vshrl.u32 %v3907_v43, 16  ;;  %v8147_v18 = vld [vmem:[#allocation2 + $0x24] sm:$0xff] }
 0x1b3   : > { %v3546_v10 = vrot.slane %v3544_v52, 7  ;;  %v3981_v50 = vshll.u32 %v3907_v43, 16  ;;  %v5211_v33 = vor.u32 %v5210_v49, %v5206_v2  ;;  %v3987_v61 = vshll.u32 %v9931_v21, 16 }
 0x1b4   : > { %v2733_v38 = vpack.c.b16 %v2717_v44, %v2716_v41  ;;  %v5202_v47 = vrot.slane %v5201_v56, 4  ;;  %v3980_v32 = vrot.slane %v3978_v6, 4  ;;  %v3991_v36 = vshrl.u32 %v9931_v21, 16  ;;  %v9965_v44 = vpop.permute.xlu2 %2422 }
 0x1b5   : > { %v3549_v11 = vor.u32 %v3547_v14, %v3546_v10  ;;  %v3551_v16 = vrot.slane %v3546_v10, 4  ;;  %v3983_v45 = vrot.slane %v3981_v50, 5  ;;  %v5212_v55 = vrot.slane %v5211_v33, 4  ;;  %v4947_v10 = vld [vmem:[#allocation2 + $0x24] sm:$0xe] }
 0x1b6   : > { %2764 = vrot.lane.b32.xlu0 %v2733_v38, %s8346_s29  ;;  %v5207_v48 = vsel %vm8473_vm5, %v5202_v47, %v5206_v2  ;;  %v3989_v35 = vrot.slane %v3987_v61, 5  ;;  %v3993_v12 = vrot.slane %v3991_v36, 4  ;;  %v3997_v37 = vshll.u32 %v9936_v7, 16  ;;  %v4547_v47 = vld [vmem:[#allocation2 + $0x2c] sm:$0x1]  ;;  %s8296_s29 = scalar_lea.hbm %s11604_s7, 512 }
 0x1b7   : > { %v3550_v46 = vsel %vm9503_vm6, %v3542_v40, %v3549_v11  ;;  %v3826_v34 = vsel %vm9593_vm10, %v3551_v16, %v3825_v17  ;;  %v3984_v1 = vor.u32 %v3983_v45, %v3980_v32  ;;  %v5217_v8 = vsel %vm8473_vm5, %v5212_v55, %v5216_v27  ;;  %v4338_v27 = vld [vmem:[#allocation2 + $0xc] sm:$0xe] }
 0x1b8   : > { %3824 = vst.msk [vmem:[#allocation2 + $0x40] sm:$0xf] %vm3376_vm0, %v3550_v46  ;;  %v6276_v60 = vunpack.c.l.b16 %v5207_v48  ;;  %v6277_v20 = vunpack.c.l.b16 %v5217_v8  ;;  %v3018_v63 = vsel %vm2994_vm11, %v2985_v25, %v9905_v42  ;;  %v3286_v15 = vmul.f32 %v9791_v54, %v3217_v58  ;;  %v4518_v25 = vld [vmem:[#allocation2 + $0x28] sm:$0xf] }
 0x1b9   : > { %3827 = vst [vmem:[#allocation2 + $0x44] sm:$0x1] %v3826_v34  ;;  %v3985_v40 = vrot.slane %v3984_v1, 4  ;;  %v3994_v59 = vor.u32 %v3993_v12, %v3989_v35  ;;  %v3051_v26 = vsel %vm3027_vm12, %v3018_v63, %v2677_v13  ;;  %v7765_v62 = vrot.slane %v5556_v29, 9  ;;  %v3219_v34 = vpop.f32.mrf.mxu0  ;;  %v5126_v1 = vld [vmem:[#allocation2 + $0x30] sm:$0xf] }
 0x1ba   : > { %v5634_v24 = vrot.slane %v9946_v53, 5  ;;  %v6307_v31 = vpack.c.b16 %v6277_v20, %v6276_v60  ;;  %v3999_v2 = vrot.slane %v3997_v37, 5  ;;  %v3322_v22 = vadd.f32 %v9803_v4, %v3286_v15  ;;  %v8131_v20 = vld [vmem:[#allocation2 + $0x18] sm:$0xff]  ;;  %v3828_v15 = vld [vmem:[#allocation2 + $0x48] sm:$0xf] }
 0x1bb   : > { %v3990_v28 = vsel %vm8473_vm5, %v3985_v40, %v3989_v35  ;;  %v3995_v43 = vrot.slane %v3994_v59, 4  ;;  %v5637_v52 = vrot.slane %v9955_v0, 5  ;;  %v3084_v49 = vsel %vm3060_vm13, %v3051_v26, %v2757_v57  ;;  %v2247_v35 = vpop.permute.xlu0 %2246  ;;  %v2327_v57 = vpop.permute.xlu1 %2326 }
 0x1bc   : > { %v5635_v42 = vsel %vm8450_vm4, %v7765_v62, %v5634_v24  ;;  %v5636_v41 = vrot.slane %v5634_v24, 4  ;;  %6324 = vrot.lane.b32.xlu1 %v6307_v31, %s8349_s16  ;;  %v5796_v14 = vunpack.c.l.b16 %v3990_v28  ;;  %v3354_v56 = vmax.f32 %v3322_v22, 0.0 }
 0x1bd   : > { %v4000_v6 = vsel %vm8473_vm5, %v3995_v43, %v3999_v2  ;;  %v6358_v38 = vunpack.c.l.b16 %v5635_v42  ;;  %v3117_v17 = vsel %vm3093_vm14, %v3084_v49, %v9933_v30  ;;  %v5025_v16 = vrot.slane %v4518_v25, 5  ;;  %v8076_v30 = vld [vmem:[%s8445_s17 + $0x90] sm:$0xff] }
 0x1be   : > { %6244 = vrot.lane.b32.xlu0 %v8147_v18, %s8350_s9  ;;  %v5638_v50 = vsel %vm8450_vm4, %v5636_v41, %v5637_v52  ;;  %v5797_v33 = vunpack.c.l.b16 %v4000_v6  ;;  %v3442_v61 = vpack.c.bf16 %v3354_v56, %v3354_v56  ;;  %7726 = vmatmul.msk.bf16.gmra.mxu0 %vm3146_vm15, %v3117_v17  ;;  %v4581_v32 = vshll.u32 %v9729_v9, 16  ;;  %v3909_v41 = vld [vmem:[#allocation2 + $0x18] sm:$0xf]  ;;  %v9999_v52 = vpop.permute.xlu2 %2678 }
 0x1bf   : > { %v6359_v11 = vunpack.c.l.b16 %v5638_v50  ;;  %v7749_v45 = vrot.slane %v4947_v10, 9  ;;  %v7732_v48 = vrot.slane %v4338_v27, 9  ;;  %v4410_v55 = vrot.slane %v9931_v21, 5  ;;  %v10004_v10 = vld [vmem:[#allocation2 + $0x1c] sm:$0xf] }
 0x1c0   : > { %v5827_v36 = vpack.c.b16 %v5797_v33, %v5796_v14  ;;  %v3553_v13 = vshrl.u32 %v3442_v61, 16  ;;  %v5028_v46 = vrot.slane %v4547_v47, 5  ;;  %v5027_v8 = vrot.slane %v5025_v16, 4  ;;  %v4515_v9 = vld [vmem:[#allocation2 + $0x18] sm:$0xf] }
 0x1c1   : > { %v6388_v58 = vpack.c.b16 %v6359_v11, %v6358_v38  ;;  %v5026_v29 = vsel %vm8450_vm4, %v7749_v45, %v5025_v16  ;;  %v4411_v60 = vsel %vm8450_vm4, %v7732_v48, %v4410_v55  ;;  %v4412_v12 = vrot.slane %v4410_v55, 4  ;;  %v10010_v48 = vld [vmem:[#allocation2 + $0x20] sm:$0x1] }
 0x1c2   : > { %5844 = vrot.lane.b32.xlu2 %v5827_v36, %s8347_s8  ;;  %v9985_v37 = vrot.slane %v3553_v13, 7  ;;  %v3556_v21 = vshll.u32 %v3442_v61, 16  ;;  %v6102_v40 = vunpack.c.l.b16 %v5026_v29  ;;  %v4413_v63 = vrot.slane %v9936_v7, 5 }
 0x1c3   : > { %8045 = vmatmul.msk.bf16.gmra.mxu3 %vm3093_vm14, %v6388_v58  ;;  %v5029_v59 = vsel %vm8450_vm4, %v5027_v8, %v5028_v46  ;;  %v5876_v26 = vunpack.c.l.b16 %v4411_v60  ;;  %v3287_v62 = vmul.f32 %v9791_v54, %v3219_v34  ;;  %v5219_v24 = vshrl.u32 %v5126_v1, 16  ;;  %v2583_v29 = vpop.permute.xlu1 %2582 }
 0x1c4   : > { %v3558_v31 = vor.u32 %v3556_v21, %v9985_v37  ;;  %6020 = vrot.lane.b32.xlu1 %v8131_v20, %s8349_s16  ;;  %v6103_v28 = vunpack.c.l.b16 %v5029_v59  ;;  %v4414_v2 = vsel %vm8450_vm4, %v4412_v12, %v4413_v63  ;;  %v2885_v22 = vsel %vm11620_vm1, %v8076_v30, %v2247_v35  ;;  %v2503_v35 = vpop.permute.xlu0 %2502  ;;  %v8077_v21 = vld [vmem:[%s8445_s17 + $0x9c] sm:$0xff] }
 0x1c5   : > { %v3559_v7 = vrot.slane %v9985_v37, 4  ;;  %v5877_v43 = vunpack.c.l.b16 %v4414_v2  ;;  %v3323_v18 = vadd.f32 %v9803_v4, %v3287_v62  ;;  %v5221_v42 = vrot.slane %v5219_v24, 4 }
 0x1c6   : > { %v3829_v25 = vsel %vm9418_vm2, %v3558_v31, %v3828_v15  ;;  %v6132_v14 = vpack.c.b16 %v6103_v28, %v6102_v40  ;;  %v5222_v56 = vshll.u32 %v5126_v1, 16  ;;  %v5228_v49 = vshll.u32 %v9946_v53, 16  ;;  %v3832_v15 = vld [vmem:[#allocation2 + $0x50] sm:$0x1] }
 0x1c7   : > { %3830 = vst [vmem:[#allocation2 + $0x48] sm:$0xf] %v3829_v25  ;;  %v5907_v27 = vpack.c.b16 %v5877_v43, %v5876_v26  ;;  %v3355_v6 = vmax.f32 %v3323_v18, 0.0  ;;  %v5232_v50 = vshrl.u32 %v9946_v53, 16  ;;  %v5238_v38 = vshll.u32 %v9955_v0, 16  ;;  %v8148_v43 = vld [vmem:[#allocation2 + $0x30] sm:$0xff] }
 0x1c8   : > { %v5224_v17 = vrot.slane %v5222_v56, 5  ;;  %v5230_v47 = vrot.slane %v5228_v49, 5  ;;  %v4002_v33 = vshrl.u32 %v3909_v41, 16  ;;  %v4005_v61 = vshll.u32 %v3909_v41, 16  ;;  %v4520_v18 = vld [vmem:[#allocation2 + $0x34] sm:$0xf]  ;;  %v2249_v41 = vpop.permute.xlu2 %2248 }
 0x1c9   : > { %5924 = vrot.lane.b32.xlu0 %v5907_v27, %s8350_s9  ;;  %v2921_v11 = vsel %vm2895_vm7, %v2885_v22, %v2327_v57  ;;  %v3443_v16 = vpack.c.bf16 %v3355_v6, %v3355_v6  ;;  %v5234_v45 = vrot.slane %v5232_v50, 4  ;;  %v4011_v55 = vshll.u32 %v10004_v10, 16  ;;  %v4548_v49 = vld [vmem:[#allocation2 + $0x38] sm:$0x1] }
 0x1ca   : > { %6150 = vrot.lane.b32.xlu2 %v6132_v14, %s8347_s8  ;;  %v5225_v53 = vor.u32 %v5224_v17, %v5221_v42  ;;  %v4004_v0 = vrot.slane %v4002_v33, 4  ;;  %v4007_v36 = vrot.slane %v4005_v61, 5  ;;  %v4015_v13 = vshrl.u32 %v10004_v10, 16  ;;  %v4948_v42 = vld [vmem:[#allocation2 + $0x30] sm:$0xe] }
 0x1cb   : > { %v3561_v58 = vshrl.u32 %v3443_v16, 16  ;;  %v5235_v46 = vor.u32 %v5234_v45, %v5230_v47  ;;  %v5240_v30 = vrot.slane %v5238_v38, 5  ;;  %v4013_v34 = vrot.slane %v4011_v55, 5  ;;  %v4339_v17 = vld [vmem:[#allocation2 + $0x18] sm:$0xe] }
 0x1cc   : > { %v5226_v1 = vrot.slane %v5225_v53, 4  ;;  %v4008_v8 = vor.u32 %v4007_v36, %v4004_v0  ;;  %v4017_v60 = vrot.slane %v4015_v13, 4  ;;  %v4021_v12 = vshll.u32 %v10010_v48, 16  ;;  %v10040_v45 = vld [vmem:[#allocation2 + $0x40] sm:$0xf]  ;;  %v2759_v53 = vpop.permute.xlu0 %2758 }
 0x1cd   : > { %v3563_v20 = vrot.slane %v3561_v58, 7  ;;  %v3564_v57 = vshll.u32 %v3443_v16, 16  ;;  %v5236_v40 = vrot.slane %v5235_v46, 4  ;;  %v2954_v63 = vsel %vm2928_vm8, %v2921_v11, %v9965_v44  ;;  %v3222_v16 = vpop.f32.mrf.mxu0  ;;  %v10047_v46 = vld [vmem:[#allocation2 + $0x44] sm:$0x1] }
 0x1ce   : > { %v5231_v59 = vsel %vm8473_vm5, %v5226_v1, %v5230_v47  ;;  %v4009_v26 = vrot.slane %v4008_v8, 4  ;;  %v4018_v62 = vor.u32 %v4017_v60, %v4013_v34  ;;  %v4023_v24 = vrot.slane %v4021_v12, 5  ;;  %v5557_v8 = vld [vmem:[#allocation2 + $0x3c] sm:$0xe]  ;;  %v2839_v60 = vpop.permute.xlu1 %2838 }
 0x1cf   : > { %v3566_v31 = vor.u32 %v3564_v57, %v3563_v20  ;;  %v3568_v28 = vrot.slane %v3563_v20, 4  ;;  %v5241_v2 = vsel %vm8473_vm5, %v5236_v40, %v5240_v30  ;;  %v6278_v22 = vunpack.c.l.b16 %v5231_v59 }
 0x1d0   : > { %v6279_v25 = vunpack.c.l.b16 %v5241_v2  ;;  %v4014_v44 = vsel %vm8473_vm5, %v4009_v26, %v4013_v34  ;;  %v4019_v14 = vrot.slane %v4018_v62, 4  ;;  %v2987_v56 = vsel %vm2961_vm9, %v2954_v63, %v2503_v35 }
 0x1d1   : > { %v4575_v27 = vshrl.u32 %v9720_v19, 16  ;;  %v10028_v6 = vsel %vm11622_vm3, %v8077_v21, %v2249_v41  ;;  %v3567_v50 = vsel %vm9503_vm6, %v3559_v7, %v3566_v31  ;;  %v3833_v38 = vsel %vm9593_vm10, %v3568_v28, %v3832_v15  ;;  %6246 = vrot.lane.b32.xlu0 %v8148_v43, %s8350_s9  ;;  %v5128_v15 = vld [vmem:[#allocation2 + $0x3c] sm:$0xf] }
 0x1d2   : > { %3831 = vst.msk [vmem:[#allocation2 + $0x4c] sm:$0xf] %vm3376_vm0, %v3567_v50  ;;  %v6308_v47 = vpack.c.b16 %v6279_v25, %v6278_v22  ;;  %v4024_v33 = vsel %vm8473_vm5, %v4019_v14, %v4023_v24  ;;  %v7750_v61 = vrot.slane %v4948_v42, 9  ;;  %v5032_v11 = vrot.slane %v4520_v18, 5  ;;  %v8177_v31 = vld [vmem:[%s11601_s4 + $0x78] sm:$0xff]  ;;  %v8132_v18 = vld [vmem:[#allocation2 + $0x24] sm:$0xff] }
 0x1d3   : > { %3834 = vst [vmem:[#allocation2 + $0x50] sm:$0x1] %v3833_v38  ;;  %v5798_v37 = vunpack.c.l.b16 %v4014_v44  ;;  %v5799_v7 = vunpack.c.l.b16 %v4024_v33  ;;  %v3020_v55 = vsel %vm2994_vm11, %v2987_v56, %v2583_v29  ;;  %v5035_v35 = vrot.slane %v4548_v49, 5  ;;  %6941 = vmatpush.bf16.msra.mxu2 %v8177_v31  ;;  %v3911_v38 = vld [vmem:[#allocation2 + $0x24] sm:$0xf] }
 0x1d4   : > { %6326 = vrot.lane.b32.xlu1 %v6308_v47, %s8349_s16  ;;  %v5033_v0 = vsel %vm8450_vm4, %v7750_v61, %v5032_v11  ;;  %v5034_v36 = vrot.slane %v5032_v11, 4  ;;  %v7733_v13 = vrot.slane %v4339_v17, 9  ;;  %v4417_v58 = vrot.slane %v10004_v10, 5  ;;  %v10071_v17 = vld [vmem:[#allocation2 + $0x28] sm:$0xf] }
 0x1d5   : > { %v5828_v30 = vpack.c.b16 %v5799_v7, %v5798_v37  ;;  %v4420_v34 = vrot.slane %v10010_v48, 5  ;;  %v3288_v1 = vmul.f32 %v9791_v54, %v3222_v16  ;;  %v5256_v29 = vshrl.u32 %v10040_v45, 16 }
 0x1d6   : > { %v5036_v12 = vsel %vm8450_vm4, %v5034_v36, %v5035_v35  ;;  %v6104_v21 = vunpack.c.l.b16 %v5033_v0  ;;  %v4418_v20 = vsel %vm8450_vm4, %v7733_v13, %v4417_v58  ;;  %v4419_v57 = vrot.slane %v4417_v58, 4 }
 0x1d7   : > { %5846 = vrot.lane.b32.xlu2 %v5828_v30, %s8347_s8  ;;  %v6105_v10 = vunpack.c.l.b16 %v5036_v12  ;;  %v5878_v40 = vunpack.c.l.b16 %v4418_v20  ;;  %v3324_v48 = vadd.f32 %v9803_v4, %v3288_v1  ;;  %v5262_v63 = vshll.u32 %v10047_v46, 16  ;;  %v10084_v30 = vld [vmem:[#allocation2 + $0x2c] sm:$0x1]  ;;  %v3224_v1 = vpop.f32.mrf.mxu0 }
 0x1d8   : > { %v4421_v59 = vsel %vm8450_vm4, %v4419_v57, %v4420_v34  ;;  %v5258_v26 = vrot.slane %v5256_v29, 4  ;;  %v7766_v62 = vrot.slane %v5557_v8, 9  ;;  %v5641_v24 = vrot.slane %v10040_v45, 5  ;;  %v3835_v29 = vld [vmem:[#allocation2 + $0x54] sm:$0xf]  ;;  %v2425_v8 = vpop.permute.xlu1 %2424 }
 0x1d9   : > { %v6133_v28 = vpack.c.b16 %v6105_v10, %v6104_v21  ;;  %v5879_v2 = vunpack.c.l.b16 %v4421_v59  ;;  %v3356_v22 = vmax.f32 %v3324_v48, 0.0  ;;  %v5644_v43 = vrot.slane %v10047_v46, 5 }
 0x1da   : > { %v5642_v42 = vsel %vm8450_vm4, %v7766_v62, %v5641_v24  ;;  %v5643_v41 = vrot.slane %v5641_v24, 4  ;;  %v3053_v25 = vsel %vm3027_vm12, %v3020_v55, %v9999_v52  ;;  %v5243_v44 = vshrl.u32 %v5128_v15, 16  ;;  %v2329_v55 = vpop.permute.xlu0 %2328  ;;  %v2505_v24 = vpop.permute.xlu2 %2504 }
 0x1db   : > { %v5908_v14 = vpack.c.b16 %v5879_v2, %v5878_v40  ;;  %v3444_v56 = vpack.c.bf16 %v3356_v22, %v3356_v22  ;;  %v6360_v49 = vunpack.c.l.b16 %v5642_v42  ;;  %v3086_v50 = vsel %vm3060_vm13, %v3053_v25, %v2759_v53  ;;  %v8149_v22 = vld [vmem:[#allocation2 + $0x3c] sm:$0xff] }
 0x1dc   : > { %6022 = vrot.lane.b32.xlu1 %v8132_v18, %s8349_s16  ;;  %v5645_v47 = vsel %vm8450_vm4, %v5643_v41, %v5644_v43  ;;  %v3119_v33 = vsel %vm3093_vm14, %v3086_v50, %v2839_v60  ;;  %v5245_v61 = vrot.slane %v5243_v44, 4  ;;  %v5246_v11 = vshll.u32 %v5128_v15, 16  ;;  %v4522_v43 = vld [vmem:[#allocation2 + $0x40] sm:$0xf]  ;;  %v4949_v41 = vld [vmem:[#allocation2 + $0x3c] sm:$0xe] }
 0x1dd   : > { %5926 = vrot.lane.b32.xlu0 %v5908_v14, %s8350_s9  ;;  %v3570_v52 = vshrl.u32 %v3444_v56, 16  ;;  %v3573_v16 = vshll.u32 %v3444_v56, 16  ;;  %v6361_v37 = vunpack.c.l.b16 %v5645_v47  ;;  %7727 = vmatmul.msk.bf16.gmra.mxu0 %vm3146_vm15, %v3119_v33  ;;  %v5252_v7 = vshll.u32 %v10040_v45, 16  ;;  %v8169_v50 = vld [vmem:[%s11601_s4 + $0x38] sm:$0xff] }
 0x1de   : > { %v5248_v35 = vrot.slane %v5246_v11, 5  ;;  %v4026_v53 = vshrl.u32 %v3911_v38, 16  ;;  %v4029_v0 = vshll.u32 %v3911_v38, 16  ;;  %v4035_v36 = vshll.u32 %v10071_v17, 16  ;;  %6852 = vmatpush.bf16.msra.mxu1 %v8169_v50 }
 0x1df   : > { %6152 = vrot.lane.b32.xlu2 %v6133_v28, %s8347_s8  ;;  %v10082_v13 = vrot.slane %v3570_v52, 7  ;;  %v6389_v58 = vpack.c.b16 %v6361_v37, %v6360_v49  ;;  %v5254_v46 = vrot.slane %v5252_v7, 5  ;;  %v4039_v34 = vshrl.u32 %v10071_v17, 16  ;;  %v8176_v49 = vld [vmem:[%s11601_s4 + $0x70] sm:$0xff] }
 0x1e0   : > { %v5249_v45 = vor.u32 %v5248_v35, %v5245_v61  ;;  %v4028_v60 = vrot.slane %v4026_v53, 4  ;;  %v4031_v12 = vrot.slane %v4029_v0, 5  ;;  %v4037_v21 = vrot.slane %v4035_v36, 5  ;;  %v4340_v61 = vld [vmem:[#allocation2 + $0x24] sm:$0xe]  ;;  %6942 = vmatpush.bf16.msra.mxu2 %v8176_v49 }
 0x1e1   : > { %v3575_v20 = vor.u32 %v3573_v16, %v10082_v13  ;;  %v5264_v57 = vrot.slane %v5262_v63, 5  ;;  %8046 = vmatmul.msk.bf16.gmra.mxu3 %vm3093_vm14, %v6389_v58  ;;  %v5259_v10 = vor.u32 %v5258_v26, %v5254_v46  ;;  %v4041_v40 = vrot.slane %v4039_v34, 4  ;;  %v10141_v49 = vld [vmem:[#allocation2 + $0x34] sm:$0xf] }
 0x1e2   : > { %v5250_v48 = vrot.slane %v5249_v45, 4  ;;  %v4032_v15 = vor.u32 %v4031_v12, %v4028_v60  ;;  %v4045_v59 = vshll.u32 %v10084_v30, 16  ;;  %v3289_v62 = vmul.f32 %v9791_v54, %v3224_v1  ;;  %v2585_v7 = vpop.permute.xlu0 %2584  ;;  %v2681_v12 = vpop.permute.xlu1 %2680 }
 0x1e3   : > { %v3836_v31 = vsel %vm9418_vm2, %v3575_v20, %v3835_v29  ;;  %v5260_v28 = vrot.slane %v5259_v10, 4  ;;  %v4042_v2 = vor.u32 %v4041_v40, %v4037_v21  ;;  %v2923_v63 = vsel %vm2895_vm7, %v10028_v6, %v2329_v55  ;;  %v4549_v6 = vld [vmem:[#allocation2 + $0x44] sm:$0x1]  ;;  %v8175_v55 = vld [vmem:[%s11601_s4 + $0x68] sm:$0xff]  ;;  %v5158_v20 = vld [vmem:[#allocation2 + $0x50] sm:$0x1] }
 0x1e4   : > { %v3576_v26 = vrot.slane %v10082_v13, 4  ;;  %3837 = vst [vmem:[#allocation2 + $0x54] sm:$0xf] %v3836_v31  ;;  %v5255_v18 = vsel %vm8473_vm5, %v5250_v48, %v5254_v46  ;;  %v4033_v42 = vrot.slane %v4032_v15, 4  ;;  %v3325_v54 = vadd.f32 %v9803_v4, %v3289_v62  ;;  %v10119_v29 = vld [vmem:[#allocation2 + $0x4c] sm:$0xf]  ;;  %6943 = vmatpush.bf16.msra.mxu2 %v8175_v55 }
 0x1e5   : > { %v5265_v25 = vsel %vm8473_vm5, %v5260_v28, %v5264_v57  ;;  %v6280_v44 = vunpack.c.l.b16 %v5255_v18  ;;  %v4043_v14 = vrot.slane %v4042_v2, 4  ;;  %v4047_v56 = vrot.slane %v4045_v59, 5  ;;  %6248 = vrot.lane.b32.xlu0 %v8149_v22, %s8350_s9  ;;  %v5558_v31 = vld [vmem:[#allocation2 + $0x48] sm:$0xe]  ;;  %v3839_v28 = vld [vmem:[#allocation2 + $0x5c] sm:$0x1] }
 0x1e6   : > { %v6281_v38 = vunpack.c.l.b16 %v5265_v25  ;;  %v4038_v4 = vsel %vm8473_vm5, %v4033_v42, %v4037_v21  ;;  %v3357_v47 = vmax.f32 %v3325_v54, 0.0  ;;  %v2956_v33 = vsel %vm2928_vm8, %v2923_v63, %v2425_v8  ;;  %v8133_v42 = vld [vmem:[#allocation2 + $0x30] sm:$0xff] }
 0x1e7   : > { %v4048_v11 = vsel %vm8473_vm5, %v4043_v14, %v4047_v56  ;;  %v5800_v52 = vunpack.c.l.b16 %v4038_v4  ;;  %v7751_v16 = vrot.slane %v4949_v41, 9  ;;  %v5039_v37 = vrot.slane %v4522_v43, 5  ;;  %v3913_v25 = vld [vmem:[#allocation2 + $0x30] sm:$0xf] }
 0x1e8   : > { %v6309_v35 = vpack.c.b16 %v6281_v38, %v6280_v44  ;;  %v5801_v53 = vunpack.c.l.b16 %v4048_v11  ;;  %v3445_v0 = vpack.c.bf16 %v3357_v47, %v3357_v47  ;;  %v5042_v36 = vrot.slane %v4549_v6, 5  ;;  %v5130_v11 = vld [vmem:[#allocation2 + $0x48] sm:$0xf] }
 0x1e9   : > { %v5040_v58 = vsel %vm8450_vm4, %v7751_v16, %v5039_v37  ;;  %v5041_v46 = vrot.slane %v5039_v37, 4  ;;  %v7734_v34 = vrot.slane %v4340_v61, 9  ;;  %v4424_v1 = vrot.slane %v10071_v17, 5  ;;  %v10150_v61 = vld [vmem:[#allocation2 + $0x38] sm:$0x1] }
 0x1ea   : > { %6328 = vrot.lane.b32.xlu1 %v6309_v35, %s8349_s16  ;;  %v5829_v8 = vpack.c.b16 %v5801_v53, %v5800_v52  ;;  %v3578_v45 = vshrl.u32 %v3445_v0, 16  ;;  %v3581_v60 = vshll.u32 %v3445_v0, 16  ;;  %v4427_v21 = vrot.slane %v10084_v30, 5  ;;  %v10130_v30 = vpop.permute.xlu2 %2760  ;;  %v2841_v55 = vpop.permute.xlu0 %2840  ;;  %v8174_v35 = vld [vmem:[%s11601_s4 + $0x60] sm:$0xff] }
 0x1eb   : > { %v5043_v57 = vsel %vm8450_vm4, %v5041_v46, %v5042_v36  ;;  %v4425_v10 = vsel %vm8450_vm4, %v7734_v34, %v4424_v1  ;;  %v4426_v40 = vrot.slane %v4424_v1, 4  ;;  %v2989_v17 = vsel %vm2961_vm9, %v2956_v33, %v2505_v24  ;;  %v8078_v33 = vld [vmem:[%s8445_s17 + $0xa8] sm:$0xff]  ;;  %6944 = vmatpush.bf16.msra.mxu2 %v8174_v35 }
 0x1ec   : > { %5848 = vrot.lane.b32.xlu2 %v5829_v8, %s8347_s8  ;;  %v3580_v48 = vrot.slane %v3578_v45, 7  ;;  %v6106_v15 = vunpack.c.l.b16 %v5040_v58  ;;  %v6107_v59 = vunpack.c.l.b16 %v5043_v57  ;;  %v3022_v62 = vsel %vm2994_vm11, %v2989_v17, %v2585_v7  ;;  %v3227_v7 = vpop.f32.mrf.mxu0  ;;  %v8167_v45 = vld [vmem:[%s11601_s4 + $0x28] sm:$0xff] }
 0x1ed   : > { %v4428_v2 = vsel %vm8450_vm4, %v4426_v40, %v4427_v21  ;;  %v5880_v22 = vunpack.c.l.b16 %v4425_v10  ;;  %v5280_v63 = vshrl.u32 %v10119_v29, 16  ;;  %v5286_v43 = vshll.u32 %v5158_v20, 16  ;;  %v2251_v21 = vpop.permute.xlu1 %2250 }
 0x1ee   : > { %v3583_v24 = vor.u32 %v3581_v60, %v3580_v48  ;;  %v3585_v18 = vrot.slane %v3580_v48, 4  ;;  %v5881_v54 = vunpack.c.l.b16 %v4428_v2  ;;  %v3055_v41 = vsel %vm3027_vm12, %v3022_v62, %v2681_v12  ;;  %v8173_v60 = vld [vmem:[%s11601_s4 + $0x58] sm:$0xff] }
 0x1ef   : > { %v10136_v44 = vrot.slane %v5280_v63, 4  ;;  %v10138_v14 = vrot.slane %v5286_v43, 5  ;;  %v7767_v56 = vrot.slane %v5558_v31, 9  ;;  %v5648_v6 = vrot.slane %v10119_v29, 5  ;;  %v4550_v63 = vld [vmem:[#allocation2 + $0x50] sm:$0x1]  ;;  %6945 = vmatpush.bf16.msra.mxu2 %v8173_v60 }
 0x1f0   : > { %v3584_v50 = vsel %vm9503_vm6, %v3576_v26, %v3583_v24  ;;  %v3840_v38 = vsel %vm9593_vm10, %v3585_v18, %v3839_v28  ;;  %v5909_v4 = vpack.c.b16 %v5881_v54, %v5880_v22  ;;  %v5651_v47 = vrot.slane %v5158_v20, 5  ;;  %v8168_v26 = vld [vmem:[%s11601_s4 + $0x30] sm:$0xff]  ;;  %v10182_v28 = vld [vmem:[%s11599_s2] ss:$0 sm:$0xff]  ;;  %v4524_v22 = vld [vmem:[#allocation2 + $0x4c] sm:$0xf] }
 0x1f1   : > { %3838 = vst.msk [vmem:[#allocation2 + $0x58] sm:$0xf] %vm3376_vm0, %v3584_v50  ;;  %v6134_v52 = vpack.c.b16 %v6107_v59, %v6106_v15  ;;  %v5649_v16 = vsel %vm8450_vm4, %v7767_v56, %v5648_v6  ;;  %v5650_v37 = vrot.slane %v5648_v6, 4  ;;  %v4050_v13 = vshrl.u32 %v3913_v25, 16  ;;  %6853 = vmatpush.bf16.msra.mxu1 %v8168_v26  ;;  %v4950_v43 = vld [vmem:[#allocation2 + $0x48] sm:$0xe] }
 0x1f2   : > { %3841 = vst [vmem:[#allocation2 + $0x5c] sm:$0x1] %v3840_v38  ;;  %6024 = vrot.lane.b32.xlu1 %v8133_v42, %s8349_s16  ;;  %5928 = vrot.lane.b32.xlu0 %v5909_v4, %s8350_s9  ;;  %v6362_v53 = vunpack.c.l.b16 %v5649_v16  ;;  %v4053_v0 = vshll.u32 %v3913_v25, 16  ;;  %v4059_v36 = vshll.u32 %v10141_v49, 16  ;;  %v4063_v58 = vshrl.u32 %v10141_v49, 16  ;;  %v10185_v24 = vpop.permute.xlu2 %2330  ;;  %v8166_v25 = vld [vmem:[%s11601_s4 + $0x20] sm:$0xff] }
 0x1f3   : > { %v5652_v46 = vsel %vm8450_vm4, %v5650_v37, %v5651_v47  ;;  %v4052_v34 = vrot.slane %v4050_v13, 4  ;;  %v4069_v1 = vshll.u32 %v10150_v61, 16  ;;  %v5267_v8 = vshrl.u32 %v5130_v11, 16  ;;  %v8172_v56 = vld [vmem:[%s11601_s4 + $0x50] sm:$0xff]  ;;  %v8150_v38 = vld [vmem:[#allocation2 + $0x48] sm:$0xff] }
 0x1f4   : > { %6154 = vrot.lane.b32.xlu2 %v6134_v52, %s8347_s8  ;;  %v6363_v12 = vunpack.c.l.b16 %v5652_v46  ;;  %v4055_v20 = vrot.slane %v4053_v0, 5  ;;  %v4061_v57 = vrot.slane %v4059_v36, 5  ;;  %v4065_v10 = vrot.slane %v4063_v58, 4  ;;  %v10199_v4 = vld [vmem:[%s11600_s3] ss:$0 sm:$0xff]  ;;  %v2427_v36 = vpop.permute.xlu0 %2426  ;;  %6946 = vmatpush.bf16.msra.mxu2 %v8172_v56  ;;  %v8165_v58 = vld [vmem:[%s11601_s4 + $0x18] sm:$0xff] }
 0x1f5   : > { %v10176_v40 = vsel %vm11620_vm1, %v8078_v33, %v2251_v21  ;;  %v5269_v17 = vrot.slane %v5267_v8, 4  ;;  %v5270_v48 = vshll.u32 %v5130_v11, 16  ;;  %v5276_v15 = vshll.u32 %v10119_v29, 16  ;;  %6854 = vmatpush.bf16.msra.mxu1 %v8167_v45  ;;  %v4341_v26 = vld [vmem:[#allocation2 + $0x30] sm:$0xe]  ;;  %v8171_v45 = vld [vmem:[%s11601_s4 + $0x48] sm:$0xff] }
 0x1f6   : > { %v6390_v59 = vpack.c.b16 %v6363_v12, %v6362_v53  ;;  %v4056_v62 = vor.u32 %v4055_v20, %v4052_v34  ;;  %v4066_v31 = vor.u32 %v4065_v10, %v4061_v57  ;;  %v3290_v2 = vmul.f32 %v10182_v28, %v3227_v7  ;;  %v10235_v56 = vld [vmem:[#allocation2 + $0x40] sm:$0xf] }
 0x1f7   : > { %v4071_v18 = vrot.slane %v4069_v1, 5  ;;  %v5272_v42 = vrot.slane %v5270_v48, 5  ;;  %v5278_v54 = vrot.slane %v5276_v15, 5  ;;  %v3088_v29 = vsel %vm3060_vm13, %v3055_v41, %v10130_v30  ;;  %v3915_v15 = vld [vmem:[#allocation2 + $0x3c] sm:$0xf] }
 0x1f8   : > { %8047 = vmatmul.msk.bf16.gmra.mxu3 %vm3093_vm14, %v6390_v59  ;;  %v4057_v6 = vrot.slane %v4056_v62, 4  ;;  %v4067_v50 = vrot.slane %v4066_v31, 4  ;;  %v3326_v30 = vadd.f32 %v10199_v4, %v3290_v2  ;;  %v3121_v41 = vsel %vm3093_vm14, %v3088_v29, %v2841_v55  ;;  %6947 = vmatpush.bf16.msra.mxu2 %v8171_v45 }
 0x1f9   : > { %v5273_v47 = vor.u32 %v5272_v42, %v5269_v17  ;;  %v5283_v33 = vor.u32 %v10136_v44, %v5278_v54  ;;  %7728 = vmatmul.msk.bf16.gmra.mxu0 %vm3146_vm15, %v3121_v41  ;;  %v7752_v11 = vrot.slane %v4950_v43, 9  ;;  %v5046_v52 = vrot.slane %v4524_v22, 5  ;;  %v3229_v44 = vpop.f32.mrf.mxu0  ;;  %6855 = vmatpush.bf16.msra.mxu1 %v8166_v25  ;;  %v3842_v42 = vld [vmem:[#allocation2 + $0x60] sm:$0xf]  ;;  %v10242_v41 = vld [vmem:[#allocation2 + $0x44] sm:$0x1] }
 0x1fa   : > { %v4062_v16 = vsel %vm8473_vm5, %v4057_v6, %v4061_v57  ;;  %v4072_v37 = vsel %vm8473_vm5, %v4067_v50, %v4071_v18  ;;  %6250 = vrot.lane.b32.xlu0 %v8150_v38, %s8350_s9  ;;  %v3358_v13 = vmax.f32 %v3326_v30, 0.0  ;;  %v5049_v7 = vrot.slane %v4550_v63, 5  ;;  %v2587_v18 = vpop.permute.xlu2 %2586 }
 0x1fb   : > { %v5802_v35 = vunpack.c.l.b16 %v4062_v16  ;;  %v5803_v55 = vunpack.c.l.b16 %v4072_v37  ;;  %v5274_v53 = vrot.slane %v5273_v47, 4  ;;  %v5284_v0 = vrot.slane %v5283_v33, 4  ;;  %v10246_v37 = vld [vmem:[#allocation2 + $0x58] sm:$0xf] }
 0x1fc   : > { %v3446_v46 = vpack.c.bf16 %v3358_v13, %v3358_v13  ;;  %v5047_v34 = vsel %vm8450_vm4, %v7752_v11, %v5046_v52  ;;  %v5048_v1 = vrot.slane %v5046_v52, 4  ;;  %v4431_v8 = vrot.slane %v10141_v49, 5  ;;  %v2507_v49 = vpop.permute.xlu1 %2506 }
 0x1fd   : > { %v5830_v60 = vpack.c.b16 %v5803_v55, %v5802_v35  ;;  %v5279_v12 = vsel %vm8473_vm5, %v5274_v53, %v5278_v54  ;;  %v5289_v21 = vsel %vm8473_vm5, %v5284_v0, %v10138_v14  ;;  %v7735_v20 = vrot.slane %v4341_v26, 9  ;;  %6856 = vmatpush.bf16.msra.mxu1 %v8165_v58 }
 0x1fe   : > { %v6282_v57 = vunpack.c.l.b16 %v5279_v12  ;;  %v6283_v10 = vunpack.c.l.b16 %v5289_v21  ;;  %v3587_v17 = vshrl.u32 %v3446_v46, 16  ;;  %v6108_v48 = vunpack.c.l.b16 %v5047_v34  ;;  %v8134_v12 = vld [vmem:[#allocation2 + $0x3c] sm:$0xff] }
 0x1ff   : > { %5850 = vrot.lane.b32.xlu2 %v5830_v60, %s8347_s8  ;;  %v5050_v59 = vsel %vm8450_vm4, %v5048_v1, %v5049_v7  ;;  %v4432_v62 = vsel %vm8450_vm4, %v7735_v20, %v4431_v8  ;;  %v4433_v31 = vrot.slane %v4431_v8, 4  ;;  %v4434_v2 = vrot.slane %v10150_v61, 5 }
 0x200   : > { %v6310_v14 = vpack.c.b16 %v6283_v10, %v6282_v57  ;;  %v10230_v22 = vrot.slane %v3587_v17, 7  ;;  %v3590_v63 = vshll.u32 %v3446_v46, 16  ;;  %v6109_v43 = vunpack.c.l.b16 %v5050_v59 }
 0x201   : > { %v4435_v54 = vsel %vm8450_vm4, %v4433_v31, %v4434_v2  ;;  %v5882_v29 = vunpack.c.l.b16 %v4432_v62  ;;  %v3291_v25 = vmul.f32 %v10182_v28, %v3229_v44  ;;  %v4074_v6 = vshrl.u32 %v3915_v15, 16  ;;  %v3232_v16 = vpop.f32.mrf.mxu0  ;;  %v2683_v44 = vpop.permute.xlu0 %2682  ;;  %v5559_v62 = vld [vmem:[#allocation2 + $0x54] sm:$0xe] }
 0x202   : > { %6330 = vrot.lane.b32.xlu1 %v6310_v14, %s8349_s16  ;;  %v3592_v61 = vor.u32 %v3590_v63, %v10230_v22  ;;  %v6135_v50 = vpack.c.b16 %v6109_v43, %v6108_v48  ;;  %v5883_v38 = vunpack.c.l.b16 %v4435_v54  ;;  %v2925_v30 = vsel %vm2895_vm7, %v10176_v40, %v10185_v24  ;;  %v10252_v40 = vld [vmem:[#allocation2 + $0x5c] sm:$0x1]  ;;  %v2843_v63 = vpop.permute.xlu2 %2842 }
 0x203   : > { %v3327_v47 = vadd.f32 %v10199_v4, %v3291_v25  ;;  %v2958_v33 = vsel %vm2928_vm8, %v2925_v30, %v2427_v36  ;;  %v4076_v11 = vrot.slane %v4074_v6, 4  ;;  %v4077_v52 = vshll.u32 %v3915_v15, 16  ;;  %v8170_v25 = vld [vmem:[%s11601_s4 + $0x40] sm:$0xff]  ;;  %v3846_v6 = vld [vmem:[#allocation2 + $0x68] sm:$0x1] }
 0x204   : > { %v3843_v13 = vsel %vm9418_vm2, %v3592_v61, %v3842_v42  ;;  %v5910_v7 = vpack.c.b16 %v5883_v38, %v5882_v29  ;;  %v2991_v26 = vsel %vm2961_vm9, %v2958_v33, %v2507_v49  ;;  %v4083_v35 = vshll.u32 %v10235_v56, 16  ;;  %v2763_v48 = vpop.permute.xlu1 %2762  ;;  %v8164_v29 = vld [vmem:[%s11601_s4 + $0x10] sm:$0xff]  ;;  %6948 = vmatpush.bf16.msra.mxu2 %v8170_v25 }
 0x205   : > { %3844 = vst [vmem:[#allocation2 + $0x60] sm:$0xf] %v3843_v13  ;;  %v3359_v24 = vmax.f32 %v3327_v47, 0.0  ;;  %v4079_v55 = vrot.slane %v4077_v52, 5  ;;  %v4087_v53 = vshrl.u32 %v10235_v56, 16  ;;  %v4093_v0 = vshll.u32 %v10242_v41, 16  ;;  %6857 = vmatpush.bf16.msra.mxu1 %v8164_v29 }
 0x206   : > { %v3593_v36 = vrot.slane %v10230_v22, 4  ;;  %5930 = vrot.lane.b32.xlu0 %v5910_v7, %s8350_s9  ;;  %v4085_v58 = vrot.slane %v4083_v35, 5  ;;  %v3292_v46 = vmul.f32 %v10182_v28, %v3232_v16  ;;  %v5304_v34 = vshrl.u32 %v10246_v37, 16  ;;  %v5132_v33 = vld [vmem:[#allocation2 + $0x54] sm:$0xf]  ;;  %v8163_v7 = vld [vmem:[%s11601_s4 + $0x8] sm:$0xff] }
 0x207   : > { %6156 = vrot.lane.b32.xlu2 %v6135_v50, %s8347_s8  ;;  %v3447_v1 = vpack.c.bf16 %v3359_v24, %v3359_v24  ;;  %v4080_v8 = vor.u32 %v4079_v55, %v4076_v11  ;;  %v4089_v45 = vrot.slane %v4087_v53, 4  ;;  %v3024_v60 = vsel %vm2994_vm11, %v2991_v26, %v2587_v18  ;;  %v8151_v50 = vld [vmem:[#allocation2 + $0x54] sm:$0xff]  ;;  %v4342_v53 = vld [vmem:[#allocation2 + $0x3c] sm:$0xe] }
 0x208   : > { %v4095_v21 = vrot.slane %v4093_v0, 5  ;;  %v3057_v20 = vsel %vm3027_vm12, %v3024_v60, %v2683_v44  ;;  %v3328_v57 = vadd.f32 %v10199_v4, %v3292_v46  ;;  %v5310_v10 = vshll.u32 %v10252_v40, 16  ;;  %v4526_v46 = vld [vmem:[#allocation2 + $0x58] sm:$0xf] }
 0x209   : > { %v3595_v17 = vshrl.u32 %v3447_v1, 16  ;;  %v4081_v15 = vrot.slane %v4080_v8, 4  ;;  %v4090_v49 = vor.u32 %v4089_v45, %v4085_v58  ;;  %v10265_v59 = vrot.slane %v5304_v34, 4  ;;  %v4951_v34 = vld [vmem:[#allocation2 + $0x54] sm:$0xe]  ;;  %6858 = vmatpush.bf16.msra.mxu1 %v8163_v7 }
 0x20a   : > { %6026 = vrot.lane.b32.xlu1 %v8134_v12, %s8349_s16  ;;  %v3598_v31 = vshll.u32 %v3447_v1, 16  ;;  %v3090_v2 = vsel %vm3060_vm13, %v3057_v20, %v2763_v48  ;;  %v3360_v14 = vmax.f32 %v3328_v57, 0.0  ;;  %v10269_v22 = vrot.slane %v5310_v10, 5  ;;  %v4551_v12 = vld [vmem:[#allocation2 + $0x5c] sm:$0x1] }
 0x20b   : > { %v3597_v43 = vrot.slane %v3595_v17, 7  ;;  %v4086_v18 = vsel %vm8473_vm5, %v4081_v15, %v4085_v58  ;;  %v4091_v42 = vrot.slane %v4090_v49, 4  ;;  %v5655_v54 = vrot.slane %v10246_v37, 5 }
 0x20c   : > { %v5804_v61 = vunpack.c.l.b16 %v4086_v18  ;;  %v3448_v38 = vpack.c.bf16 %v3360_v14, %v3360_v14  ;;  %v7768_v30 = vrot.slane %v5559_v62, 9  ;;  %v3123_v47 = vsel %vm3093_vm14, %v3090_v2, %v2843_v63  ;;  %v8162_v62 = vld [vmem:[%s11601_s4] sm:$0xff] }
 0x20d   : > { %v3600_v11 = vor.u32 %v3598_v31, %v3597_v43  ;;  %v3602_v52 = vrot.slane %v3597_v43, 4  ;;  %v4096_v16 = vsel %vm8473_vm5, %v4091_v42, %v4095_v21  ;;  %v5658_v13 = vrot.slane %v10252_v40, 5  ;;  %7729 = vmatmul.msk.bf16.gmra.mxu0 %vm3146_vm15, %v3123_v47  ;;  %v3849_v21 = vld [vmem:[#allocation2 + $0x6c] sm:$0xf]  ;;  %6859 = vmatpush.bf16.msra.mxu1 %v8162_v62 }
 0x20e   : > { %v5805_v26 = vunpack.c.l.b16 %v4096_v16  ;;  %6252 = vrot.lane.b32.xlu0 %v8151_v50, %s8350_s9  ;;  %v3604_v35 = vshrl.u32 %v3448_v38, 16  ;;  %v5656_v24 = vsel %vm8450_vm4, %v7768_v30, %v5655_v54  ;;  %v5657_v55 = vrot.slane %v5655_v54, 4  ;;  %v4513_v43 = vld [vmem:[#allocation2 + $0xc] sm:$0xf] }
 0x20f   : > { %v3601_v40 = vsel %vm9503_vm6, %v3593_v36, %v3600_v11  ;;  %v3847_v0 = vsel %vm9593_vm10, %v3602_v52, %v3846_v6  ;;  %v3607_v44 = vshll.u32 %v3448_v38, 16  ;;  %v5291_v58 = vshrl.u32 %v5132_v33, 16 }
 0x210   : > { %3845 = vst.msk [vmem:[#allocation2 + $0x64] sm:$0xf] %vm3376_vm0, %v3601_v40  ;;  %v5831_v1 = vpack.c.b16 %v5805_v26, %v5804_v61  ;;  %v10296_v8 = vrot.slane %v3604_v35, 7  ;;  %v5659_v45 = vsel %vm8450_vm4, %v5657_v55, %v5658_v13  ;;  %v5294_v60 = vshll.u32 %v5132_v33, 16  ;;  %v10320_v26 = vpop.permute.xlu2 %6018 }
 0x211   : > { %3848 = vst [vmem:[#allocation2 + $0x68] sm:$0x1] %v3847_v0  ;;  %v6364_v36 = vunpack.c.l.b16 %v5656_v24  ;;  %v6365_v20 = vunpack.c.l.b16 %v5659_v45  ;;  %v5293_v57 = vrot.slane %v5291_v58, 4  ;;  %v5300_v10 = vshll.u32 %v10246_v37, 16  ;;  %v8241_v58 = vld [vmem:[#allocation2 + $0x10] sm:$0xf] }
 0x212   : > { %5852 = vrot.lane.b32.xlu2 %v5831_v1, %s8347_s8  ;;  %v3609_v17 = vor.u32 %v3607_v44, %v10296_v8  ;;  %v5296_v48 = vrot.slane %v5294_v60, 5  ;;  %v7753_v15 = vrot.slane %v4951_v34, 9  ;;  %v5053_v49 = vrot.slane %v4526_v46, 5  ;;  %v3917_v34 = vld [vmem:[#allocation2 + $0x48] sm:$0xf] }
 0x213   : > { %v6391_v31 = vpack.c.b16 %v6365_v20, %v6364_v36  ;;  %v5302_v2 = vrot.slane %v5300_v10, 5  ;;  %v5056_v14 = vrot.slane %v4551_v12, 5  ;;  %v7736_v63 = vrot.slane %v4342_v53, 9  ;;  %v10327_v1 = vld [vmem:[#allocation2 + $0x1c] sm:$0xf]  ;;  %v6147_v12 = vpop.permute.xlu0 %6146 }
 0x214   : > { %v3850_v37 = vsel %vm9418_vm2, %v3609_v17, %v3849_v21  ;;  %v5297_v18 = vor.u32 %v5296_v48, %v5293_v57  ;;  %v5054_v42 = vsel %vm8450_vm4, %v7753_v15, %v5053_v49  ;;  %v5055_v54 = vrot.slane %v5053_v49, 4  ;;  %v10335_v36 = vld [vmem:[#allocation2 + $0x4c] sm:$0xf]  ;;  %v10340_v49 = vld [vmem:[#allocation2 + $0x50] sm:$0x1] }
 0x215   : > { %3851 = vst [vmem:[#allocation2 + $0x6c] sm:$0xf] %v3850_v37  ;;  %8048 = vmatmul.msk.bf16.gmra.mxu3 %vm3093_vm14, %v6391_v31  ;;  %v5307_v29 = vor.u32 %v10265_v59, %v5302_v2  ;;  %v6110_v25 = vunpack.c.l.b16 %v5054_v42  ;;  %v4438_v6 = vrot.slane %v10235_v56, 5  ;;  %v4441_v61 = vrot.slane %v10242_v41, 5  ;;  %v3234_v41 = vpop.f32.mrf.mxu0 }
 0x216   : > { %v5298_v50 = vrot.slane %v5297_v18, 4  ;;  %v5057_v38 = vsel %vm8450_vm4, %v5055_v54, %v5056_v14  ;;  %v4562_v30 = vshrl.u32 %v4513_v43, 16  ;;  %v4565_v47 = vshll.u32 %v4513_v43, 16 }
 0x217   : > { %v5308_v33 = vrot.slane %v5307_v29, 4  ;;  %v6111_v11 = vunpack.c.l.b16 %v5057_v38  ;;  %v4439_v52 = vsel %vm8450_vm4, %v7736_v63, %v4438_v6  ;;  %v4440_v16 = vrot.slane %v4438_v6, 4 }
 0x218   : > { %v5303_v59 = vsel %vm8473_vm5, %v5298_v50, %v5302_v2  ;;  %v5884_v13 = vunpack.c.l.b16 %v4439_v52  ;;  %v4564_v56 = vrot.slane %v4562_v30, 4  ;;  %v4567_v7 = vrot.slane %v4565_v47, 5  ;;  %v8152_v52 = vld [vmem:[#allocation2 + $0x60] sm:$0xff] }
 0x219   : > { %v5313_v35 = vsel %vm8473_vm5, %v5308_v33, %v10269_v22  ;;  %v6284_v24 = vunpack.c.l.b16 %v5303_v59  ;;  %v6136_v55 = vpack.c.b16 %v6111_v11, %v6110_v25  ;;  %v4442_v53 = vsel %vm8450_vm4, %v4440_v16, %v4441_v61  ;;  %v6323_v25 = vpop.permute.xlu2 %6322 }
 0x21a   : > { %v6285_v40 = vunpack.c.l.b16 %v5313_v35  ;;  %v5885_v0 = vunpack.c.l.b16 %v4442_v53  ;;  %v4568_v44 = vor.u32 %v4567_v7, %v4564_v56  ;;  %v4571_v46 = vshll.u32 %v8241_v58, 16  ;;  %v8135_v7 = vld [vmem:[#allocation2 + $0x48] sm:$0xff]  ;;  %v8114_v53 = vld [vmem:[#allocation2] sm:$0xff] }
 0x21b   : > { %v4599_v45 = vshrl.u32 %v10327_v1, 16  ;;  %v3610_v60 = vrot.slane %v10296_v8, 4  ;;  %6158 = vrot.lane.b32.xlu2 %v6136_v55, %s8347_s8  ;;  %v4577_v22 = vrot.slane %v4575_v27, 4  ;;  %v3293_v21 = vmul.f32 %v10182_v28, %v3234_v41 }
 0x21c   : > { %v6311_v20 = vpack.c.b16 %v6285_v40, %v6284_v24  ;;  %v5911_v57 = vpack.c.b16 %v5885_v0, %v5884_v13  ;;  %v4573_v10 = vrot.slane %v4571_v46, 5  ;;  %v4583_v17 = vrot.slane %v4581_v32, 5  ;;  %v6243_v32 = vpop.permute.xlu1 %6242  ;;  %v5843_v46 = vpop.permute.xlu0 %5842 }
 0x21d   : > { %v4569_v48 = vrot.slane %v4568_v44, 4  ;;  %v3329_v15 = vadd.f32 %v10199_v4, %v3293_v21  ;;  %vm6450_vm3 = vcmask 523264   ;;  %v4098_v62 = vshrl.u32 %v3917_v34, 16 }
 0x21e   : > { %v4101_v19 = vshll.u32 %v3917_v34, 16  ;;  %6332 = vrot.lane.b32.xlu1 %v6311_v20, %s8349_s16  ;;  %5932 = vrot.lane.b32.xlu0 %v5911_v57, %s8350_s9  ;;  %v4578_v27 = vor.u32 %v4577_v22, %v4573_v10  ;;  %vm11606_vm1 = vcmask 785408   ;;  %v4107_v31 = vshll.u32 %v10335_v36, 16  ;;  %v3853_v34 = vld [vmem:[#allocation2 + $0x74] sm:$0x1] }
 0x21f   : > { %v4111_v2 = vshrl.u32 %v10335_v36, 16  ;;  %v4574_v14 = vsel %vm8473_vm5, %v4569_v48, %v4573_v10  ;;  %v3361_v63 = vmax.f32 %v3329_v15, 0.0  ;;  %v4100_v43 = vrot.slane %v4098_v62, 4  ;;  %v8243_v15 = vld [vmem:[#allocation2 + $0x20] sm:$0x1] }
 0x220   : > { %v4103_v37 = vrot.slane %v4101_v19, 5  ;;  %v4579_v18 = vrot.slane %v4578_v27, 4  ;;  %v4109_v42 = vrot.slane %v4107_v31, 5  ;;  %v4117_v29 = vshll.u32 %v10340_v49, 16  ;;  %v10361_v31 = vld [vmem:[#allocation2 + $0x64] sm:$0xf] }
 0x221   : > { %v4113_v54 = vrot.slane %v4111_v2, 4  ;;  %v3449_v6 = vpack.c.bf16 %v3361_v63, %v3361_v63  ;;  %v4586_v50 = vshrl.u32 %v4515_v9, 16  ;;  %v4589_v38 = vshll.u32 %v4515_v9, 16  ;;  %v10374_v8 = vpop.permute.xlu2 %2428 }
 0x222   : > { %v4104_v61 = vor.u32 %v4103_v37, %v4100_v43  ;;  %v4584_v30 = vsel %vm8473_vm5, %v4579_v18, %v4583_v17  ;;  %v6050_v47 = vunpack.c.l.b16 %v4574_v14  ;;  %v4119_v11 = vrot.slane %v4117_v29, 5  ;;  %v5560_v43 = vld [vmem:[#allocation2 + $0x60] sm:$0xe]  ;;  %v4528_v29 = vld [vmem:[#allocation2 + $0x64] sm:$0xf] }
 0x223   : > { %v4114_v33 = vor.u32 %v4113_v54, %v4109_v42  ;;  %v6051_v16 = vunpack.c.l.b16 %v4584_v30  ;;  %v3612_v59 = vshrl.u32 %v3449_v6, 16  ;;  %v3615_v13 = vshll.u32 %v3449_v6, 16  ;;  %v4952_v37 = vld [vmem:[#allocation2 + $0x60] sm:$0xe]  ;;  %v3237_v30 = vpop.f32.mrf.mxu0 }
 0x224   : > { %v4105_v56 = vrot.slane %v4104_v61, 4  ;;  %v4588_v35 = vrot.slane %v4586_v50, 4  ;;  %v4591_v24 = vrot.slane %v4589_v38, 5  ;;  %v4595_v55 = vshll.u32 %v10327_v1, 16  ;;  %v5923_v9 = vpop.permute.xlu1 %5922 }
 0x225   : > { %v4115_v41 = vrot.slane %v4114_v33, 4  ;;  %v6082_v40 = vpack.c.b16 %v6051_v16, %v6050_v47  ;;  %v3614_v0 = vrot.slane %v3612_v59, 7  ;;  %v4601_v58 = vrot.slane %v4599_v45, 4  ;;  %v10386_v47 = vld [vmem:[#allocation2 + $0x28] sm:$0xf] }
 0x226   : > { %v4110_v44 = vsel %vm8473_vm5, %v4105_v56, %v4109_v42  ;;  %6028 = vrot.lane.b32.xlu1 %v8135_v7, %s8349_s16  ;;  %v4592_v20 = vor.u32 %v4591_v24, %v4588_v35  ;;  %v4597_v57 = vrot.slane %v4595_v55, 5  ;;  %6254 = vrot.lane.b32.xlu0 %v8152_v52, %s8350_s9  ;;  %v4605_v62 = vshll.u32 %v8243_v15, 16  ;;  %v10372_v42 = vld [vmem:[#allocation2 + $0x68] sm:$0x1] }
 0x227   : > { %v4120_v22 = vsel %vm8473_vm5, %v4115_v41, %v4119_v11  ;;  %v5806_v21 = vunpack.c.l.b16 %v4110_v44  ;;  %v6534_v1 = vsel %vm3093_vm14, %v6082_v40, %v6147_v12  ;;  %v3617_v10 = vor.u32 %v3615_v13, %v3614_v0  ;;  %v4552_v16 = vld [vmem:[#allocation2 + $0x68] sm:$0x1]  ;;  %v4343_v40 = vld [vmem:[#allocation2 + $0x48] sm:$0xe] }
 0x228   : > { %v3619_v17 = vrot.slane %v3614_v0, 4  ;;  %v5807_v48 = vunpack.c.l.b16 %v4120_v22  ;;  %v6581_v45 = vsel %vm6450_vm3, %v6534_v1, %v6243_v32  ;;  %v4602_v19 = vor.u32 %v4601_v58, %v4597_v57 }
 0x229   : > { %v6404_v27 = vsel %vm3093_vm14, %v8114_v53, %v5843_v46  ;;  %v3618_v2 = vsel %vm9503_vm6, %v3610_v60, %v3617_v10  ;;  %v6613_v14 = vsel %vm11606_vm1, %v6581_v45, %v6323_v25  ;;  %v4593_v32 = vrot.slane %v4592_v20, 4  ;;  %v10380_v25 = vld [vmem:[#allocation2 + $0x2c] sm:$0x1]  ;;  %v2253_v53 = vpop.permute.xlu0 %2252 }
 0x22a   : > { %v3854_v12 = vsel %vm9593_vm10, %v3619_v17, %v3853_v34  ;;  %v5832_v63 = vpack.c.b16 %v5807_v48, %v5806_v21  ;;  %3852 = vst.msk [vmem:[#allocation2 + $0x70] sm:$0xf] %vm3376_vm0, %v3618_v2  ;;  %6949 = vmatmul.bf16.vlgmr.msra.gmra.mxu2 %v6613_v14  ;;  %v6452_v18 = vsel %vm6450_vm3, %v6404_v27, %v5923_v9  ;;  %v5328_v54 = vshrl.u32 %v10361_v31, 16  ;;  %v5134_v34 = vld [vmem:[#allocation2 + $0x60] sm:$0xf]  ;;  %v8079_v27 = vld [vmem:[%s8445_s17 + $0xb4] sm:$0xff] }
 0x22b   : > { %3855 = vst [vmem:[#allocation2 + $0x74] sm:$0x1] %v3854_v12  ;;  %v6485_v60 = vsel %vm11606_vm1, %v6452_v18, %v10320_v26  ;;  %v4629_v6 = vshll.u32 %v10380_v25, 16  ;;  %v4598_v61 = vsel %vm8473_vm5, %v4593_v32, %v4597_v57  ;;  %v7769_v50 = vrot.slane %v5560_v43, 9  ;;  %v10409_v43 = vpop.permute.xlu2 %2684  ;;  %s269_s17 = sand.u32 1, %s8330_s25  }
 0x22c   : > { %5854 = vrot.lane.b32.xlu2 %v5832_v63, %s8347_s8  ;;  %6860 = vmatmul.bf16.vlgmr.msra.gmra.mxu1 %v6485_v60  ;;  %v5662_v38 = vrot.slane %v10361_v31, 5  ;;  %v4623_v33 = vshrl.u32 %v10386_v47, 16  ;;  %v4607_v26 = vrot.slane %v4605_v62, 5  ;;  %v4603_v11 = vrot.slane %v4602_v19, 4  ;;  %v4517_v63 = vld [vmem:[#allocation2 + $0x24] sm:$0xf] }
 0x22d   : > { %v5665_v52 = vrot.slane %v10372_v42, 5  ;;  %v7754_v56 = vrot.slane %v4952_v37, 9  ;;  %v5060_v7 = vrot.slane %v4528_v29, 5  ;;  %v10392_v41 = vunpack.c.l.b16 %v4598_v61  ;;  %s11053_s20 = sshll.u32 %s269_s17, 8 }
 0x22e   : > { %v5663_v59 = vsel %vm8450_vm4, %v7769_v50, %v5662_v38  ;;  %v5664_v13 = vrot.slane %v5662_v38, 4  ;;  %v5330_v35 = vrot.slane %v5328_v54, 4  ;;  %v5334_v24 = vshll.u32 %v10372_v42, 16  ;;  %v3919_v38 = vld [vmem:[#allocation2 + $0x54] sm:$0xf]  ;;  %s11069_s22 = scalar_lea.vmem [#allocation3], %s11053_s20 }
 0x22f   : > { %v3294_v55 = vmul.f32 %v10182_v28, %v3237_v30  ;;  %v5061_v44 = vsel %vm8450_vm4, %v7754_v56, %v5060_v7  ;;  %v5062_v58 = vrot.slane %v5060_v7, 4  ;;  %v5063_v46 = vrot.slane %v4552_v16, 5  ;;  %s7268_s18 = sshll.u32 %s11069_s22, 4  ;;  %s7269_s18 = int_to_ptr.vmem [resolvable:$true] %s7268_s18 }
 0x230   : > { %v5666_v0 = vsel %vm8450_vm4, %v5664_v13, %v5665_v52  ;;  %v6366_v22 = vunpack.c.l.b16 %v5663_v59  ;;  %v6112_v20 = vunpack.c.l.b16 %v5061_v44  ;;  %v7737_v10 = vrot.slane %v4343_v40, 9  ;;  %v3856_v40 = vld [vmem:[#allocation2 + $0x78] sm:$0xf] }
 0x231   : > { %v6367_v21 = vunpack.c.l.b16 %v5666_v0  ;;  %v3330_v57 = vadd.f32 %v10199_v4, %v3294_v55  ;;  %v5064_v1 = vsel %vm8450_vm4, %v5062_v58, %v5063_v46  ;;  %v4445_v17 = vrot.slane %v10335_v36, 5  ;;  %v2509_v55 = vpop.permute.xlu0 %2508  ;;  %v4530_v25 = vld [vmem:[#allocation2 + $0x70] sm:$0xf] }
 0x232   : > { %v4448_v48 = vrot.slane %v10340_v49, 5  ;;  %v6113_v62 = vunpack.c.l.b16 %v5064_v1  ;;  %v5315_v19 = vshrl.u32 %v5134_v34, 16  ;;  %v5318_v9 = vshll.u32 %v5134_v34, 16 }
 0x233   : > { %v6392_v15 = vpack.c.b16 %v6367_v21, %v6366_v22  ;;  %v3362_v45 = vmax.f32 %v3330_v57, 0.0  ;;  %v4446_v2 = vsel %vm8450_vm4, %v7737_v10, %v4445_v17  ;;  %v4447_v12 = vrot.slane %v4445_v17, 4  ;;  %v3239_v10 = vpop.f32.mrf.mxu0 }
 0x234   : > { %v5324_v14 = vshll.u32 %v10361_v31, 16  ;;  %v4608_v36 = vsel %vm8473_vm5, %v4603_v11, %v4607_v26  ;;  %v6137_v49 = vpack.c.b16 %v6113_v62, %v6112_v20  ;;  %v5317_v32 = vrot.slane %v5315_v19, 4  ;;  %v2333_v26 = vpop.permute.xlu1 %2332 }
 0x235   : > { %8049 = vmatmul.msk.bf16.gmra.mxu3 %vm3093_vm14, %v6392_v15  ;;  %v3450_v37 = vpack.c.bf16 %v3362_v45, %v3362_v45  ;;  %v4449_v18 = vsel %vm8450_vm4, %v4447_v12, %v4448_v48  ;;  %v5886_v42 = vunpack.c.l.b16 %v4446_v2  ;;  %v5320_v60 = vrot.slane %v5318_v9, 5  ;;  %v10434_v45 = vld [vmem:[#allocation2 + $0x5c] sm:$0x1]  ;;  %v10440_v9 = vld [vmem:[#allocation2 + $0x38] sm:$0x1] }
 0x236   : > { %v5326_v54 = vrot.slane %v5324_v14, 5  ;;  %6160 = vrot.lane.b32.xlu2 %v6137_v49, %s8347_s8  ;;  %v5887_v29 = vunpack.c.l.b16 %v4449_v18  ;;  %v4610_v61 = vshrl.u32 %v4517_v63, 16  ;;  %v4613_v50 = vshll.u32 %v4517_v63, 16  ;;  %v10443_v63 = vld [vmem:[#allocation2 + $0x34] sm:$0xf] }
 0x237   : > { %v3621_v31 = vshrl.u32 %v3450_v37, 16  ;;  %v6053_v30 = vunpack.c.l.b16 %v4608_v36  ;;  %vm11623_vm1 = vcmask 31744   ;;  %v5321_v52 = vor.u32 %v5320_v60, %v5317_v32 }
 0x238   : > { %v2894_v11 = vsel %vm11623_vm1, %v8079_v27, %v2253_v53  ;;  %v5331_v16 = vor.u32 %v5330_v35, %v5326_v54  ;;  %v5336_v59 = vrot.slane %v5334_v24, 5  ;;  %v3624_v56 = vshll.u32 %v3450_v37, 16  ;;  %v10424_v24 = vld [vmem:[#allocation2 + $0x58] sm:$0xf]  ;;  %v8153_v37 = vld [vmem:[#allocation2 + $0x6c] sm:$0xff] }
 0x239   : > { %v10418_v13 = vrot.slane %v3621_v31, 7  ;;  %v5912_v7 = vpack.c.b16 %v5887_v29, %v5886_v42  ;;  %v5322_v0 = vrot.slane %v5321_v52, 4  ;;  %v4619_v58 = vshll.u32 %v10386_v47, 16  ;;  %v6149_v47 = vpop.permute.xlu2 %6148 }
 0x23a   : > { %v5332_v44 = vrot.slane %v5331_v16, 4  ;;  %v4122_v46 = vshrl.u32 %v3919_v38, 16  ;;  %v2927_v22 = vsel %vm2895_vm7, %v2894_v11, %v2333_v26  ;;  %v4612_v53 = vrot.slane %v4610_v61, 4 }
 0x23b   : > { %v3626_v34 = vor.u32 %v3624_v56, %v10418_v13  ;;  %5934 = vrot.lane.b32.xlu0 %v5912_v7, %s8350_s9  ;;  %v4615_v35 = vrot.slane %v4613_v50, 5  ;;  %v5327_v21 = vsel %vm8473_vm5, %v5322_v0, %v5326_v54  ;;  %v4125_v1 = vshll.u32 %v3919_v38, 16  ;;  %v10453_v50 = vld [vmem:[#allocation2 + $0x70] sm:$0xf]  ;;  %v5561_v56 = vld [vmem:[#allocation2 + $0x6c] sm:$0xe] }
 0x23c   : > { %v5337_v20 = vsel %vm8473_vm5, %v5332_v44, %v5336_v59  ;;  %v4124_v57 = vrot.slane %v4122_v46, 4  ;;  %v6286_v48 = vunpack.c.l.b16 %v5327_v21  ;;  %v4625_v62 = vrot.slane %v4623_v33, 4  ;;  %v2589_v38 = vpop.permute.xlu1 %2588 }
 0x23d   : > { %v3857_v17 = vsel %vm9418_vm2, %v3626_v34, %v3856_v40  ;;  %v6287_v15 = vunpack.c.l.b16 %v5337_v20  ;;  %v10436_v19 = vrot.slane %v4619_v58, 5  ;;  %v4127_v27 = vrot.slane %v4125_v1, 5  ;;  %v10474_v34 = vld [vmem:[#allocation2 + $0x74] sm:$0x1] }
 0x23e   : > { %3858 = vst [vmem:[#allocation2 + $0x78] sm:$0xf] %v3857_v17  ;;  %v4131_v2 = vshll.u32 %v10424_v24, 16  ;;  %v4135_v12 = vshrl.u32 %v10424_v24, 16  ;;  %v4653_v14 = vshll.u32 %v10440_v9, 16  ;;  %v4647_v36 = vshrl.u32 %v10443_v63, 16 }
 0x23f   : > { %v6312_v33 = vpack.c.b16 %v6287_v15, %v6286_v48  ;;  %v3295_v49 = vmul.f32 %v10182_v28, %v3239_v10  ;;  %v6083_v32 = vpack.c.b16 %v6053_v30, %v10392_v41  ;;  %v4616_v18 = vor.u32 %v4615_v35, %v4612_v53  ;;  %v4553_v20 = vld [vmem:[#allocation2 + $0x74] sm:$0x1] }
 0x240   : > { %v4128_v42 = vor.u32 %v4127_v27, %v4124_v57  ;;  %v4133_v60 = vrot.slane %v4131_v2, 5  ;;  %v4137_v54 = vrot.slane %v4135_v12, 4  ;;  %v4141_v31 = vshll.u32 %v10434_v45, 16  ;;  %v4344_v57 = vld [vmem:[#allocation2 + $0x54] sm:$0xe] }
 0x241   : > { %6334 = vrot.lane.b32.xlu1 %v6312_v33, %s8349_s16  ;;  %v3331_v29 = vadd.f32 %v10199_v4, %v3295_v49  ;;  %v2960_v61 = vsel %vm2928_vm8, %v2927_v22, %v10374_v8  ;;  %v10456_v28 = vsel %vm3093_vm14, %v6083_v32, %v6149_v47  ;;  %v4626_v41 = vor.u32 %v4625_v62, %v10436_v19  ;;  %v2765_v8 = vpop.permute.xlu0 %2764  ;;  %v4953_v22 = vld [vmem:[#allocation2 + $0x6c] sm:$0xe]  ;;  %v8136_v48 = vld [vmem:[#allocation2 + $0x54] sm:$0xff]  ;;  %v3860_v32 = vld [vmem:[#allocation2 + $0x80] sm:$0x1] }
 0x242   : > { %v4129_v30 = vrot.slane %v4128_v42, 4  ;;  %v2993_v26 = vsel %vm2961_vm9, %v2960_v61, %v2509_v55  ;;  %v10462_v11 = vrot.slane %v4629_v6, 5  ;;  %v4138_v52 = vor.u32 %v4137_v54, %v4133_v60 }
 0x243   : > { %v3363_v16 = vmax.f32 %v3331_v29, 0.0  ;;  %v3026_v59 = vsel %vm2994_vm11, %v2993_v26, %v2589_v38  ;;  %6256 = vrot.lane.b32.xlu0 %v8153_v37, %s8350_s9  ;;  %v3627_v7 = vrot.slane %v10418_v13, 4  ;;  %v10467_v40 = vrot.slane %v4616_v18, 4 }
 0x244   : > { %v4134_v0 = vsel %vm8473_vm5, %v4129_v30, %v4133_v60  ;;  %v5352_v55 = vshrl.u32 %v10453_v50, 16  ;;  %v4139_v6 = vrot.slane %v4138_v52, 4  ;;  %v4143_v44 = vrot.slane %v4141_v31, 5  ;;  %v2845_v38 = vpop.permute.xlu1 %2844 }
 0x245   : > { %v3451_v58 = vpack.c.bf16 %v3363_v16, %v3363_v16  ;;  %v3059_v46 = vsel %vm3027_vm12, %v3026_v59, %v10409_v43  ;;  %v10476_v53 = vrot.slane %v4626_v41, 4  ;;  %v5808_v13 = vunpack.c.l.b16 %v4134_v0  ;;  %v5136_v16 = vld [vmem:[#allocation2 + $0x6c] sm:$0xf]  ;;  %v10496_v59 = vpop.permute.xlu2 %5844 }
 0x246   : > { %v3092_v35 = vsel %vm3060_vm13, %v3059_v46, %v2765_v8  ;;  %v10479_v21 = vrot.slane %v5352_v55, 4  ;;  %v4144_v1 = vsel %vm8473_vm5, %v4139_v6, %v4143_v44  ;;  %v7770_v15 = vrot.slane %v5561_v56, 9  ;;  %v4519_v55 = vld [vmem:[#allocation2 + $0x30] sm:$0xf] }
 0x247   : > { %v3629_v10 = vshrl.u32 %v3451_v58, 16  ;;  %v3632_v17 = vshll.u32 %v3451_v58, 16  ;;  %v5809_v43 = vunpack.c.l.b16 %v4144_v1  ;;  %v5669_v62 = vrot.slane %v10453_v50, 5 }
 0x248   : > { %v5672_v27 = vrot.slane %v10474_v34, 5  ;;  %v7755_v2 = vrot.slane %v4953_v22, 9  ;;  %v5067_v47 = vrot.slane %v4530_v25, 5  ;;  %v5070_v33 = vrot.slane %v4553_v20, 5 }
 0x249   : > { %v3631_v12 = vrot.slane %v3629_v10, 7  ;;  %6030 = vrot.lane.b32.xlu1 %v8136_v48, %s8349_s16  ;;  %v7738_v49 = vrot.slane %v4344_v57, 9  ;;  %v5833_v37 = vpack.c.b16 %v5809_v43, %v5808_v13  ;;  %v5670_v18 = vsel %vm8450_vm4, %v7770_v15, %v5669_v62  ;;  %v6245_v43 = vpop.permute.xlu0 %6244 }
 0x24a   : > { %v5671_v42 = vrot.slane %v5669_v62, 4  ;;  %v4452_v60 = vrot.slane %v10424_v24, 5  ;;  %v6368_v29 = vunpack.c.l.b16 %v5670_v18  ;;  %v5068_v61 = vsel %vm8450_vm4, %v7755_v2, %v5067_v47 }
 0x24b   : > { %v3634_v54 = vor.u32 %v3632_v17, %v3631_v12  ;;  %v3636_v31 = vrot.slane %v3631_v12, 4  ;;  %5856 = vrot.lane.b32.xlu2 %v5833_v37, %s8347_s8  ;;  %v5069_v30 = vrot.slane %v5067_v47, 4  ;;  %v6114_v26 = vunpack.c.l.b16 %v5068_v61  ;;  %v3242_v17 = vpop.f32.mrf.mxu0  ;;  %v3921_v12 = vld [vmem:[#allocation2 + $0x60] sm:$0xf] }
 0x24c   : > { %v5673_v41 = vsel %vm8450_vm4, %v5671_v42, %v5672_v27  ;;  %v4453_v52 = vsel %vm8450_vm4, %v7738_v49, %v4452_v60  ;;  %v4454_v0 = vrot.slane %v4452_v60, 4  ;;  %v4455_v6 = vrot.slane %v10434_v45, 5 }
 0x24d   : > { %v3635_v24 = vsel %vm9503_vm6, %v3627_v7, %v3634_v54  ;;  %v3861_v8 = vsel %vm9593_vm10, %v3636_v31, %v3860_v32  ;;  %v6369_v56 = vunpack.c.l.b16 %v5673_v41  ;;  %v5071_v25 = vsel %vm8450_vm4, %v5069_v30, %v5070_v33  ;;  %v10522_v32 = vld [vmem:[#allocation2 + $0x64] sm:$0xf]  ;;  %v10539_v61 = vpop.permute.xlu2 %6150 }
 0x24e   : > { %3859 = vst.msk [vmem:[#allocation2 + $0x7c] sm:$0xf] %vm3376_vm0, %v3635_v24  ;;  %v5888_v44 = vunpack.c.l.b16 %v4453_v52  ;;  %v3125_v58 = vsel %vm3093_vm14, %v3092_v35, %v2845_v38  ;;  %v6115_v22 = vunpack.c.l.b16 %v5071_v25  ;;  %v5339_v7 = vshrl.u32 %v5136_v16, 16 }
 0x24f   : > { %3862 = vst [vmem:[#allocation2 + $0x80] sm:$0x1] %v3861_v8  ;;  %v6393_v46 = vpack.c.b16 %v6369_v56, %v6368_v29  ;;  %7730 = vmatmul.msk.bf16.gmra.mxu0 %vm3146_vm15, %v3125_v58  ;;  %v5342_v13 = vshll.u32 %v5136_v16, 16  ;;  %v4456_v20 = vsel %vm8450_vm4, %v4454_v0, %v4455_v6  ;;  %v5348_v57 = vshll.u32 %v10453_v50, 16  ;;  %v8115_v8 = vld [vmem:[#allocation2 + $0xc] sm:$0xff] }
 0x250   : > { %v4634_v1 = vshrl.u32 %v4519_v55, 16  ;;  %v4637_v10 = vshll.u32 %v4519_v55, 16  ;;  %v6138_v45 = vpack.c.b16 %v6115_v22, %v6114_v26  ;;  %v5889_v48 = vunpack.c.l.b16 %v4456_v20  ;;  %v10552_v6 = vld [vmem:[#allocation2 + $0x68] sm:$0x1] }
 0x251   : > { %8050 = vmatmul.msk.bf16.gmra.mxu3 %vm3093_vm14, %v6393_v46  ;;  %v5341_v35 = vrot.slane %v5339_v7, 4  ;;  %v5344_v15 = vrot.slane %v5342_v13, 5  ;;  %v4622_v62 = vsel %vm8473_vm5, %v10467_v40, %v10436_v19  ;;  %v4632_v50 = vsel %vm8473_vm5, %v10476_v53, %v10462_v11  ;;  %v10531_v11 = vld [vmem:[%s11599_s2] ss:$0 sm:$0xff] }
 0x252   : > { %v5358_v27 = vshll.u32 %v10474_v34, 16  ;;  %v5350_v2 = vrot.slane %v5348_v57, 5  ;;  %v5913_v47 = vpack.c.b16 %v5889_v48, %v5888_v44  ;;  %v4636_v49 = vrot.slane %v4634_v1, 4  ;;  %v5925_v1 = vpop.permute.xlu0 %5924 }
 0x253   : > { %v5345_v33 = vor.u32 %v5344_v15, %v5341_v35  ;;  %v4643_v37 = vshll.u32 %v10443_v63, 16  ;;  %6162 = vrot.lane.b32.xlu2 %v6138_v45, %s8347_s8  ;;  %v4639_v40 = vrot.slane %v4637_v10, 5  ;;  %v4649_v18 = vrot.slane %v4647_v36, 4  ;;  %v3244_v13 = vpop.f32.mrf.mxu0  ;;  %v4521_v35 = vld [vmem:[#allocation2 + $0x3c] sm:$0xf] }
 0x254   : > { %v5355_v19 = vor.u32 %v10479_v21, %v5350_v2  ;;  %v3296_v34 = vmul.f32 %v10531_v11, %v3242_v17  ;;  %5936 = vrot.lane.b32.xlu0 %v5913_v47, %s8350_s9  ;;  %v4146_v60 = vshrl.u32 %v3921_v12, 16  ;;  %v4149_v54 = vshll.u32 %v3921_v12, 16  ;;  %v6325_v21 = vpop.permute.xlu1 %6324  ;;  %v3863_v47 = vld [vmem:[#allocation2 + $0x84] sm:$0xf] }
 0x255   : > { %v5346_v53 = vrot.slane %v5345_v33, 4  ;;  %v10535_v42 = vrot.slane %v4643_v37, 5  ;;  %v5360_v31 = vrot.slane %v5358_v27, 5  ;;  %v4155_v36 = vshll.u32 %v10522_v32, 16  ;;  %v8154_v44 = vld [vmem:[#allocation2 + $0x78] sm:$0xff] }
 0x256   : > { %v5356_v29 = vrot.slane %v5355_v19, 4  ;;  %v3332_v63 = vadd.f32 %v10199_v4, %v3296_v34  ;;  %v10541_v38 = vunpack.c.l.b16 %v4622_v62  ;;  %v4148_v30 = vrot.slane %v4146_v60, 4  ;;  %v10571_v33 = vld [vmem:[%s11600_s3] ss:$0 sm:$0xff]  ;;  %v5847_v60 = vpop.permute.xlu2 %5846 }
 0x257   : > { %v5351_v41 = vsel %vm8473_vm5, %v5346_v53, %v5350_v2  ;;  %v4151_v26 = vrot.slane %v4149_v54, 5  ;;  %v10545_v52 = vunpack.c.l.b16 %v4632_v50  ;;  %v6583_v4 = vsel %vm6450_vm3, %v10456_v28, %v6245_v43 }
 0x258   : > { %v5361_v16 = vsel %vm8473_vm5, %v5356_v29, %v5360_v31  ;;  %v3364_v24 = vmax.f32 %v3332_v63, 0.0  ;;  %v6288_v56 = vunpack.c.l.b16 %v5351_v41  ;;  %v4640_v55 = vor.u32 %v4639_v40, %v4636_v49  ;;  %v8116_v63 = vld [vmem:[#allocation2 + $0x18] sm:$0xff] }
 0x259   : > { %v6289_v0 = vunpack.c.l.b16 %v5361_v16  ;;  %v4650_v25 = vor.u32 %v4649_v18, %v10535_v42  ;;  %v4152_v46 = vor.u32 %v4151_v26, %v4148_v30  ;;  %v4157_v22 = vrot.slane %v4155_v36, 5  ;;  %v8250_v30 = vld [vmem:[#allocation2 + $0x44] sm:$0x1] }
 0x25a   : > { %v3452_v58 = vpack.c.bf16 %v3364_v24, %v3364_v24  ;;  %v4159_v7 = vshrl.u32 %v10522_v32, 16  ;;  %v6407_v20 = vsel %vm3093_vm14, %v8115_v8, %v10496_v59  ;;  %vm11624_vm7 = vcmask 785408   ;;  %v8137_v24 = vld [vmem:[#allocation2 + $0x60] sm:$0xff] }
 0x25b   : > { %v6313_v57 = vpack.c.b16 %v6289_v0, %v6288_v56  ;;  %v6616_v28 = vsel %vm11624_vm7, %v6583_v4, %v6325_v21  ;;  %v6084_v10 = vpack.c.b16 %v10545_v52, %v10541_v38  ;;  %v4165_v48 = vshll.u32 %v10552_v6, 16  ;;  %vm11625_vm8 = vmmov %vm11624_vm7  ;;  %v8251_v56 = vld [vmem:[#allocation2 + $0x40] sm:$0xf] }
 0x25c   : > { %v3638_v17 = vshrl.u32 %v3452_v58, 16  ;;  %v4161_v45 = vrot.slane %v4159_v7, 4  ;;  %6954 = vmatmul.bf16.gmra.mxu2 %v6616_v28  ;;  %v4641_v15 = vrot.slane %v4640_v55, 4  ;;  %v4655_v43 = vrot.slane %v4653_v14, 5  ;;  %6258 = vrot.lane.b32.xlu0 %v8154_v44, %s8350_s9  ;;  %v6021_v53 = vpop.permute.xlu1 %6020  ;;  %v5562_v44 = vld [vmem:[#allocation2 + $0x78] sm:$0xe]  ;;  %vm11626_vm9 = vmmov %vm11624_vm7 }
 0x25d   : > { %6336 = vrot.lane.b32.xlu1 %v6313_v57, %s8349_s16  ;;  %v4651_v59 = vrot.slane %v4650_v25, 4  ;;  %v3297_v62 = vmul.f32 %v10531_v11, %v3244_v13  ;;  %v3641_v27 = vshll.u32 %v3452_v58, 16  ;;  %v4153_v2 = vrot.slane %v4152_v46, 4  ;;  %v10595_v25 = vld [vmem:[#allocation2 + $0x7c] sm:$0xf]  ;;  %v6247_v13 = vpop.permute.xlu0 %6246  ;;  %vm11627_vm11 = vmmov %vm11624_vm7 }
 0x25e   : > { %v10566_v50 = vrot.slane %v3638_v17, 7  ;;  %v4162_v12 = vor.u32 %v4161_v45, %v4157_v22  ;;  %v6454_v9 = vsel %vm6450_vm3, %v6407_v20, %v5925_v1  ;;  %v4658_v14 = vshrl.u32 %v4521_v35, 16  ;;  %v5162_v20 = vld [vmem:[#allocation2 + $0x80] sm:$0x1]  ;;  %v4954_v45 = vld [vmem:[#allocation2 + $0x78] sm:$0xe]  ;;  %vm11628_vm12 = vmmov %vm11624_vm7 }
 0x25f   : > { %v3333_v49 = vadd.f32 %v10571_v33, %v3297_v62  ;;  %v4661_v37 = vshll.u32 %v4521_v35, 16  ;;  %v4158_v40 = vsel %vm8473_vm5, %v4153_v2, %v4157_v22  ;;  %v4167_v34 = vrot.slane %v4165_v48, 5  ;;  %v3247_v2 = vpop.f32.mrf.mxu0  ;;  %vm11629_vm13 = vmmov %vm11624_vm7 }
 0x260   : > { %v3643_v19 = vor.u32 %v3641_v27, %v10566_v50  ;;  %v4163_v18 = vrot.slane %v4162_v12, 4  ;;  %v4646_v54 = vsel %vm8473_vm5, %v4641_v15, %v10535_v42  ;;  %v6488_v21 = vsel %vm11625_vm8, %v6454_v9, %v6021_v53  ;;  %v4532_v15 = vld [vmem:[#allocation2 + $0x7c] sm:$0xf]  ;;  %vm11630_vm15 = vmmov %vm11624_vm7 }
 0x261   : > { %v3365_v31 = vmax.f32 %v3333_v49, 0.0  ;;  %v10582_v29 = vrot.slane %v4658_v14, 4  ;;  %6865 = vmatmul.bf16.gmra.mxu1 %v6488_v21  ;;  %v10588_v41 = vrot.slane %v4661_v37, 5  ;;  %v4677_v26 = vshll.u32 %v8250_v30, 16  ;;  %v4554_v14 = vld [vmem:[#allocation2 + $0x80] sm:$0x1]  ;;  %vm11631_vm1 = vmmov %vm11624_vm7 }
 0x262   : > { %v3864_v36 = vsel %vm9418_vm2, %v3643_v19, %v3863_v47  ;;  %v4168_v38 = vsel %vm8473_vm5, %v4163_v18, %v4167_v34  ;;  %v4656_v42 = vsel %vm8473_vm5, %v4651_v59, %v4655_v43  ;;  %v5810_v52 = vunpack.c.l.b16 %v4158_v40  ;;  %v3867_v43 = vld [vmem:[#allocation2 + $0x8c] sm:$0x1]  ;;  %vm11632_vm7 = vmmov %vm11631_vm1 }
 0x263   : > { %3865 = vst [vmem:[#allocation2 + $0x84] sm:$0xf] %v3864_v36  ;;  %v5811_v16 = vunpack.c.l.b16 %v4168_v38  ;;  %v3453_v4 = vpack.c.bf16 %v3365_v31, %v3365_v31  ;;  %v10593_v8 = vsel %vm3093_vm14, %v8116_v63, %v5847_v60  ;;  %v4667_v0 = vshll.u32 %v8251_v56, 16  ;;  %v4345_v31 = vld [vmem:[#allocation2 + $0x60] sm:$0xe]  ;;  %vm11633_vm8 = vmmov %vm11631_vm1 }
 0x264   : > { %v4671_v55 = vshrl.u32 %v8251_v56, 16  ;;  %v6540_v58 = vsel %vm3093_vm14, %v6084_v10, %v10539_v61  ;;  %v10599_v46 = vunpack.c.l.b16 %v4646_v54  ;;  %v10602_v57 = vunpack.c.l.b16 %v4656_v42 }
 0x265   : > { %v5834_v22 = vpack.c.b16 %v5811_v16, %v5810_v52  ;;  %6032 = vrot.lane.b32.xlu1 %v8137_v24, %s8349_s16  ;;  %v3646_v7 = vshrl.u32 %v3453_v4, 16  ;;  %v3644_v28 = vrot.slane %v10566_v50, 4  ;;  %v4664_v1 = vor.u32 %v10588_v41, %v10582_v29  ;;  %v5138_v16 = vld [vmem:[#allocation2 + $0x78] sm:$0xf]  ;;  %v6327_v24 = vpop.permute.xlu1 %6326 }
 0x266   : > { %v10607_v17 = vrot.slane %v4677_v26, 5  ;;  %v3649_v10 = vshll.u32 %v3453_v4, 16  ;;  %v7771_v48 = vrot.slane %v5562_v44, 9  ;;  %v5676_v35 = vrot.slane %v10595_v25, 5  ;;  %v10632_v44 = vpop.permute.xlu2 %6152 }
 0x267   : > { %5858 = vrot.lane.b32.xlu2 %v5834_v22, %s8347_s8  ;;  %v3648_v61 = vrot.slane %v3646_v7, 7  ;;  %v10611_v59 = vrot.slane %v4667_v0, 5  ;;  %v4673_v62 = vrot.slane %v4671_v55, 4  ;;  %v6585_v50 = vsel %vm6450_vm3, %v6540_v58, %v6247_v13 }
 0x268   : > { %v5679_v27 = vrot.slane %v5162_v20, 5  ;;  %v5677_v49 = vsel %vm8450_vm4, %v7771_v48, %v5676_v35  ;;  %v5678_v9 = vrot.slane %v5676_v35, 4  ;;  %v5376_v37 = vshrl.u32 %v10595_v25, 16 }
 0x269   : > { %v3651_v12 = vor.u32 %v3649_v10, %v3648_v61  ;;  %v3653_v47 = vrot.slane %v3648_v61, 4  ;;  %v6370_v19 = vunpack.c.l.b16 %v5677_v49  ;;  %v7756_v40 = vrot.slane %v4954_v45, 9 }
 0x26a   : > { %v5074_v18 = vrot.slane %v4532_v15, 5  ;;  %v5680_v60 = vsel %vm8450_vm4, %v5678_v9, %v5679_v27  ;;  %v3298_v54 = vmul.f32 %v10531_v11, %v3247_v2  ;;  %v5077_v38 = vrot.slane %v4554_v14, 5  ;;  %v3923_v15 = vld [vmem:[#allocation2 + $0x6c] sm:$0xf]  ;;  %v5927_v27 = vpop.permute.xlu0 %5926  ;;  %v10642_v2 = vld [vmem:[#allocation2 + $0x70] sm:$0xf] }
 0x26b   : > { %v3652_v34 = vsel %vm9503_vm6, %v3644_v28, %v3651_v12  ;;  %v3868_v53 = vsel %vm9593_vm10, %v3653_v47, %v3867_v43  ;;  %v6371_v21 = vunpack.c.l.b16 %v5680_v60  ;;  %v4674_v30 = vor.u32 %v4673_v62, %v10611_v59 }
 0x26c   : > { %3866 = vst.msk [vmem:[#allocation2 + $0x88] sm:$0xf] %vm3376_vm0, %v3652_v34  ;;  %v5075_v63 = vsel %vm8450_vm4, %v7756_v40, %v5074_v18  ;;  %v5076_v36 = vrot.slane %v5074_v18, 4  ;;  %v5382_v26 = vshll.u32 %v5162_v20, 16  ;;  %v3334_v52 = vadd.f32 %v10571_v33, %v3298_v54  ;;  %v3870_v54 = vld [vmem:[#allocation2 + $0x90] sm:$0xf] }
 0x26d   : > { %3869 = vst [vmem:[#allocation2 + $0x8c] sm:$0x1] %v3868_v53  ;;  %v6116_v42 = vunpack.c.l.b16 %v5075_v63  ;;  %v6394_v4 = vpack.c.b16 %v6371_v21, %v6370_v19  ;;  %v7739_v0 = vrot.slane %v4345_v31, 9  ;;  %v4459_v55 = vrot.slane %v10522_v32, 5  ;;  %v10647_v53 = vld [vmem:[#allocation2 + $0x74] sm:$0x1] }
 0x26e   : > { %v5078_v56 = vsel %vm8450_vm4, %v5076_v36, %v5077_v38  ;;  %v3366_v22 = vmax.f32 %v3334_v52, 0.0  ;;  %v4462_v7 = vrot.slane %v10552_v6, 5  ;;  %v6619_v13 = vsel %vm11626_vm9, %v6585_v50, %v6327_v24  ;;  %v3249_v38 = vpop.f32.mrf.mxu0  ;;  %vm11634_vm9 = vmmov %vm11631_vm1 }
 0x26f   : > { %v6117_v58 = vunpack.c.l.b16 %v5078_v56  ;;  %8051 = vmatmul.msk.bf16.gmra.mxu3 %vm3093_vm14, %v6394_v4  ;;  %v4460_v20 = vsel %vm8450_vm4, %v7739_v0, %v4459_v55  ;;  %v4461_v28 = vrot.slane %v4459_v55, 4  ;;  %6959 = vmatmul.bf16.gmra.mxu2 %v6619_v13  ;;  %v5363_v45 = vshrl.u32 %v5138_v16, 16  ;;  %v5849_v0 = vpop.permute.xlu2 %5848 }
 0x270   : > { %v5366_v61 = vshll.u32 %v5138_v16, 16  ;;  %v5378_v10 = vrot.slane %v5376_v37, 4  ;;  %v5384_v48 = vrot.slane %v5382_v26, 5  ;;  %v3454_v35 = vpack.c.bf16 %v3366_v22, %v3366_v22  ;;  %v6023_v22 = vpop.permute.xlu1 %6022 }
 0x271   : > { %v6139_v32 = vpack.c.b16 %v6117_v58, %v6116_v42  ;;  %v4463_v43 = vsel %vm8450_vm4, %v4461_v28, %v4462_v7  ;;  %v5365_v6 = vrot.slane %v5363_v45, 4  ;;  %v5372_v50 = vshll.u32 %v10595_v25, 16 }
 0x272   : > { %v5368_v62 = vrot.slane %v5366_v61, 5  ;;  %v4675_v12 = vrot.slane %v4674_v30, 4  ;;  %v3655_v47 = vshrl.u32 %v3454_v35, 16  ;;  %v5890_v49 = vunpack.c.l.b16 %v4460_v20 }
 0x273   : > { %6164 = vrot.lane.b32.xlu2 %v6139_v32, %s8347_s8  ;;  %v5891_v9 = vunpack.c.l.b16 %v4463_v43  ;;  %v3658_v14 = vshll.u32 %v3454_v35, 16  ;;  %v5374_v19 = vrot.slane %v5372_v50, 5  ;;  %v4170_v40 = vshrl.u32 %v3923_v15, 16  ;;  %v8155_v32 = vld [vmem:[#allocation2 + $0x84] sm:$0xff]  ;;  %v6249_v43 = vpop.permute.xlu0 %6248 }
 0x274   : > { %v5369_v37 = vor.u32 %v5368_v62, %v5365_v6  ;;  %v10645_v18 = vrot.slane %v3655_v47, 7  ;;  %v4173_v60 = vshll.u32 %v3923_v15, 16  ;;  %v4179_v25 = vshll.u32 %v10642_v2, 16 }
 0x275   : > { %v5914_v34 = vpack.c.b16 %v5891_v9, %v5890_v49  ;;  %v5379_v21 = vor.u32 %v5378_v10, %v5374_v19  ;;  %v4172_v63 = vrot.slane %v4170_v40, 4  ;;  %v4183_v36 = vshrl.u32 %v10642_v2, 16  ;;  %v4523_v10 = vld [vmem:[#allocation2 + $0x48] sm:$0xf] }
 0x276   : > { %v5370_v31 = vrot.slane %v5369_v37, 4  ;;  %v3660_v30 = vor.u32 %v3658_v14, %v10645_v18  ;;  %v6456_v26 = vsel %vm6450_vm3, %v10593_v8, %v5927_v27  ;;  %v4175_v42 = vrot.slane %v4173_v60, 5  ;;  %v10689_v60 = vld [vmem:[#allocation2 + $0x88] sm:$0xf] }
 0x277   : > { %5938 = vrot.lane.b32.xlu0 %v5914_v34, %s8350_s9  ;;  %v4181_v52 = vrot.slane %v4179_v25, 5  ;;  %v5380_v24 = vrot.slane %v5379_v21, 4  ;;  %v4185_v4 = vrot.slane %v4183_v36, 4  ;;  %v4189_v56 = vshll.u32 %v10647_v53, 16  ;;  %v5563_v21 = vld [vmem:[#allocation2 + $0x84] sm:$0xe] }
 0x278   : > { %v5375_v16 = vsel %vm8473_vm5, %v5370_v31, %v5374_v19  ;;  %v4665_v55 = vrot.slane %v4664_v1, 4  ;;  %v3871_v58 = vsel %vm9418_vm2, %v3660_v30, %v3870_v54  ;;  %v4176_v7 = vor.u32 %v4175_v42, %v4172_v63  ;;  %v8252_v19 = vld [vmem:[#allocation2 + $0x4c] sm:$0xf]  ;;  %v6329_v31 = vpop.permute.xlu1 %6328  ;;  %v4955_v42 = vld [vmem:[#allocation2 + $0x84] sm:$0xe] }
 0x279   : > { %v3299_v8 = vmul.f32 %v10531_v11, %v3249_v38  ;;  %v4680_v13 = vsel %vm8473_vm5, %v4675_v12, %v10607_v17  ;;  %3872 = vst [vmem:[#allocation2 + $0x90] sm:$0xf] %v3871_v58  ;;  %v5385_v20 = vsel %vm8473_vm5, %v5380_v24, %v5384_v48  ;;  %v4186_v28 = vor.u32 %v4185_v4, %v4181_v52  ;;  %v3874_v58 = vld [vmem:[#allocation2 + $0x98] sm:$0x1] }
 0x27a   : > { %v6491_v45 = vsel %vm11627_vm11, %v6456_v26, %v6023_v22  ;;  %v6290_v29 = vunpack.c.l.b16 %v5375_v16  ;;  %v6291_v41 = vunpack.c.l.b16 %v5385_v20  ;;  %v4177_v1 = vrot.slane %v4176_v7, 4  ;;  %v10699_v26 = vld [vmem:[#allocation2 + $0x8c] sm:$0x1]  ;;  %v10706_v22 = vld [vmem:[#allocation2 + $0x50] sm:$0x1]  ;;  %vm11635_vm11 = vmmov %vm11631_vm1 }
 0x27b   : > { %v3335_v61 = vadd.f32 %v10571_v33, %v3299_v8  ;;  %6870 = vmatmul.bf16.gmra.mxu1 %v6491_v45  ;;  %v6085_v35 = vpack.c.b16 %v10602_v57, %v10599_v46  ;;  %v4187_v15 = vrot.slane %v4186_v28, 4  ;;  %v4191_v17 = vrot.slane %v4189_v56, 5  ;;  %v8117_v57 = vld [vmem:[#allocation2 + $0x24] sm:$0xff]  ;;  %v8138_v45 = vld [vmem:[#allocation2 + $0x6c] sm:$0xff] }
 0x27c   : > { %v4670_v48 = vsel %vm8473_vm5, %v4665_v55, %v10611_v59  ;;  %v6314_v6 = vpack.c.b16 %v6291_v41, %v6290_v29  ;;  %v4182_v62 = vsel %vm8473_vm5, %v4177_v1, %v4181_v52  ;;  %v10678_v27 = vunpack.c.l.b16 %v4680_v13  ;;  %v10701_v52 = vpop.permute.xlu2 %6154  ;;  %v4555_v1 = vld [vmem:[#allocation2 + $0x8c] sm:$0x1] }
 0x27d   : > { %v3367_v50 = vmax.f32 %v3335_v61, 0.0  ;;  %v4192_v12 = vsel %vm8473_vm5, %v4187_v15, %v4191_v17  ;;  %v4682_v47 = vshrl.u32 %v4523_v10, 16  ;;  %v4685_v49 = vshll.u32 %v4523_v10, 16  ;;  %v5929_v15 = vpop.permute.xlu0 %5928 }
 0x27e   : > { %v6543_v46 = vsel %vm3093_vm14, %v6085_v35, %v10632_v44  ;;  %6338 = vrot.lane.b32.xlu1 %v6314_v6, %s8349_s16  ;;  %v5812_v9 = vunpack.c.l.b16 %v4182_v62  ;;  %v5813_v59 = vunpack.c.l.b16 %v4192_v12  ;;  %v10686_v37 = vunpack.c.l.b16 %v4670_v48  ;;  %v3252_v35 = vpop.f32.mrf.mxu0  ;;  %v4346_v62 = vld [vmem:[#allocation2 + $0x6c] sm:$0xe] }
 0x27f   : > { %v3455_v14 = vpack.c.bf16 %v3367_v50, %v3367_v50  ;;  %6260 = vrot.lane.b32.xlu0 %v8155_v32, %s8350_s9  ;;  %v4691_v40 = vshll.u32 %v8252_v19, 16  ;;  %v6587_v34 = vsel %vm6450_vm3, %v6543_v46, %v6249_v43  ;;  %v6413_v25 = vsel %vm3093_vm14, %v8117_v57, %v5849_v0  ;;  %v4534_v0 = vld [vmem:[#allocation2 + $0x88] sm:$0xf] }
 0x280   : > { %v5835_v54 = vpack.c.b16 %v5813_v59, %v5812_v9  ;;  %v6086_v63 = vpack.c.b16 %v10678_v27, %v10686_v37  ;;  %v10694_v36 = vrot.slane %v4682_v47, 4  ;;  %v10696_v38 = vrot.slane %v4685_v49, 5 }
 0x281   : > { %v3663_v44 = vshrl.u32 %v3455_v14, 16  ;;  %v6622_v30 = vsel %vm11628_vm12, %v6587_v34, %v6329_v31  ;;  %v3666_v24 = vshll.u32 %v3455_v14, 16  ;;  %v4695_v4 = vshrl.u32 %v8252_v19, 16  ;;  %vm11636_vm12 = vmmov %vm11631_vm1 }
 0x282   : > { %5860 = vrot.lane.b32.xlu2 %v5835_v54, %s8347_s8  ;;  %6964 = vmatmul.bf16.gmra.mxu2 %v6622_v30  ;;  %v5683_v56 = vrot.slane %v10689_v60, 5  ;;  %v3661_v55 = vrot.slane %v10645_v18, 4  ;;  %v4701_v7 = vshll.u32 %v10706_v22, 16  ;;  %v10709_v8 = vrot.slane %v4691_v40, 5  ;;  %v5140_v54 = vld [vmem:[#allocation2 + $0x84] sm:$0xf] }
 0x283   : > { %v3665_v16 = vrot.slane %v3663_v44, 7  ;;  %v7772_v13 = vrot.slane %v5563_v21, 9  ;;  %v5400_v29 = vshrl.u32 %v10689_v60, 16  ;;  %v5686_v41 = vrot.slane %v10699_v26, 5  ;;  %v6025_v44 = vpop.permute.xlu1 %6024 }
 0x284   : > { %v5685_v18 = vrot.slane %v5683_v56, 4  ;;  %v7757_v10 = vrot.slane %v4955_v42, 9  ;;  %v5081_v32 = vrot.slane %v4534_v0, 5  ;;  %v4688_v48 = vor.u32 %v10696_v38, %v10694_v36 }
 0x285   : > { %v3668_v20 = vor.u32 %v3666_v24, %v3665_v16  ;;  %v3670_v28 = vrot.slane %v3665_v16, 4  ;;  %v5684_v61 = vsel %vm8450_vm4, %v7772_v13, %v5683_v56  ;;  %v4697_v6 = vrot.slane %v4695_v4, 4  ;;  %v5851_v24 = vpop.permute.xlu2 %5850  ;;  %v6251_v27 = vpop.permute.xlu0 %6250 }
 0x286   : > { %6034 = vrot.lane.b32.xlu1 %v8138_v45, %s8349_s16  ;;  %v5687_v50 = vsel %vm8450_vm4, %v5685_v18, %v5686_v41  ;;  %v5082_v12 = vsel %vm8450_vm4, %v7757_v10, %v5081_v32  ;;  %v5083_v47 = vrot.slane %v5081_v32, 4  ;;  %v5084_v49 = vrot.slane %v4555_v1, 5  ;;  %v4525_v10 = vld [vmem:[#allocation2 + $0x54] sm:$0xf]  ;;  %v3925_v32 = vld [vmem:[#allocation2 + $0x78] sm:$0xf] }
 0x287   : > { %v3669_v17 = vsel %vm9503_vm6, %v3661_v55, %v3668_v20  ;;  %v3875_v43 = vsel %vm9593_vm10, %v3670_v28, %v3874_v58  ;;  %v6372_v46 = vunpack.c.l.b16 %v5684_v61  ;;  %v6373_v57 = vunpack.c.l.b16 %v5687_v50  ;;  %v8118_v55 = vld [vmem:[#allocation2 + $0x30] sm:$0xff] }
 0x288   : > { %3873 = vst.msk [vmem:[#allocation2 + $0x94] sm:$0xf] %vm3376_vm0, %v3669_v17  ;;  %v3300_v9 = vmul.f32 %v10531_v11, %v3252_v35  ;;  %v6458_v59 = vsel %vm6450_vm3, %v6413_v25, %v5929_v15  ;;  %v5402_v14 = vrot.slane %v5400_v29, 4  ;;  %v5085_v19 = vsel %vm8450_vm4, %v5083_v47, %v5084_v49  ;;  %v3877_v47 = vld [vmem:[#allocation2 + $0x9c] sm:$0xf] }
 0x289   : > { %3876 = vst [vmem:[#allocation2 + $0x98] sm:$0x1] %v3875_v43  ;;  %v7740_v40 = vrot.slane %v4346_v62, 9  ;;  %v4466_v34 = vrot.slane %v10642_v2, 5  ;;  %v6395_v31 = vpack.c.b16 %v6373_v57, %v6372_v46  ;;  %v6118_v21 = vunpack.c.l.b16 %v5082_v12 }
 0x28a   : > { %v6119_v36 = vunpack.c.l.b16 %v5085_v19  ;;  %v3336_v38 = vadd.f32 %v10571_v33, %v3300_v9  ;;  %v4469_v25 = vrot.slane %v10647_v53, 5  ;;  %v6494_v16 = vsel %vm11629_vm13, %v6458_v59, %v6025_v44  ;;  %v8254_v9 = vld [vmem:[#allocation2 + $0x58] sm:$0xf]  ;;  %v10761_v19 = vld [vmem:[#allocation2 + $0x7c] sm:$0xf]  ;;  %vm11637_vm13 = vmmov %vm11631_vm1 }
 0x28b   : > { %v4467_v30 = vsel %vm8450_vm4, %v7740_v40, %v4466_v34  ;;  %v4468_v42 = vrot.slane %v4466_v34, 4  ;;  %v5406_v4 = vshll.u32 %v10699_v26, 16  ;;  %8052 = vmatmul.msk.bf16.gmra.mxu3 %vm3093_vm14, %v6395_v31  ;;  %6875 = vmatmul.bf16.gmra.mxu1 %v6494_v16  ;;  %v5387_v0 = vshrl.u32 %v5140_v54, 16  ;;  %v3254_v31 = vpop.f32.mrf.mxu0 }
 0x28c   : > { %v6140_v2 = vpack.c.b16 %v6119_v36, %v6118_v21  ;;  %v3368_v56 = vmax.f32 %v3336_v38, 0.0  ;;  %v4698_v58 = vor.u32 %v4697_v6, %v10709_v8  ;;  %v5390_v20 = vshll.u32 %v5140_v54, 16 }
 0x28d   : > { %v4470_v13 = vsel %vm8450_vm4, %v4468_v42, %v4469_v25  ;;  %v5396_v53 = vshll.u32 %v10689_v60, 16  ;;  %v5892_v45 = vunpack.c.l.b16 %v4467_v30  ;;  %v5389_v29 = vrot.slane %v5387_v0, 4  ;;  %v10767_v21 = vpop.permute.xlu2 %6156  ;;  %v10773_v42 = vld [vmem:[#allocation2 + $0x80] sm:$0x1] }
 0x28e   : > { %6166 = vrot.lane.b32.xlu2 %v6140_v2, %s8347_s8  ;;  %v3456_v28 = vpack.c.bf16 %v3368_v56, %v3368_v56  ;;  %v5893_v26 = vunpack.c.l.b16 %v4470_v13  ;;  %v6546_v41 = vsel %vm3093_vm14, %v6086_v63, %v10701_v52  ;;  %v10750_v1 = vsel %vm3093_vm14, %v8118_v55, %v5851_v24 }
 0x28f   : > { %v5392_v61 = vrot.slane %v5390_v20, 5  ;;  %v5398_v18 = vrot.slane %v5396_v53, 5  ;;  %v4689_v60 = vrot.slane %v4688_v48, 4  ;;  %v4703_v35 = vrot.slane %v4701_v7, 5  ;;  %v8156_v25 = vld [vmem:[#allocation2 + $0x90] sm:$0xff] }
 0x290   : > { %v3672_v15 = vshrl.u32 %v3456_v28, 16  ;;  %v5915_v17 = vpack.c.b16 %v5893_v26, %v5892_v45  ;;  %v4699_v43 = vrot.slane %v4698_v58, 4  ;;  %v5408_v6 = vrot.slane %v5406_v4, 5  ;;  %v6331_v4 = vpop.permute.xlu1 %6330 }
 0x291   : > { %v5393_v62 = vor.u32 %v5392_v61, %v5389_v29  ;;  %v5403_v50 = vor.u32 %v5402_v14, %v5398_v18  ;;  %v3675_v63 = vshll.u32 %v3456_v28, 16  ;;  %v4706_v52 = vshrl.u32 %v4525_v10, 16 }
 0x292   : > { %v10754_v37 = vrot.slane %v3672_v15, 7  ;;  %5940 = vrot.lane.b32.xlu0 %v5915_v17, %s8350_s9  ;;  %v4194_v12 = vshrl.u32 %v3925_v32, 16  ;;  %v4709_v46 = vshll.u32 %v4525_v10, 16  ;;  %v4197_v22 = vshll.u32 %v3925_v32, 16  ;;  %v10792_v10 = vld [vmem:[#allocation2 + $0x94] sm:$0xf] }
 0x293   : > { %v5394_v49 = vrot.slane %v5393_v62, 4  ;;  %v5404_v48 = vrot.slane %v5403_v50, 4  ;;  %v4694_v7 = vsel %vm8473_vm5, %v4689_v60, %v10709_v8  ;;  %v4715_v59 = vshll.u32 %v8254_v9, 16  ;;  %v5564_v32 = vld [vmem:[#allocation2 + $0x90] sm:$0xe] }
 0x294   : > { %v3677_v57 = vor.u32 %v3675_v63, %v10754_v37  ;;  %v4719_v14 = vshrl.u32 %v8254_v9, 16  ;;  %v4196_v54 = vrot.slane %v4194_v12, 4  ;;  %v4199_v44 = vrot.slane %v4197_v22, 5  ;;  %v10800_v15 = vld [vmem:[#allocation2 + $0x5c] sm:$0x1] }
 0x295   : > { %v5399_v40 = vsel %vm8473_vm5, %v5394_v49, %v5398_v18  ;;  %v5409_v34 = vsel %vm8473_vm5, %v5404_v48, %v5408_v6  ;;  %v4704_v8 = vsel %vm8473_vm5, %v4699_v43, %v4703_v35  ;;  %v10775_v16 = vrot.slane %v4706_v52, 4  ;;  %v5931_v43 = vpop.permute.xlu0 %5930  ;;  %v10806_v63 = vld [vmem:[#allocation2 + $0x98] sm:$0x1] }
 0x296   : > { %v3878_v36 = vsel %vm9418_vm2, %v3677_v57, %v3877_v47  ;;  %v6292_v38 = vunpack.c.l.b16 %v5399_v40  ;;  %v6293_v30 = vunpack.c.l.b16 %v5409_v34  ;;  %v10777_v24 = vrot.slane %v4709_v46, 5  ;;  %v4536_v40 = vld [vmem:[#allocation2 + $0x94] sm:$0xf]  ;;  %v4556_v34 = vld [vmem:[#allocation2 + $0x98] sm:$0x1] }
 0x297   : > { %3879 = vst [vmem:[#allocation2 + $0x9c] sm:$0xf] %v3878_v36  ;;  %v4200_v2 = vor.u32 %v4199_v44, %v4196_v54  ;;  %v4203_v56 = vshll.u32 %v10761_v19, 16  ;;  %v10780_v55 = vrot.slane %v4715_v59, 5  ;;  %v4207_v58 = vshrl.u32 %v10761_v19, 16  ;;  %v5853_v54 = vpop.permute.xlu2 %5852  ;;  %v8139_v36 = vld [vmem:[#allocation2 + $0x78] sm:$0xff] }
 0x298   : > { %v6315_v0 = vpack.c.b16 %v6293_v30, %v6292_v38  ;;  %v3301_v13 = vmul.f32 %v10531_v11, %v3254_v31  ;;  %v10784_v20 = vrot.slane %v4719_v14, 4  ;;  %v4213_v28 = vshll.u32 %v10773_v42, 16 }
 0x299   : > { %v4205_v53 = vrot.slane %v4203_v56, 5  ;;  %v6589_v45 = vsel %vm6450_vm3, %v6546_v41, %v6251_v27  ;;  %v4201_v26 = vrot.slane %v4200_v2, 4  ;;  %v4209_v29 = vrot.slane %v4207_v58, 4 }
 0x29a   : > { %6340 = vrot.lane.b32.xlu1 %v6315_v0, %s8349_s16  ;;  %v3337_v61 = vadd.f32 %v10571_v33, %v3301_v13  ;;  %6262 = vrot.lane.b32.xlu0 %v8156_v25, %s8350_s9  ;;  %v6625_v18 = vsel %vm11630_vm15, %v6589_v45, %v6331_v4  ;;  %v10794_v60 = vunpack.c.l.b16 %v4694_v7  ;;  %v10796_v35 = vunpack.c.l.b16 %v4704_v8  ;;  %v4956_v7 = vld [vmem:[#allocation2 + $0x90] sm:$0xe]  ;;  %v6027_v45 = vpop.permute.xlu1 %6026 }
 0x29b   : > { %v4712_v41 = vor.u32 %v10777_v24, %v10775_v16  ;;  %v4725_v17 = vshll.u32 %v10800_v15, 16  ;;  %6969 = vmatmul.bf16.gmra.mxu2 %v6625_v18  ;;  %v3678_v6 = vrot.slane %v10754_v37, 4  ;;  %v4206_v62 = vsel %vm8473_vm5, %v4201_v26, %v4205_v53 }
 0x29c   : > { %v4210_v50 = vor.u32 %v4209_v29, %v4205_v53  ;;  %v3369_v27 = vmax.f32 %v3337_v61, 0.0  ;;  %v4722_v52 = vor.u32 %v10784_v20, %v10780_v55  ;;  %v5424_v12 = vshrl.u32 %v10792_v10, 16 }
 0x29d   : > { %v7773_v47 = vrot.slane %v5564_v32, 9  ;;  %v5690_v49 = vrot.slane %v10792_v10, 5  ;;  %v4215_v46 = vrot.slane %v4213_v28, 5  ;;  %v6460_v37 = vsel %vm6450_vm3, %v10750_v1, %v5931_v43  ;;  %v4347_v1 = vld [vmem:[#allocation2 + $0x78] sm:$0xe]  ;;  %v6253_v24 = vpop.permute.xlu0 %6252 }
 0x29e   : > { %v4211_v48 = vrot.slane %v4210_v50, 4  ;;  %v3457_v22 = vpack.c.bf16 %v3369_v27, %v3369_v27  ;;  %v5814_v57 = vunpack.c.l.b16 %v4206_v62  ;;  %v5693_v14 = vrot.slane %v10806_v63, 5  ;;  %v3881_v28 = vld [vmem:[#allocation2 + $0xa4] sm:$0x1]  ;;  %v5142_v50 = vld [vmem:[#allocation2 + $0x90] sm:$0xf] }
 0x29f   : > { %v5691_v9 = vsel %vm8450_vm4, %v7773_v47, %v5690_v49  ;;  %v5692_v59 = vrot.slane %v5690_v49, 4  ;;  %v10819_v38 = vrot.slane %v5424_v12, 4  ;;  %v7758_v2 = vrot.slane %v4956_v7, 9 }
 0x2a0   : > { %v4216_v44 = vsel %vm8473_vm5, %v4211_v48, %v4215_v46  ;;  %v3680_v31 = vshrl.u32 %v3457_v22, 16  ;;  %v3683_v8 = vshll.u32 %v3457_v22, 16  ;;  %v6374_v4 = vunpack.c.l.b16 %v5691_v9  ;;  %v3257_v48 = vpop.f32.mrf.mxu0 }
 0x2a1   : > { %v5815_v30 = vunpack.c.l.b16 %v4216_v44  ;;  %v5694_v25 = vsel %vm8450_vm4, %v5692_v59, %v5693_v14  ;;  %v5088_v58 = vrot.slane %v4536_v40, 5  ;;  %v5091_v13 = vrot.slane %v4556_v34, 5  ;;  %v8119_v44 = vld [vmem:[#allocation2 + $0x3c] sm:$0xff] }
 0x2a2   : > { %v3682_v56 = vrot.slane %v3680_v31, 7  ;;  %6036 = vrot.lane.b32.xlu1 %v8139_v36, %s8349_s16  ;;  %v6375_v0 = vunpack.c.l.b16 %v5694_v25  ;;  %v7741_v26 = vrot.slane %v4347_v1, 9  ;;  %v4473_v29 = vrot.slane %v10761_v19, 5  ;;  %v10848_v1 = vpop.permute.xlu2 %6158 }
 0x2a3   : > { %v5836_v53 = vpack.c.b16 %v5815_v30, %v5814_v57  ;;  %v4476_v61 = vrot.slane %v10773_v42, 5  ;;  %v5089_v62 = vsel %vm8450_vm4, %v7758_v2, %v5088_v58  ;;  %v5090_v27 = vrot.slane %v5088_v58, 4 }
 0x2a4   : > { %v3685_v18 = vor.u32 %v3683_v8, %v3682_v56  ;;  %v3687_v32 = vrot.slane %v3682_v56, 4  ;;  %v6396_v43 = vpack.c.b16 %v6375_v0, %v6374_v4  ;;  %v6120_v12 = vunpack.c.l.b16 %v5089_v62  ;;  %v3927_v56 = vld [vmem:[#allocation2 + $0x84] sm:$0xf] }
 0x2a5   : > { %5862 = vrot.lane.b32.xlu2 %v5836_v53, %s8347_s8  ;;  %v4474_v47 = vsel %vm8450_vm4, %v7741_v26, %v4473_v29  ;;  %v4475_v49 = vrot.slane %v4473_v29, 4  ;;  %v6497_v22 = vsel %vm11631_vm1, %v6460_v37, %v6027_v45  ;;  %v5092_v7 = vsel %vm8450_vm4, %v5090_v27, %v5091_v13  ;;  %v4527_v13 = vld [vmem:[#allocation2 + $0x60] sm:$0xf]  ;;  %v8256_v53 = vld [vmem:[#allocation2 + $0x64] sm:$0xf] }
 0x2a6   : > { %v3686_v19 = vsel %vm9503_vm6, %v3678_v6, %v3685_v18  ;;  %v3882_v42 = vsel %vm9593_vm10, %v3687_v32, %v3881_v28  ;;  %8053 = vmatmul.msk.bf16.gmra.mxu3 %vm3093_vm14, %v6396_v43  ;;  %v5894_v46 = vunpack.c.l.b16 %v4474_v47  ;;  %6880 = vmatmul.bf16.gmra.mxu1 %v6497_v22  ;;  %v5411_v9 = vshrl.u32 %v5142_v50, 16  ;;  %v10871_v29 = vld [vmem:[#allocation2 + $0x88] sm:$0xf] }
 0x2a7   : > { %3880 = vst.msk [vmem:[#allocation2 + $0xa0] sm:$0xf] %vm3376_vm0, %v3686_v19  ;;  %v4477_v57 = vsel %vm8450_vm4, %v4475_v49, %v4476_v61  ;;  %v5414_v59 = vshll.u32 %v5142_v50, 16  ;;  %v6121_v6 = vunpack.c.l.b16 %v5092_v7  ;;  %v5420_v40 = vshll.u32 %v10792_v10, 16  ;;  %v10877_v49 = vld [vmem:[#allocation2 + $0x8c] sm:$0x1]  ;;  %v6333_v7 = vpop.permute.xlu1 %6332 }
 0x2a8   : > { %3883 = vst [vmem:[#allocation2 + $0xa4] sm:$0x1] %v3882_v42  ;;  %v5895_v14 = vunpack.c.l.b16 %v4477_v57  ;;  %v3302_v34 = vmul.f32 %v10531_v11, %v3257_v48  ;;  %v4723_v37 = vrot.slane %v4722_v52, 4  ;;  %v5430_v31 = vshll.u32 %v10806_v63, 16  ;;  %v3259_v57 = vpop.f32.mrf.mxu0 }
 0x2a9   : > { %v5413_v8 = vrot.slane %v5411_v9, 4  ;;  %v5416_v36 = vrot.slane %v5414_v59, 5  ;;  %v6141_v30 = vpack.c.b16 %v6121_v6, %v6120_v12  ;;  %v5422_v4 = vrot.slane %v5420_v40, 5 }
 0x2aa   : > { %v5916_v25 = vpack.c.b16 %v5895_v14, %v5894_v46  ;;  %v3338_v2 = vadd.f32 %v10571_v33, %v3302_v34  ;;  %v6087_v11 = vpack.c.b16 %v10796_v35, %v10794_v60  ;;  %v10854_v10 = vsel %vm3093_vm14, %v8119_v44, %v5853_v54  ;;  %v3884_v14 = vld [vmem:[#allocation2 + $0xa8] sm:$0xf]  ;;  %v5855_v34 = vpop.permute.xlu2 %5854 }
 0x2ab   : > { %v4713_v20 = vrot.slane %v4712_v41, 4  ;;  %v5417_v63 = vor.u32 %v5416_v36, %v5413_v8  ;;  %v4727_v52 = vrot.slane %v4725_v17, 5  ;;  %v5427_v0 = vor.u32 %v10819_v38, %v5422_v4 }
 0x2ac   : > { %5942 = vrot.lane.b32.xlu0 %v5916_v25, %s8350_s9  ;;  %v3370_v58 = vmax.f32 %v3338_v2, 0.0  ;;  %v4739_v28 = vshll.u32 %v8256_v53, 16  ;;  %v4743_v35 = vshrl.u32 %v8256_v53, 16  ;;  %v4218_v41 = vshrl.u32 %v3927_v56, 16  ;;  %v8120_v25 = vld [vmem:[#allocation2 + $0x48] sm:$0xff] }
 0x2ad   : > { %v4718_v60 = vsel %vm8473_vm5, %v4713_v20, %v10780_v55  ;;  %6168 = vrot.lane.b32.xlu2 %v6141_v30, %s8347_s8  ;;  %v5418_v16 = vrot.slane %v5417_v63, 4  ;;  %v4728_v15 = vsel %vm8473_vm5, %v4723_v37, %v4727_v52  ;;  %v5432_v17 = vrot.slane %v5430_v31, 5  ;;  %v8257_v37 = vld [vmem:[#allocation2 + $0x68] sm:$0x1]  ;;  %v10904_v63 = vld [vmem:[%s11599_s2] ss:$0 sm:$0xff] }
 0x2ae   : > { %v5428_v54 = vrot.slane %v5427_v0, 4  ;;  %v3458_v38 = vpack.c.bf16 %v3370_v58, %v3370_v58  ;;  %v4730_v26 = vshrl.u32 %v4527_v13, 16  ;;  %v4220_v61 = vrot.slane %v4218_v41, 4  ;;  %v8157_v50 = vld [vmem:[#allocation2 + $0x9c] sm:$0xff] }
 0x2af   : > { %v5423_v45 = vsel %vm8473_vm5, %v5418_v16, %v5422_v4  ;;  %v4221_v55 = vshll.u32 %v3927_v56, 16  ;;  %v4733_v43 = vshll.u32 %v4527_v13, 16  ;;  %v10875_v62 = vrot.slane %v4739_v28, 5  ;;  %v10907_v0 = vld [vmem:[#allocation2 + $0xa0] sm:$0xf] }
 0x2b0   : > { %v5433_v18 = vsel %vm8473_vm5, %v5428_v54, %v5432_v17  ;;  %v3689_v32 = vshrl.u32 %v3458_v38, 16  ;;  %v6294_v27 = vunpack.c.l.b16 %v5423_v45  ;;  %v4745_v47 = vrot.slane %v4743_v35, 4  ;;  %v5565_v58 = vld [vmem:[#allocation2 + $0x9c] sm:$0xe]  ;;  %v10918_v17 = vld [vmem:[#allocation2 + $0xa4] sm:$0x1] }
 0x2b1   : > { %v6295_v12 = vunpack.c.l.b16 %v5433_v18  ;;  %v4223_v48 = vrot.slane %v4221_v55, 5  ;;  %v3692_v42 = vshll.u32 %v3458_v38, 16  ;;  %v4227_v46 = vshll.u32 %v10871_v29, 16 }
 0x2b2   : > { %v10879_v19 = vrot.slane %v3689_v32, 7  ;;  %v4231_v22 = vshrl.u32 %v10871_v29, 16  ;;  %v6549_v9 = vsel %vm3093_vm14, %v6087_v11, %v10767_v21  ;;  %v10885_v59 = vunpack.c.l.b16 %v4728_v15 }
 0x2b3   : > { %v6316_v6 = vpack.c.b16 %v6295_v12, %v6294_v27  ;;  %v4224_v40 = vor.u32 %v4223_v48, %v4220_v61  ;;  %v4749_v31 = vshll.u32 %v8257_v37, 16  ;;  %v4229_v8 = vrot.slane %v4227_v46, 5  ;;  %v8140_v12 = vld [vmem:[#allocation2 + $0x84] sm:$0xff] }
 0x2b4   : > { %v3694_v44 = vor.u32 %v3692_v42, %v10879_v19  ;;  %v4237_v36 = vshll.u32 %v10877_v49, 16  ;;  %6264 = vrot.lane.b32.xlu0 %v8157_v50, %s8350_s9  ;;  %v10890_v30 = vunpack.c.l.b16 %v4718_v60  ;;  %v6591_v21 = vsel %vm6450_vm3, %v6549_v9, %v6253_v24  ;;  %v5933_v60 = vpop.permute.xlu0 %5932  ;;  %v3262_v50 = vpop.f32.mrf.mxu0  ;;  %v4557_v46 = vld [vmem:[#allocation2 + $0xa4] sm:$0x1] }
 0x2b5   : > { %6342 = vrot.lane.b32.xlu1 %v6316_v6, %s8349_s16  ;;  %v10894_v4 = vrot.slane %v4730_v26, 4  ;;  %v4233_v2 = vrot.slane %v4231_v22, 4  ;;  %v10898_v11 = vrot.slane %v4733_v43, 5  ;;  %v4746_v20 = vor.u32 %v4745_v47, %v10875_v62  ;;  %v4957_v43 = vld [vmem:[#allocation2 + $0x9c] sm:$0xe]  ;;  %v6029_v9 = vpop.permute.xlu1 %6028 }
 0x2b6   : > { %v3885_v56 = vsel %vm9418_vm2, %v3694_v44, %v3884_v14  ;;  %v3303_v52 = vmul.f32 %v10904_v63, %v3259_v57  ;;  %v10910_v13 = vsel %vm3093_vm14, %v8120_v25, %v5855_v34  ;;  %v4225_v53 = vrot.slane %v4224_v40, 4 }
 0x2b7   : > { %3886 = vst [vmem:[#allocation2 + $0xa8] sm:$0xf] %v3885_v56  ;;  %v4234_v28 = vor.u32 %v4233_v2, %v4229_v8  ;;  %v6628_v16 = vsel %vm11632_vm7, %v6591_v21, %v6333_v7  ;;  %v6088_v24 = vpack.c.b16 %v10885_v59, %v10890_v30  ;;  %v10915_v35 = vrot.slane %v4749_v31, 5  ;;  %v10943_v2 = vld [vmem:[%s11600_s3] ss:$0 sm:$0xff] }
 0x2b8   : > { %v4239_v41 = vrot.slane %v4237_v36, 5  ;;  %v3339_v15 = vadd.f32 %v10571_v33, %v3303_v52  ;;  %6974 = vmatmul.bf16.gmra.mxu2 %v6628_v16  ;;  %v4230_v54 = vsel %vm8473_vm5, %v4225_v53, %v4229_v8  ;;  %v7774_v45 = vrot.slane %v5565_v58, 9  ;;  %v4538_v33 = vld [vmem:[#allocation2 + $0xa0] sm:$0xf]  ;;  %v4348_v36 = vld [vmem:[#allocation2 + $0x84] sm:$0xe] }
 0x2b9   : > { %v4235_v38 = vrot.slane %v4234_v28, 4  ;;  %v5697_v26 = vrot.slane %v10907_v0, 5  ;;  %v4736_v61 = vor.u32 %v10898_v11, %v10894_v4  ;;  %v10925_v55 = vrot.slane %v4746_v20, 4  ;;  %v3891_v4 = vld [vmem:[#allocation2 + $0xb4] sm:$0xf] }
 0x2ba   : > { %v3371_v18 = vmax.f32 %v3339_v15, 0.0  ;;  %v6462_v32 = vsel %vm6450_vm3, %v10854_v10, %v5933_v60  ;;  %v5700_v42 = vrot.slane %v10918_v17, 5  ;;  %v5816_v22 = vunpack.c.l.b16 %v4230_v54  ;;  %v3888_v60 = vld [vmem:[#allocation2 + $0xb0] sm:$0x1] }
 0x2bb   : > { %v4240_v27 = vsel %vm8473_vm5, %v4235_v38, %v4239_v41  ;;  %v5698_v47 = vsel %vm8450_vm4, %v7774_v45, %v5697_v26  ;;  %v5699_v48 = vrot.slane %v5697_v26, 4  ;;  %v7759_v14 = vrot.slane %v4957_v43, 9 }
 0x2bc   : > { %v5817_v7 = vunpack.c.l.b16 %v4240_v27  ;;  %v3459_v57 = vpack.c.bf16 %v3371_v18, %v3371_v18  ;;  %v6376_v6 = vunpack.c.l.b16 %v5698_v47  ;;  %v5095_v40 = vrot.slane %v4538_v33, 5  ;;  %v5144_v47 = vld [vmem:[#allocation2 + $0x9c] sm:$0xf] }
 0x2bd   : > { %6038 = vrot.lane.b32.xlu1 %v8140_v12, %s8349_s16  ;;  %v5701_v10 = vsel %vm8450_vm4, %v5699_v48, %v5700_v42  ;;  %v3304_v34 = vmul.f32 %v10904_v63, %v3262_v50  ;;  %v5098_v8 = vrot.slane %v4557_v46, 5  ;;  %v6500_v20 = vsel %vm11633_vm8, %v6462_v32, %v6029_v9 }
 0x2be   : > { %v5837_v44 = vpack.c.b16 %v5817_v7, %v5816_v22  ;;  %v3697_v37 = vshrl.u32 %v3459_v57, 16  ;;  %v6377_v31 = vunpack.c.l.b16 %v5701_v10  ;;  %v5096_v25 = vsel %vm8450_vm4, %v7759_v14, %v5095_v40  ;;  %6885 = vmatmul.bf16.gmra.mxu1 %v6500_v20  ;;  %v3933_v5 = vld [vmem:[#allocation2 + $0xa8] sm:$0xf] }
 0x2bf   : > { %v5097_v21 = vrot.slane %v5095_v40, 4  ;;  %v3340_v56 = vadd.f32 %v10943_v2, %v3304_v34  ;;  %v3695_v52 = vrot.slane %v10879_v19, 4  ;;  %v3700_v53 = vshll.u32 %v3459_v57, 16  ;;  %v4529_v57 = vld [vmem:[#allocation2 + $0x6c] sm:$0xf] }
 0x2c0   : > { %5864 = vrot.lane.b32.xlu2 %v5837_v44, %s8347_s8  ;;  %v3699_v58 = vrot.slane %v3697_v37, 7  ;;  %v6397_v28 = vpack.c.b16 %v6377_v31, %v6376_v6  ;;  %v7742_v15 = vrot.slane %v4348_v36, 9  ;;  %v4480_v54 = vrot.slane %v10871_v29, 5  ;;  %v6255_v6 = vpop.permute.xlu0 %6254  ;;  %v3929_v40 = vld [vmem:[#allocation2 + $0x90] sm:$0xf] }
 0x2c1   : > { %v5099_v16 = vsel %vm8450_vm4, %v5097_v21, %v5098_v8  ;;  %v3372_v41 = vmax.f32 %v3340_v56, 0.0  ;;  %v6122_v26 = vunpack.c.l.b16 %v5096_v25  ;;  %v4483_v43 = vrot.slane %v10877_v49, 5  ;;  %v8260_v56 = vld [vmem:[#allocation2 + $0x70] sm:$0xf] }
 0x2c2   : > { %v3702_v38 = vor.u32 %v3700_v53, %v3699_v58  ;;  %v3704_v45 = vrot.slane %v3699_v58, 4  ;;  %8054 = vmatmul.msk.bf16.gmra.mxu3 %vm3093_vm14, %v6397_v28  ;;  %v6123_v19 = vunpack.c.l.b16 %v5099_v16  ;;  %v4481_v32 = vsel %vm8450_vm4, %v7742_v15, %v4480_v54 }
 0x2c3   : > { %v3460_v18 = vpack.c.bf16 %v3372_v41, %v3372_v41  ;;  %v4482_v33 = vrot.slane %v4480_v54, 4  ;;  %v5448_v29 = vshrl.u32 %v10907_v0, 16  ;;  %v4752_v48 = vsel %vm8473_vm5, %v10925_v55, %v10915_v35 }
 0x2c4   : > { %v3703_v50 = vsel %vm9503_vm6, %v3695_v52, %v3702_v38  ;;  %v3889_v27 = vsel %vm9593_vm10, %v3704_v45, %v3888_v60  ;;  %v6142_v12 = vpack.c.b16 %v6123_v19, %v6122_v26  ;;  %v5454_v42 = vshll.u32 %v10918_v17, 16  ;;  %v10995_v52 = vld [vmem:[#allocation2 + $0x98] sm:$0x1] }
 0x2c5   : > { %3887 = vst.msk [vmem:[#allocation2 + $0xac] sm:$0xf] %vm3376_vm0, %v3703_v50  ;;  %v3706_v49 = vshrl.u32 %v3460_v18, 16  ;;  %v4484_v46 = vsel %vm8450_vm4, %v4482_v33, %v4483_v43  ;;  %v6552_v22 = vsel %vm3093_vm14, %v6088_v24, %v10848_v1  ;;  %v10977_v7 = vrot.slane %v4736_v61, 4  ;;  %v10988_v24 = vld [vmem:[#allocation2 + $0x94] sm:$0xf]  ;;  %v6335_v33 = vpop.permute.xlu1 %6334 }
 0x2c6   : > { %3890 = vst [vmem:[#allocation2 + $0xb0] sm:$0x1] %v3889_v27  ;;  %v5896_v35 = vunpack.c.l.b16 %v4481_v32  ;;  %v5897_v55 = vunpack.c.l.b16 %v4484_v46  ;;  %v3709_v9 = vshll.u32 %v3460_v18, 16  ;;  %v5435_v10 = vshrl.u32 %v5144_v47, 16  ;;  %v3264_v32 = vpop.f32.mrf.mxu0  ;;  %v11005_v27 = vld [vmem:[#allocation2 + $0x74] sm:$0x1] }
 0x2c7   : > { %v10979_v17 = vrot.slane %v3706_v49, 7  ;;  %v5438_v14 = vshll.u32 %v5144_v47, 16  ;;  %v4742_v1 = vsel %vm8473_vm5, %v10977_v7, %v10875_v62  ;;  %v10985_v59 = vunpack.c.l.b16 %v4752_v48 }
 0x2c8   : > { %v5450_v30 = vrot.slane %v5448_v29, 4  ;;  %6170 = vrot.lane.b32.xlu2 %v6142_v12, %s8347_s8  ;;  %v5917_v11 = vpack.c.b16 %v5897_v55, %v5896_v35  ;;  %v5456_v61 = vrot.slane %v5454_v42, 5  ;;  %v4754_v44 = vshrl.u32 %v4529_v57, 16 }
 0x2c9   : > { %v3711_v34 = vor.u32 %v3709_v9, %v10979_v17  ;;  %v5437_v37 = vrot.slane %v5435_v10, 4  ;;  %v4757_v31 = vshll.u32 %v4529_v57, 16  ;;  %v5440_v8 = vrot.slane %v5438_v14, 5  ;;  %v5935_v9 = vpop.permute.xlu0 %5934 }
 0x2ca   : > { %5944 = vrot.lane.b32.xlu0 %v5917_v11, %s8350_s9  ;;  %v5444_v36 = vshll.u32 %v10907_v0, 16  ;;  %v4242_v25 = vshrl.u32 %v3929_v40, 16  ;;  %v4763_v20 = vshll.u32 %v8260_v56, 16  ;;  %v4245_v58 = vshll.u32 %v3929_v40, 16 }
 0x2cb   : > { %v3892_v21 = vsel %vm9418_vm2, %v3711_v34, %v3891_v4  ;;  %v4251_v53 = vshll.u32 %v10988_v24, 16  ;;  %v4767_v28 = vshrl.u32 %v8260_v56, 16  ;;  %v5441_v60 = vor.u32 %v5440_v8, %v5437_v37  ;;  %v11024_v4 = vld [vmem:[%s11602_s5] ss:$0 sm:$0xff] }
 0x2cc   : > { %3893 = vst [vmem:[#allocation2 + $0xb4] sm:$0xf] %v3892_v21  ;;  %v5446_v16 = vrot.slane %v5444_v36, 5  ;;  %v4244_v41 = vrot.slane %v4242_v25, 4  ;;  %v10998_v15 = vrot.slane %v4754_v44, 4  ;;  %v4247_v54 = vrot.slane %v4245_v58, 5 }
 0x2cd   : > { %v4253_v0 = vrot.slane %v4251_v53, 5  ;;  %v4255_v38 = vshrl.u32 %v10988_v24, 16  ;;  %v11001_v45 = vrot.slane %v4757_v31, 5  ;;  %v5442_v26 = vrot.slane %v5441_v60, 4  ;;  %v8158_v43 = vld [vmem:[#allocation2 + $0xa8] sm:$0xff]  ;;  %v6950_v31 = vpop.f32.mrf.mxu2 }
 0x2ce   : > { %v5451_v19 = vor.u32 %v5450_v30, %v5446_v16  ;;  %v4261_v18 = vshll.u32 %v10995_v52, 16  ;;  %v6593_v50 = vsel %vm6450_vm3, %v6552_v22, %v6255_v6  ;;  %v4773_v29 = vshll.u32 %v11005_v27, 16  ;;  %v6861_v6 = vpop.f32.mrf.mxu1  ;;  %v11029_v8 = vld [vmem:[#allocation2 + $0xac] sm:$0xf]  ;;  %v4958_v53 = vld [vmem:[#allocation2 + $0xa8] sm:$0xe] }
 0x2cf   : > { %v4248_v12 = vor.u32 %v4247_v54, %v4244_v41  ;;  %v4257_v47 = vrot.slane %v4255_v38, 4  ;;  %v11008_v48 = vrot.slane %v4763_v20, 5  ;;  %v11010_v42 = vrot.slane %v4767_v28, 4  ;;  %v11036_v20 = vld [vmem:[#allocation2 + $0xb0] sm:$0x1]  ;;  %v7039_v28 = vpop.f32.mrf.mxu3 }
 0x2d0   : > { %v5447_v49 = vsel %vm8473_vm5, %v5442_v26, %v5446_v16  ;;  %v5452_v46 = vrot.slane %v5451_v19, 4  ;;  %v3712_v35 = vrot.slane %v10979_v17, 4  ;;  %v3305_v22 = vmul.f32 %v10904_v63, %v3264_v32  ;;  %v4540_v58 = vld [vmem:[#allocation2 + $0xac] sm:$0xf]  ;;  %v4531_v27 = vld [vmem:[#allocation2 + $0x78] sm:$0xf] }
 0x2d1   : > { %v4249_v55 = vrot.slane %v4248_v12, 4  ;;  %v4258_v57 = vor.u32 %v4257_v47, %v4253_v0  ;;  %v4760_v10 = vor.u32 %v11001_v45, %v10998_v15  ;;  %v6296_v40 = vunpack.c.l.b16 %v5447_v49 }
 0x2d2   : > { %v5457_v14 = vsel %vm8473_vm5, %v5452_v46, %v5456_v61  ;;  %v4263_v30 = vrot.slane %v4261_v18, 5  ;;  %6266 = vrot.lane.b32.xlu0 %v8158_v43, %s8350_s9  ;;  %v3341_v37 = vadd.f32 %v10943_v2, %v3305_v22  ;;  %v5566_v61 = vld [vmem:[#allocation2 + $0xa8] sm:$0xe]  ;;  %v4770_v36 = vor.u32 %v11010_v42, %v11008_v48  ;;  %v11047_v18 = vpop.permute.xlu2 %6160  ;;  %v4558_v43 = vld [vmem:[#allocation2 + $0xb0] sm:$0x1]  ;;  %v6031_v46 = vpop.permute.xlu1 %6030 }
 0x2d3   : > { %v6297_v11 = vunpack.c.l.b16 %v5457_v14  ;;  %v4254_v34 = vsel %vm8473_vm5, %v4249_v55, %v4253_v0  ;;  %v4259_v44 = vrot.slane %v4258_v57, 4  ;;  %v6464_v25 = vsel %vm6450_vm3, %v10910_v13, %v5935_v9  ;;  %v11044_v13 = vld [vmem:[%s11603_s6] ss:$0 sm:$0xff] }
 0x2d4   : > { %v6631_v21 = vsel %vm11634_vm9, %v6593_v50, %v6335_v33  ;;  %v6951_v56 = vadd.f32 %v6950_v31, %v6861_v6  ;;  %v5818_v41 = vunpack.c.l.b16 %v4254_v34  ;;  %v3373_v54 = vmax.f32 %v3341_v37, 0.0 }
 0x2d5   : > { %v6317_v60 = vpack.c.b16 %v6297_v11, %v6296_v40  ;;  %v4264_v16 = vsel %vm8473_vm5, %v4259_v44, %v4263_v30  ;;  %6979 = vmatmul.bf16.gmra.mxu2 %v6631_v21  ;;  %v7775_v26 = vrot.slane %v5566_v61, 9  ;;  %v5704_v19 = vrot.slane %v11029_v8, 5  ;;  %v4349_v40 = vld [vmem:[#allocation2 + $0x90] sm:$0xe] }
 0x2d6   : > { %v5819_v0 = vunpack.c.l.b16 %v4264_v16  ;;  %v7040_v38 = vadd.f32 %v7039_v28, %v6951_v56  ;;  %v3461_v32 = vpack.c.bf16 %v3373_v54, %v3373_v54  ;;  %v5707_v33 = vrot.slane %v11036_v20, 5  ;;  %v6863_v56 = vpop.f32.mrf.mxu1 }
 0x2d7   : > { %6344 = vrot.lane.b32.xlu1 %v6317_v60, %s8349_s16  ;;  %v7760_v50 = vrot.slane %v4958_v53, 9  ;;  %v5102_v12 = vrot.slane %v4540_v58, 5  ;;  %v5705_v55 = vsel %vm8450_vm4, %v7775_v26, %v5704_v19  ;;  %v5706_v57 = vrot.slane %v5704_v19, 4  ;;  %v3895_v58 = vld [vmem:[#allocation2 + $0xbc] sm:$0x1] }
 0x2d8   : > { %v5838_v47 = vpack.c.b16 %v5819_v0, %v5818_v41  ;;  %v7123_v49 = vmul.f32 %v11024_v4, %v7040_v38  ;;  %v3714_v22 = vshrl.u32 %v3461_v32, 16  ;;  %v3717_v9 = vshll.u32 %v3461_v32, 16  ;;  %v8141_v0 = vld [vmem:[#allocation2 + $0x90] sm:$0xff]  ;;  %v6952_v38 = vpop.f32.mrf.mxu2 }
 0x2d9   : > { %v6378_v6 = vunpack.c.l.b16 %v5705_v55  ;;  %v5103_v14 = vsel %vm8450_vm4, %v7760_v50, %v5102_v12  ;;  %v5708_v11 = vsel %vm8450_vm4, %v5706_v57, %v5707_v33  ;;  %v5104_v34 = vrot.slane %v5102_v12, 4  ;;  %v7041_v50 = vpop.f32.mrf.mxu3 }
 0x2da   : > { %5866 = vrot.lane.b32.xlu2 %v5838_v47, %s8347_s8  ;;  %v7159_v30 = vadd.f32 %v11044_v13, %v7123_v49  ;;  %v5105_v44 = vrot.slane %v4558_v43, 5  ;;  %v3716_v37 = vrot.slane %v3714_v22, 7  ;;  %v6379_v31 = vunpack.c.l.b16 %v5708_v11  ;;  %v8121_v22 = vld [vmem:[#allocation2 + $0x54] sm:$0xff] }
 0x2db   : > { %v6124_v61 = vunpack.c.l.b16 %v5103_v14  ;;  %v6503_v21 = vsel %vm11635_vm11, %v6464_v25, %v6031_v46  ;;  %v7743_v60 = vrot.slane %v4349_v40, 9  ;;  %v4487_v16 = vrot.slane %v10988_v24, 5 }
 0x2dc   : > { %v7191_v53 = vmax.f32 %v7159_v30, 0.0  ;;  %v5106_v28 = vsel %vm8450_vm4, %v5104_v34, %v5105_v44  ;;  %6890 = vmatmul.bf16.gmra.mxu1 %v6503_v21  ;;  %v3719_v41 = vor.u32 %v3717_v9, %v3716_v37  ;;  %v3721_v54 = vrot.slane %v3716_v37, 4  ;;  %v6257_v9 = vpop.permute.xlu0 %6256 }
 0x2dd   : > { %v6398_v26 = vpack.c.b16 %v6379_v31, %v6378_v6  ;;  %v6125_v19 = vunpack.c.l.b16 %v5106_v28  ;;  %v4488_v25 = vsel %vm8450_vm4, %v7743_v60, %v4487_v16  ;;  %v4489_v32 = vrot.slane %v4487_v16, 4 }
 0x2de   : > { %7223 = vst.msk [vmem:[%s11069_s22] sm:$0xff] %vm3093_vm14, %v7191_v53  ;;  %v4490_v33 = vrot.slane %v10995_v52, 5  ;;  %v6953_v43 = vadd.f32 %v6952_v38, %v6863_v56  ;;  %v4771_v24 = vrot.slane %v4770_v36, 4  ;;  %v3720_v12 = vsel %vm9503_vm6, %v3712_v35, %v3719_v41  ;;  %v5146_v52 = vld [vmem:[#allocation2 + $0xa8] sm:$0xf]  ;;  %v5857_v35 = vpop.permute.xlu2 %5856  ;;  %v6337_v56 = vpop.permute.xlu1 %6336 }
 0x2df   : > { %v3896_v47 = vsel %vm9593_vm10, %v3721_v54, %v3895_v58  ;;  %6040 = vrot.lane.b32.xlu1 %v8141_v0, %s8349_s16  ;;  %8055 = vmatmul.msk.bf16.gmra.mxu3 %vm3093_vm14, %v6398_v26  ;;  %v6143_v49 = vpack.c.b16 %v6125_v19, %v6124_v61  ;;  %3894 = vst.msk [vmem:[#allocation2 + $0xb8] sm:$0xf] %vm3376_vm0, %v3720_v12  ;;  %v6064_v17 = vunpack.c.l.b16 %v4742_v1  ;;  %v4775_v46 = vrot.slane %v4773_v29, 5  ;;  %v8262_v0 = vld [vmem:[#allocation2 + $0x7c] sm:$0xf] }
 0x2e0   : > { %v4491_v42 = vsel %vm8450_vm4, %v4489_v32, %v4490_v33  ;;  %v7042_v36 = vadd.f32 %v7041_v50, %v6953_v43  ;;  %3897 = vst [vmem:[#allocation2 + $0xbc] sm:$0x1] %v3896_v47  ;;  %v5898_v55 = vunpack.c.l.b16 %v4488_v25  ;;  %v5459_v14 = vshrl.u32 %v5146_v52, 16  ;;  %v11126_v25 = vld [vmem:[#allocation2 + $0xa4] sm:$0x1] }
 0x2e1   : > { %v5899_v57 = vunpack.c.l.b16 %v4491_v42  ;;  %v6089_v40 = vpack.c.b16 %v10985_v59, %v6064_v17  ;;  %v11103_v62 = vrot.slane %v4760_v10, 4  ;;  %v4776_v7 = vsel %vm8473_vm5, %v4771_v24, %v4775_v46  ;;  %v3931_v10 = vld [vmem:[#allocation2 + $0x9c] sm:$0xf] }
 0x2e2   : > { %6172 = vrot.lane.b32.xlu2 %v6143_v49, %s8347_s8  ;;  %v7124_v6 = vmul.f32 %v11024_v4, %v7042_v36  ;;  %v6425_v29 = vsel %vm3093_vm14, %v8121_v22, %v5857_v35  ;;  %v5461_v11 = vrot.slane %v5459_v14, 4  ;;  %v5462_v34 = vshll.u32 %v5146_v52, 16 }
 0x2e3   : > { %v5918_v1 = vpack.c.b16 %v5899_v57, %v5898_v55  ;;  %v6555_v44 = vsel %vm3093_vm14, %v6089_v40, %v11047_v18  ;;  %v4766_v59 = vsel %vm8473_vm5, %v11103_v62, %v11008_v48  ;;  %v5468_v15 = vshll.u32 %v11029_v8, 16  ;;  %v11120_v18 = vld [vmem:[#allocation2 + $0xa0] sm:$0xf]  ;;  %v3267_v55 = vpop.f32.mrf.mxu0  ;;  %v5567_v40 = vld [vmem:[#allocation2 + $0xb4] sm:$0xe] }
 0x2e4   : > { %v7160_v30 = vadd.f32 %v11044_v13, %v7124_v6  ;;  %v5472_v45 = vshrl.u32 %v11029_v8, 16  ;;  %v11118_v37 = vunpack.c.l.b16 %v4776_v7  ;;  %v4778_v61 = vshrl.u32 %v4531_v27, 16  ;;  %v5937_v36 = vpop.permute.xlu0 %5936  ;;  %v8122_v62 = vld [vmem:[#allocation2 + $0x60] sm:$0xff] }
 0x2e5   : > { %5946 = vrot.lane.b32.xlu0 %v5918_v1, %s8350_s9  ;;  %v5464_v21 = vrot.slane %v5462_v34, 5  ;;  %v6595_v58 = vsel %vm6450_vm3, %v6555_v44, %v6257_v9  ;;  %v5470_v53 = vrot.slane %v5468_v15, 5  ;;  %v5478_v60 = vshll.u32 %v11036_v20, 16  ;;  %v4959_v34 = vld [vmem:[#allocation2 + $0xb4] sm:$0xe]  ;;  %v11149_v44 = vpop.f32.mrf.mxu3 }
 0x2e6   : > { %v7192_v31 = vmax.f32 %v7160_v30, 0.0  ;;  %v5474_v28 = vrot.slane %v5472_v45, 4  ;;  %v4781_v16 = vshll.u32 %v4531_v27, 16  ;;  %v4266_v8 = vshrl.u32 %v3931_v10, 16  ;;  %v8159_v33 = vld [vmem:[#allocation2 + $0xb4] sm:$0xff] }
 0x2e7   : > { %v5465_v41 = vor.u32 %v5464_v21, %v5461_v11  ;;  %v4269_v54 = vshll.u32 %v3931_v10, 16  ;;  %v4787_v38 = vshll.u32 %v8262_v0, 16  ;;  %v4791_v26 = vshrl.u32 %v8262_v0, 16  ;;  %v11136_v57 = vld [vmem:[#allocation2 + $0xb8] sm:$0xf] }
 0x2e8   : > { %7224 = vst.msk [vmem:[%s11069_s22 + $0x8] sm:$0xff] %vm3093_vm14, %v7192_v31  ;;  %v5475_v19 = vor.u32 %v5474_v28, %v5470_v53  ;;  %v4275_v32 = vshll.u32 %v11120_v18, 16  ;;  %v11129_v43 = vrot.slane %v4778_v61, 4  ;;  %v4268_v24 = vrot.slane %v4266_v8, 4  ;;  %v11147_v11 = vld [vmem:[#allocation2 + $0xbc] sm:$0x1] }
 0x2e9   : > { %v5466_v50 = vrot.slane %v5465_v41, 4  ;;  %v4271_v20 = vrot.slane %v4269_v54, 5  ;;  %v5480_v47 = vrot.slane %v5478_v60, 5  ;;  %v4279_v52 = vshrl.u32 %v11120_v18, 16  ;;  %v4542_v61 = vld [vmem:[#allocation2 + $0xb8] sm:$0xf] }
 0x2ea   : > { %v5476_v12 = vrot.slane %v5475_v19, 4  ;;  %v4277_v49 = vrot.slane %v4275_v32, 5  ;;  %v4285_v35 = vshll.u32 %v11126_v25, 16  ;;  %v6634_v46 = vsel %vm11636_vm12, %v6595_v58, %v6337_v56  ;;  %v4559_v60 = vld [vmem:[#allocation2 + $0xbc] sm:$0x1] }
 0x2eb   : > { %v5471_v42 = vsel %vm8473_vm5, %v5466_v50, %v5470_v53  ;;  %v4272_v17 = vor.u32 %v4271_v20, %v4268_v24  ;;  %v11138_v22 = vrot.slane %v4781_v16, 5  ;;  %v11140_v9 = vrot.slane %v4787_v38, 5  ;;  %6984 = vmatmul.bf16.gmra.mxu2 %v6634_v46  ;;  %v6033_v53 = vpop.permute.xlu1 %6032  ;;  %v4350_v24 = vld [vmem:[#allocation2 + $0x9c] sm:$0xe]  ;;  %v5148_v46 = vld [vmem:[#allocation2 + $0xb4] sm:$0xf] }
 0x2ec   : > { %v5481_v6 = vsel %vm8473_vm5, %v5476_v12, %v5480_v47  ;;  %v4281_v14 = vrot.slane %v4279_v52, 4  ;;  %v11145_v7 = vrot.slane %v4791_v26, 4  ;;  %v6298_v1 = vunpack.c.l.b16 %v5471_v42  ;;  %v11168_v52 = vpop.f32.mrf.mxu2 }
 0x2ed   : > { %6268 = vrot.lane.b32.xlu0 %v8159_v33, %s8350_s9  ;;  %v6299_v27 = vunpack.c.l.b16 %v5481_v6  ;;  %v4273_v30 = vrot.slane %v4272_v17, 4  ;;  %v6466_v15 = vsel %vm6450_vm3, %v6425_v29, %v5937_v36  ;;  %v3306_v10 = vmul.f32 %v10904_v63, %v3267_v55  ;;  %v11171_v55 = vpop.f32.mrf.mxu1 }
 0x2ee   : > { %v4282_v45 = vor.u32 %v4281_v14, %v4277_v49  ;;  %v5711_v31 = vrot.slane %v11136_v57, 5  ;;  %v4287_v58 = vrot.slane %v4285_v35, 5  ;;  %v7776_v28 = vrot.slane %v5567_v40, 9 }
 0x2ef   : > { %v6318_v21 = vpack.c.b16 %v6299_v27, %v6298_v1  ;;  %v4278_v56 = vsel %vm8473_vm5, %v4273_v30, %v4277_v49  ;;  %v3342_v41 = vadd.f32 %v10943_v2, %v3306_v10  ;;  %v5714_v8 = vrot.slane %v11147_v11, 5  ;;  %v11175_v27 = vpop.permute.xlu2 %6162  ;;  %v8142_v10 = vld [vmem:[#allocation2 + $0x9c] sm:$0xff] }
 0x2f0   : > { %v4283_v16 = vrot.slane %v4282_v45, 4  ;;  %v7761_v29 = vrot.slane %v4959_v34, 9  ;;  %v5820_v54 = vunpack.c.l.b16 %v4278_v56  ;;  %v5712_v0 = vsel %vm8450_vm4, %v7776_v28, %v5711_v31  ;;  %v11181_v56 = vpop.f32.mrf.mxu3 }
 0x2f1   : > { %6346 = vrot.lane.b32.xlu1 %v6318_v21, %s8349_s16  ;;  %v5713_v38 = vrot.slane %v5711_v31, 4  ;;  %v5109_v26 = vrot.slane %v4542_v61, 5  ;;  %v3374_v32 = vmax.f32 %v3342_v41, 0.0  ;;  %v5112_v33 = vrot.slane %v4559_v60, 5 }
 0x2f2   : > { %v4288_v19 = vsel %vm8473_vm5, %v4283_v16, %v4287_v58  ;;  %v6506_v50 = vsel %vm11637_vm13, %v6466_v15, %v6033_v53  ;;  %v6380_v36 = vunpack.c.l.b16 %v5712_v0  ;;  %v4494_v35 = vrot.slane %v11120_v18, 5  ;;  %v3898_v16 = vld [vmem:[#allocation2 + $0xc0] sm:$0xf] }
 0x2f3   : > { %v5821_v20 = vunpack.c.l.b16 %v4288_v19  ;;  %v5715_v12 = vsel %vm8450_vm4, %v5713_v38, %v5714_v8  ;;  %v5110_v47 = vsel %vm8450_vm4, %v7761_v29, %v5109_v26  ;;  %v5111_v49 = vrot.slane %v5109_v26, 4  ;;  %6895 = vmatmul.bf16.gmra.mxu1 %v6506_v50 }
 0x2f4   : > { %v3462_v42 = vpack.c.bf16 %v3374_v32, %v3374_v32  ;;  %v6381_v17 = vunpack.c.l.b16 %v5715_v12  ;;  %v6126_v40 = vunpack.c.l.b16 %v5110_v47  ;;  %v7744_v1 = vrot.slane %v4350_v24, 9  ;;  %v8263_v12 = vld [vmem:[#allocation2 + $0x80] sm:$0x1] }
 0x2f5   : > { %v5839_v6 = vpack.c.b16 %v5821_v20, %v5820_v54  ;;  %v5113_v14 = vsel %vm8450_vm4, %v5111_v49, %v5112_v33  ;;  %v4497_v45 = vrot.slane %v11126_v25, 5  ;;  %v4496_v31 = vrot.slane %v4494_v35, 4  ;;  %v3269_v25 = vpop.f32.mrf.mxu0  ;;  %v11194_v20 = vpop.f32.mrf.mxu2 }
 0x2f6   : > { %v3723_v30 = vshrl.u32 %v3462_v42, 16  ;;  %v6399_v34 = vpack.c.b16 %v6381_v17, %v6380_v36  ;;  %v6127_v15 = vunpack.c.l.b16 %v5113_v14  ;;  %v4495_v18 = vsel %vm8450_vm4, %v7744_v1, %v4494_v35  ;;  %v11200_v36 = vpop.f32.mrf.mxu1 }
 0x2f7   : > { %5868 = vrot.lane.b32.xlu2 %v5839_v6, %s8347_s8  ;;  %v5483_v61 = vshrl.u32 %v5148_v46, 16  ;;  %v5486_v21 = vshll.u32 %v5148_v46, 16  ;;  %v3726_v53 = vshll.u32 %v3462_v42, 16  ;;  %v5492_v60 = vshll.u32 %v11136_v57, 16 }
 0x2f8   : > { %v11183_v58 = vrot.slane %v3723_v30, 7  ;;  %8056 = vmatmul.msk.bf16.gmra.mxu3 %vm3093_vm14, %v6399_v34  ;;  %v6144_v28 = vpack.c.b16 %v6127_v15, %v6126_v40  ;;  %v4498_v41 = vsel %vm8450_vm4, %v4496_v31, %v4497_v45  ;;  %v5496_v54 = vshrl.u32 %v11136_v57, 16  ;;  %v11214_v40 = vld [vmem:[#allocation2 + $0xac] sm:$0xf]  ;;  %v5859_v30 = vpop.permute.xlu2 %5858 }
 0x2f9   : > { %6042 = vrot.lane.b32.xlu1 %v8142_v10, %s8349_s16  ;;  %v5485_v8 = vrot.slane %v5483_v61, 4  ;;  %v5488_v29 = vrot.slane %v5486_v21, 5  ;;  %v5900_v38 = vunpack.c.l.b16 %v4495_v18  ;;  %v5901_v26 = vunpack.c.l.b16 %v4498_v41 }
 0x2fa   : > { %v3728_v0 = vor.u32 %v3726_v53, %v11183_v58  ;;  %v5494_v19 = vrot.slane %v5492_v60, 5  ;;  %v5498_v33 = vrot.slane %v5496_v54, 4  ;;  %v5502_v50 = vshll.u32 %v11147_v11, 16  ;;  %v6259_v11 = vpop.permute.xlu0 %6258 }
 0x2fb   : > { %v5489_v32 = vor.u32 %v5488_v29, %v5485_v8  ;;  %v3307_v24 = vmul.f32 %v10904_v63, %v3269_v25  ;;  %v4797_v47 = vshll.u32 %v8263_v12, 16  ;;  %v4794_v49 = vor.u32 %v11145_v7, %v11140_v9  ;;  %v11230_v29 = vld [vmem:[#allocation2 + $0xb0] sm:$0x1] }
 0x2fc   : > { %v3899_v57 = vsel %vm9418_vm2, %v3728_v0, %v3898_v16  ;;  %v5919_v42 = vpack.c.b16 %v5901_v26, %v5900_v38  ;;  %v4784_v17 = vor.u32 %v11138_v22, %v11129_v43  ;;  %v5499_v63 = vor.u32 %v5498_v33, %v5494_v19  ;;  %vm11638_vm2 = vmmov %vm11631_vm1 }
 0x2fd   : > { %3900 = vst [vmem:[#allocation2 + $0xc0] sm:$0xf] %v3899_v57  ;;  %v5490_v35 = vrot.slane %v5489_v32, 4  ;;  %v3343_v46 = vadd.f32 %v10943_v2, %v3307_v24  ;;  %v6066_v7 = vunpack.c.l.b16 %v4766_v59  ;;  %v5504_v6 = vrot.slane %v5502_v50, 5  ;;  %v6339_v2 = vpop.permute.xlu1 %6338  ;;  %v11223_v25 = vpop.f32.mrf.mxu2  ;;  %v4533_v57 = vld [vmem:[#allocation2 + $0x84] sm:$0xf] }
 0x2fe   : > { %5948 = vrot.lane.b32.xlu0 %v5919_v42, %s8350_s9  ;;  %v5500_v22 = vrot.slane %v5499_v63, 4  ;;  %v4799_v34 = vrot.slane %v4797_v47, 5  ;;  %v4795_v48 = vrot.slane %v4794_v49, 4  ;;  %v4785_v59 = vrot.slane %v4784_v17, 4  ;;  %v6871_v0 = vpop.f32.mrf.mxu1  ;;  %v11233_v32 = vpop.f32.mrf.mxu3  ;;  %v8264_v63 = vld [vmem:[#allocation2 + $0x88] sm:$0xf] }
 0x2ff   : > { %6174 = vrot.lane.b32.xlu2 %v6144_v28, %s8347_s8  ;;  %v5495_v43 = vsel %vm8473_vm5, %v5490_v35, %v5494_v19  ;;  %v3375_v14 = vmax.f32 %v3343_v46, 0.0  ;;  %v6090_v1 = vpack.c.b16 %v11118_v37, %v6066_v7  ;;  %v4290_v10 = vshrl.u32 %v3933_v5, 16 }
 0x300   : > { %v5505_v15 = vsel %vm8473_vm5, %v5500_v22, %v5504_v6  ;;  %v6300_v18 = vunpack.c.l.b16 %v5495_v43  ;;  %v4293_v61 = vshll.u32 %v3933_v5, 16  ;;  %v4299_v21 = vshll.u32 %v11214_v40, 16 }
 0x301   : > { %v3463_v45 = vpack.c.bf16 %v3375_v14, %v3375_v14  ;;  %v6301_v31 = vunpack.c.l.b16 %v5505_v15  ;;  %v6558_v53 = vsel %vm3093_vm14, %v6090_v1, %v11175_v27  ;;  %v6428_v37 = vsel %vm3093_vm14, %v8122_v62, %v5859_v30 }
 0x302   : > { %v4292_v60 = vrot.slane %v4290_v10, 4  ;;  %v4790_v16 = vsel %vm8473_vm5, %v4785_v59, %v11140_v9  ;;  %v4800_v41 = vsel %vm8473_vm5, %v4795_v48, %v4799_v34  ;;  %v4295_v54 = vrot.slane %v4293_v61, 5  ;;  %v3902_v9 = vld [vmem:[#allocation2 + $0xc8] sm:$0x1]  ;;  %v5939_v35 = vpop.permute.xlu0 %5938 }
 0x303   : > { %v3731_v28 = vshrl.u32 %v3463_v45, 16  ;;  %v6319_v8 = vpack.c.b16 %v6301_v31, %v6300_v18  ;;  %v3734_v27 = vshll.u32 %v3463_v45, 16  ;;  %v4301_v26 = vrot.slane %v4299_v21, 5  ;;  %v8143_v59 = vld [vmem:[#allocation2 + $0xa8] sm:$0xff]  ;;  %v6165_v18 = vpop.permute.xlu2 %6164 }
 0x304   : > { %v4303_v19 = vshrl.u32 %v11214_v40, 16  ;;  %v3729_v33 = vrot.slane %v11183_v58, 4  ;;  %v6597_v50 = vsel %vm6450_vm3, %v6558_v53, %v6259_v11  ;;  %v4296_v24 = vor.u32 %v4295_v54, %v4292_v60 }
 0x305   : > { %v3733_v38 = vrot.slane %v3731_v28, 7  ;;  %6348 = vrot.lane.b32.xlu1 %v6319_v8, %s8349_s16  ;;  %v6956_v12 = vadd.f32 %v11168_v52, %v11171_v55  ;;  %v4309_v17 = vshll.u32 %v11230_v29, 16  ;;  %v4811_v46 = vshll.u32 %v8264_v63, 16  ;;  %v6035_v22 = vpop.permute.xlu1 %6034 }
 0x306   : > { %v4305_v42 = vrot.slane %v4303_v19, 4  ;;  %v4815_v7 = vshrl.u32 %v8264_v63, 16  ;;  %v4297_v58 = vrot.slane %v4296_v24, 4  ;;  %v6637_v55 = vsel %vm11638_vm2, %v6597_v50, %v6339_v2  ;;  %v6962_v2 = vpop.f32.mrf.mxu2  ;;  %v6873_v10 = vpop.f32.mrf.mxu1 }
 0x307   : > { %v3736_v47 = vor.u32 %v3734_v27, %v3733_v38  ;;  %v3738_v49 = vrot.slane %v3733_v38, 4  ;;  %v7045_v11 = vadd.f32 %v11149_v44, %v6956_v12  ;;  %v4802_v6 = vshrl.u32 %v4533_v57, 16  ;;  %6989 = vmatmul.bf16.gmra.mxu2 %v6637_v55  ;;  %v5568_v38 = vld [vmem:[#allocation2 + $0xc0] sm:$0xe]  ;;  %v7051_v27 = vpop.f32.mrf.mxu3 }
 0x308   : > { %v4306_v52 = vor.u32 %v4305_v42, %v4301_v26  ;;  %v4805_v14 = vshll.u32 %v4533_v57, 16  ;;  %v6468_v1 = vsel %vm6450_vm3, %v6428_v37, %v5939_v35  ;;  %v4302_v51 = vsel %vm8473_vm5, %v4297_v58, %v4301_v26 }
 0x309   : > { %v3737_v5 = vsel %vm9503_vm6, %v3729_v33, %v3736_v47  ;;  %v3903_v43 = vsel %vm9593_vm10, %v3738_v49, %v3902_v9  ;;  %v7125_v30 = vmul.f32 %v11024_v4, %v7045_v11  ;;  %v4311_v23 = vrot.slane %v4309_v17, 5  ;;  %vm11639_vm6 = vmmov %vm11631_vm1 }
 0x30a   : > { %3901 = vst.msk [vmem:[#allocation2 + $0xc4] sm:$0xf] %vm3376_vm0, %v3737_v5  ;;  %v4307_v44 = vrot.slane %v4306_v52, 4  ;;  %v6958_v34 = vadd.f32 %v11194_v20, %v11200_v36  ;;  %v6068_v48 = vunpack.c.l.b16 %v4790_v16  ;;  %v6069_v62 = vunpack.c.l.b16 %v4800_v41  ;;  %v8265_v16 = vld [vmem:[#allocation2 + $0x8c] sm:$0x1]  ;;  %vm11640_vm0 = vmmov %vm11631_vm1 }
 0x30b   : > { %3904 = vst [vmem:[#allocation2 + $0xc8] sm:$0x1] %v3903_v43  ;;  %v7161_v15 = vadd.f32 %v11044_v13, %v7125_v30  ;;  %v6509_v45 = vsel %vm11639_vm6, %v6468_v1, %v6035_v22  ;;  %v11256_v31 = vrot.slane %v4811_v46, 5  ;;  %v4817_v61 = vrot.slane %v4815_v7, 4  ;;  %v4960_v43 = vld [vmem:[#allocation2 + $0xc0] sm:$0xe]  ;;  %vm11641_vm10 = vmmov %vm11640_vm0 }
 0x30c   : > { %v4312_v21 = vsel %vm8473_vm5, %v4307_v44, %v4311_v23  ;;  %v7047_v53 = vadd.f32 %v11181_v56, %v6958_v34  ;;  %6900 = vmatmul.bf16.gmra.mxu1 %v6509_v45  ;;  %v4804_v20 = vrot.slane %v4802_v6, 4  ;;  %v5822_v36 = vunpack.c.l.b16 %v4302_v51  ;;  %v4351_v1 = vld [vmem:[#allocation2 + $0xa8] sm:$0xe]  ;;  %vm11642_vm15 = vmmov %vm11640_vm0 }
 0x30d   : > { %v5823_v37 = vunpack.c.l.b16 %v4312_v21  ;;  %6044 = vrot.lane.b32.xlu1 %v8143_v59, %s8349_s16  ;;  %v7193_v28 = vmax.f32 %v7161_v15, 0.0  ;;  %v4807_v60 = vrot.slane %v4805_v14, 5  ;;  %v4821_v41 = vshll.u32 %v8265_v16, 16  ;;  %v6341_v63 = vpop.permute.xlu1 %6340  ;;  %vm11643_vm1 = vmmov %vm11640_vm0 }
 0x30e   : > { %v7126_v8 = vmul.f32 %v11024_v4, %v7047_v53  ;;  %v6961_v54 = vadd.f32 %v11223_v25, %v6871_v0  ;;  %v6091_v26 = vpack.c.b16 %v6069_v62, %v6068_v48  ;;  %v4818_v56 = vor.u32 %v4817_v61, %v11256_v31  ;;  %v6261_v25 = vpop.permute.xlu0 %6260  ;;  %v11285_v52 = vpop.f32.mrf.mxu2  ;;  %vm11644_vm7 = vmmov %vm11640_vm0 }
 0x30f   : > { %v5840_v19 = vpack.c.b16 %v5823_v37, %v5822_v36  ;;  %7225 = vst.msk [vmem:[%s11069_s22 + $0x10] sm:$0xff] %vm3093_vm14, %v7193_v28  ;;  %v6963_v0 = vadd.f32 %v6962_v2, %v6873_v10  ;;  %v7777_v49 = vrot.slane %v5568_v38, 9  ;;  %v4808_v42 = vor.u32 %v4807_v60, %v4804_v20  ;;  %v6876_v30 = vpop.f32.mrf.mxu1  ;;  %v5861_v2 = vpop.permute.xlu2 %5860  ;;  %v8123_v10 = vld [vmem:[#allocation2 + $0x6c] sm:$0xff]  ;;  %v5150_v60 = vld [vmem:[#allocation2 + $0xc0] sm:$0xf]  ;;  %vm11645_vm8 = vmmov %vm11640_vm0 }
 0x310   : > { %v7162_v33 = vadd.f32 %v11044_v13, %v7126_v8  ;;  %v7050_v50 = vadd.f32 %v11233_v32, %v6961_v54  ;;  %v6561_v12 = vsel %vm3093_vm14, %v6091_v26, %v6165_v18  ;;  %v11276_v17 = vrot.slane %v4821_v41, 5  ;;  %v7054_v45 = vpop.f32.mrf.mxu3  ;;  %vm11646_vm9 = vmmov %vm11640_vm0 }
 0x311   : > { %v8160_v9 = vld [vmem:[#allocation2 + $0xc0] sm:$0xff]  ;;  %5870 = vrot.lane.b32.xlu2 %v5840_v19, %s8347_s8  ;;  %v7052_v46 = vadd.f32 %v7051_v27, %v6963_v0  ;;  %v4819_v55 = vrot.slane %v4818_v56, 4  ;;  %v6599_v22 = vsel %vm6450_vm3, %v6561_v12, %v6261_v25  ;;  %v7762_v59 = vrot.slane %v4960_v43, 9  ;;  %vm11647_vm11 = vmmov %vm11640_vm0 }
 0x312   : > { %v11269_v24 = vld [vmem:[#allocation2 + $0xc4] sm:$0xf]  ;;  %v11273_v47 = vld [vmem:[#allocation2 + $0xc8] sm:$0x1]  ;;  %v7194_v35 = vmax.f32 %v7162_v33, 0.0  ;;  %v7127_v32 = vmul.f32 %v11024_v4, %v7050_v50  ;;  %6270 = vrot.lane.b32.xlu0 %v8160_v9, %s8350_s9  ;;  %v6640_v44 = vsel %vm11640_vm0, %v6599_v22, %v6341_v63  ;;  %v11298_v18 = vrot.slane %v4808_v42, 4  ;;  %vm11648_vm12 = vmmov %vm11640_vm0 }
 0x313   : > { %v5718_v57 = vrot.slane %v11269_v24, 5  ;;  %v5721_v11 = vrot.slane %v11273_v47, 5  ;;  %v11283_v5 = vld [vmem:[#allocation2 + $0xc4] sm:$0xf]  ;;  %v11291_v14 = vld [vmem:[#allocation2 + $0xc8] sm:$0x1]  ;;  %v7128_v51 = vmul.f32 %v11024_v4, %v7052_v46  ;;  %v6431_v16 = vsel %vm3093_vm14, %v8123_v10, %v5861_v2  ;;  %vm11649_vm13 = vmmov %vm11640_vm0 }
 0x314   : > { %7226 = vst.msk [vmem:[%s11069_s22 + $0x18] sm:$0xff] %vm3093_vm14, %v7194_v35  ;;  %v7163_v6 = vadd.f32 %v11044_v13, %v7127_v32  ;;  %v5116_v15 = vrot.slane %v11283_v5, 5  ;;  %v5119_v21 = vrot.slane %v11291_v14, 5  ;;  %v7745_v53 = vrot.slane %v4351_v1, 9  ;;  %v3935_v35 = vld [vmem:[#allocation2 + $0xb4] sm:$0xf]  ;;  %vm11651_vm2 = vmmov %vm11640_vm0 }
 0x315   : > { %v5719_v7 = vsel %vm8450_vm4, %v7777_v49, %v5718_v57  ;;  %v5720_v58 = vrot.slane %v5718_v57, 4  ;;  %v7164_v61 = vadd.f32 %v11044_v13, %v7128_v51  ;;  %v4501_v28 = vrot.slane %v11214_v40, 5  ;;  %v6037_v49 = vpop.permute.xlu1 %6036  ;;  %v11336_v51 = vld [vmem:[#allocation2 + $0xbc] sm:$0x1]  ;;  %vm11653_vm6 = vmmov %vm11640_vm0 }
 0x316   : > { %v6382_v34 = vunpack.c.l.b16 %v5719_v7  ;;  %v7195_v48 = vmax.f32 %v7163_v6, 0.0  ;;  %v5117_v36 = vsel %vm8450_vm4, %v7762_v59, %v5116_v15  ;;  %v5118_v37 = vrot.slane %v5116_v15, 4  ;;  %v5941_v19 = vpop.permute.xlu0 %5940  ;;  %v11328_v32 = vpop.f32.mrf.mxu2 }
 0x317   : > { %v5722_v23 = vsel %vm8450_vm4, %v5720_v58, %v5721_v11  ;;  %v4814_v41 = vsel %vm8473_vm5, %v11298_v18, %v11256_v31  ;;  %v4824_v8 = vsel %vm8473_vm5, %v4819_v55, %v11276_v17  ;;  %v7196_v54 = vmax.f32 %v7164_v61, 0.0  ;;  %6994 = vmatmul.bf16.gmra.mxu2 %v6640_v44  ;;  %v11331_v11 = vld [vmem:[#allocation2 + $0xb8] sm:$0xf]  ;;  %v6878_v43 = vpop.f32.mrf.mxu1 }
 0x318   : > { %v6383_v62 = vunpack.c.l.b16 %v5722_v23  ;;  %7227 = vst.msk [vmem:[%s11069_s22 + $0x20] sm:$0xff] %vm3093_vm14, %v7195_v48  ;;  %v5120_v38 = vsel %vm8450_vm4, %v5118_v37, %v5119_v21  ;;  %v4502_v40 = vsel %vm8450_vm4, %v7745_v53, %v4501_v28  ;;  %v4503_v27 = vrot.slane %v4501_v28, 4 }
 0x319   : > { %v4504_v26 = vrot.slane %v11230_v29, 5  ;;  %7228 = vst.msk [vmem:[%s11069_s22 + $0x28] sm:$0xff] %vm3093_vm14, %v7196_v54  ;;  %v6128_v31 = vunpack.c.l.b16 %v5117_v36  ;;  %v6129_v56 = vunpack.c.l.b16 %v5120_v38  ;;  %v5902_v33 = vunpack.c.l.b16 %v4502_v40  ;;  %v8161_v38 = vld [vmem:[#allocation2 + $0xcc] sm:$0xff] }
 0x31a   : > { %v6400_v20 = vpack.c.b16 %v6383_v62, %v6382_v34  ;;  %v5507_v50 = vshrl.u32 %v5150_v60, 16  ;;  %v5510_v12 = vshll.u32 %v5150_v60, 16  ;;  %v5516_v25 = vshll.u32 %v11269_v24, 16  ;;  %v7056_v34 = vpop.f32.mrf.mxu3 }
 0x31b   : > { %v4505_v9 = vsel %vm8450_vm4, %v4503_v27, %v4504_v26  ;;  %v5520_v0 = vshrl.u32 %v11269_v24, 16  ;;  %v6145_v57 = vpack.c.b16 %v6129_v56, %v6128_v31  ;;  %v5526_v29 = vshll.u32 %v11273_v47, 16 }
 0x31c   : > { %8057 = vmatmul.msk.bf16.gmra.mxu3 %vm3093_vm14, %v6400_v20  ;;  %v5903_v42 = vunpack.c.l.b16 %v4505_v9  ;;  %v5509_v17 = vrot.slane %v5507_v50, 4  ;;  %v6470_v63 = vsel %vm6450_vm3, %v6431_v16, %v5941_v19  ;;  %v5512_v46 = vrot.slane %v5510_v12, 5  ;;  %v6167_v20 = vpop.permute.xlu2 %6166  ;;  %v4352_v12 = vld [vmem:[#allocation2 + $0xb4] sm:$0xe] }
 0x31d   : > { %v5518_v7 = vrot.slane %v5516_v25, 5  ;;  %v5522_v58 = vrot.slane %v5520_v0, 4  ;;  %v6071_v55 = vunpack.c.l.b16 %v4824_v8  ;;  %6176 = vrot.lane.b32.xlu2 %v6145_v57, %s8347_s8  ;;  %v6966_v22 = vadd.f32 %v11285_v52, %v6876_v30  ;;  %v8266_v57 = vld [vmem:[#allocation2 + $0x94] sm:$0xf] }
 0x31e   : > { %v5920_v24 = vpack.c.b16 %v5903_v42, %v5902_v33  ;;  %v6512_v6 = vsel %vm11641_vm10, %v6470_v63, %v6037_v49  ;;  %v5513_v47 = vor.u32 %v5512_v46, %v5509_v17  ;;  %v4314_v44 = vshrl.u32 %v3935_v35, 16  ;;  %v6263_v27 = vpop.permute.xlu0 %6262  ;;  %v6970_v50 = vpop.f32.mrf.mxu2 }
 0x31f   : > { %v5523_v1 = vor.u32 %v5522_v58, %v5518_v7  ;;  %6905 = vmatmul.bf16.gmra.mxu1 %v6512_v6  ;;  %v4317_v23 = vshll.u32 %v3935_v35, 16  ;;  %v5528_v2 = vrot.slane %v5526_v29, 5  ;;  %v7055_v48 = vadd.f32 %v7054_v45, %v6966_v22  ;;  %v4535_v58 = vld [vmem:[#allocation2 + $0x90] sm:$0xf] }
 0x320   : > { %5950 = vrot.lane.b32.xlu0 %v5920_v24, %s8350_s9  ;;  %v4323_v62 = vshll.u32 %v11331_v11, 16  ;;  %v4327_v59 = vshrl.u32 %v11331_v11, 16  ;;  %v5514_v15 = vrot.slane %v5513_v47, 4  ;;  %v4316_v30 = vrot.slane %v4314_v44, 4 }
 0x321   : > { %v5524_v52 = vrot.slane %v5523_v1, 4  ;;  %v4319_v10 = vrot.slane %v4317_v23, 5  ;;  %v7129_v18 = vmul.f32 %v11024_v4, %v7055_v48  ;;  %v4333_v53 = vshll.u32 %v11336_v51, 16  ;;  %v11366_v48 = vld [vmem:[#allocation2 + $0xd0] sm:$0xf] }
 0x322   : > { %v4325_v61 = vrot.slane %v4323_v62, 5  ;;  %v4329_v21 = vrot.slane %v4327_v59, 4  ;;  %v6070_v36 = vunpack.c.l.b16 %v4814_v41  ;;  %v5519_v37 = vsel %vm8473_vm5, %v5514_v15, %v5518_v7  ;;  %v11350_v0 = vpop.f32.mrf.mxu3  ;;  %v5152_v7 = vld [vmem:[#allocation2 + $0xcc] sm:$0xf] }
 0x323   : > { %v5529_v45 = vsel %vm8473_vm5, %v5524_v52, %v5528_v2  ;;  %v4320_v28 = vor.u32 %v4319_v10, %v4316_v30  ;;  %v6302_v60 = vunpack.c.l.b16 %v5519_v37  ;;  %v7165_v8 = vadd.f32 %v11044_v13, %v7129_v18  ;;  %v6881_v25 = vpop.f32.mrf.mxu1  ;;  %v8144_v10 = vld [vmem:[#allocation2 + $0xb4] sm:$0xff] }
 0x324   : > { %v6303_v16 = vunpack.c.l.b16 %v5529_v45  ;;  %v4330_v54 = vor.u32 %v4329_v21, %v4325_v61  ;;  %v6092_v40 = vpack.c.b16 %v6071_v55, %v6070_v36  ;;  %v4335_v56 = vrot.slane %v4333_v53, 5  ;;  %v5863_v62 = vpop.permute.xlu2 %5862 }
 0x325   : > { %v4321_v26 = vrot.slane %v4320_v28, 4  ;;  %v7197_v31 = vmax.f32 %v7165_v8, 0.0  ;;  %v4835_v42 = vshll.u32 %v8266_v57, 16  ;;  %v6968_v46 = vadd.f32 %v11328_v32, %v6878_v43 }
 0x326   : > { %v6320_v19 = vpack.c.b16 %v6303_v16, %v6302_v60  ;;  %v4331_v41 = vrot.slane %v4330_v54, 4  ;;  %v6564_v49 = vsel %vm3093_vm14, %v6092_v40, %v6167_v20  ;;  %v4839_v55 = vshrl.u32 %v8266_v57, 16  ;;  %v5943_v53 = vpop.permute.xlu0 %5942  ;;  %v6972_v54 = vpop.f32.mrf.mxu2 }
 0x327   : > { %v6343_v33 = vpop.permute.xlu1 %6342  ;;  %v4326_v9 = vsel %vm8473_vm5, %v4321_v26, %v4325_v61  ;;  %7229 = vst.msk [vmem:[%s11069_s22 + $0x30] sm:$0xff] %vm3093_vm14, %v7197_v31  ;;  %v6601_v29 = vsel %vm6450_vm3, %v6564_v49, %v6263_v27  ;;  %v7746_v24 = vrot.slane %v4352_v12, 9  ;;  %v4508_v22 = vrot.slane %v11331_v11, 5 }
 0x328   : > { %6350 = vrot.lane.b32.xlu1 %v6320_v19, %s8349_s16  ;;  %v4336_v17 = vsel %vm8473_vm5, %v4331_v41, %v4335_v56  ;;  %6272 = vrot.lane.b32.xlu0 %v8161_v38, %s8350_s9  ;;  %v5824_v35 = vunpack.c.l.b16 %v4326_v9  ;;  %v6643_v6 = vsel %vm11642_vm15, %v6601_v29, %v6343_v33  ;;  %v7057_v1 = vadd.f32 %v7056_v34, %v6968_v46  ;;  %v11372_v34 = vld [vmem:[#allocation2 + $0xd4] sm:$0x1]  ;;  %v11394_v29 = vld [vmem:[%s11602_s5] ss:$0 sm:$0xff] }
 0x329   : > { %v5825_v63 = vunpack.c.l.b16 %v4336_v17  ;;  %v4511_v44 = vrot.slane %v11336_v51, 5  ;;  %6999 = vmatmul.bf16.gmra.mxu2 %v6643_v6  ;;  %v4509_v23 = vsel %vm8450_vm4, %v7746_v24, %v4508_v22  ;;  %v4510_v2 = vrot.slane %v4508_v22, 4  ;;  %v8124_v51 = vld [vmem:[#allocation2 + $0x78] sm:$0xff] }
 0x32a   : > { %v5531_v32 = vshrl.u32 %v5152_v7, 16  ;;  %v5534_v43 = vshll.u32 %v5152_v7, 16  ;;  %v4826_v59 = vshrl.u32 %v4535_v58, 16  ;;  %v4829_v15 = vshll.u32 %v4535_v58, 16  ;;  %v7061_v19 = vpop.f32.mrf.mxu3 }
 0x32b   : > { %v5841_v47 = vpack.c.b16 %v5825_v63, %v5824_v35  ;;  %v11368_v52 = vrot.slane %v4835_v42, 5  ;;  %v7130_v11 = vmul.f32 %v11024_v4, %v7057_v1  ;;  %v4841_v30 = vrot.slane %v4839_v55, 4  ;;  %v6883_v26 = vpop.f32.mrf.mxu1  ;;  %v8268_v63 = vld [vmem:[#allocation2 + $0x98] sm:$0x1]  ;;  %v11400_v55 = vld [vmem:[%s11603_s6] ss:$0 sm:$0xff] }
 0x32c   : > { %v4512_v18 = vsel %vm8450_vm4, %v4510_v2, %v4511_v44  ;;  %v5533_v61 = vrot.slane %v5531_v32, 4  ;;  %v5536_v21 = vrot.slane %v5534_v43, 5  ;;  %v5904_v36 = vunpack.c.l.b16 %v4509_v23 }
 0x32d   : > { %5872 = vrot.lane.b32.xlu2 %v5841_v47, %s8347_s8  ;;  %v7166_v20 = vadd.f32 %v11044_v13, %v7130_v11  ;;  %v5905_v37 = vunpack.c.l.b16 %v4512_v18  ;;  %v5540_v45 = vshll.u32 %v11366_v48, 16  ;;  %v6434_v28 = vsel %vm3093_vm14, %v8124_v51, %v5863_v62 }
 0x32e   : > { %v5537_v4 = vor.u32 %v5536_v21, %v5533_v61  ;;  %v5544_v60 = vshrl.u32 %v11366_v48, 16  ;;  %v5550_v16 = vshll.u32 %v11372_v34, 16  ;;  %v6971_v13 = vadd.f32 %v6970_v50, %v6881_v25 }
 0x32f   : > { %v6039_v8 = vpop.permute.xlu1 %6038  ;;  %v7198_v38 = vmax.f32 %v7166_v20, 0.0  ;;  %v5921_v40 = vpack.c.b16 %v5905_v37, %v5904_v36  ;;  %v5542_v27 = vrot.slane %v5540_v45, 5  ;;  %v4828_v31 = vrot.slane %v4826_v59, 4  ;;  %v6169_v20 = vpop.permute.xlu2 %6168 }
 0x330   : > { %6046 = vrot.lane.b32.xlu1 %v8144_v10, %s8349_s16  ;;  %v6472_v41 = vsel %vm6450_vm3, %v6434_v28, %v5943_v53  ;;  %v5538_v56 = vrot.slane %v5537_v4, 4  ;;  %v5546_v33 = vrot.slane %v5544_v60, 4  ;;  %v4831_v9 = vrot.slane %v4829_v15, 5  ;;  %v6265_v37 = vpop.permute.xlu0 %6264 }
 0x331   : > { %v4842_v12 = vor.u32 %v4841_v30, %v11368_v52  ;;  %7230 = vst.msk [vmem:[%s11069_s22 + $0x38] sm:$0xff] %vm3093_vm14, %v7198_v38  ;;  %5952 = vrot.lane.b32.xlu0 %v5921_v40, %s8350_s9  ;;  %v7060_v49 = vadd.f32 %v11350_v0, %v6971_v13  ;;  %v6515_v57 = vsel %vm11643_vm1, %v6472_v41, %v6039_v8  ;;  %v5552_v42 = vrot.slane %v5550_v16, 5  ;;  %v8145_v16 = vld [vmem:[#allocation2 + $0xc0] sm:$0xff]  ;;  %v4537_v41 = vld [vmem:[#allocation2 + $0x9c] sm:$0xf] }
 0x332   : > { %v5543_v50 = vsel %vm8473_vm5, %v5538_v56, %v5542_v27  ;;  %v5547_v25 = vor.u32 %v5546_v33, %v5542_v27  ;;  %6910 = vmatmul.bf16.gmra.mxu1 %v6515_v57  ;;  %v6973_v17 = vadd.f32 %v6972_v54, %v6883_v26  ;;  %v4845_v46 = vshll.u32 %v8268_v63, 16  ;;  %v7064_v32 = vpop.f32.mrf.mxu3  ;;  %v8270_v27 = vld [vmem:[#allocation2 + $0xa0] sm:$0xf] }
 0x333   : > { %v7131_v35 = vmul.f32 %v11394_v29, %v7060_v49  ;;  %v6304_v58 = vunpack.c.l.b16 %v5543_v50  ;;  %v4832_v22 = vor.u32 %v4831_v9, %v4828_v31  ;;  %v4843_v6 = vrot.slane %v4842_v12, 4 }
 0x334   : > { %v5548_v7 = vrot.slane %v5547_v25, 4  ;;  %v7062_v0 = vadd.f32 %v7061_v19, %v6973_v17  ;;  %v4847_v43 = vrot.slane %v4845_v46, 5  ;;  %v4859_v13 = vshll.u32 %v8270_v27, 16 }
 0x335   : > { %v7167_v24 = vadd.f32 %v11400_v55, %v7131_v35  ;;  %v4833_v51 = vrot.slane %v4832_v22, 4  ;;  %v4863_v26 = vshrl.u32 %v8270_v27, 16  ;;  %v4850_v49 = vshrl.u32 %v4537_v41, 16 }
 0x336   : > { %v5553_v47 = vsel %vm8473_vm5, %v5548_v7, %v5552_v42  ;;  %v7132_v1 = vmul.f32 %v11394_v29, %v7062_v0  ;;  %v4848_v30 = vsel %vm8473_vm5, %v4843_v6, %v4847_v43  ;;  %v4853_v57 = vshll.u32 %v4537_v41, 16  ;;  %v8125_v42 = vld [vmem:[#allocation2 + $0x84] sm:$0xff] }
 0x337   : > { %v6305_v23 = vunpack.c.l.b16 %v5553_v47  ;;  %v7199_v2 = vmax.f32 %v7167_v24, 0.0  ;;  %v4838_v61 = vsel %vm8473_vm5, %v4833_v51, %v11368_v52  ;;  %v6073_v21 = vunpack.c.l.b16 %v4848_v30  ;;  %v5865_v12 = vpop.permute.xlu2 %5864  ;;  %v8271_v6 = vld [vmem:[#allocation2 + $0xa4] sm:$0x1] }
 0x338   : > { %v7168_v62 = vadd.f32 %v11400_v55, %v7132_v1  ;;  %v6072_v36 = vunpack.c.l.b16 %v4838_v61  ;;  %v4861_v50 = vrot.slane %v4859_v13, 5  ;;  %v4865_v25 = vrot.slane %v4863_v26, 4 }
 0x339   : > { %v6321_v15 = vpack.c.b16 %v6305_v23, %v6304_v58  ;;  %7231 = vst.msk [vmem:[%s11069_s22 + $0x40] sm:$0xff] %vm3093_vm14, %v7199_v2  ;;  %v6437_v63 = vsel %vm3093_vm14, %v8125_v42, %v5865_v12  ;;  %v4852_v46 = vrot.slane %v4850_v49, 4  ;;  %v4855_v7 = vrot.slane %v4853_v57, 5 }
 0x33a   : > { %v7200_v10 = vmax.f32 %v7168_v62, 0.0  ;;  %v6093_v60 = vpack.c.b16 %v6073_v21, %v6072_v36  ;;  %v7066_v38 = vpop.f32.mrf.mxu3  ;;  %v4866_v0 = vor.u32 %v4865_v25, %v4861_v50  ;;  %v4869_v47 = vshll.u32 %v8271_v6, 16  ;;  %v8272_v21 = vld [vmem:[#allocation2 + $0xac] sm:$0xf]  ;;  %v8273_v25 = vld [vmem:[#allocation2 + $0xb0] sm:$0x1] }
 0x33b   : > { %v6975_v44 = vpop.f32.mrf.mxu2  ;;  %v6886_v59 = vpop.f32.mrf.mxu1  ;;  %6352 = vrot.lane.b32.xlu1 %v6321_v15, %s8349_s16  ;;  %v4856_v1 = vor.u32 %v4855_v7, %v4852_v46  ;;  %v4893_v42 = vshll.u32 %v8273_v25, 16  ;;  %v5728_v25 = vrot.slane %v11372_v34, 5 }
 0x33c   : > { %v6976_v11 = vadd.f32 %v6975_v44, %v6886_v59  ;;  %7232 = vst.msk [vmem:[%s11069_s22 + $0x48] sm:$0xff] %vm3093_vm14, %v7200_v10  ;;  %v6567_v52 = vsel %vm3093_vm14, %v6093_v60, %v6169_v20  ;;  %v5945_v17 = vpop.permute.xlu0 %5944  ;;  %v4867_v44 = vrot.slane %v4866_v0, 4  ;;  %v4871_v23 = vrot.slane %v4869_v47, 5 }
 0x33d   : > { %v6603_v19 = vsel %vm6450_vm3, %v6567_v52, %v6265_v37  ;;  %v6474_v58 = vsel %vm6450_vm3, %v6437_v63, %v5945_v17  ;;  %v4857_v43 = vrot.slane %v4856_v1, 4  ;;  %v4887_v20 = vshrl.u32 %v8272_v21, 16 }
 0x33e   : > { %v7065_v18 = vadd.f32 %v7064_v32, %v6976_v11  ;;  %v4872_v62 = vsel %vm8473_vm5, %v4867_v44, %v4871_v23 }
 0x33f   : > { %v4862_v11 = vsel %vm8473_vm5, %v4857_v43, %v4861_v50  ;;  %v6075_v51 = vunpack.c.l.b16 %v4872_v62  ;;  %v6171_v10 = vpop.permute.xlu2 %6170  ;;  %v4889_v13 = vrot.slane %v4887_v20, 4  ;;  %v8126_v50 = vld [vmem:[#allocation2 + $0x90] sm:$0xff] }
 0x340   : > { %v7133_v53 = vmul.f32 %v11394_v29, %v7065_v18  ;;  %v6074_v18 = vunpack.c.l.b16 %v4862_v11 }
 0x342   : > { %v7169_v45 = vadd.f32 %v11400_v55, %v7133_v53  ;;  %v7069_v32 = vpop.f32.mrf.mxu3  ;;  %v4883_v53 = vshll.u32 %v8272_v21, 16  ;;  %v6094_v37 = vpack.c.b16 %v6075_v51, %v6074_v18 }
 0x343   : > { %v6977_v28 = vpop.f32.mrf.mxu2  ;;  %v6888_v4 = vpop.f32.mrf.mxu1  ;;  %6048 = vrot.lane.b32.xlu1 %v8145_v16, %s8349_s16  ;;  %s8180_s16 = sshll.u32 %s8413_s28, 8  ;;  %s7256_s28 = scalar_lea.sflag [#allocation4], %s269_s17 }
 0x344   : > { %v7201_v8 = vmax.f32 %v7169_v45, 0.0  ;;  %v6978_v54 = vadd.f32 %v6977_v28, %v6888_v4  ;;  %v6267_v36 = vpop.permute.xlu0 %6266  ;;  %v4539_v45 = vld [vmem:[#allocation2 + $0xa8] sm:$0xf]  ;;  %v6570_v16 = vsel %vm3093_vm14, %v6094_v37, %v6171_v10  ;;  %v4885_v27 = vrot.slane %v4883_v53, 5  ;;  %s7267_s13 = scalar_lea.hbm %s11604_s7, %s8180_s16 }
 0x345   : > { %v4874_v52 = vshrl.u32 %v4539_v45, 16  ;;  %v6605_v26 = vsel %vm6450_vm3, %v6570_v16, %v6267_v36  ;;  %v8127_v16 = vld [vmem:[#allocation2 + $0x9c] sm:$0xff]  ;;  %s7270_s19 = sshll.u32 %s7267_s13, 4  ;;  %s7271_s19 = int_to_ptr.hbm [resolvable:$true] %s7270_s19 }
 0x346   : > { %7233 = vst.msk [vmem:[%s11069_s22 + $0x50] sm:$0xff] %vm3093_vm14, %v7201_v8  ;;  %v7067_v40 = vadd.f32 %v7066_v38, %v6978_v54  ;;  %v4890_v12 = vor.u32 %v4889_v13, %v4885_v27  ;;  %s8290_s20 = sshra.s32 %s7271_s19, 4  ;;  %s8291_s20 = int_to_ptr.hbm [resolvable:$true] %s8290_s20 }
 0x347   : > { %v5867_v49 = vpop.permute.xlu2 %5866  ;;  %s8292_s8 = scalar_lea.hbm %s8291_s20, 256  ;;  %p8297_p0 = scmp.lt.s32.totalorder %s8291_s20, %s11604_s7 }
 0x348   : > { %v7134_v33 = vmul.f32 %v11394_v29, %v7067_v40  ;;  %v4877_v40 = vshll.u32 %v4539_v45, 16  ;;  %v6440_v63 = vsel %vm3093_vm14, %v8126_v50, %v5867_v49  ;;  %v4891_v7 = vrot.slane %v4890_v12, 4  ;;  %p8293_p11 = scmp.ne.s32.totalorder %s8291_s20, %s8292_s8  ;;  %p8298_p1 = scmp.lt.s32.totalorder %s8296_s29, %s8292_s8 }
 0x349   : > { %v6345_v31 = vpop.permute.xlu1 %6344  ;;  %v5725_v50 = vrot.slane %v11366_v48, 5 }
 0x34a   : > { %v6646_v56 = vsel %vm11644_vm7, %v6603_v19, %v6345_v31  ;;  %v7170_v9 = vadd.f32 %v11400_v55, %v7134_v33  ;;  %v7071_v38 = vpop.f32.mrf.mxu3  ;;  %v4876_v33 = vrot.slane %v4874_v52, 4  ;;  %p8294_p12 = pnand %p8293_p11, %p8430_p5  ;;  %p8299_p2 = por %p8298_p1, %p8297_p0 }
 0x34b   : > { %7004 = vmatmul.bf16.gmra.mxu2 %v6646_v56 }
 0x34c   : > { %v7202_v35 = vmax.f32 %v7170_v9, 0.0  ;;  %v4879_v9 = vrot.slane %v4877_v40, 5  ;;  %p8295_p13 = pneg %p8294_p12 }
 0x34e   : > { %7234 = vst.msk [vmem:[%s11069_s22 + $0x58] sm:$0xff] %vm3093_vm14, %v7202_v35  ;;  %v4880_v46 = vor.u32 %v4879_v9, %v4876_v33  ;;  %p8300_p3 = pnand %p8299_p2, %p8295_p13 }
 0x34f   : > { %v6173_v62 = vpop.permute.xlu2 %6172 }
 0x350   : > { %v4881_v6 = vrot.slane %v4880_v46, 4 }
 0x351   : > { %v6041_v24 = vpop.permute.xlu1 %6040 }
 0x352   : > { %v6518_v22 = vsel %vm11645_vm8, %v6474_v58, %v6041_v24  ;;  %v4895_v24 = vrot.slane %v4893_v42, 5  ;;  %v7074_v44 = vpop.f32.mrf.mxu3  ;;  %v4886_v23 = vsel %vm8473_vm5, %v4881_v6, %v4885_v27 }
 0x353   : > { %6915 = vmatmul.bf16.gmra.mxu1 %v6518_v22 }
 0x354   : > { %v4896_v47 = vsel %vm8473_vm5, %v4891_v7, %v4895_v24  ;;  %v5727_v7 = vrot.slane %v5725_v50, 4 }
 0x357   : > { %v5947_v17 = vpop.permute.xlu0 %5946 }
 0x358   : > { %v6980_v2 = vpop.f32.mrf.mxu2  ;;  %v6476_v0 = vsel %vm6450_vm3, %v6440_v63, %v5947_v17 }
 0x359   : > { %v6891_v59 = vpop.f32.mrf.mxu1 }
 0x35a   : > { %v6981_v15 = vadd.f32 %v6980_v2, %v6891_v59  ;;  %v6076_v59 = vunpack.c.l.b16 %v4886_v23 }
 0x35c   : > { %v7070_v30 = vadd.f32 %v7069_v32, %v6981_v15  ;;  %v6077_v32 = vunpack.c.l.b16 %v4896_v47  ;;  %v5729_v47 = vsel %vm8450_vm4, %v5727_v7, %v5728_v25  ;;  %v4941_v25 = vshll.u32 %v11291_v14, 16 }
 0x35d   : > { %v6385_v23 = vunpack.c.l.b16 %v5729_v47 }
 0x35e   : > { %v7135_v61 = vmul.f32 %v11394_v29, %v7070_v30  ;;  %v6095_v51 = vpack.c.b16 %v6077_v32, %v6076_v59 }
 0x35f   : > { %v6269_v15 = vpop.permute.xlu0 %6268 }
 0x360   : > { %v7171_v28 = vadd.f32 %v11400_v55, %v7135_v61  ;;  %v6982_v4 = vpop.f32.mrf.mxu2  ;;  %v6573_v10 = vsel %vm3093_vm14, %v6095_v51, %v6173_v62 }
 0x361   : > { %v6893_v60 = vpop.f32.mrf.mxu1  ;;  %v6607_v21 = vsel %vm6450_vm3, %v6573_v10, %v6269_v15 }
 0x362   : > { %v7203_v8 = vmax.f32 %v7171_v28, 0.0  ;;  %v6983_v54 = vadd.f32 %v6982_v4, %v6893_v60  ;;  %v7076_v28 = vpop.f32.mrf.mxu3  ;;  %v5869_v60 = vpop.permute.xlu2 %5868 }
 0x363   : > { %v6347_v19 = vpop.permute.xlu1 %6346 }
 0x364   : > { %7235 = vst.msk [vmem:[%s11069_s22 + $0x60] sm:$0xff] %vm3093_vm14, %v7203_v8  ;;  %v7072_v31 = vadd.f32 %v7071_v38, %v6983_v54  ;;  %v6649_v41 = vsel %vm11646_vm9, %v6605_v26, %v6347_v19  ;;  %v6443_v38 = vsel %vm3093_vm14, %v8127_v16, %v5869_v60  ;;  %v8274_v19 = vld [vmem:[#allocation2 + $0xb8] sm:$0xf] }
 0x365   : > { %7009 = vmatmul.bf16.gmra.mxu2 %v6649_v41  ;;  %v4911_v41 = vshrl.u32 %v8274_v19, 16 }
 0x366   : > { %v7136_v56 = vmul.f32 %v11394_v29, %v7072_v31  ;;  %v4907_v31 = vshll.u32 %v8274_v19, 16 }
 0x367   : > { %v4913_v49 = vrot.slane %v4911_v41, 4 }
 0x368   : > { %v7172_v57 = vadd.f32 %v11400_v55, %v7136_v56  ;;  %v4541_v56 = vld [vmem:[#allocation2 + $0xb4] sm:$0xf]  ;;  %v4909_v12 = vrot.slane %v4907_v31, 5 }
 0x369   : > { %v4898_v33 = vshrl.u32 %v4541_v56, 16  ;;  %v4901_v9 = vshll.u32 %v4541_v56, 16 }
 0x36a   : > { %v7204_v35 = vmax.f32 %v7172_v57, 0.0  ;;  %v5569_v57 = vld [vmem:[#allocation2 + $0xcc] sm:$0xe] }
 0x36b   : > { %v6043_v58 = vpop.permute.xlu1 %6042  ;;  %v4900_v42 = vrot.slane %v4898_v33, 4  ;;  %v4903_v17 = vrot.slane %v4901_v9, 5  ;;  %v7778_v46 = vrot.slane %v5569_v57, 9 }
 0x36c   : > { %7236 = vst.msk [vmem:[%s11069_s22 + $0x68] sm:$0xff] %vm3093_vm14, %v7204_v35  ;;  %v6521_v22 = vsel %vm11647_vm11, %v6476_v0, %v6043_v58  ;;  %v4914_v35 = vor.u32 %v4913_v49, %v4909_v12  ;;  %v7079_v0 = vpop.f32.mrf.mxu3  ;;  %v8275_v58 = vld [vmem:[#allocation2 + $0xbc] sm:$0x1] }
 0x36d   : > { %6920 = vmatmul.bf16.gmra.mxu1 %v6521_v22  ;;  %v4917_v24 = vshll.u32 %v8275_v58, 16  ;;  %v5726_v22 = vsel %vm8450_vm4, %v7778_v46, %v5725_v50  ;;  %v4904_v48 = vor.u32 %v4903_v17, %v4900_v42  ;;  %vm11650_vm4 = vmmov %vm11640_vm0  ;;  %v8128_v50 = vld [vmem:[#allocation2 + $0xa8] sm:$0xff] }
 0x36e   : > { %v6985_v1 = vpop.f32.mrf.mxu2 }
 0x36f   : > { %v4905_v62 = vrot.slane %v4904_v48, 4 }
 0x370   : > { %v6896_v2 = vpop.f32.mrf.mxu1  ;;  %v5949_v8 = vpop.permute.xlu0 %5948 }
 0x371   : > { %v6986_v43 = vadd.f32 %v6985_v1, %v6896_v2  ;;  %v6478_v40 = vsel %vm6450_vm3, %v6443_v38, %v5949_v8  ;;  %v6384_v1 = vunpack.c.l.b16 %v5726_v22  ;;  %v4919_v2 = vrot.slane %v4917_v24, 5 }
 0x372   : > { %v4910_v3 = vsel %vm8473_vm5, %v4905_v62, %v4909_v12  ;;  %v4943_v24 = vrot.slane %v4941_v25, 5 }
 0x373   : > { %v7075_v11 = vadd.f32 %v7074_v44, %v6986_v43  ;;  %v4915_v44 = vrot.slane %v4914_v35, 4  ;;  %v6401_v43 = vpack.c.b16 %v6385_v23, %v6384_v1 }
 0x375   : > { %v7137_v30 = vmul.f32 %v11394_v29, %v7075_v11  ;;  %v4920_v59 = vsel %vm8473_vm5, %v4915_v44, %v4919_v2  ;;  %8058 = vmatmul.msk.bf16.gmra.mxu3 %vm3093_vm14, %v6401_v43 }
 0x376   : > { %v6987_v61 = vpop.f32.mrf.mxu2 }
 0x377   : > { %v7173_v18 = vadd.f32 %v11400_v55, %v7137_v30  ;;  %v6349_v53 = vpop.permute.xlu1 %6348  ;;  %v6079_v30 = vunpack.c.l.b16 %v4920_v59 }
 0x378   : > { %v6898_v20 = vpop.f32.mrf.mxu1  ;;  %v6652_v36 = vsel %vm11648_vm12, %v6607_v21, %v6349_v53 }
 0x379   : > { %v7205_v37 = vmax.f32 %v7173_v18, 0.0  ;;  %v6988_v45 = vadd.f32 %v6987_v61, %v6898_v20  ;;  %7014 = vmatmul.bf16.gmra.mxu2 %v6652_v36  ;;  %v7081_v18 = vpop.f32.mrf.mxu3  ;;  %v6175_v61 = vpop.permute.xlu2 %6174  ;;  %v6078_v20 = vunpack.c.l.b16 %v4910_v3  ;;  %v4543_v36 = vld [vmem:[#allocation2 + $0xc0] sm:$0xf] }
 0x37a   : > { %v4922_v16 = vshrl.u32 %v4543_v36, 16  ;;  %v4925_v38 = vshll.u32 %v4543_v36, 16 }
 0x37b   : > { %7237 = vst.msk [vmem:[%s11069_s22 + $0x70] sm:$0xff] %vm3093_vm14, %v7205_v37  ;;  %v7077_v4 = vadd.f32 %v7076_v28, %v6988_v45  ;;  %v4931_v37 = vshll.u32 %v11283_v5, 16  ;;  %v4935_v45 = vshrl.u32 %v11283_v5, 16  ;;  %v6096_v60 = vpack.c.b16 %v6079_v30, %v6078_v20 }
 0x37c   : > { %v4924_v33 = vrot.slane %v4922_v16, 4  ;;  %v4927_v9 = vrot.slane %v4925_v38, 5 }
 0x37d   : > { %v7138_v54 = vmul.f32 %v11394_v29, %v7077_v4 }
 0x37f   : > { %v7174_v52 = vadd.f32 %v11400_v55, %v7138_v54  ;;  %v6045_v27 = vpop.permute.xlu1 %6044  ;;  %v6576_v54 = vsel %vm3093_vm14, %v6096_v60, %v6175_v61 }
 0x380   : > { %v6524_v13 = vsel %vm11649_vm13, %v6478_v40, %v6045_v27  ;;  %v4937_v40 = vrot.slane %v4935_v45, 4  ;;  %v8129_v45 = vld [vmem:[#allocation2 + $0xb4] sm:$0xff] }
 0x381   : > { %v7206_v26 = vmax.f32 %v7174_v52, 0.0  ;;  %6925 = vmatmul.bf16.gmra.mxu1 %v6524_v13  ;;  %v4933_v52 = vrot.slane %v4931_v37, 5  ;;  %v7084_v31 = vpop.f32.mrf.mxu3  ;;  %v5871_v57 = vpop.permute.xlu2 %5870 }
 0x382   : > { %v6446_v35 = vsel %vm3093_vm14, %v8128_v50, %v5871_v57 }
 0x383   : > { %7238 = vst.msk [vmem:[%s11069_s22 + $0x78] sm:$0xff] %vm3093_vm14, %v7206_v26  ;;  %v4938_v12 = vor.u32 %v4937_v40, %v4933_v52 }
 0x384   : > { %v6271_v28 = vpop.permute.xlu0 %6270 }
 0x385   : > { %v6609_v27 = vsel %vm6450_vm3, %v6576_v54, %v6271_v28  ;;  %v4939_v46 = vrot.slane %v4938_v12, 4 }
 0x387   : > { %v4944_v48 = vsel %vm8473_vm5, %v4939_v46, %v4943_v24 }
 0x388   : > { %v6081_v43 = vunpack.c.l.b16 %v4944_v48 }
 0x389   : > { %v6901_v63 = vpop.f32.mrf.mxu1  ;;  %v7086_v23 = vpop.f32.mrf.mxu3 }
 0x38a   : > { %v6990_v6 = vpop.f32.mrf.mxu2  ;;  %v6177_v62 = vpop.permute.xlu2 %6176 }
 0x38b   : > { %v6991_v34 = vadd.f32 %v6990_v6, %v6901_v63  ;;  %v4928_v63 = vor.u32 %v4927_v9, %v4924_v33 }
 0x38d   : > { %v7080_v32 = vadd.f32 %v7079_v0, %v6991_v34  ;;  %v4929_v1 = vrot.slane %v4928_v63, 4 }
 0x38f   : > { %v7139_v15 = vmul.f32 %v11394_v29, %v7080_v32  ;;  %v4934_v2 = vsel %vm8473_vm5, %v4929_v1, %v4933_v52  ;;  %vm11652_vm5 = vmmov %vm11640_vm0 }
 0x391   : > { %v6903_v11 = vpop.f32.mrf.mxu1  ;;  %v7175_v51 = vadd.f32 %v11400_v55, %v7139_v15  ;;  %v6080_v15 = vunpack.c.l.b16 %v4934_v2 }
 0x392   : > { %v6992_v10 = vpop.f32.mrf.mxu2  ;;  %v5951_v42 = vpop.permute.xlu0 %5950 }
 0x393   : > { %v7207_v21 = vmax.f32 %v7175_v51, 0.0  ;;  %v6993_v53 = vadd.f32 %v6992_v10, %v6903_v11  ;;  %v6480_v0 = vsel %vm6450_vm3, %v6446_v35, %v5951_v42  ;;  %v6097_v51 = vpack.c.b16 %v6081_v43, %v6080_v15  ;;  %v5873_v37 = vpop.permute.xlu2 %5872 }
 0x394   : > { %v6449_v60 = vsel %vm3093_vm14, %v8129_v45, %v5873_v37 }
 0x395   : > { %7239 = vst.msk [vmem:[%s11069_s22 + $0x80] sm:$0xff] %vm3093_vm14, %v7207_v21  ;;  %v7082_v4 = vadd.f32 %v7081_v18, %v6993_v53  ;;  %v6579_v10 = vsel %vm3093_vm14, %v6097_v51, %v6177_v62  ;;  %v7089_v53 = vpop.f32.mrf.mxu3 }
 0x397   : > { %v7140_v8 = vmul.f32 %v11394_v29, %v7082_v4 }
 0x399   : > { %v7176_v13 = vadd.f32 %v11400_v55, %v7140_v8 }
 0x39a   : > { %v6351_v26 = vpop.permute.xlu1 %6350  ;;  %v6995_v19 = vpop.f32.mrf.mxu2 }
 0x39b   : > { %v6655_v5 = vsel %vm11650_vm4, %v6609_v27, %v6351_v26  ;;  %v7208_v41 = vmax.f32 %v7176_v13, 0.0  ;;  %v6273_v11 = vpop.permute.xlu0 %6272 }
 0x39c   : > { %7019 = vmatmul.bf16.gmra.mxu2 %v6655_v5  ;;  %v6906_v56 = vpop.f32.mrf.mxu1  ;;  %v6611_v18 = vsel %vm6450_vm3, %v6579_v10, %v6273_v11 }
 0x39d   : > { %v6996_v49 = vadd.f32 %v6995_v19, %v6906_v56  ;;  %7240 = vst.msk [vmem:[%s11069_s22 + $0x88] sm:$0xff] %vm3093_vm14, %v7208_v41  ;;  %v7091_v5 = vpop.f32.mrf.mxu3 }
 0x39f   : > { %v7085_v17 = vadd.f32 %v7084_v31, %v6996_v49 }
 0x3a1   : > { %v7141_v7 = vmul.f32 %v11394_v29, %v7085_v17 }
 0x3a2   : > { %v6047_v58 = vpop.permute.xlu1 %6046  ;;  %v6997_v47 = vpop.f32.mrf.mxu2 }
 0x3a3   : > { %v6527_v22 = vsel %vm11651_vm2, %v6480_v0, %v6047_v58  ;;  %v7177_v6 = vadd.f32 %v11400_v55, %v7141_v7  ;;  %v5953_v28 = vpop.permute.xlu0 %5952 }
 0x3a4   : > { %6930 = vmatmul.bf16.gmra.mxu1 %v6527_v22  ;;  %v6908_v14 = vpop.f32.mrf.mxu1  ;;  %v6482_v8 = vsel %vm6450_vm3, %v6449_v60, %v5953_v28 }
 0x3a5   : > { %v7209_v44 = vmax.f32 %v7177_v6, 0.0  ;;  %v6998_v34 = vadd.f32 %v6997_v47, %v6908_v14  ;;  %v7094_v9 = vpop.f32.mrf.mxu3 }
 0x3a7   : > { %7241 = vst.msk [vmem:[%s11069_s22 + $0x90] sm:$0xff] %vm3093_vm14, %v7209_v44  ;;  %v7087_v32 = vadd.f32 %v7086_v23, %v6998_v34 }
 0x3a9   : > { %v7142_v59 = vmul.f32 %v11394_v29, %v7087_v32 }
 0x3ab   : > { %v7178_v3 = vadd.f32 %v11400_v55, %v7142_v59 }
 0x3ac   : > { %v7000_v39 = vpop.f32.mrf.mxu2 }
 0x3ad   : > { %v7210_v30 = vmax.f32 %v7178_v3, 0.0  ;;  %v6353_v61 = vpop.permute.xlu1 %6352  ;;  %v7096_v46 = vpop.f32.mrf.mxu3 }
 0x3ae   : > { %v6658_v21 = vsel %vm11652_vm5, %v6611_v18, %v6353_v61 }
 0x3af   : > { %7242 = vst.msk [vmem:[%s11069_s22 + $0x98] sm:$0xff] %vm3093_vm14, %v7210_v30  ;;  %7024 = vmatmul.bf16.gmra.mxu2 %v6658_v21  ;;  %v6911_v20 = vpop.f32.mrf.mxu1 }
 0x3b0   : > { %v7001_v36 = vadd.f32 %v7000_v39, %v6911_v20 }
 0x3b2   : > { %v7090_v4 = vadd.f32 %v7089_v53, %v7001_v36 }
 0x3b4   : > { %v7143_v16 = vmul.f32 %v11394_v29, %v7090_v4  ;;  %v7002_v40 = vpop.f32.mrf.mxu2 }
 0x3b5   : > { %v6049_v54 = vpop.permute.xlu1 %6048  ;;  %v7099_v6 = vpop.f32.mrf.mxu3 }
 0x3b6   : > { %v6530_v38 = vsel %vm11653_vm6, %v6482_v8, %v6049_v54  ;;  %v7179_v52 = vadd.f32 %v11400_v55, %v7143_v16 }
 0x3b7   : > { %6935 = vmatmul.bf16.gmra.mxu1 %v6530_v38  ;;  %v6913_v27 = vpop.f32.mrf.mxu1 }
 0x3b8   : > { %v7211_v13 = vmax.f32 %v7179_v52, 0.0  ;;  %v7003_v26 = vadd.f32 %v7002_v40, %v6913_v27 }
 0x3ba   : > { %7243 = vst.msk [vmem:[%s11069_s22 + $0xa0] sm:$0xff] %vm3093_vm14, %v7211_v13  ;;  %v7092_v19 = vadd.f32 %v7091_v5, %v7003_v26 }
 0x3bc   : > { %v7144_v31 = vmul.f32 %v11394_v29, %v7092_v19 }
 0x3bd   : > { %v7101_v43 = vpop.f32.mrf.mxu3 }
 0x3be   : > { %v7180_v41 = vadd.f32 %v11400_v55, %v7144_v31 }
 0x3c0   : > { %v7212_v56 = vmax.f32 %v7180_v41, 0.0 }
 0x3c2   : > { %7244 = vst.msk [vmem:[%s11069_s22 + $0xa8] sm:$0xff] %vm3093_vm14, %v7212_v56 }
 0x3c5   : > { %v7104_v51 = vpop.f32.mrf.mxu3 }
 0x3cd   : > { %v7106_v37 = vpop.f32.mrf.mxu3 }
 0x3ce   : > { %v7005_v33 = vpop.f32.mrf.mxu2 }
 0x3d0   : > { %v6916_v12 = vpop.f32.mrf.mxu1 }
 0x3d1   : > { %v7006_v49 = vadd.f32 %v7005_v33, %v6916_v12 }
 0x3d3   : > { %v7095_v57 = vadd.f32 %v7094_v9, %v7006_v49 }
 0x3d5   : > { %v7145_v50 = vmul.f32 %v11394_v29, %v7095_v57  ;;  %v7109_v8 = vpop.f32.mrf.mxu3 }
 0x3d6   : > { %v7007_v42 = vpop.f32.mrf.mxu2 }
 0x3d7   : > { %v7181_v25 = vadd.f32 %v11400_v55, %v7145_v50 }
 0x3d8   : > { %v6918_v17 = vpop.f32.mrf.mxu1 }
 0x3d9   : > { %v7213_v35 = vmax.f32 %v7181_v25, 0.0  ;;  %v7008_v63 = vadd.f32 %v7007_v42, %v6918_v17 }
 0x3db   : > { %7245 = vst.msk [vmem:[%s11069_s22 + $0xb0] sm:$0xff] %vm3093_vm14, %v7213_v35  ;;  %v7097_v7 = vadd.f32 %v7096_v46, %v7008_v63 }
 0x3dd   : > { %v7146_v0 = vmul.f32 %v11394_v29, %v7097_v7  ;;  %v7111_v31 = vpop.f32.mrf.mxu3 }
 0x3df   : > { %v7182_v58 = vadd.f32 %v11400_v55, %v7146_v0 }
 0x3e1   : > { %v7214_v24 = vmax.f32 %v7182_v58, 0.0 }
 0x3e3   : > { %7246 = vst.msk [vmem:[%s11069_s22 + $0xb8] sm:$0xff] %vm3093_vm14, %v7214_v24 }
 0x3e8   : > { %v7010_v22 = vpop.f32.mrf.mxu2 }
 0x3ea   : > { %v6921_v47 = vpop.f32.mrf.mxu1 }
 0x3eb   : > { %v7011_v14 = vadd.f32 %v7010_v22, %v6921_v47 }
 0x3ed   : > { %v7100_v1 = vadd.f32 %v7099_v6, %v7011_v14 }
 0x3ef   : > { %v7147_v48 = vmul.f32 %v11394_v29, %v7100_v1 }
 0x3f0   : > { %v7012_v34 = vpop.f32.mrf.mxu2 }
 0x3f1   : > { %v7183_v44 = vadd.f32 %v11400_v55, %v7147_v48 }
 0x3f2   : > { %v6923_v23 = vpop.f32.mrf.mxu1 }
 0x3f3   : > { %v7215_v2 = vmax.f32 %v7183_v44, 0.0  ;;  %v7013_v32 = vadd.f32 %v7012_v34, %v6923_v23 }
 0x3f5   : > { %7247 = vst.msk [vmem:[%s11069_s22 + $0xc0] sm:$0xff] %vm3093_vm14, %v7215_v2  ;;  %v7102_v62 = vadd.f32 %v7101_v43, %v7013_v32 }
 0x3f7   : > { %v7148_v59 = vmul.f32 %v11394_v29, %v7102_v62 }
 0x3f8   : > { %v7114_v49 = vpop.f32.mrf.mxu3 }
 0x3f9   : > { %v7184_v15 = vadd.f32 %v11400_v55, %v7148_v59 }
 0x3fb   : > { %v7216_v11 = vmax.f32 %v7184_v15, 0.0 }
 0x3fc   : > { %v7015_v3 = vpop.f32.mrf.mxu2 }
 0x3fd   : > { %7248 = vst.msk [vmem:[%s11069_s22 + $0xc8] sm:$0xff] %vm3093_vm14, %v7216_v11 }
 0x3fe   : > { %v6926_v30 = vpop.f32.mrf.mxu1 }
 0x3ff   : > { %v7016_v10 = vadd.f32 %v7015_v3, %v6926_v30 }
 0x400   : > { %v7116_v0 = vpop.f32.mrf.mxu3 }
 0x401   : > { %v7105_v18 = vadd.f32 %v7104_v51, %v7016_v10 }
 0x403   : > { %v7149_v61 = vmul.f32 %v11394_v29, %v7105_v18 }
 0x404   : > { %v7017_v21 = vpop.f32.mrf.mxu2 }
 0x405   : > { %v7185_v39 = vadd.f32 %v11400_v55, %v7149_v61 }
 0x406   : > { %v6928_v53 = vpop.f32.mrf.mxu1 }
 0x407   : > { %v7217_v20 = vmax.f32 %v7185_v39, 0.0  ;;  %v7018_v36 = vadd.f32 %v7017_v21, %v6928_v53 }
 0x409   : > { %7249 = vst.msk [vmem:[%s11069_s22 + $0xd0] sm:$0xff] %vm3093_vm14, %v7217_v20  ;;  %v7107_v45 = vadd.f32 %v7106_v37, %v7018_v36 }
 0x40b   : > { %v7150_v28 = vmul.f32 %v11394_v29, %v7107_v45 }
 0x40d   : > { %v7186_v4 = vadd.f32 %v11400_v55, %v7150_v28 }
 0x40f   : > { %v7218_v60 = vmax.f32 %v7186_v4, 0.0 }
 0x411   : > { %7250 = vst.msk [vmem:[%s11069_s22 + $0xd8] sm:$0xff] %vm3093_vm14, %v7218_v60 }
 0x41f   : > { %v7020_v16 = vpop.f32.mrf.mxu2 }
 0x421   : > { %v6931_v54 = vpop.f32.mrf.mxu1 }
 0x422   : > { %v7021_v38 = vadd.f32 %v7020_v16, %v6931_v54 }
 0x424   : > { %v7110_v52 = vadd.f32 %v7109_v8, %v7021_v38 }
 0x426   : > { %v7151_v40 = vmul.f32 %v11394_v29, %v7110_v52 }
 0x427   : > { %v7022_v13 = vpop.f32.mrf.mxu2 }
 0x428   : > { %v7187_v27 = vadd.f32 %v11400_v55, %v7151_v40 }
 0x429   : > { %v6933_v26 = vpop.f32.mrf.mxu1 }
 0x42a   : > { %v7219_v5 = vmax.f32 %v7187_v27, 0.0  ;;  %v7023_v19 = vadd.f32 %v7022_v13, %v6933_v26 }
 0x42c   : > { %7251 = vst.msk [vmem:[%s11069_s22 + $0xe0] sm:$0xff] %vm3093_vm14, %v7219_v5  ;;  %v7112_v41 = vadd.f32 %v7111_v31, %v7023_v19 }
 0x42e   : > { %v7152_v56 = vmul.f32 %v11394_v29, %v7112_v41 }
 0x430   : > { %v7188_v33 = vadd.f32 %v11400_v55, %v7152_v56 }
 0x432   : > { %v7220_v9 = vmax.f32 %v7188_v33, 0.0  ;;  %v7025_v12 = vpop.f32.mrf.mxu2 }
 0x434   : > { %7252 = vst.msk [vmem:[%s11069_s22 + $0xe8] sm:$0xff] %vm3093_vm14, %v7220_v9  ;;  %v6936_v57 = vpop.f32.mrf.mxu1 }
 0x435   : > { %v7026_v50 = vadd.f32 %v7025_v12, %v6936_v57 }
 0x437   : > { %v7115_v25 = vadd.f32 %v7114_v49, %v7026_v50 }
 0x439   : > { %v7153_v42 = vmul.f32 %v11394_v29, %v7115_v25 }
 0x43a   : > { %v7027_v35 = vpop.f32.mrf.mxu2 }
 0x43b   : > { %v7189_v17 = vadd.f32 %v11400_v55, %v7153_v42 }
 0x43c   : > { %v6938_v63 = vpop.f32.mrf.mxu1 }
 0x43d   : > { %v7221_v46 = vmax.f32 %v7189_v17, 0.0  ;;  %v7028_v7 = vadd.f32 %v7027_v35, %v6938_v63 }
 0x43f   : > { %7253 = vst.msk [vmem:[%s11069_s22 + $0xf0] sm:$0xff] %vm3093_vm14, %v7221_v46  ;;  %v7117_v58 = vadd.f32 %v7116_v0, %v7028_v7 }
 0x441   : > { %v7154_v24 = vmul.f32 %v11394_v29, %v7117_v58 }
 0x443   : > { %v7190_v22 = vadd.f32 %v11400_v55, %v7154_v24 }
 0x445   : > { %v7222_v6 = vmax.f32 %v7190_v22, 0.0 }
 0x447   : > { %7254 = vst.msk [vmem:[%s11069_s22 + $0xf8] sm:$0xff] %vm3093_vm14, %v7222_v6 }
 0x448   : > { %8303 = shalt.err (!%p8300_p3)
}
 0x449   : > { %s8351_s17 = smov 128  }
 0x44a   : > { %8182 = dma.vmem_to_hbm [thread:$0]  (%p8430_p5), %s7269_s18, 4096, %s7271_s19, %s7256_s28, %s8351_s17, %s8351_s17, %s8343_s21  }
 0x44b PF: > { %p8188_p4 = scmp.ge.s32.totalorder %s8338_s27, 2  ;;  %s7285_s22 = sand.u32 1, %s8326_s24  }
 0x44c   : > { %s7286_s15 = scalar_lea.sflag [#allocation4], %s7285_s22 }
 0x44d   : > { %p8185_p7 = pnand %p8188_p4, %p8434_p6 }
 0x44f   : > { %p8186_p8 = pneg %p8185_p7 }
 0x451   : > { %8321 = dma.done.wait (%p8186_p8), %s7286_s15, 4096  }
 0x452   : > { %8323 = vsyncadd (%p8186_p8), %s7286_s15, 4294963200  ;;  %p17_p9 = scmp.ge.s32.totalorder %s8417_s30, 4   ;;  %s11654_s24 = smov %s8330_s25 }
 0x453   : > { %s11655_s25 = smov %s8334_s26  ;;  %s11656_s26 = smov %s8428_s10 }
 0x454   : > { %s11657_s27 = smov %s8417_s30  ;;  %19 = sbr.rel (!%p17_p9) target bundleno = 3 (0x3), region = 87 }
 0x459   :  { %7292 = vsyncpa [#allocation4], 1 }
 0x45a   :  { %7294 = vsyncpa [#allocation4 + $0x1], 1 }

</bundles_post_ra>
